<compile_context>
chip_gen: v7x
topology: tpu7x:2x2x1
jax: 0.10.0
libtpu: 0.0.40
codegen_flags: <defaults>
</compile_context>

<pallas_src>
import jax
import jax.numpy as jnp
from jax.experimental import pallas as pl
from jax.experimental.pallas import tpu as pltpu


def _make_decoder_block_kernel(H, W, Cx, Cs, Cout):
    """Builds the fused kernel body for fixed (static) shapes."""
    HO, WO = 2 * H, 2 * W
    has_skip = Cs > 0

    def kernel(*refs):
        if has_skip:
            (x_ref, skip_ref, uh_ref, uw_ref, bx_ref, bs_ref, b1_ref,
             b2w_ref, b2_ref, o_ref, bufx, bufs, act1) = refs
        else:
            (x_ref, uh_ref, uw_ref, bx_ref, b1_ref,
             b2w_ref, b2_ref, o_ref, bufx, act1) = refs
            skip_ref = bs_ref = bufs = None

        def zero_border(buf, c_lo, c_hi):
            # Zero only the 1-pixel conv-padding border (top/bottom pad rows plus
            # left/right pad-pixel column strips); the interior is fully rewritten
            # below every grid step, so no full-buffer VPU sweep is needed.
            R, C = buf.shape
            buf[0:1, :] = jnp.zeros((1, C), jnp.float32)
            buf[R - 1:R, :] = jnp.zeros((1, C), jnp.float32)
            buf[:, 0:c_lo] = jnp.zeros((R, c_lo), jnp.float32)
            buf[:, c_hi:C] = jnp.zeros((R, C - c_hi), jnp.float32)

        zero_border(bufx, Cx, Cx + WO * Cx)
        if has_skip:
            zero_border(bufs, Cs, Cs + WO * Cs)
        zero_border(act1, Cout, Cout + WO * Cout)

        # ---- Stage 0: nearest 2x upsample of x, fully in-kernel ---------------
        # x_ref is the *pre-upsample* (H, W*Cx) slab.  W-doubling and H-doubling
        # are two small 0/1 matmuls (layout-safe, runs on the MXU, no reshapes
        # that touch the lane dim).
        xw = jnp.dot(x_ref[...], uw_ref[...],
                     preferred_element_type=jnp.float32)          # (H,  WO*Cx)
        xu = jnp.dot(uh_ref[...], xw,
                     preferred_element_type=jnp.float32)          # (HO, WO*Cx)
        bufx[1:1 + HO, Cx:Cx + WO * Cx] = xu
        if has_skip:
            bufs[1:1 + HO, Cs:Cs + WO * Cs] = skip_ref[...].astype(jnp.float32)

        def conv3x3(sources):
            # 3x3 conv (pad=1) over lane-dense (rows, W*C) slabs:
            # 9 shifted (HO, WO*cin) x (WO*cin, WO*Cout) matmuls with
            # block-diagonal weights; SSA accumulator = (HO, WO*Cout) = 8 vregs.
            acc = jnp.zeros((HO, WO * Cout), jnp.float32)
            for ky in range(3):
                for kx in range(3):
                    t = ky * 3 + kx
                    for buf, cin, w_ref in sources:
                        tap = buf[ky:ky + HO, kx * cin:kx * cin + WO * cin]
                        acc = acc + jnp.dot(tap, w_ref[t],
                                            preferred_element_type=jnp.float32)
            return acc

        # ---- Stage 1: conv1 + bias + ReLU; activation stays resident in VMEM --
        srcs1 = [(bufx, Cx, bx_ref)]
        if has_skip:
            srcs1.append((bufs, Cs, bs_ref))   # channel concat == weight split
        a1 = jnp.maximum(conv3x3(srcs1) + b1_ref[...], 0.0)       # (HO, WO*Cout)
        act1[1:1 + HO, Cout:Cout + WO * Cout] = a1

        # ---- Stage 2: conv2 + bias + ReLU -> lane-dense HBM output ------------
        a2 = jnp.maximum(conv3x3([(act1, Cout, b2w_ref)]) + b2_ref[...], 0.0)
        o_ref[...] = a2.astype(o_ref.dtype)                       # (HO, WO*Cout)

    return kernel


def decoder_block(params, x_nchw, skip_nchw=None):
    """Forward pass of DecoderBlock. Inputs/outputs NCHW to mirror PyTorch."""
    N, Cx, H, W = x_nchw.shape
    HO, WO = 2 * H, 2 * W
    Cs = 0 if skip_nchw is None else skip_nchw.shape[1]
    Cin = Cx + Cs
    Cout = params["b1"].shape[0]

    # NCHW -> NHWC -> flatten (W, C) onto lanes.  Single cheap pass over the
    # small *pre-upsample* x; the 2x upsample itself runs inside the kernel.
    x = jnp.transpose(x_nchw, (0, 2, 3, 1)).reshape(N, H, W * Cx).astype(jnp.float32)

    # 0/1 nearest-upsample operators (exact; multiplication by 0/1 only).
    UH = jnp.repeat(jnp.eye(H, dtype=jnp.float32), 2, axis=0)                 # (HO, H)
    UW = jnp.kron(jnp.repeat(jnp.eye(W, dtype=jnp.float32), 2, axis=1),
                  jnp.eye(Cx, dtype=jnp.float32))                             # (W*Cx, WO*Cx)

    # Block-diagonal conv weights: kron(I_WO, K_tap), built exactly (outer product,
    # no contraction).  Small-C specialization: keeps every matmul operand and the
    # accumulator lane-dense and raises MXU contraction depth from Cin to WO*Cin.
    k1 = params["w1"].reshape(9, Cin, Cout).astype(jnp.float32)
    k2 = params["w2"].reshape(9, Cout, Cout).astype(jnp.float32)
    eyeW = jnp.eye(WO, dtype=jnp.float32)

    def blockdiag(k):   # (9, Ci, Co) -> (9, WO*Ci, WO*Co)
        ci, co = k.shape[1], k.shape[2]
        return jnp.einsum("wv,tio->twivo", eyeW, k).reshape(9, WO * ci, WO * co)

    Bx = blockdiag(k1[:, :Cx, :])
    B2 = blockdiag(k2)
    b1t = jnp.tile(params["b1"].astype(jnp.float32), WO).reshape(1, WO * Cout)
    b2t = jnp.tile(params["b2"].astype(jnp.float32), WO).reshape(1, WO * Cout)

    inputs = [x]
    in_specs = [pl.BlockSpec((None, H, W * Cx), lambda n: (n, 0, 0))]
    if Cs > 0:
        skip = (jnp.transpose(skip_nchw, (0, 2, 3, 1))
                .reshape(N, HO, WO * Cs).astype(jnp.float32))
        inputs.append(skip)
        in_specs.append(pl.BlockSpec((None, HO, WO * Cs), lambda n: (n, 0, 0)))

    inputs += [UH, UW, Bx]
    in_specs += [
        pl.BlockSpec((HO, H), lambda n: (0, 0)),
        pl.BlockSpec((W * Cx, WO * Cx), lambda n: (0, 0)),
        pl.BlockSpec((9, WO * Cx, WO * Cout), lambda n: (0, 0, 0)),
    ]
    if Cs > 0:
        Bs = blockdiag(k1[:, Cx:, :])
        inputs.append(Bs)
        in_specs.append(pl.BlockSpec((9, WO * Cs, WO * Cout), lambda n: (0, 0, 0)))
    inputs += [b1t, B2, b2t]
    in_specs += [
        pl.BlockSpec((1, WO * Cout), lambda n: (0, 0)),
        pl.BlockSpec((9, WO * Cout, WO * Cout), lambda n: (0, 0, 0)),
        pl.BlockSpec((1, WO * Cout), lambda n: (0, 0)),
    ]

    scratch_shapes = [pltpu.VMEM((HO + 2, (WO + 2) * Cx), jnp.float32)]   # padded x slab
    if Cs > 0:
        scratch_shapes.append(pltpu.VMEM((HO + 2, (WO + 2) * Cs), jnp.float32))  # padded skip
    scratch_shapes.append(pltpu.VMEM((HO + 2, (WO + 2) * Cout), jnp.float32))    # padded act1

    weight_elems = (Bx.size + (9 * WO * Cs * WO * Cout if Cs > 0 else 0)
                    + B2.size + b1t.size + b2t.size + UH.size + UW.size)
    flops = 2 * 9 * HO * WO * Cout * (Cin + Cout) * N
    bytes_accessed = 4 * (x.size + (N * HO * WO * Cs if Cs > 0 else 0)
                          + weight_elems + N * HO * WO * Cout)

    kernel = _make_decoder_block_kernel(H, W, Cx, Cs, Cout)

    out_flat = pl.pallas_call(
        kernel,
        out_shape=jax.ShapeDtypeStruct((N, HO, WO * Cout), x_nchw.dtype),
        grid=(N,),
        in_specs=in_specs,
        out_specs=pl.BlockSpec((None, HO, WO * Cout), lambda n: (n, 0, 0)),
        scratch_shapes=scratch_shapes,
        compiler_params=pltpu.CompilerParams(
            dimension_semantics=("parallel",)),   # megacore / v7x: split batch
        cost_estimate=pl.CostEstimate(
            flops=flops, transcendentals=0, bytes_accessed=bytes_accessed),
    )(*inputs)

    # (N, HO, WO*Cout) -> NHWC (free reshape for contiguous data) -> NCHW
    return jnp.transpose(out_flat.reshape(N, HO, WO, Cout), (0, 3, 1, 2))


def init_decoder_block_params(key, kernels_in, kernels_out):
    k1, k2, k3, k4 = jax.random.split(key, 4)
    scale1 = 1.0 / jnp.sqrt(9.0 * kernels_in)
    scale2 = 1.0 / jnp.sqrt(9.0 * kernels_out)
    return {
        "w1": jax.random.normal(k1, (3, 3, kernels_in, kernels_out), jnp.float32) * scale1,
        "b1": jax.random.normal(k2, (kernels_out,), jnp.float32) * scale1,
        "w2": jax.random.normal(k3, (3, 3, kernels_out, kernels_out), jnp.float32) * scale2,
        "b2": jax.random.normal(k4, (kernels_out,), jnp.float32) * scale2,
    }


def _decoder_block_ref(params, x_nchw, skip_nchw=None):
    """Pure-JAX (XLA) reference for correctness checking."""
    x = jnp.repeat(jnp.repeat(x_nchw, 2, axis=2), 2, axis=3)        # nearest 2x
    if skip_nchw is not None:
        x = jnp.concatenate([x, skip_nchw], axis=1)

    def conv_relu(x, w, b):
        y = jax.lax.conv_general_dilated(
            x, w, window_strides=(1, 1), padding=((1, 1), (1, 1)),
            dimension_numbers=("NCHW", "HWIO", "NCHW"))
        return jnp.maximum(y + b[None, :, None, None], 0.0)

    x = conv_relu(x, params["w1"], params["b1"])
    x = conv_relu(x, params["w2"], params["b2"])
    return x


if __name__ == "__main__":
    key = jax.random.PRNGKey(0)
    kx, ks, kp = jax.random.split(key, 3)

    # small shapes: batch=2, x channels=4, spatial=16; skip channels=4, spatial=32
    N, C_x, H, W = 2, 4, 16, 16
    C_skip = 4
    kernels_in = C_x + C_skip        # channels after upsample + concat = 8
    kernels_out = 8

    x = jax.random.normal(kx, (N, C_x, H, W), jnp.float32)
    skip = jax.random.normal(ks, (N, C_skip, 2 * H, 2 * W), jnp.float32)
    params = init_decoder_block_params(kp, kernels_in, kernels_out)

    out = jax.jit(decoder_block)(params, x, skip)
    out = jax.block_until_ready(out)

    assert out.shape == (N, kernels_out, 2 * H, 2 * W), out.shape
    assert bool(jnp.all(jnp.isfinite(out)))

    # numeric check vs pure-JAX reference (loose tol: MXU f32 matmuls may run at
    # default bf16-pass precision on some generations)
    ref = _decoder_block_ref(params, x, skip)
    assert bool(jnp.allclose(out, ref, rtol=3e-2, atol=3e-2)), (
        float(jnp.max(jnp.abs(out - ref))))

    print("KERNEL_OK")
</pallas_src>

<mosaic_0001>
module attributes {stable_mosaic.version = 11 : i64} {
  func.func @kernel(%arg0: i32, %arg1: memref<1x16x64xf32, #tpu.memory_space<vmem>>, %arg2: memref<1x32x128xf32, #tpu.memory_space<vmem>>, %arg3: memref<32x16xf32, #tpu.memory_space<vmem>>, %arg4: memref<64x128xf32, #tpu.memory_space<vmem>>, %arg5: memref<9x128x256xf32, #tpu.memory_space<vmem>>, %arg6: memref<9x128x256xf32, #tpu.memory_space<vmem>>, %arg7: memref<1x256xf32, #tpu.memory_space<vmem>>, %arg8: memref<9x256x256xf32, #tpu.memory_space<vmem>>, %arg9: memref<1x256xf32, #tpu.memory_space<vmem>>, %arg10: memref<1x32x256xf32, #tpu.memory_space<vmem>>, %arg11: memref<34x136xf32, #tpu.memory_space<vmem>>, %arg12: memref<34x136xf32, #tpu.memory_space<vmem>>, %arg13: memref<34x272xf32, #tpu.memory_space<vmem>>) attributes {dimension_semantics = [#tpu.dimension_semantics<parallel>], iteration_bounds = array<i64: 2>, scalar_prefetch = 0 : i64, scratch_operands = 3 : i64, tpu.core_type = #tpu.core_type<tc>, window_params = [{transform_indices = @transform_0, window_bounds = array<i64: 1, 16, 64>}, {transform_indices = @transform_1, window_bounds = array<i64: 1, 32, 128>}, {pipeline_mode = #tpu.pipeline_mode<synchronous>, transform_indices = @transform_2, window_bounds = array<i64: 32, 16>}, {pipeline_mode = #tpu.pipeline_mode<synchronous>, transform_indices = @transform_3, window_bounds = array<i64: 64, 128>}, {pipeline_mode = #tpu.pipeline_mode<synchronous>, transform_indices = @transform_4, window_bounds = array<i64: 9, 128, 256>}, {pipeline_mode = #tpu.pipeline_mode<synchronous>, transform_indices = @transform_5, window_bounds = array<i64: 9, 128, 256>}, {pipeline_mode = #tpu.pipeline_mode<synchronous>, transform_indices = @transform_6, window_bounds = array<i64: 1, 256>}, {pipeline_mode = #tpu.pipeline_mode<synchronous>, transform_indices = @transform_7, window_bounds = array<i64: 9, 256, 256>}, {pipeline_mode = #tpu.pipeline_mode<synchronous>, transform_indices = @transform_8, window_bounds = array<i64: 1, 256>}, {transform_indices = @transform_9, window_bounds = array<i64: 1, 32, 256>}]} {
    %cst = arith.constant 0.000000e+00 : f32
    %0 = vector.broadcast %cst : f32 to vector<1x136xf32>
    %c0 = arith.constant 0 : index
    %c0_0 = arith.constant 0 : index
    %1 = vector.load %arg11[%c0, %c0_0] : memref<34x136xf32, #tpu.memory_space<vmem>>, vector<1x136xf32>
    tpu.vector_store %arg11[%c0, %c0_0], %0 {strides = array<i32>} : memref<34x136xf32, #tpu.memory_space<vmem>>, vector<1x136xf32>,
    %cst_1 = arith.constant 0.000000e+00 : f32
    %2 = vector.broadcast %cst_1 : f32 to vector<1x136xf32>
    %c33 = arith.constant 33 : index
    %c0_2 = arith.constant 0 : index
    %3 = vector.load %arg11[%c33, %c0_2] : memref<34x136xf32, #tpu.memory_space<vmem>>, vector<1x136xf32>
    tpu.vector_store %arg11[%c33, %c0_2], %2 {strides = array<i32>} : memref<34x136xf32, #tpu.memory_space<vmem>>, vector<1x136xf32>,
    %cst_3 = arith.constant 0.000000e+00 : f32
    %4 = vector.broadcast %cst_3 : f32 to vector<34x4xf32>
    %c0_4 = arith.constant 0 : index
    %c0_5 = arith.constant 0 : index
    %5 = vector.load %arg11[%c0_4, %c0_5] : memref<34x136xf32, #tpu.memory_space<vmem>>, vector<34x4xf32>
    tpu.vector_store %arg11[%c0_4, %c0_5], %4 {strides = array<i32>} : memref<34x136xf32, #tpu.memory_space<vmem>>, vector<34x4xf32>,
    %cst_6 = arith.constant 0.000000e+00 : f32
    %6 = vector.broadcast %cst_6 : f32 to vector<34x4xf32>
    %c0_7 = arith.constant 0 : index
    %c132 = arith.constant 132 : index
    %7 = vector.load %arg11[%c0_7, %c132] : memref<34x136xf32, #tpu.memory_space<vmem>>, vector<34x4xf32>
    tpu.vector_store %arg11[%c0_7, %c132], %6 {strides = array<i32>} : memref<34x136xf32, #tpu.memory_space<vmem>>, vector<34x4xf32>,
    %cst_8 = arith.constant 0.000000e+00 : f32
    %8 = vector.broadcast %cst_8 : f32 to vector<1x136xf32>
    %c0_9 = arith.constant 0 : index
    %c0_10 = arith.constant 0 : index
    %9 = vector.load %arg12[%c0_9, %c0_10] : memref<34x136xf32, #tpu.memory_space<vmem>>, vector<1x136xf32>
    tpu.vector_store %arg12[%c0_9, %c0_10], %8 {strides = array<i32>} : memref<34x136xf32, #tpu.memory_space<vmem>>, vector<1x136xf32>,
    %cst_11 = arith.constant 0.000000e+00 : f32
    %10 = vector.broadcast %cst_11 : f32 to vector<1x136xf32>
    %c33_12 = arith.constant 33 : index
    %c0_13 = arith.constant 0 : index
    %11 = vector.load %arg12[%c33_12, %c0_13] : memref<34x136xf32, #tpu.memory_space<vmem>>, vector<1x136xf32>
    tpu.vector_store %arg12[%c33_12, %c0_13], %10 {strides = array<i32>} : memref<34x136xf32, #tpu.memory_space<vmem>>, vector<1x136xf32>,
    %cst_14 = arith.constant 0.000000e+00 : f32
    %12 = vector.broadcast %cst_14 : f32 to vector<34x4xf32>
    %c0_15 = arith.constant 0 : index
    %c0_16 = arith.constant 0 : index
    %13 = vector.load %arg12[%c0_15, %c0_16] : memref<34x136xf32, #tpu.memory_space<vmem>>, vector<34x4xf32>
    tpu.vector_store %arg12[%c0_15, %c0_16], %12 {strides = array<i32>} : memref<34x136xf32, #tpu.memory_space<vmem>>, vector<34x4xf32>,
    %cst_17 = arith.constant 0.000000e+00 : f32
    %14 = vector.broadcast %cst_17 : f32 to vector<34x4xf32>
    %c0_18 = arith.constant 0 : index
    %c132_19 = arith.constant 132 : index
    %15 = vector.load %arg12[%c0_18, %c132_19] : memref<34x136xf32, #tpu.memory_space<vmem>>, vector<34x4xf32>
    tpu.vector_store %arg12[%c0_18, %c132_19], %14 {strides = array<i32>} : memref<34x136xf32, #tpu.memory_space<vmem>>, vector<34x4xf32>,
    %cst_20 = arith.constant 0.000000e+00 : f32
    %16 = vector.broadcast %cst_20 : f32 to vector<1x272xf32>
    %c0_21 = arith.constant 0 : index
    %c0_22 = arith.constant 0 : index
    %17 = vector.load %arg13[%c0_21, %c0_22] : memref<34x272xf32, #tpu.memory_space<vmem>>, vector<1x272xf32>
    tpu.vector_store %arg13[%c0_21, %c0_22], %16 {strides = array<i32>} : memref<34x272xf32, #tpu.memory_space<vmem>>, vector<1x272xf32>,
    %cst_23 = arith.constant 0.000000e+00 : f32
    %18 = vector.broadcast %cst_23 : f32 to vector<1x272xf32>
    %c33_24 = arith.constant 33 : index
    %c0_25 = arith.constant 0 : index
    %19 = vector.load %arg13[%c33_24, %c0_25] : memref<34x272xf32, #tpu.memory_space<vmem>>, vector<1x272xf32>
    tpu.vector_store %arg13[%c33_24, %c0_25], %18 {strides = array<i32>} : memref<34x272xf32, #tpu.memory_space<vmem>>, vector<1x272xf32>,
    %cst_26 = arith.constant 0.000000e+00 : f32
    %20 = vector.broadcast %cst_26 : f32 to vector<34x8xf32>
    %c0_27 = arith.constant 0 : index
    %c0_28 = arith.constant 0 : index
    %21 = vector.load %arg13[%c0_27, %c0_28] : memref<34x272xf32, #tpu.memory_space<vmem>>, vector<34x8xf32>
    tpu.vector_store %arg13[%c0_27, %c0_28], %20 {strides = array<i32>} : memref<34x272xf32, #tpu.memory_space<vmem>>, vector<34x8xf32>,
    %cst_29 = arith.constant 0.000000e+00 : f32
    %22 = vector.broadcast %cst_29 : f32 to vector<34x8xf32>
    %c0_30 = arith.constant 0 : index
    %c264 = arith.constant 264 : index
    %23 = vector.load %arg13[%c0_30, %c264] : memref<34x272xf32, #tpu.memory_space<vmem>>, vector<34x8xf32>
    tpu.vector_store %arg13[%c0_30, %c264], %22 {strides = array<i32>} : memref<34x272xf32, #tpu.memory_space<vmem>>, vector<34x8xf32>,
    %c0_31 = arith.constant 0 : index
    %c0_32 = arith.constant 0 : index
    %c0_33 = arith.constant 0 : index
    %24 = vector.load %arg1[%c0_31, %c0_32, %c0_33] : memref<1x16x64xf32, #tpu.memory_space<vmem>>, vector<1x16x64xf32>
    %25 = vector.shape_cast %24 : vector<1x16x64xf32> to vector<16x64xf32>
    %c0_34 = arith.constant 0 : index
    %c0_35 = arith.constant 0 : index
    %26 = vector.load %arg4[%c0_34, %c0_35] : memref<64x128xf32, #tpu.memory_space<vmem>>, vector<64x128xf32>
    %cst_36 = arith.constant dense<0.000000e+00> : vector<16x128xf32>
    %27 = tpu.matmul %25, %26, %cst_36 {dimension_numbers = #tpu.dot_dimension_numbers<[1], [0], [0], [1], [0, 0, 1, 1], [], []>} : vector<16x64xf32>, vector<64x128xf32>, vector<16x128xf32> -> vector<16x128xf32>
    %c0_37 = arith.constant 0 : index
    %c0_38 = arith.constant 0 : index
    %28 = vector.load %arg3[%c0_37, %c0_38] : memref<32x16xf32, #tpu.memory_space<vmem>>, vector<32x16xf32>
    %cst_39 = arith.constant dense<0.000000e+00> : vector<32x128xf32>
    %29 = tpu.matmul %28, %27, %cst_39 {dimension_numbers = #tpu.dot_dimension_numbers<[1], [0], [0], [1], [0, 0, 1, 1], [], []>} : vector<32x16xf32>, vector<16x128xf32>, vector<32x128xf32> -> vector<32x128xf32>
    %c1 = arith.constant 1 : index
    %c4 = arith.constant 4 : index
    %30 = vector.load %arg11[%c1, %c4] : memref<34x136xf32, #tpu.memory_space<vmem>>, vector<32x128xf32>
    tpu.vector_store %arg11[%c1, %c4], %29 {strides = array<i32>} : memref<34x136xf32, #tpu.memory_space<vmem>>, vector<32x128xf32>,
    %c0_40 = arith.constant 0 : index
    %c0_41 = arith.constant 0 : index
    %c0_42 = arith.constant 0 : index
    %31 = vector.load %arg2[%c0_40, %c0_41, %c0_42] : memref<1x32x128xf32, #tpu.memory_space<vmem>>, vector<1x32x128xf32>
    %32 = vector.shape_cast %31 : vector<1x32x128xf32> to vector<32x128xf32>
    %c1_43 = arith.constant 1 : index
    %c4_44 = arith.constant 4 : index
    %33 = vector.load %arg12[%c1_43, %c4_44] : memref<34x136xf32, #tpu.memory_space<vmem>>, vector<32x128xf32>
    tpu.vector_store %arg12[%c1_43, %c4_44], %32 {strides = array<i32>} : memref<34x136xf32, #tpu.memory_space<vmem>>, vector<32x128xf32>,
    %cst_45 = arith.constant 0.000000e+00 : f32
    %34 = vector.broadcast %cst_45 : f32 to vector<32x256xf32>
    %c0_46 = arith.constant 0 : index
    %c0_47 = arith.constant 0 : index
    %35 = vector.load %arg11[%c0_46, %c0_47] : memref<34x136xf32, #tpu.memory_space<vmem>>, vector<32x128xf32>
    %c0_48 = arith.constant 0 : index
    %c0_49 = arith.constant 0 : index
    %c0_50 = arith.constant 0 : index
    %36 = vector.load %arg5[%c0_48, %c0_49, %c0_50] : memref<9x128x256xf32, #tpu.memory_space<vmem>>, vector<1x128x256xf32>
    %37 = vector.shape_cast %36 : vector<1x128x256xf32> to vector<128x256xf32>
    %cst_51 = arith.constant dense<0.000000e+00> : vector<32x256xf32>
    %38 = tpu.matmul %35, %37, %cst_51 {dimension_numbers = #tpu.dot_dimension_numbers<[1], [0], [0], [1], [0, 0, 1, 1], [], []>} : vector<32x128xf32>, vector<128x256xf32>, vector<32x256xf32> -> vector<32x256xf32>
    %39 = arith.addf %34, %38 : vector<32x256xf32>
    %c0_52 = arith.constant 0 : index
    %c0_53 = arith.constant 0 : index
    %40 = vector.load %arg12[%c0_52, %c0_53] : memref<34x136xf32, #tpu.memory_space<vmem>>, vector<32x128xf32>
    %c0_54 = arith.constant 0 : index
    %c0_55 = arith.constant 0 : index
    %c0_56 = arith.constant 0 : index
    %41 = vector.load %arg6[%c0_54, %c0_55, %c0_56] : memref<9x128x256xf32, #tpu.memory_space<vmem>>, vector<1x128x256xf32>
    %42 = vector.shape_cast %41 : vector<1x128x256xf32> to vector<128x256xf32>
    %cst_57 = arith.constant dense<0.000000e+00> : vector<32x256xf32>
    %43 = tpu.matmul %40, %42, %cst_57 {dimension_numbers = #tpu.dot_dimension_numbers<[1], [0], [0], [1], [0, 0, 1, 1], [], []>} : vector<32x128xf32>, vector<128x256xf32>, vector<32x256xf32> -> vector<32x256xf32>
    %44 = arith.addf %39, %43 : vector<32x256xf32>
    %c0_58 = arith.constant 0 : index
    %c4_59 = arith.constant 4 : index
    %45 = vector.load %arg11[%c0_58, %c4_59] : memref<34x136xf32, #tpu.memory_space<vmem>>, vector<32x128xf32>
    %c1_60 = arith.constant 1 : index
    %c0_61 = arith.constant 0 : index
    %c0_62 = arith.constant 0 : index
    %46 = vector.load %arg5[%c1_60, %c0_61, %c0_62] : memref<9x128x256xf32, #tpu.memory_space<vmem>>, vector<1x128x256xf32>
    %47 = vector.shape_cast %46 : vector<1x128x256xf32> to vector<128x256xf32>
    %cst_63 = arith.constant dense<0.000000e+00> : vector<32x256xf32>
    %48 = tpu.matmul %45, %47, %cst_63 {dimension_numbers = #tpu.dot_dimension_numbers<[1], [0], [0], [1], [0, 0, 1, 1], [], []>} : vector<32x128xf32>, vector<128x256xf32>, vector<32x256xf32> -> vector<32x256xf32>
    %49 = arith.addf %44, %48 : vector<32x256xf32>
    %c0_64 = arith.constant 0 : index
    %c4_65 = arith.constant 4 : index
    %50 = vector.load %arg12[%c0_64, %c4_65] : memref<34x136xf32, #tpu.memory_space<vmem>>, vector<32x128xf32>
    %c1_66 = arith.constant 1 : index
    %c0_67 = arith.constant 0 : index
    %c0_68 = arith.constant 0 : index
    %51 = vector.load %arg6[%c1_66, %c0_67, %c0_68] : memref<9x128x256xf32, #tpu.memory_space<vmem>>, vector<1x128x256xf32>
    %52 = vector.shape_cast %51 : vector<1x128x256xf32> to vector<128x256xf32>
    %cst_69 = arith.constant dense<0.000000e+00> : vector<32x256xf32>
    %53 = tpu.matmul %50, %52, %cst_69 {dimension_numbers = #tpu.dot_dimension_numbers<[1], [0], [0], [1], [0, 0, 1, 1], [], []>} : vector<32x128xf32>, vector<128x256xf32>, vector<32x256xf32> -> vector<32x256xf32>
    %54 = arith.addf %49, %53 : vector<32x256xf32>
    %c0_70 = arith.constant 0 : index
    %c8 = arith.constant 8 : index
    %55 = vector.load %arg11[%c0_70, %c8] : memref<34x136xf32, #tpu.memory_space<vmem>>, vector<32x128xf32>
    %c2 = arith.constant 2 : index
    %c0_71 = arith.constant 0 : index
    %c0_72 = arith.constant 0 : index
    %56 = vector.load %arg5[%c2, %c0_71, %c0_72] : memref<9x128x256xf32, #tpu.memory_space<vmem>>, vector<1x128x256xf32>
    %57 = vector.shape_cast %56 : vector<1x128x256xf32> to vector<128x256xf32>
    %cst_73 = arith.constant dense<0.000000e+00> : vector<32x256xf32>
    %58 = tpu.matmul %55, %57, %cst_73 {dimension_numbers = #tpu.dot_dimension_numbers<[1], [0], [0], [1], [0, 0, 1, 1], [], []>} : vector<32x128xf32>, vector<128x256xf32>, vector<32x256xf32> -> vector<32x256xf32>
    %59 = arith.addf %54, %58 : vector<32x256xf32>
    %c0_74 = arith.constant 0 : index
    %c8_75 = arith.constant 8 : index
    %60 = vector.load %arg12[%c0_74, %c8_75] : memref<34x136xf32, #tpu.memory_space<vmem>>, vector<32x128xf32>
    %c2_76 = arith.constant 2 : index
    %c0_77 = arith.constant 0 : index
    %c0_78 = arith.constant 0 : index
    %61 = vector.load %arg6[%c2_76, %c0_77, %c0_78] : memref<9x128x256xf32, #tpu.memory_space<vmem>>, vector<1x128x256xf32>
    %62 = vector.shape_cast %61 : vector<1x128x256xf32> to vector<128x256xf32>
    %cst_79 = arith.constant dense<0.000000e+00> : vector<32x256xf32>
    %63 = tpu.matmul %60, %62, %cst_79 {dimension_numbers = #tpu.dot_dimension_numbers<[1], [0], [0], [1], [0, 0, 1, 1], [], []>} : vector<32x128xf32>, vector<128x256xf32>, vector<32x256xf32> -> vector<32x256xf32>
    %64 = arith.addf %59, %63 : vector<32x256xf32>
    %c1_80 = arith.constant 1 : index
    %c0_81 = arith.constant 0 : index
    %65 = vector.load %arg11[%c1_80, %c0_81] : memref<34x136xf32, #tpu.memory_space<vmem>>, vector<32x128xf32>
    %c3 = arith.constant 3 : index
    %c0_82 = arith.constant 0 : index
    %c0_83 = arith.constant 0 : index
    %66 = vector.load %arg5[%c3, %c0_82, %c0_83] : memref<9x128x256xf32, #tpu.memory_space<vmem>>, vector<1x128x256xf32>
    %67 = vector.shape_cast %66 : vector<1x128x256xf32> to vector<128x256xf32>
    %cst_84 = arith.constant dense<0.000000e+00> : vector<32x256xf32>
    %68 = tpu.matmul %65, %67, %cst_84 {dimension_numbers = #tpu.dot_dimension_numbers<[1], [0], [0], [1], [0, 0, 1, 1], [], []>} : vector<32x128xf32>, vector<128x256xf32>, vector<32x256xf32> -> vector<32x256xf32>
    %69 = arith.addf %64, %68 : vector<32x256xf32>
    %c1_85 = arith.constant 1 : index
    %c0_86 = arith.constant 0 : index
    %70 = vector.load %arg12[%c1_85, %c0_86] : memref<34x136xf32, #tpu.memory_space<vmem>>, vector<32x128xf32>
    %c3_87 = arith.constant 3 : index
    %c0_88 = arith.constant 0 : index
    %c0_89 = arith.constant 0 : index
    %71 = vector.load %arg6[%c3_87, %c0_88, %c0_89] : memref<9x128x256xf32, #tpu.memory_space<vmem>>, vector<1x128x256xf32>
    %72 = vector.shape_cast %71 : vector<1x128x256xf32> to vector<128x256xf32>
    %cst_90 = arith.constant dense<0.000000e+00> : vector<32x256xf32>
    %73 = tpu.matmul %70, %72, %cst_90 {dimension_numbers = #tpu.dot_dimension_numbers<[1], [0], [0], [1], [0, 0, 1, 1], [], []>} : vector<32x128xf32>, vector<128x256xf32>, vector<32x256xf32> -> vector<32x256xf32>
    %74 = arith.addf %69, %73 : vector<32x256xf32>
    %c1_91 = arith.constant 1 : index
    %c4_92 = arith.constant 4 : index
    %75 = vector.load %arg11[%c1_91, %c4_92] : memref<34x136xf32, #tpu.memory_space<vmem>>, vector<32x128xf32>
    %c4_93 = arith.constant 4 : index
    %c0_94 = arith.constant 0 : index
    %c0_95 = arith.constant 0 : index
    %76 = vector.load %arg5[%c4_93, %c0_94, %c0_95] : memref<9x128x256xf32, #tpu.memory_space<vmem>>, vector<1x128x256xf32>
    %77 = vector.shape_cast %76 : vector<1x128x256xf32> to vector<128x256xf32>
    %cst_96 = arith.constant dense<0.000000e+00> : vector<32x256xf32>
    %78 = tpu.matmul %75, %77, %cst_96 {dimension_numbers = #tpu.dot_dimension_numbers<[1], [0], [0], [1], [0, 0, 1, 1], [], []>} : vector<32x128xf32>, vector<128x256xf32>, vector<32x256xf32> -> vector<32x256xf32>
    %79 = arith.addf %74, %78 : vector<32x256xf32>
    %c1_97 = arith.constant 1 : index
    %c4_98 = arith.constant 4 : index
    %80 = vector.load %arg12[%c1_97, %c4_98] : memref<34x136xf32, #tpu.memory_space<vmem>>, vector<32x128xf32>
    %c4_99 = arith.constant 4 : index
    %c0_100 = arith.constant 0 : index
    %c0_101 = arith.constant 0 : index
    %81 = vector.load %arg6[%c4_99, %c0_100, %c0_101] : memref<9x128x256xf32, #tpu.memory_space<vmem>>, vector<1x128x256xf32>
    %82 = vector.shape_cast %81 : vector<1x128x256xf32> to vector<128x256xf32>
    %cst_102 = arith.constant dense<0.000000e+00> : vector<32x256xf32>
    %83 = tpu.matmul %80, %82, %cst_102 {dimension_numbers = #tpu.dot_dimension_numbers<[1], [0], [0], [1], [0, 0, 1, 1], [], []>} : vector<32x128xf32>, vector<128x256xf32>, vector<32x256xf32> -> vector<32x256xf32>
    %84 = arith.addf %79, %83 : vector<32x256xf32>
    %c1_103 = arith.constant 1 : index
    %c8_104 = arith.constant 8 : index
    %85 = vector.load %arg11[%c1_103, %c8_104] : memref<34x136xf32, #tpu.memory_space<vmem>>, vector<32x128xf32>
    %c5 = arith.constant 5 : index
    %c0_105 = arith.constant 0 : index
    %c0_106 = arith.constant 0 : index
    %86 = vector.load %arg5[%c5, %c0_105, %c0_106] : memref<9x128x256xf32, #tpu.memory_space<vmem>>, vector<1x128x256xf32>
    %87 = vector.shape_cast %86 : vector<1x128x256xf32> to vector<128x256xf32>
    %cst_107 = arith.constant dense<0.000000e+00> : vector<32x256xf32>
    %88 = tpu.matmul %85, %87, %cst_107 {dimension_numbers = #tpu.dot_dimension_numbers<[1], [0], [0], [1], [0, 0, 1, 1], [], []>} : vector<32x128xf32>, vector<128x256xf32>, vector<32x256xf32> -> vector<32x256xf32>
    %89 = arith.addf %84, %88 : vector<32x256xf32>
    %c1_108 = arith.constant 1 : index
    %c8_109 = arith.constant 8 : index
    %90 = vector.load %arg12[%c1_108, %c8_109] : memref<34x136xf32, #tpu.memory_space<vmem>>, vector<32x128xf32>
    %c5_110 = arith.constant 5 : index
    %c0_111 = arith.constant 0 : index
    %c0_112 = arith.constant 0 : index
    %91 = vector.load %arg6[%c5_110, %c0_111, %c0_112] : memref<9x128x256xf32, #tpu.memory_space<vmem>>, vector<1x128x256xf32>
    %92 = vector.shape_cast %91 : vector<1x128x256xf32> to vector<128x256xf32>
    %cst_113 = arith.constant dense<0.000000e+00> : vector<32x256xf32>
    %93 = tpu.matmul %90, %92, %cst_113 {dimension_numbers = #tpu.dot_dimension_numbers<[1], [0], [0], [1], [0, 0, 1, 1], [], []>} : vector<32x128xf32>, vector<128x256xf32>, vector<32x256xf32> -> vector<32x256xf32>
    %94 = arith.addf %89, %93 : vector<32x256xf32>
    %c2_114 = arith.constant 2 : index
    %c0_115 = arith.constant 0 : index
    %95 = vector.load %arg11[%c2_114, %c0_115] : memref<34x136xf32, #tpu.memory_space<vmem>>, vector<32x128xf32>
    %c6 = arith.constant 6 : index
    %c0_116 = arith.constant 0 : index
    %c0_117 = arith.constant 0 : index
    %96 = vector.load %arg5[%c6, %c0_116, %c0_117] : memref<9x128x256xf32, #tpu.memory_space<vmem>>, vector<1x128x256xf32>
    %97 = vector.shape_cast %96 : vector<1x128x256xf32> to vector<128x256xf32>
    %cst_118 = arith.constant dense<0.000000e+00> : vector<32x256xf32>
    %98 = tpu.matmul %95, %97, %cst_118 {dimension_numbers = #tpu.dot_dimension_numbers<[1], [0], [0], [1], [0, 0, 1, 1], [], []>} : vector<32x128xf32>, vector<128x256xf32>, vector<32x256xf32> -> vector<32x256xf32>
    %99 = arith.addf %94, %98 : vector<32x256xf32>
    %c2_119 = arith.constant 2 : index
    %c0_120 = arith.constant 0 : index
    %100 = vector.load %arg12[%c2_119, %c0_120] : memref<34x136xf32, #tpu.memory_space<vmem>>, vector<32x128xf32>
    %c6_121 = arith.constant 6 : index
    %c0_122 = arith.constant 0 : index
    %c0_123 = arith.constant 0 : index
    %101 = vector.load %arg6[%c6_121, %c0_122, %c0_123] : memref<9x128x256xf32, #tpu.memory_space<vmem>>, vector<1x128x256xf32>
    %102 = vector.shape_cast %101 : vector<1x128x256xf32> to vector<128x256xf32>
    %cst_124 = arith.constant dense<0.000000e+00> : vector<32x256xf32>
    %103 = tpu.matmul %100, %102, %cst_124 {dimension_numbers = #tpu.dot_dimension_numbers<[1], [0], [0], [1], [0, 0, 1, 1], [], []>} : vector<32x128xf32>, vector<128x256xf32>, vector<32x256xf32> -> vector<32x256xf32>
    %104 = arith.addf %99, %103 : vector<32x256xf32>
    %c2_125 = arith.constant 2 : index
    %c4_126 = arith.constant 4 : index
    %105 = vector.load %arg11[%c2_125, %c4_126] : memref<34x136xf32, #tpu.memory_space<vmem>>, vector<32x128xf32>
    %c7 = arith.constant 7 : index
    %c0_127 = arith.constant 0 : index
    %c0_128 = arith.constant 0 : index
    %106 = vector.load %arg5[%c7, %c0_127, %c0_128] : memref<9x128x256xf32, #tpu.memory_space<vmem>>, vector<1x128x256xf32>
    %107 = vector.shape_cast %106 : vector<1x128x256xf32> to vector<128x256xf32>
    %cst_129 = arith.constant dense<0.000000e+00> : vector<32x256xf32>
    %108 = tpu.matmul %105, %107, %cst_129 {dimension_numbers = #tpu.dot_dimension_numbers<[1], [0], [0], [1], [0, 0, 1, 1], [], []>} : vector<32x128xf32>, vector<128x256xf32>, vector<32x256xf32> -> vector<32x256xf32>
    %109 = arith.addf %104, %108 : vector<32x256xf32>
    %c2_130 = arith.constant 2 : index
    %c4_131 = arith.constant 4 : index
    %110 = vector.load %arg12[%c2_130, %c4_131] : memref<34x136xf32, #tpu.memory_space<vmem>>, vector<32x128xf32>
    %c7_132 = arith.constant 7 : index
    %c0_133 = arith.constant 0 : index
    %c0_134 = arith.constant 0 : index
    %111 = vector.load %arg6[%c7_132, %c0_133, %c0_134] : memref<9x128x256xf32, #tpu.memory_space<vmem>>, vector<1x128x256xf32>
    %112 = vector.shape_cast %111 : vector<1x128x256xf32> to vector<128x256xf32>
    %cst_135 = arith.constant dense<0.000000e+00> : vector<32x256xf32>
    %113 = tpu.matmul %110, %112, %cst_135 {dimension_numbers = #tpu.dot_dimension_numbers<[1], [0], [0], [1], [0, 0, 1, 1], [], []>} : vector<32x128xf32>, vector<128x256xf32>, vector<32x256xf32> -> vector<32x256xf32>
    %114 = arith.addf %109, %113 : vector<32x256xf32>
    %c2_136 = arith.constant 2 : index
    %c8_137 = arith.constant 8 : index
    %115 = vector.load %arg11[%c2_136, %c8_137] : memref<34x136xf32, #tpu.memory_space<vmem>>, vector<32x128xf32>
    %c8_138 = arith.constant 8 : index
    %c0_139 = arith.constant 0 : index
    %c0_140 = arith.constant 0 : index
    %116 = vector.load %arg5[%c8_138, %c0_139, %c0_140] : memref<9x128x256xf32, #tpu.memory_space<vmem>>, vector<1x128x256xf32>
    %117 = vector.shape_cast %116 : vector<1x128x256xf32> to vector<128x256xf32>
    %cst_141 = arith.constant dense<0.000000e+00> : vector<32x256xf32>
    %118 = tpu.matmul %115, %117, %cst_141 {dimension_numbers = #tpu.dot_dimension_numbers<[1], [0], [0], [1], [0, 0, 1, 1], [], []>} : vector<32x128xf32>, vector<128x256xf32>, vector<32x256xf32> -> vector<32x256xf32>
    %119 = arith.addf %114, %118 : vector<32x256xf32>
    %c2_142 = arith.constant 2 : index
    %c8_143 = arith.constant 8 : index
    %120 = vector.load %arg12[%c2_142, %c8_143] : memref<34x136xf32, #tpu.memory_space<vmem>>, vector<32x128xf32>
    %c8_144 = arith.constant 8 : index
    %c0_145 = arith.constant 0 : index
    %c0_146 = arith.constant 0 : index
    %121 = vector.load %arg6[%c8_144, %c0_145, %c0_146] : memref<9x128x256xf32, #tpu.memory_space<vmem>>, vector<1x128x256xf32>
    %122 = vector.shape_cast %121 : vector<1x128x256xf32> to vector<128x256xf32>
    %cst_147 = arith.constant dense<0.000000e+00> : vector<32x256xf32>
    %123 = tpu.matmul %120, %122, %cst_147 {dimension_numbers = #tpu.dot_dimension_numbers<[1], [0], [0], [1], [0, 0, 1, 1], [], []>} : vector<32x128xf32>, vector<128x256xf32>, vector<32x256xf32> -> vector<32x256xf32>
    %124 = arith.addf %119, %123 : vector<32x256xf32>
    %c0_148 = arith.constant 0 : index
    %c0_149 = arith.constant 0 : index
    %125 = vector.load %arg7[%c0_148, %c0_149] : memref<1x256xf32, #tpu.memory_space<vmem>>, vector<1x256xf32>
    %126 = vector.broadcast %125 : vector<1x256xf32> to vector<32x256xf32>
    %127 = arith.addf %124, %126 : vector<32x256xf32>
    %cst_150 = arith.constant 0.000000e+00 : f32
    %128 = vector.broadcast %cst_150 : f32 to vector<32x256xf32>
    %129 = arith.maximumf %127, %128 : vector<32x256xf32>
    %c1_151 = arith.constant 1 : index
    %c8_152 = arith.constant 8 : index
    %130 = vector.load %arg13[%c1_151, %c8_152] : memref<34x272xf32, #tpu.memory_space<vmem>>, vector<32x256xf32>
    tpu.vector_store %arg13[%c1_151, %c8_152], %129 {strides = array<i32>} : memref<34x272xf32, #tpu.memory_space<vmem>>, vector<32x256xf32>,
    %cst_153 = arith.constant 0.000000e+00 : f32
    %131 = vector.broadcast %cst_153 : f32 to vector<32x256xf32>
    %c0_154 = arith.constant 0 : index
    %c0_155 = arith.constant 0 : index
    %132 = vector.load %arg13[%c0_154, %c0_155] : memref<34x272xf32, #tpu.memory_space<vmem>>, vector<32x256xf32>
    %c0_156 = arith.constant 0 : index
    %c0_157 = arith.constant 0 : index
    %c0_158 = arith.constant 0 : index
    %133 = vector.load %arg8[%c0_156, %c0_157, %c0_158] : memref<9x256x256xf32, #tpu.memory_space<vmem>>, vector<1x256x256xf32>
    %134 = vector.shape_cast %133 : vector<1x256x256xf32> to vector<256x256xf32>
    %cst_159 = arith.constant dense<0.000000e+00> : vector<32x256xf32>
    %135 = tpu.matmul %132, %134, %cst_159 {dimension_numbers = #tpu.dot_dimension_numbers<[1], [0], [0], [1], [0, 0, 1, 1], [], []>} : vector<32x256xf32>, vector<256x256xf32>, vector<32x256xf32> -> vector<32x256xf32>
    %136 = arith.addf %131, %135 : vector<32x256xf32>
    %c0_160 = arith.constant 0 : index
    %c8_161 = arith.constant 8 : index
    %137 = vector.load %arg13[%c0_160, %c8_161] : memref<34x272xf32, #tpu.memory_space<vmem>>, vector<32x256xf32>
    %c1_162 = arith.constant 1 : index
    %c0_163 = arith.constant 0 : index
    %c0_164 = arith.constant 0 : index
    %138 = vector.load %arg8[%c1_162, %c0_163, %c0_164] : memref<9x256x256xf32, #tpu.memory_space<vmem>>, vector<1x256x256xf32>
    %139 = vector.shape_cast %138 : vector<1x256x256xf32> to vector<256x256xf32>
    %cst_165 = arith.constant dense<0.000000e+00> : vector<32x256xf32>
    %140 = tpu.matmul %137, %139, %cst_165 {dimension_numbers = #tpu.dot_dimension_numbers<[1], [0], [0], [1], [0, 0, 1, 1], [], []>} : vector<32x256xf32>, vector<256x256xf32>, vector<32x256xf32> -> vector<32x256xf32>
    %141 = arith.addf %136, %140 : vector<32x256xf32>
    %c0_166 = arith.constant 0 : index
    %c16 = arith.constant 16 : index
    %142 = vector.load %arg13[%c0_166, %c16] : memref<34x272xf32, #tpu.memory_space<vmem>>, vector<32x256xf32>
    %c2_167 = arith.constant 2 : index
    %c0_168 = arith.constant 0 : index
    %c0_169 = arith.constant 0 : index
    %143 = vector.load %arg8[%c2_167, %c0_168, %c0_169] : memref<9x256x256xf32, #tpu.memory_space<vmem>>, vector<1x256x256xf32>
    %144 = vector.shape_cast %143 : vector<1x256x256xf32> to vector<256x256xf32>
    %cst_170 = arith.constant dense<0.000000e+00> : vector<32x256xf32>
    %145 = tpu.matmul %142, %144, %cst_170 {dimension_numbers = #tpu.dot_dimension_numbers<[1], [0], [0], [1], [0, 0, 1, 1], [], []>} : vector<32x256xf32>, vector<256x256xf32>, vector<32x256xf32> -> vector<32x256xf32>
    %146 = arith.addf %141, %145 : vector<32x256xf32>
    %c1_171 = arith.constant 1 : index
    %c0_172 = arith.constant 0 : index
    %147 = vector.load %arg13[%c1_171, %c0_172] : memref<34x272xf32, #tpu.memory_space<vmem>>, vector<32x256xf32>
    %c3_173 = arith.constant 3 : index
    %c0_174 = arith.constant 0 : index
    %c0_175 = arith.constant 0 : index
    %148 = vector.load %arg8[%c3_173, %c0_174, %c0_175] : memref<9x256x256xf32, #tpu.memory_space<vmem>>, vector<1x256x256xf32>
    %149 = vector.shape_cast %148 : vector<1x256x256xf32> to vector<256x256xf32>
    %cst_176 = arith.constant dense<0.000000e+00> : vector<32x256xf32>
    %150 = tpu.matmul %147, %149, %cst_176 {dimension_numbers = #tpu.dot_dimension_numbers<[1], [0], [0], [1], [0, 0, 1, 1], [], []>} : vector<32x256xf32>, vector<256x256xf32>, vector<32x256xf32> -> vector<32x256xf32>
    %151 = arith.addf %146, %150 : vector<32x256xf32>
    %c1_177 = arith.constant 1 : index
    %c8_178 = arith.constant 8 : index
    %152 = vector.load %arg13[%c1_177, %c8_178] : memref<34x272xf32, #tpu.memory_space<vmem>>, vector<32x256xf32>
    %c4_179 = arith.constant 4 : index
    %c0_180 = arith.constant 0 : index
    %c0_181 = arith.constant 0 : index
    %153 = vector.load %arg8[%c4_179, %c0_180, %c0_181] : memref<9x256x256xf32, #tpu.memory_space<vmem>>, vector<1x256x256xf32>
    %154 = vector.shape_cast %153 : vector<1x256x256xf32> to vector<256x256xf32>
    %cst_182 = arith.constant dense<0.000000e+00> : vector<32x256xf32>
    %155 = tpu.matmul %152, %154, %cst_182 {dimension_numbers = #tpu.dot_dimension_numbers<[1], [0], [0], [1], [0, 0, 1, 1], [], []>} : vector<32x256xf32>, vector<256x256xf32>, vector<32x256xf32> -> vector<32x256xf32>
    %156 = arith.addf %151, %155 : vector<32x256xf32>
    %c1_183 = arith.constant 1 : index
    %c16_184 = arith.constant 16 : index
    %157 = vector.load %arg13[%c1_183, %c16_184] : memref<34x272xf32, #tpu.memory_space<vmem>>, vector<32x256xf32>
    %c5_185 = arith.constant 5 : index
    %c0_186 = arith.constant 0 : index
    %c0_187 = arith.constant 0 : index
    %158 = vector.load %arg8[%c5_185, %c0_186, %c0_187] : memref<9x256x256xf32, #tpu.memory_space<vmem>>, vector<1x256x256xf32>
    %159 = vector.shape_cast %158 : vector<1x256x256xf32> to vector<256x256xf32>
    %cst_188 = arith.constant dense<0.000000e+00> : vector<32x256xf32>
    %160 = tpu.matmul %157, %159, %cst_188 {dimension_numbers = #tpu.dot_dimension_numbers<[1], [0], [0], [1], [0, 0, 1, 1], [], []>} : vector<32x256xf32>, vector<256x256xf32>, vector<32x256xf32> -> vector<32x256xf32>
    %161 = arith.addf %156, %160 : vector<32x256xf32>
    %c2_189 = arith.constant 2 : index
    %c0_190 = arith.constant 0 : index
    %162 = vector.load %arg13[%c2_189, %c0_190] : memref<34x272xf32, #tpu.memory_space<vmem>>, vector<32x256xf32>
    %c6_191 = arith.constant 6 : index
    %c0_192 = arith.constant 0 : index
    %c0_193 = arith.constant 0 : index
    %163 = vector.load %arg8[%c6_191, %c0_192, %c0_193] : memref<9x256x256xf32, #tpu.memory_space<vmem>>, vector<1x256x256xf32>
    %164 = vector.shape_cast %163 : vector<1x256x256xf32> to vector<256x256xf32>
    %cst_194 = arith.constant dense<0.000000e+00> : vector<32x256xf32>
    %165 = tpu.matmul %162, %164, %cst_194 {dimension_numbers = #tpu.dot_dimension_numbers<[1], [0], [0], [1], [0, 0, 1, 1], [], []>} : vector<32x256xf32>, vector<256x256xf32>, vector<32x256xf32> -> vector<32x256xf32>
    %166 = arith.addf %161, %165 : vector<32x256xf32>
    %c2_195 = arith.constant 2 : index
    %c8_196 = arith.constant 8 : index
    %167 = vector.load %arg13[%c2_195, %c8_196] : memref<34x272xf32, #tpu.memory_space<vmem>>, vector<32x256xf32>
    %c7_197 = arith.constant 7 : index
    %c0_198 = arith.constant 0 : index
    %c0_199 = arith.constant 0 : index
    %168 = vector.load %arg8[%c7_197, %c0_198, %c0_199] : memref<9x256x256xf32, #tpu.memory_space<vmem>>, vector<1x256x256xf32>
    %169 = vector.shape_cast %168 : vector<1x256x256xf32> to vector<256x256xf32>
    %cst_200 = arith.constant dense<0.000000e+00> : vector<32x256xf32>
    %170 = tpu.matmul %167, %169, %cst_200 {dimension_numbers = #tpu.dot_dimension_numbers<[1], [0], [0], [1], [0, 0, 1, 1], [], []>} : vector<32x256xf32>, vector<256x256xf32>, vector<32x256xf32> -> vector<32x256xf32>
    %171 = arith.addf %166, %170 : vector<32x256xf32>
    %c2_201 = arith.constant 2 : index
    %c16_202 = arith.constant 16 : index
    %172 = vector.load %arg13[%c2_201, %c16_202] : memref<34x272xf32, #tpu.memory_space<vmem>>, vector<32x256xf32>
    %c8_203 = arith.constant 8 : index
    %c0_204 = arith.constant 0 : index
    %c0_205 = arith.constant 0 : index
    %173 = vector.load %arg8[%c8_203, %c0_204, %c0_205] : memref<9x256x256xf32, #tpu.memory_space<vmem>>, vector<1x256x256xf32>
    %174 = vector.shape_cast %173 : vector<1x256x256xf32> to vector<256x256xf32>
    %cst_206 = arith.constant dense<0.000000e+00> : vector<32x256xf32>
    %175 = tpu.matmul %172, %174, %cst_206 {dimension_numbers = #tpu.dot_dimension_numbers<[1], [0], [0], [1], [0, 0, 1, 1], [], []>} : vector<32x256xf32>, vector<256x256xf32>, vector<32x256xf32> -> vector<32x256xf32>
    %176 = arith.addf %171, %175 : vector<32x256xf32>
    %c0_207 = arith.constant 0 : index
    %c0_208 = arith.constant 0 : index
    %177 = vector.load %arg9[%c0_207, %c0_208] : memref<1x256xf32, #tpu.memory_space<vmem>>, vector<1x256xf32>
    %178 = vector.broadcast %177 : vector<1x256xf32> to vector<32x256xf32>
    %179 = arith.addf %176, %178 : vector<32x256xf32>
    %cst_209 = arith.constant 0.000000e+00 : f32
    %180 = vector.broadcast %cst_209 : f32 to vector<32x256xf32>
    %181 = arith.maximumf %179, %180 : vector<32x256xf32>
    %c0_210 = arith.constant 0 : index
    %c0_211 = arith.constant 0 : index
    %c0_212 = arith.constant 0 : index
    %182 = vector.load %arg10[%c0_210, %c0_211, %c0_212] : memref<1x32x256xf32, #tpu.memory_space<vmem>>, vector<1x32x256xf32>
    %183 = vector.shape_cast %182 : vector<1x32x256xf32> to vector<32x256xf32>
    %184 = vector.shape_cast %181 : vector<32x256xf32> to vector<1x32x256xf32>
    tpu.vector_store %arg10[%c0_210, %c0_211, %c0_212], %184 {strides = array<i32>} : memref<1x32x256xf32, #tpu.memory_space<vmem>>, vector<1x32x256xf32>,
    return
  }
  func.func @transform_0(%arg0: i32) -> (i32, i32, i32) {
    %c0_i32 = arith.constant 0 : i32
    %c0_i32_0 = arith.constant 0 : i32
    %c0_i32_1 = arith.constant 0 : i32
    return %arg0, %c0_i32, %c0_i32_0 : i32, i32, i32
  }
  func.func @transform_1(%arg0: i32) -> (i32, i32, i32) {
    %c0_i32 = arith.constant 0 : i32
    %c0_i32_0 = arith.constant 0 : i32
    %c0_i32_1 = arith.constant 0 : i32
    return %arg0, %c0_i32, %c0_i32_0 : i32, i32, i32
  }
  func.func @transform_2(%arg0: i32) -> (i32, i32) {
    %c0_i32 = arith.constant 0 : i32
    %c0_i32_0 = arith.constant 0 : i32
    %c0_i32_1 = arith.constant 0 : i32
    return %c0_i32, %c0_i32_0 : i32, i32
  }
  func.func @transform_3(%arg0: i32) -> (i32, i32) {
    %c0_i32 = arith.constant 0 : i32
    %c0_i32_0 = arith.constant 0 : i32
    %c0_i32_1 = arith.constant 0 : i32
    return %c0_i32, %c0_i32_0 : i32, i32
  }
  func.func @transform_4(%arg0: i32) -> (i32, i32, i32) {
    %c0_i32 = arith.constant 0 : i32
    %c0_i32_0 = arith.constant 0 : i32
    %c0_i32_1 = arith.constant 0 : i32
    %c0_i32_2 = arith.constant 0 : i32
    return %c0_i32, %c0_i32_0, %c0_i32_1 : i32, i32, i32
  }
  func.func @transform_5(%arg0: i32) -> (i32, i32, i32) {
    %c0_i32 = arith.constant 0 : i32
    %c0_i32_0 = arith.constant 0 : i32
    %c0_i32_1 = arith.constant 0 : i32
    %c0_i32_2 = arith.constant 0 : i32
    return %c0_i32, %c0_i32_0, %c0_i32_1 : i32, i32, i32
  }
  func.func @transform_6(%arg0: i32) -> (i32, i32) {
    %c0_i32 = arith.constant 0 : i32
    %c0_i32_0 = arith.constant 0 : i32
    %c0_i32_1 = arith.constant 0 : i32
    return %c0_i32, %c0_i32_0 : i32, i32
  }
  func.func @transform_7(%arg0: i32) -> (i32, i32, i32) {
    %c0_i32 = arith.constant 0 : i32
    %c0_i32_0 = arith.constant 0 : i32
    %c0_i32_1 = arith.constant 0 : i32
    %c0_i32_2 = arith.constant 0 : i32
    return %c0_i32, %c0_i32_0, %c0_i32_1 : i32, i32, i32
  }
  func.func @transform_8(%arg0: i32) -> (i32, i32) {
    %c0_i32 = arith.constant 0 : i32
    %c0_i32_0 = arith.constant 0 : i32
    %c0_i32_1 = arith.constant 0 : i32
    return %c0_i32, %c0_i32_0 : i32, i32
  }
  func.func @transform_9(%arg0: i32) -> (i32, i32, i32) {
    %c0_i32 = arith.constant 0 : i32
    %c0_i32_0 = arith.constant 0 : i32
    %c0_i32_1 = arith.constant 0 : i32
    return %arg0, %c0_i32, %c0_i32_0 : i32, i32, i32
  }
}

</mosaic_0001>

<bundles_post_ra>
// kernel: tile.13
= control target key start
LH: loop header
LB: loop body
LE: loop exit
PB: predicated region body
PF: predicated region fallthrough
CT: control target
= control target key end

     0   :  { %s40_s0 = inlined_call_operand.vmem [shape: f32[8], index: 0, kind: input, shape index: {}]   ;;  %s41_s1 = inlined_call_operand.vmem [shape: f32[32,8], index: 1, kind: output, shape index: {}]  }
   0x1   :  { %v4_v0 = vld [vmem:[%s40_s0] ss:$0 sm:$0xff] }
   0x2   :  { %5 = vst [vmem:[%s41_s1] sm:$0xff] %v4_v0  ;;  %12 = vst [vmem:[%s41_s1 + $0x8] sm:$0xff] %v4_v0 }
   0x3   :  { %13 = vst [vmem:[%s41_s1 + $0x10] sm:$0xff] %v4_v0  ;;  %14 = vst [vmem:[%s41_s1 + $0x18] sm:$0xff] %v4_v0 }

// kernel: tile.14
= control target key start
LH: loop header
LB: loop body
LE: loop exit
PB: predicated region body
PF: predicated region fallthrough
CT: control target
= control target key end

     0   :  { %s7_s6 = smov 3  ;;  %s21_s9 = smov 3  ;;  %vm4_vm0 = vcmask 64512   ;;  %vm11_vm1 = vcmask 1048512   ;;  %vm18_vm2 = vcmask 982912   ;;  %vm25_vm3 = vcmask 917312   ;;  %s232_s0 = inlined_call_operand.vmem [shape: f32[32,8], index: 0, kind: input, shape index: {}]   ;;  %s233_s1 = inlined_call_operand.vmem [shape: f32[1,256], index: 1, kind: output, shape index: {}]  }
   0x1   :  { %v122_v0 = vld [vmem:[%s232_s0 + $0xf] ss:$16 sm:%s7_s6]   ;;  %s153_s10 = smov 120   ;;  %v124_v1 = vld [vmem:[%s232_s0 + $0xd] ss:$16 sm:%s21_s9]   ;;  %s14_s13 = smov 3 }
   0x2   :  { %9 = vrot.lane.b32.xlu0 %v122_v0, %s153_s10  ;;  %s154_s14 = smov 104   ;;  %v123_v2 = vld [vmem:[%s232_s0 + $0xe] ss:$16 sm:%s14_s13]   ;;  %s28_s17 = smov 3  ;;  %vm32_vm4 = vcmask 851712   ;;  %vm39_vm5 = vcmask 786112  }
   0x3   :  { %23 = vrot.lane.b32.xlu1 %v124_v1, %s154_s14  ;;  %v125_v3 = vld [vmem:[%s232_s0 + $0xc] ss:$16 sm:%s28_s17]   ;;  %s35_s20 = smov 3  ;;  %s42_s21 = smov 3  ;;  %vm46_vm6 = vcmask 720512   ;;  %vm53_vm7 = vcmask 654912  }
   0x4   :  { %s155_s22 = smov 112   ;;  %s156_s23 = smov 96   ;;  %v126_v4 = vld [vmem:[%s232_s0 + $0xb] ss:$16 sm:%s35_s20]   ;;  %v127_v5 = vld [vmem:[%s232_s0 + $0xa] ss:$16 sm:%s42_s21]  }
   0x5   :  { %s49_s28 = smov 3  ;;  %s56_s29 = smov 3  ;;  %vm60_vm8 = vcmask 589312   ;;  %vm67_vm9 = vcmask 523712   ;;  %vm74_vm10 = vcmask 458112   ;;  %vm81_vm11 = vcmask 392512  }
   0x6   :  { %16 = vrot.lane.b32.xlu0 %v123_v2, %s155_s22  ;;  %s157_s30 = smov 88   ;;  %s158_s2 = smov 80   ;;  %v128_v6 = vld [vmem:[%s232_s0 + $0x9] ss:$16 sm:%s49_s28]   ;;  %vm88_vm12 = vcmask 326912   ;;  %vm95_vm13 = vcmask 261312  }
   0x7   :  { %30 = vrot.lane.b32.xlu1 %v125_v3, %s156_s23  ;;  %v129_v7 = vld [vmem:[%s232_s0 + $0x8] ss:$16 sm:%s56_s29]   ;;  %s63_s7 = smov 3  ;;  %s70_s8 = smov 3  ;;  %vm102_vm14 = vcmask 195712   ;;  %vm109_vm15 = vcmask 130112  }
   0x8   :  { %s159_s9 = smov 72   ;;  %s160_s10 = smov 64   ;;  %v130_v8 = vld [vmem:[%s232_s0 + $0x7] ss:$16 sm:%s63_s7]   ;;  %v131_v9 = vld [vmem:[%s232_s0 + $0x6] ss:$16 sm:%s70_s8]  }
   0x9   :  { %s2_s13 = smov 3  ;;  %s77_s16 = smov 3 }
   0xa   :  { %37 = vrot.lane.b32.xlu0 %v126_v4, %s157_s30  ;;  %v3_v10 = vld [vmem:[%s232_s0] ss:$16 sm:%s2_s13]   ;;  %s84_s19 = smov 3  ;;  %s161_s20 = smov 56  }
   0xb   :  { %44 = vrot.lane.b32.xlu1 %v127_v5, %s158_s2  ;;  %5 = vst.msk [vmem:[#allocation0] ss:$8 sm:$0x3] %vm4_vm0, %v3_v10   ;;  %s162_s21 = smov 48   ;;  %v132_v11 = vld [vmem:[%s232_s0 + $0x5] ss:$16 sm:%s77_s16]  }
   0xc   :  { %v133_v12 = vld [vmem:[%s232_s0 + $0x4] ss:$16 sm:%s84_s19]   ;;  %s91_s26 = smov 3  ;;  %s98_s27 = smov 3 }
   0xd   :  { %s163_s28 = smov 40   ;;  %s164_s29 = smov 32   ;;  %v134_v13 = vld [vmem:[%s232_s0 + $0x3] ss:$16 sm:%s91_s26]   ;;  %v135_v14 = vld [vmem:[%s232_s0 + $0x2] ss:$16 sm:%s98_s27]  }
   0xe   :  { %51 = vrot.lane.b32.xlu0 %v128_v6, %s159_s9  ;;  %s105_s5 = smov 3  ;;  %s165_s6 = smov 24  }
   0xf   :  { %58 = vrot.lane.b32.xlu1 %v129_v7, %s160_s10  ;;  %s166_s7 = smov 16   ;;  %v136_v15 = vld [vmem:[%s232_s0 + $0x1] ss:$16 sm:%s105_s5]   ;;  %s167_s0 = smov 8  }
  0x12   :  { %65 = vrot.lane.b32.xlu0 %v130_v8, %s161_s20 }
  0x13   :  { %72 = vrot.lane.b32.xlu1 %v131_v9, %s162_s21 }
  0x16   :  { %79 = vrot.lane.b32.xlu0 %v132_v11, %s163_s28 }
  0x17   :  { %86 = vrot.lane.b32.xlu1 %v133_v12, %s164_s29 }
  0x1a   :  { %93 = vrot.lane.b32.xlu0 %v134_v13, %s165_s6 }
  0x1b   :  { %100 = vrot.lane.b32.xlu1 %v135_v14, %s166_s7 }
  0x1e   :  { %107 = vrot.lane.b32.xlu0 %v136_v15, %s167_s0 }
  0x74   :  { %v10_v16 = vpop.permute.xlu0 %9  }
  0x75   :  { %12 = vst.msk [vmem:[#allocation0] ss:$8 sm:$0x3] %vm11_vm1, %v10_v16   ;;  %v24_v17 = vpop.permute.xlu1 %23  }
  0x78   :  { %v17_v18 = vpop.permute.xlu0 %16  }
  0x79   :  { %19 = vst.msk [vmem:[#allocation0] ss:$8 sm:$0x3] %vm18_vm2, %v17_v18   ;;  %v31_v19 = vpop.permute.xlu1 %30  }
  0x7a   :  { %26 = vst.msk [vmem:[#allocation0] ss:$8 sm:$0x3] %vm25_vm3, %v24_v17  }
  0x7b   :  { %33 = vst.msk [vmem:[#allocation0] ss:$8 sm:$0x3] %vm32_vm4, %v31_v19  }
  0x7c   :  { %v38_v20 = vpop.permute.xlu0 %37  }
  0x7d   :  { %40 = vst.msk [vmem:[#allocation0] ss:$8 sm:$0x3] %vm39_vm5, %v38_v20   ;;  %v45_v21 = vpop.permute.xlu1 %44  }
  0x7e   :  { %47 = vst.msk [vmem:[#allocation0] ss:$8 sm:$0x3] %vm46_vm6, %v45_v21  }
  0x80   :  { %v52_v22 = vpop.permute.xlu0 %51  }
  0x81   :  { %54 = vst.msk [vmem:[#allocation0] ss:$8 sm:$0x3] %vm53_vm7, %v52_v22   ;;  %v59_v23 = vpop.permute.xlu1 %58  }
  0x82   :  { %61 = vst.msk [vmem:[#allocation0] ss:$8 sm:$0x3] %vm60_vm8, %v59_v23  }
  0x84   :  { %v66_v24 = vpop.permute.xlu0 %65  }
  0x85   :  { %68 = vst.msk [vmem:[#allocation0] ss:$8 sm:$0x3] %vm67_vm9, %v66_v24   ;;  %v73_v25 = vpop.permute.xlu1 %72  }
  0x86   :  { %75 = vst.msk [vmem:[#allocation0] ss:$8 sm:$0x3] %vm74_vm10, %v73_v25  }
  0x88   :  { %v80_v26 = vpop.permute.xlu0 %79  }
  0x89   :  { %82 = vst.msk [vmem:[#allocation0] ss:$8 sm:$0x3] %vm81_vm11, %v80_v26   ;;  %v87_v27 = vpop.permute.xlu1 %86  }
  0x8a   :  { %89 = vst.msk [vmem:[#allocation0] ss:$8 sm:$0x3] %vm88_vm12, %v87_v27  }
  0x8c   :  { %v94_v28 = vpop.permute.xlu0 %93  }
  0x8d   :  { %96 = vst.msk [vmem:[#allocation0] ss:$8 sm:$0x3] %vm95_vm13, %v94_v28   ;;  %v101_v29 = vpop.permute.xlu1 %100  }
  0x8e   :  { %103 = vst.msk [vmem:[#allocation0] ss:$8 sm:$0x3] %vm102_vm14, %v101_v29  }
  0x90   :  { %v108_v30 = vpop.permute.xlu0 %107  }
  0x91   :  { %110 = vst.msk [vmem:[#allocation0] ss:$8 sm:$0x3] %vm109_vm15, %v108_v30  }
  0x98   :  { %v114_v31 = vld [vmem:[#allocation0] sm:$0x1]  ;;  %v118_v32 = vld [vmem:[#allocation0 + $0x8] sm:$0x1] }
  0x99   :  { %116 = vst [vmem:[%s233_s1] sm:$0x1] %v114_v31  ;;  %137 = vst [vmem:[%s233_s1 + $0x1] sm:$0x1] %v118_v32 }

// kernel: decoder_block.1
= control target key start
LH: loop header
LB: loop body
LE: loop exit
PB: predicated region body
PF: predicated region fallthrough
CT: control target
= control target key end

     0   :  { %s8592_s30 = smov 0   ;;  %s13118_s0 = inlined_call_operand.vmem [shape: f32[2,16,64], index: 0, kind: input, shape index: {}]   ;;  %s13119_s1 = inlined_call_operand.vmem [shape: f32[2,32,128], index: 1, kind: input, shape index: {}]   ;;  %s13120_s2 = inlined_call_operand.vmem [shape: f32[32,16], index: 2, kind: input, shape index: {}]   ;;  %s13121_s3 = inlined_call_operand.vmem [shape: f32[64,128], index: 3, kind: input, shape index: {}]   ;;  %s13122_s4 = inlined_call_operand.vmem [shape: f32[9,128,256], index: 4, kind: input, shape index: {}]   ;;  %s13123_s5 = inlined_call_operand.vmem [shape: f32[9,128,256], index: 5, kind: input, shape index: {}]   ;;  %s13124_s6 = inlined_call_operand.vmem [shape: f32[1,256], index: 6, kind: input, shape index: {}]   ;;  %s13125_s7 = inlined_call_operand.vmem [shape: f32[9,256,256], index: 7, kind: input, shape index: {}]   ;;  %s13126_s8 = inlined_call_operand.vmem [shape: f32[1,256], index: 8, kind: input, shape index: {}]   ;;  %s13127_s9 = inlined_call_operand.vmem [shape: f32[2,32,256], index: 9, kind: output, shape index: {}]  }
   0x1 LB: > { %s5645_s10 = sadd.s32 4294967295, %s8534_s30   ;;  %p5649_p0 = scmp.ge.s32.totalorder %s8534_s30, 1  ;;  %s8534_s30 = sphi %s8592_s30, %s19_s30  }
   0x2   : > { %p297_p1 = scmp.lt.s32.totalorder %s8534_s30, 3 }
   0x4   : > { %p298_p2 = pnand %p5649_p0, %p297_p1 }
   0x5   : > { %v414_v0 = vld [vmem:[%s13121_s3] sm:$0xff] (!%p298_p2)  ;;  %v415_v1 = vld [vmem:[%s13121_s3 + $0x8] sm:$0xff] (!%p298_p2)  ;;  %v416_v2 = vld [vmem:[%s13121_s3 + $0x10] sm:$0xff] (!%p298_p2)  ;;  %p338_p3 = scmp.lt.s32.totalorder (!%p298_p2), %s5645_s10, 1  ;;  %vm422_vm0 = vcmask (!%p298_p2), 523264   ;;  %vm508_vm1 = vcmask (!%p298_p2), 130048   ;;  %v13128_v35 = vlaneseq (!%p298_p2) }
   0x6   : > { %301 = sbr.rel (%p298_p2) target bundleno = 2388 (0x954), region = 56  ;;  %v6736_v3 = vpack.c.bf16 (!%p298_p2), %v415_v1, %v414_v0  ;;  %v417_v4 = vld [vmem:[%s13121_s3 + $0x18] sm:$0xff] (!%p298_p2)  ;;  %v418_v6 = vld [vmem:[%s13121_s3 + $0x20] sm:$0xff] (!%p298_p2)  ;;  %v419_v7 = vld [vmem:[%s13121_s3 + $0x28] sm:$0xff] (!%p298_p2)  ;;  %vm610_vm2 = vcmask (!%p298_p2), 1040384   ;;  %s8536_s18 = smov (!%p298_p2), 4  }
   0x7   : > { %v6740_v5 = vpack.c.bf16 (!%p298_p2), %v417_v4, %v416_v2  ;;  %v6744_v8 = vpack.c.bf16 (!%p298_p2), %v419_v7, %v418_v6  ;;  %v420_v9 = vld [vmem:[%s13121_s3 + $0x30] sm:$0xff] (!%p298_p2)  ;;  %v421_v10 = vld [vmem:[%s13121_s3 + $0x38] sm:$0xff] (!%p298_p2)  ;;  %v504_v14 = vld [vmem:[%s13120_s2] sm:$0xff] (!%p298_p2)  ;;  %vm362_vm3 = vcmask (!%p298_p2), 31744   ;;  %vm369_vm4 = vcmask (!%p298_p2), 64544   ;;  %s8538_s29 = smov (!%p298_p2), 124  }
   0x8   : > { %6737 = vmatprep.subr.bf16.mxu0 (!%p298_p2), %v6736_v3  ;;  %v6748_v12 = vpack.c.bf16 (!%p298_p2), %v421_v10, %v420_v9  ;;  %6730 = vmatprep.mubr.msk.f32.mxu1 (!%p298_p2), %vm508_vm1, %v504_v14  ;;  %v505_v29 = vld [vmem:[%s13120_s2 + $0x8] sm:$0xff] (!%p298_p2)  ;;  %v506_v30 = vld [vmem:[%s13120_s2 + $0x10] sm:$0xff] (!%p298_p2)  ;;  %v507_v31 = vld [vmem:[%s13120_s2 + $0x18] sm:$0xff] (!%p298_p2)  ;;  %vm633_vm5 = vcmask (!%p298_p2), 1047585   ;;  %v8537_v41 = vmov (!%p298_p2), 0.0   ;;  %vm637_vm6 = vcmask (!%p298_p2), 1047584  }
   0x9   : > { %6739 = vmatpush3.bf16.msra.mxu0 (!%p298_p2), %v6736_v3  ;;  %v729_v32 = vld [vmem:[%s13123_s5 + $0x8] sm:$0xff] (!%p298_p2)  ;;  %v731_v33 = vld [vmem:[%s13123_s5 + $0x18] sm:$0xff] (!%p298_p2)  ;;  %v728_v34 = vld [vmem:[%s13123_s5] sm:$0xff] (!%p298_p2)  ;;  %364 = vst.msk [vmem:[#allocation2 + $0x10] sm:$0xff] (!%p298_p2), %vm362_vm3, %v8537_v41  ;;  %vm355_vm7 = vcmp.lt.s32.totalorder (!%p298_p2), %v13128_v35, 136  ;;  %vm635_vm8 = vcmask (!%p298_p2), 31745  }
   0xa   : > { %6741 = vmatprep.subr.bf16.mxu0 (!%p298_p2), %v6740_v5  ;;  %v6756_v37 = vpack.c.bf16 (!%p298_p2), %v731_v33, %v729_v32  ;;  %v730_v38 = vld [vmem:[%s13123_s5 + $0x10] sm:$0xff] (!%p298_p2)  ;;  %v733_v39 = vld [vmem:[%s13123_s5 + $0x28] sm:$0xff] (!%p298_p2)  ;;  %v735_v40 = vld [vmem:[%s13123_s5 + $0x38] sm:$0xff] (!%p298_p2)  ;;  %365 = vst.msk [vmem:[#allocation2 + $0x20] sm:$0xff] (!%p298_p2), %vm362_vm3, %v8537_v41  ;;  %vm1631_vm9 = vcmask (!%p298_p2), 1046528   ;;  %vm2624_vm10 = vcmask (!%p298_p2), 1045504  }
   0xb   : > { %366 = vst.msk [vmem:[#allocation2 + $0x30] sm:$0xff] (!%p298_p2), %vm362_vm3, %v8537_v41  ;;  %382 = vst.msk [vmem:[#allocation3 + $0x10] sm:$0xff] (!%p298_p2), %vm362_vm3, %v8537_v41  ;;  %v6758_v42 = vpack.c.bf16 (!%p298_p2), %v730_v38, %v728_v34  ;;  %v6760_v43 = vpack.c.bf16 (!%p298_p2), %v735_v40, %v733_v39  ;;  %v732_v44 = vld [vmem:[%s13123_s5 + $0x20] sm:$0xff] (!%p298_p2)  ;;  %v734_v45 = vld [vmem:[%s13123_s5 + $0x30] sm:$0xff] (!%p298_p2)  ;;  %vm367_vm11 = vcmask (!%p298_p2), 25600   ;;  %vm374_vm12 = vcmask (!%p298_p2), 58400  }
   0xc   : > { %371 = vst.msk [vmem:[#allocation2 + $0x18] sm:$0xff] (!%p298_p2), %vm369_vm4, %v8537_v41  ;;  %372 = vst.msk [vmem:[#allocation2 + $0x28] sm:$0xff] (!%p298_p2), %vm369_vm4, %v8537_v41  ;;  %v737_v46 = vld [vmem:[%s13123_s5 + $0x48] sm:$0xff] (!%p298_p2)  ;;  %v739_v48 = vld [vmem:[%s13123_s5 + $0x58] sm:$0xff] (!%p298_p2)  ;;  %v6762_v49 = vpack.c.bf16 (!%p298_p2), %v734_v45, %v732_v44  ;;  %vm1003_vm13 = vcmask (!%p298_p2), 1014784   ;;  %vm644_vm14 = vcmask (!%p298_p2), 1040416  }
   0xd   : > { %s13134_s10 = smov (!%p338_p3, %s5645_s10), 1  ;;  %6743 = vmatpush3.bf16.msra.mxu0 %v6740_v5  ;;  %373 = vst.msk [vmem:[#allocation2 + $0x38] sm:$0xff] %vm369_vm4, %v8537_v41  ;;  %387 = vst.msk [vmem:[#allocation3 + $0x18] sm:$0xff] %vm369_vm4, %v8537_v41  ;;  %v6764_v51 = vpack.c.bf16 %v739_v48, %v737_v46  ;;  %v736_v52 = vld [vmem:[%s13123_s5 + $0x40] sm:$0xff]  ;;  %v738_v53 = vld [vmem:[%s13123_s5 + $0x50] sm:$0xff]  ;;  %vm646_vm15 = vcmask 24576  }
   0xe   : > { %s6688_s23 = sshll.u32 %s13134_s10, 4  ;;  %6745 = vmatprep.subr.bf16.mxu0 %v6744_v8  ;;  %s6689_s14 = sshll.u32 %s13134_s10, 5  ;;  %383 = vst.msk [vmem:[#allocation3 + $0x20] sm:$0xff] %vm362_vm3, %v8537_v41  ;;  %384 = vst.msk [vmem:[#allocation3 + $0x30] sm:$0xff] %vm362_vm3, %v8537_v41  ;;  %v741_v54 = vld [vmem:[%s13123_s5 + $0x68] sm:$0xff]  ;;  %v743_v55 = vld [vmem:[%s13123_s5 + $0x78] sm:$0xff]  ;;  %v6766_v56 = vpack.c.bf16 %v738_v53, %v736_v52 }
   0xf   : > { %s342_s26 = scalar_lea.vmem %s13118_s0, %s6688_s23  ;;  %s347_s17 = scalar_lea.vmem %s13119_s1, %s6689_s14  ;;  %388 = vst.msk [vmem:[#allocation3 + $0x28] sm:$0xff] %vm369_vm4, %v8537_v41  ;;  %389 = vst.msk [vmem:[#allocation3 + $0x38] sm:$0xff] %vm369_vm4, %v8537_v41  ;;  %v6768_v58 = vpack.c.bf16 %v743_v55, %v741_v54  ;;  %v740_v59 = vld [vmem:[%s13123_s5 + $0x60] sm:$0xff]  ;;  %v742_v60 = vld [vmem:[%s13123_s5 + $0x70] sm:$0xff] }
  0x10   : > { %v412_v11 = vld [vmem:[%s342_s26] sm:$0xff]  ;;  %v413_v13 = vld [vmem:[%s342_s26 + $0x8] sm:$0xff]  ;;  %v650_v17 = vld [vmem:[%s347_s17 + $0x10] sm:$0xff]  ;;  %376 = vst.msk [vmem:[#allocation3] ss:$8 sm:$0x3] %vm355_vm7, %v8537_v41  ;;  %v6770_v63 = vpack.c.bf16 %v742_v60, %v740_v59 }
  0x11   : > { %6723 = vmatprep.mubr.msk.f32.mxu0 %vm422_vm0, %v412_v11  ;;  %6747 = vmatpush3.bf16.msra.mxu0 %v6744_v8  ;;  %v648_v15 = vld [vmem:[%s347_s17] sm:$0xff]  ;;  %v649_v16 = vld [vmem:[%s347_s17 + $0x8] sm:$0xff]  ;;  %v659_v20 = vrot.slane %v650_v17, 7  ;;  %v8638_v21 = vld [vmem:[%s347_s17 + $0x18] sm:$0xff]  ;;  %381 = vst.msk [vmem:[#allocation3] sm:$0xff] %vm362_vm3, %v8537_v41  ;;  %s8539_s17 = smov 120  }
  0x12   : > { %6749 = vmatprep.subr.bf16.mxu0 %v6748_v12  ;;  %v656_v18 = vrot.slane %v648_v15, 7  ;;  %v657_v19 = vrot.slane %v649_v16, 7  ;;  %v661_v24 = vrot.slane %v8638_v21, 7  ;;  %357 = vst.msk [vmem:[#allocation2] ss:$8 sm:$0x3] %vm355_vm7, %v8537_v41 }
  0x13   : > { %360 = vst.msk [vmem:[#allocation2 + $0x41] ss:$8 sm:$0x3] %vm355_vm7, %v8537_v41  ;;  %379 = vst.msk [vmem:[#allocation3 + $0x41] ss:$8 sm:$0x3] %vm355_vm7, %v8537_v41 }
  0x14   : > { %663 = vrot.lane.b32.xlu0 %v656_v18, %s8536_s18  ;;  %v658_v22 = vsel %vm610_vm2, %v656_v18, %v657_v19  ;;  %v660_v23 = vsel %vm610_vm2, %v657_v19, %v659_v20  ;;  %v662_v25 = vsel %vm610_vm2, %v659_v20, %v661_v24  ;;  %386 = vst.msk [vmem:[#allocation3 + $0x8] sm:$0xff] %vm369_vm4, %v8537_v41  ;;  %370 = vst.msk [vmem:[#allocation2 + $0x8] sm:$0xff] %vm369_vm4, %v8537_v41  ;;  %v745_v61 = vld [vmem:[%s13123_s5 + $0x88] sm:$0xff]  ;;  %v747_v62 = vld [vmem:[%s13123_s5 + $0x98] sm:$0xff]  ;;  %vm405_vm4 = vcmask 130112   ;;  %s8540_s24 = smov 8  }
  0x15   : > { %6751 = vmatpush3.bf16.msra.mxu0 %v6748_v12  ;;  %665 = vrot.lane.b32.xlu1 %v658_v22, %s8536_s18  ;;  %363 = vst.msk [vmem:[#allocation2] sm:$0xff] %vm362_vm3, %v8537_v41  ;;  %v6772_v0 = vpack.c.bf16 %v747_v62, %v745_v61  ;;  %v744_v1 = vld [vmem:[%s13123_s5 + $0x80] sm:$0xff]  ;;  %v746_v2 = vld [vmem:[%s13123_s5 + $0x90] sm:$0xff]  ;;  %v749_v3 = vld [vmem:[%s13123_s5 + $0xa8] sm:$0xff]  ;;  %vm403_vm7 = vcmask 58368   ;;  %s8541_s20 = smov 112  }
  0x16   : > { %v751_v4 = vld [vmem:[%s13123_s5 + $0xb8] sm:$0xff]  ;;  %v6774_v5 = vpack.c.bf16 %v746_v2, %v744_v1  ;;  %v748_v7 = vld [vmem:[%s13123_s5 + $0xa0] sm:$0xff]  ;;  %v750_v8 = vld [vmem:[%s13123_s5 + $0xb0] sm:$0xff]  ;;  %385 = vst.msk [vmem:[#allocation3 + $0x40] sm:$0x3] %vm367_vm11, %v8537_v41  ;;  %s6690_s14 = sshll.u32 %s13134_s10, 6 }
  0x17   : > { %v6776_v6 = vpack.c.bf16 %v751_v4, %v749_v3  ;;  %v753_v9 = vld [vmem:[%s13123_s5 + $0xc8] sm:$0xff]  ;;  %v755_v10 = vld [vmem:[%s13123_s5 + $0xd8] sm:$0xff]  ;;  %v6778_v11 = vpack.c.bf16 %v750_v8, %v748_v7  ;;  %v754_v14 = vld [vmem:[%s13123_s5 + $0xd0] sm:$0xff]  ;;  %390 = vst.msk [vmem:[#allocation3 + $0x48] sm:$0x3] %vm374_vm12, %v8537_v41  ;;  %s352_s19 = scalar_lea.vmem %s13127_s9, %s6690_s14 }
  0x18   : > { %6724 = vmatmul.mubr.msk.f32.vlgmr.msra.gmra.mrb[0].mxu0 %vm422_vm0, %v413_v13  ;;  %v6780_v12 = vpack.c.bf16 %v755_v10, %v753_v9  ;;  %v752_v13 = vld [vmem:[%s13123_s5 + $0xc0] sm:$0xff]  ;;  %v757_v15 = vld [vmem:[%s13123_s5 + $0xe8] sm:$0xff]  ;;  %v759_v16 = vld [vmem:[%s13123_s5 + $0xf8] sm:$0xff]  ;;  %368 = vst.msk [vmem:[#allocation2 + $0x40] sm:$0x3] %vm367_vm11, %v8537_v41  ;;  %vm1328_vm0 = vcmask 982016  }
  0x19   : > { %667 = vrot.lane.b32.xlu1 %v660_v23, %s8536_s18  ;;  %v6782_v17 = vpack.c.bf16 %v754_v14, %v752_v13  ;;  %v6784_v18 = vpack.c.bf16 %v759_v16, %v757_v15  ;;  %v756_v19 = vld [vmem:[%s13123_s5 + $0xe0] sm:$0xff]  ;;  %v758_v20 = vld [vmem:[%s13123_s5 + $0xf0] sm:$0xff]  ;;  %v693_v22 = vld [vmem:[%s13122_s4 + $0x8] sm:$0xff]  ;;  %375 = vst.msk [vmem:[#allocation2 + $0x48] sm:$0x3] %vm374_vm12, %v8537_v41  ;;  %vm4120_vm11 = vcmask 916480  }
  0x1a   : > { %v695_v23 = vld [vmem:[%s13122_s4 + $0x18] sm:$0xff]  ;;  %v696_v34 = vld [vmem:[%s13122_s4 + $0x20] sm:$0xff]  ;;  %v702_v44 = vld [vmem:[%s13122_s4 + $0x50] sm:$0xff]  ;;  %407 = vst.msk [vmem:[#allocation4 + $0x28] sm:$0xff] %vm405_vm4, %v8537_v41  ;;  %vm3655_vm12 = vcmask 1040448  }
  0x1b   : > { %v703_v38 = vld [vmem:[%s13122_s4 + $0x58] sm:$0xff]  ;;  %v705_v45 = vld [vmem:[%s13122_s4 + $0x68] sm:$0xff]  ;;  %v708_v55 = vld [vmem:[%s13122_s4 + $0x80] sm:$0xff]  ;;  %408 = vst.msk [vmem:[#allocation4 + $0x40] sm:$0xff] %vm405_vm4, %v8537_v41 }
  0x1c   : > { %v707_v46 = vld [vmem:[%s13122_s4 + $0x78] sm:$0xff]  ;;  %v712_v61 = vld [vmem:[%s13122_s4 + $0xa0] sm:$0xff]  ;;  %v714_v62 = vld [vmem:[%s13122_s4 + $0xb0] sm:$0xff]  ;;  %409 = vst.msk [vmem:[#allocation4 + $0x58] sm:$0xff] %vm405_vm4, %v8537_v41 }
  0x1d   : > { %669 = vrot.lane.b32.xlu1 %v662_v25, %s8536_s18  ;;  %v6786_v25 = vpack.c.bf16 %v758_v20, %v756_v19  ;;  %v6800_v48 = vpack.c.bf16 %v707_v46, %v705_v45  ;;  %v711_v52 = vld [vmem:[%s13122_s4 + $0x98] sm:$0xff]  ;;  %v716_v3 = vld [vmem:[%s13122_s4 + $0xc0] sm:$0xff]  ;;  %v718_v4 = vld [vmem:[%s13122_s4 + $0xd0] sm:$0xff] }
  0x1e   : > { %v719_v1 = vld [vmem:[%s13122_s4 + $0xd8] sm:$0xff]  ;;  %v721_v7 = vld [vmem:[%s13122_s4 + $0xe8] sm:$0xff]  ;;  %v720_v10 = vld [vmem:[%s13122_s4 + $0xe0] sm:$0xff] }
  0x1f   : > { %v723_v8 = vld [vmem:[%s13122_s4 + $0xf8] sm:$0xff] }
  0x20   : > { %v6816_v9 = vpack.c.bf16 %v723_v8, %v721_v7 }
  0x86   : > { %v664_v47 = vpop.permute.xlu0 %663 }
  0x87   : > { %v666_v36 = vpop.permute.xlu1 %665  ;;  %678 = vst.msk [vmem:[#allocation3] sm:$0xfe] %vm633_vm5, %v664_v47 }
  0x88   : > { %680 = vst.msk [vmem:[#allocation3 + $0x10] sm:$0xff] %vm637_vm6, %v666_v36 }
  0x89   : > { %681 = vst.msk [vmem:[#allocation3 + $0x18] sm:$0xff] %vm362_vm3, %v666_v36  ;;  %v698_v36 = vld [vmem:[%s13122_s4 + $0x30] sm:$0xff] }
  0x8a   : > { %679 = vst.msk [vmem:[#allocation3 + $0x8] sm:$0xfe] %vm635_vm8, %v664_v47  ;;  %v6794_v39 = vpack.c.bf16 %v698_v36, %v696_v34 }
  0x8b   : > { %v668_v50 = vpop.permute.xlu1 %667 }
  0x8c   : > { %682 = vst.msk [vmem:[#allocation3 + $0x20] sm:$0xff] %vm637_vm6, %v668_v50 }
  0x8d   : > { %683 = vst.msk [vmem:[#allocation3 + $0x28] sm:$0xff] %vm362_vm3, %v668_v50  ;;  %v706_v50 = vld [vmem:[%s13122_s4 + $0x70] sm:$0xff] }
  0x8f   : > { %v670_v57 = vpop.permute.xlu1 %669  ;;  %v8838_v40 = vld [vmem:[#allocation3 + $0x10] sm:$0xff] }
  0x90   : > { %684 = vst.msk [vmem:[#allocation3 + $0x30] sm:$0xff] %vm637_vm6, %v670_v57 }
  0x91   : > { %685 = vst.msk [vmem:[#allocation3 + $0x38] sm:$0xff] %vm362_vm3, %v670_v57  ;;  %v713_v57 = vld [vmem:[%s13122_s4 + $0xa8] sm:$0xff] }
  0xeb   : > { %v6725_v26 = vpop.f32.mrb[0].mxu0 }
  0xec   : > { %v495_v27 = vpop.f32.mrb[1].mxu0 }
  0xed   : > { %v6752_v28 = vpack.c.bf16 %v6725_v26, %v495_v27  ;;  %v6788_v26 = vpack.c.bf16 %v695_v23, %v693_v22  ;;  %v692_v27 = vld [vmem:[%s13122_s4] sm:$0xff] }
  0xef   : > { %6753 = vmatprep.subr.bf16.mxu1 %v6752_v28 }
  0xf0   : > { %6755 = vmatpush3.bf16.msra.mxu1 %v6752_v28  ;;  %v694_v28 = vld [vmem:[%s13122_s4 + $0x10] sm:$0xff] }
  0xf1   : > { %6757 = vmatprep.subr.bf16.mxu1 %v6756_v37  ;;  %v6790_v32 = vpack.c.bf16 %v694_v28, %v692_v27  ;;  %v701_v37 = vld [vmem:[%s13122_s4 + $0x48] sm:$0xff]  ;;  %v8930_v28 = vld [vmem:[#allocation3 + $0x28] sm:$0xff] }
  0xf2   : > { %v8928_v27 = vld [vmem:[#allocation3 + $0x18] sm:$0xff]  ;;  %v3111_v36 = vrot.slane %v8930_v28, 2 }
  0xf3   : > { %6731 = vmatmul.mubr.msk.f32.vlgmr.msra.gmra.mrb[0].mxu1 %vm508_vm1, %v505_v29  ;;  %v697_v29 = vld [vmem:[%s13122_s4 + $0x28] sm:$0xff] }
  0xf4   : > { %6733 = vmatprep.mubr.msk.f32.mxu1 %vm508_vm1, %v506_v30  ;;  %6759 = vmatpush1.bf16.msra.mxu1 %v6758_v42  ;;  %v699_v30 = vld [vmem:[%s13122_s4 + $0x38] sm:$0xff]  ;;  %v6796_v42 = vpack.c.bf16 %v703_v38, %v701_v37  ;;  %v3104_v37 = vrot.slane %v8838_v40, 2  ;;  %v3107_v38 = vrot.slane %v8928_v27, 2 }
  0xf5   : > { %6761 = vmatprep.subr.bf16.mxu1 %v6760_v43  ;;  %v6792_v33 = vpack.c.bf16 %v699_v30, %v697_v29  ;;  %v700_v43 = vld [vmem:[%s13122_s4 + $0x40] sm:$0xff]  ;;  %v2148_v30 = vrot.slane %v8930_v28, 1 }
  0xf6   : > { %v6798_v47 = vpack.c.bf16 %v702_v44, %v700_v43  ;;  %v8950_v43 = vld [vmem:[#allocation3 + $0x38] sm:$0xff] }
  0xf7   : > { %6734 = vmatmul.mubr.msk.f32.gmra.mrb[2].mxu1 %vm508_vm1, %v507_v31  ;;  %v8822_v31 = vld [vmem:[#allocation3] sm:$0xff] }
  0xf8   : > { %824 = vmatprep.mubr.f32.mxu1 %v8537_v41  ;;  %6763 = vmatpush1.bf16.msra.mxu1 %v6762_v49  ;;  %v704_v49 = vld [vmem:[%s13122_s4 + $0x60] sm:$0xff] }
  0xf9   : > { %6765 = vmatprep.subr.bf16.mxu1 %v6764_v51  ;;  %v709_v51 = vld [vmem:[%s13122_s4 + $0x88] sm:$0xff]  ;;  %v6802_v53 = vpack.c.bf16 %v706_v50, %v704_v49 }
  0xfa   : > { %v6804_v54 = vpack.c.bf16 %v711_v52, %v709_v51  ;;  %v8970_v52 = vld [vmem:[#allocation3 + $0x10] sm:$0xff] }
  0xfc   : > { %6767 = vmatpush1.bf16.msra.mxu1 %v6766_v56  ;;  %v710_v56 = vld [vmem:[%s13122_s4 + $0x90] sm:$0xff] }
  0xfd   : > { %6769 = vmatprep.subr.bf16.mxu1 %v6768_v58  ;;  %v715_v58 = vld [vmem:[%s13122_s4 + $0xb8] sm:$0xff]  ;;  %v6806_v59 = vpack.c.bf16 %v710_v56, %v708_v55  ;;  %v2773_v55 = vrot.slane %v8970_v52, 2  ;;  %v6054_v52 = vld [vmem:[%s13122_s4 + $0x740] sm:$0xff] }
  0xfe   : > { %v6808_v60 = vpack.c.bf16 %v715_v58, %v713_v57  ;;  %v8975_v57 = vld [vmem:[#allocation3 + $0x30] sm:$0xff] }
 0x100   : > { %6771 = vmatpush1.bf16.msra.mxu1 %v6770_v63  ;;  %v6810_v63 = vpack.c.bf16 %v714_v62, %v712_v61  ;;  %v5663_v61 = vld [vmem:[%s13122_s4 + $0x108] sm:$0xff]  ;;  %v5665_v62 = vld [vmem:[%s13122_s4 + $0x118] sm:$0xff] }
 0x101   : > { %6773 = vmatprep.subr.bf16.mxu1 %v6772_v0  ;;  %v717_v0 = vld [vmem:[%s13122_s4 + $0xc8] sm:$0xff] }
 0x102   : > { %v6812_v2 = vpack.c.bf16 %v719_v1, %v717_v0  ;;  %v5662_v1 = vld [vmem:[%s13122_s4 + $0x100] sm:$0xff] }
 0x104   : > { %6775 = vmatpush1.bf16.msra.mxu1 %v6774_v5  ;;  %v8896_v5 = vld [vmem:[#allocation3 + $0x20] sm:$0xff] }
 0x105   : > { %6777 = vmatprep.subr.bf16.mxu1 %v6776_v6  ;;  %v6814_v6 = vpack.c.bf16 %v718_v4, %v716_v3  ;;  %v2146_v29 = vrot.slane %v8896_v5, 1  ;;  %v3109_v34 = vrot.slane %v8896_v5, 2  ;;  %v5667_v4 = vld [vmem:[%s13122_s4 + $0x128] sm:$0xff] }
 0x107   : > { %v3110_v45 = vsel %vm2624_vm10, %v3104_v37, %v3109_v34 }
 0x108   : > { %6779 = vmatpush1.bf16.msra.mxu1 %v6778_v11  ;;  %v722_v11 = vld [vmem:[%s13122_s4 + $0xf0] sm:$0xff] }
 0x109   : > { %6781 = vmatprep.subr.bf16.mxu1 %v6780_v12  ;;  %v8912_v12 = vld [vmem:[#allocation3 + $0x30] sm:$0xff]  ;;  %v6818_v13 = vpack.c.bf16 %v722_v11, %v720_v10  ;;  %v5668_v11 = vld [vmem:[%s13122_s4 + $0x130] sm:$0xff] }
 0x10a   : > { %v3113_v46 = vrot.slane %v8912_v12, 2  ;;  %v5666_v10 = vld [vmem:[%s13122_s4 + $0x120] sm:$0xff] }
 0x10c   : > { %6783 = vmatpush1.bf16.msra.mxu1 %v6782_v17  ;;  %v3114_v50 = vsel %vm2624_vm10, %v3109_v34, %v3113_v46  ;;  %v5670_v34 = vld [vmem:[%s13122_s4 + $0x140] sm:$0xff] }
 0x10d   : > { %6785 = vmatprep.subr.bf16.mxu1 %v6784_v18 }
 0x110   : > { %6787 = vmatpush1.bf16.msra.mxu1 %v6786_v25 }
 0x111   : > { %6789 = vmatprep.subr.bf16.mxu1 %v6788_v26 }
 0x113   : > { %825 = vmatmul.mubr.f32.vlgmr.msra.gmra.mrb[4].mxu1 %v8822_v31 }
 0x114   : > { %6791 = vmatpush1.bf16.msra.mxu1 %v6790_v32  ;;  %830 = vmatprep.mubr.f32.mxu1 %v8537_v41  ;;  %v2141_v32 = vrot.slane %v8838_v40, 1 }
 0x115   : > { %6793 = vmatprep.subr.bf16.mxu1 %v6792_v33  ;;  %v2144_v33 = vrot.slane %v8928_v27, 1 }
 0x117   : > { %831 = vmatmul.mubr.f32.gmra.mrb[6].mxu1 %v8838_v40 }
 0x118   : > { %6795 = vmatpush1.bf16.msra.mxu1 %v6794_v39  ;;  %836 = vmatprep.mubr.f32.mxu1 %v8537_v41  ;;  %v2147_v39 = vsel %vm1631_vm9, %v2141_v32, %v2146_v29 }
 0x119   : > { %6797 = vmatprep.subr.bf16.mxu1 %v6796_v42  ;;  %v2149_v42 = vsel %vm1631_vm9, %v2144_v33, %v2148_v30 }
 0x11a   : > { %v8952_v44 = vpack.i.bf16 %v2149_v42, %v2147_v39 }
 0x11b   : > { %837 = vmatmul.mubr.f32.gmra.mrb[8].mxu1 %v8896_v5 }
 0x11c   : > { %6799 = vmatpush1.bf16.msra.mxu1 %v6798_v47  ;;  %842 = vmatprep.mubr.f32.mxu1 %v8537_v41  ;;  %v3115_v47 = vrot.slane %v8950_v43, 2 }
 0x11d   : > { %6801 = vmatprep.subr.bf16.mxu1 %v6800_v48  ;;  %v3112_v48 = vsel %vm2624_vm10, %v3107_v38, %v3111_v36 }
 0x11e   : > { %v8962_v49 = vpack.i.bf16 %v3112_v48, %v3110_v45  ;;  %v3116_v51 = vsel %vm2624_vm10, %v3111_v36, %v3115_v47  ;;  %v5672_v36 = vld [vmem:[%s13122_s4 + $0x150] sm:$0xff]  ;;  %v5675_v45 = vld [vmem:[%s13122_s4 + $0x168] sm:$0xff] }
 0x11f   : > { %843 = vmatmul.mubr.f32.gmra.mrb[10].mxu1 %v8912_v12 }
 0x120   : > { %6803 = vmatpush1.bf16.msra.mxu1 %v6802_v53  ;;  %913 = vmatprep.mubr.f32.mxu1 %v8537_v41  ;;  %v1744_v53 = vld [vmem:[#allocation3 + $0x20] sm:$0xff] }
 0x121   : > { %6805 = vmatprep.subr.bf16.mxu1 %v6804_v54  ;;  %v8972_v54 = vpack.i.bf16 %v3116_v51, %v3114_v50  ;;  %v2775_v56 = vrot.slane %v1744_v53, 2 }
 0x123   : > { %v8980_v58 = vsel %vm2624_vm10, %v2773_v55, %v2775_v56 }
 0x124   : > { %6807 = vmatpush1.bf16.msra.mxu1 %v6806_v59  ;;  %v13130_v59 = vrot.slane %v8975_v57, 2 }
 0x125   : > { %6809 = vmatprep.subr.bf16.mxu1 %v6808_v60 }
 0x126   : > { %v8986_v60 = vsel %vm2624_vm10, %v2775_v56, %v13130_v59 }
 0x128   : > { %6811 = vmatpush1.bf16.msra.mxu1 %v6810_v63  ;;  %v6820_v63 = vpack.c.bf16 %v5665_v62, %v5663_v61  ;;  %v5677_v61 = vld [vmem:[%s13122_s4 + $0x178] sm:$0xff] }
 0x129   : > { %6813 = vmatprep.subr.bf16.mxu1 %v6812_v2  ;;  %v5664_v2 = vld [vmem:[%s13122_s4 + $0x110] sm:$0xff] }
 0x12a   : > { %v6822_v8 = vpack.c.bf16 %v5664_v2, %v5662_v1 }
 0x12c   : > { %6815 = vmatpush1.bf16.msra.mxu1 %v6814_v6  ;;  %v5669_v6 = vld [vmem:[%s13122_s4 + $0x138] sm:$0xff] }
 0x12d   : > { %6817 = vmatprep.subr.bf16.mxu1 %v6816_v9  ;;  %v6824_v9 = vpack.c.bf16 %v5669_v6, %v5667_v4  ;;  %v5676_v4 = vld [vmem:[%s13122_s4 + $0x170] sm:$0xff] }
 0x130   : > { %6819 = vmatpush1.bf16.msra.mxu1 %v6818_v13  ;;  %v5671_v13 = vld [vmem:[%s13122_s4 + $0x148] sm:$0xff] }
 0x131   : > { %6821 = vmatprep.subr.bf16.mxu1 %v6820_v63 }
 0x1c6   : > { %v6732_v14 = vpop.f32.mrb[0].mxu1 }
 0x1c7   : > { %v612_v15 = vrot.slane %v6732_v14, 7  ;;  %v587_v16 = vpop.f32.mrb[1].mxu1 }
 0x1c8   : > { %v611_v17 = vrot.slane %v587_v16, 7 }
 0x1ca   : > { %618 = vrot.lane.b32.xlu0 %v611_v17, %s8536_s18  ;;  %v8917_v18 = vpop.f32.mrb[2].mxu1  ;;  %v613_v19 = vsel %vm610_vm2, %v611_v17, %v612_v15  ;;  %v5673_v17 = vld [vmem:[%s13122_s4 + $0x158] sm:$0xff] }
 0x1cb   : > { %v616_v20 = vrot.slane %v8917_v18, 7  ;;  %v597_v22 = vpop.f32.mrb[3].mxu1 }
 0x1cc   : > { %v614_v23 = vrot.slane %v597_v22, 7 }
 0x1ce   : > { %620 = vrot.lane.b32.xlu0 %v613_v19, %s8536_s18  ;;  %v617_v25 = vsel %vm610_vm2, %v614_v23, %v616_v20  ;;  %v615_v26 = vsel %vm610_vm2, %v612_v15, %v614_v23  ;;  %v6826_v23 = vpack.c.bf16 %v5668_v11, %v5666_v10  ;;  %v6832_v11 = vpack.c.bf16 %v5677_v61, %v5675_v45 }
 0x1cf   : > { %624 = vrot.lane.b32.xlu1 %v617_v25, %s8536_s18 }
 0x1d2   : > { %622 = vrot.lane.b32.xlu0 %v615_v26, %s8536_s18  ;;  %v6828_v26 = vpack.c.bf16 %v5673_v17, %v5671_v13  ;;  %v1110_v17 = vld [vmem:[#allocation3 + $0x8] sm:$0xff] }
 0x23c   : > { %v619_v0 = vpop.permute.xlu0 %618 }
 0x23d   : > { %634 = vst.msk [vmem:[#allocation2] sm:$0xfe] %vm633_vm5, %v619_v0  ;;  %vm3643_vm5 = vcmask 64513  }
 0x23e   : > { %636 = vst.msk [vmem:[#allocation2 + $0x8] sm:$0xfe] %vm635_vm8, %v619_v0  ;;  %v6830_v0 = vpack.c.bf16 %v5672_v36, %v5670_v34  ;;  %v5678_v34 = vld [vmem:[%s13122_s4 + $0x180] sm:$0xff]  ;;  %v5680_v36 = vld [vmem:[%s13122_s4 + $0x190] sm:$0xff]  ;;  %vm410_vm8 = vcmask 123968  }
 0x240   : > { %v621_v3 = vpop.permute.xlu0 %620 }
 0x241   : > { %638 = vst.msk [vmem:[#allocation2 + $0x10] sm:$0xff] %vm637_vm6, %v621_v3  ;;  %v625_v7 = vpop.permute.xlu1 %624 }
 0x242   : > { %639 = vst.msk [vmem:[#allocation2 + $0x18] sm:$0xff] %vm362_vm3, %v621_v3  ;;  %643 = vst.msk [vmem:[#allocation2 + $0x38] sm:$0xff] %vm362_vm3, %v625_v7  ;;  %v5674_v3 = vld [vmem:[%s13122_s4 + $0x160] sm:$0xff] }
 0x243   : > { %642 = vst.msk [vmem:[#allocation2 + $0x30] sm:$0xff] %vm637_vm6, %v625_v7 }
 0x244   : > { %v623_v14 = vpop.permute.xlu0 %622  ;;  %v688_v15 = vld [vmem:[#allocation2] sm:$0xff] }
 0x245   : > { %v939_v16 = vld [vmem:[#allocation2 + $0x8] sm:$0xff]  ;;  %640 = vst.msk [vmem:[#allocation2 + $0x20] sm:$0xff] %vm637_vm6, %v623_v14  ;;  %914 = vmatmul.mubr.f32.vlgmr.msra.gmra.mrb[4].mxu1 %v688_v15  ;;  %v2882_v22 = vld [vmem:[#allocation2] sm:$0xfc]  ;;  %vm3645_vm6 = vcmask 1047616  }
 0x246   : > { %641 = vst.msk [vmem:[#allocation2 + $0x28] sm:$0xff] %vm362_vm3, %v623_v14  ;;  %v9026_v19 = vpack.i.bf16 %v939_v16, %v688_v15  ;;  %919 = vmatprep.mubr.f32.mxu1 %v8537_v41  ;;  %6823 = vmatpush1.bf16.msra.mxu1 %v6822_v8  ;;  %v2883_v25 = vld [vmem:[#allocation2 + $0x8] sm:$0xfc]  ;;  %v2923_v53 = vrot.slane %v2882_v22, 2  ;;  %v5681_v16 = vld [vmem:[%s13122_s4 + $0x198] sm:$0xff]  ;;  %vm398_vm3 = vcmask 64512  }
 0x247   : > { %6825 = vmatprep.subr.bf16.mxu1 %v6824_v9  ;;  %v2926_v62 = vrot.slane %v2883_v25, 2  ;;  %v5679_v15 = vld [vmem:[%s13122_s4 + $0x188] sm:$0xff]  ;;  %v6834_v25 = vpack.c.bf16 %v5676_v4, %v5674_v3  ;;  %400 = vst.msk [vmem:[#allocation4 + $0x18] sm:$0xff] %vm398_vm3, %v8537_v41  ;;  %401 = vst.msk [vmem:[#allocation4 + $0x30] sm:$0xff] %vm398_vm3, %v8537_v41 }
 0x248   : > { %8123 = vrot.lane.b32.xlu0 %v9026_v19, %s8538_s29  ;;  %v9037_v39 = vld [vmem:[#allocation2 + $0x10] sm:$0xff]  ;;  %v6836_v61 = vpack.c.bf16 %v5681_v16, %v5679_v15  ;;  %402 = vst.msk [vmem:[#allocation4 + $0x48] sm:$0xff] %vm398_vm3, %v8537_v41 }
 0x249   : > { %v9039_v42 = vld [vmem:[#allocation2 + $0x18] sm:$0xff]  ;;  %920 = vmatmul.mubr.f32.gmra.mrb[6].mxu1 %v9037_v39  ;;  %v2924_v56 = vrot.slane %v9037_v39, 2  ;;  %v9125_v4 = vld [vmem:[#allocation2 + $0x10] sm:$0xff] }
 0x24a   : > { %v9047_v48 = vpack.i.bf16 %v9039_v42, %v9037_v39  ;;  %v9049_v50 = vld [vmem:[#allocation2 + $0x30] sm:$0xff]  ;;  %v9051_v51 = vld [vmem:[#allocation2 + $0x38] sm:$0xff]  ;;  %925 = vmatprep.mubr.f32.mxu1 %v8537_v41  ;;  %v2927_v63 = vrot.slane %v9039_v42, 2  ;;  %6827 = vmatpush1.bf16.msra.mxu1 %v6826_v23 }
 0x24b   : > { %v9063_v1 = vpack.i.bf16 %v9051_v51, %v9049_v50  ;;  %v2925_v2 = vsel %vm2624_vm10, %v2923_v53, %v2924_v56  ;;  %6829 = vmatprep.subr.bf16.mxu1 %v6828_v26  ;;  %v2933_v9 = vrot.slane %v9049_v50, 2  ;;  %v2935_v10 = vrot.slane %v9051_v51, 2  ;;  %v9127_v35 = vld [vmem:[#allocation2 + $0x30] sm:$0xff] }
 0x24c   : > { %8128 = vrot.lane.b32.xlu1 %v9047_v48, %s8538_s29  ;;  %v9072_v6 = vld [vmem:[#allocation2 + $0x20] sm:$0xff]  ;;  %v2928_v8 = vsel %vm2624_vm10, %v2926_v62, %v2927_v63  ;;  %v9101_v26 = vpack.i.bf16 %v8928_v27, %v8838_v40  ;;  %v5683_v62 = vld [vmem:[%s13122_s4 + $0x1a8] sm:$0xff]  ;;  %v5696_v27 = vld [vmem:[%s13123_s5 + $0x110] sm:$0xff] }
 0x24d   : > { %v9074_v7 = vld [vmem:[#allocation2 + $0x28] sm:$0xff]  ;;  %926 = vmatmul.mubr.f32.gmra.mrb[8].mxu1 %v9072_v6  ;;  %v9084_v14 = vpack.i.bf16 %v2928_v8, %v2925_v2  ;;  %v2929_v22 = vrot.slane %v9072_v6, 2  ;;  %v8142_v2 = vpack.i.bf16 %v1110_v17, %v8822_v31  ;;  %v1590_v8 = vld [vmem:[#allocation2 + $0x20] sm:$0xff]  ;;  %v8157_v31 = vpack.i.bf16 %v8950_v43, %v8912_v12 }
 0x24e   : > { %v9082_v13 = vpack.i.bf16 %v9074_v7, %v9072_v6  ;;  %931 = vmatprep.mubr.f32.mxu1 %v8537_v41  ;;  %v2931_v23 = vrot.slane %v9074_v7, 2  ;;  %6831 = vmatpush1.bf16.msra.mxu1 %v6830_v0  ;;  %v5685_v0 = vld [vmem:[%s13122_s4 + $0x1b8] sm:$0xff]  ;;  %v8152_v17 = vpack.i.bf16 %v8930_v28, %v8896_v5  ;;  %v3062_v5 = vld [vmem:[#allocation3] sm:$0xfc]  ;;  %v5694_v40 = vld [vmem:[%s13123_s5 + $0x100] sm:$0xff] }
 0x24f   : > { %v2934_v45 = vsel %vm2624_vm10, %v2929_v22, %v2933_v9  ;;  %6833 = vmatprep.subr.bf16.mxu1 %v6832_v11  ;;  %v6838_v11 = vpack.c.bf16 %v5680_v36, %v5678_v34  ;;  %v2930_v15 = vsel %vm2624_vm10, %v2924_v56, %v2929_v22  ;;  %v5684_v56 = vld [vmem:[%s13122_s4 + $0x1b0] sm:$0xff]  ;;  %v6840_v22 = vpack.c.bf16 %v5685_v0, %v5683_v62  ;;  %v5686_v0 = vld [vmem:[%s13122_s4 + $0x1c0] sm:$0xff] }
 0x250   : > { %8138 = vrot.lane.b32.xlu1 %v9063_v1, %s8538_s29  ;;  %8133 = vrot.lane.b32.xlu0 %v9082_v13, %s8538_s29  ;;  %v2936_v53 = vsel %vm2624_vm10, %v2931_v23, %v2935_v10  ;;  %v2932_v16 = vsel %vm2624_vm10, %v2927_v63, %v2931_v23  ;;  %v2626_v23 = vrot.slane %v9125_v4, 2  ;;  %v2628_v34 = vrot.slane %v1590_v8, 2  ;;  %v5688_v8 = vld [vmem:[%s13122_s4 + $0x1d0] sm:$0xff]  ;;  %v6022_v4 = vld [vmem:[%s13123_s5 + $0x640] sm:$0xff] }
 0x251   : > { %932 = vmatmul.mubr.f32.gmra.mrb[10].mxu1 %v9049_v50  ;;  %v9123_v3 = vpack.i.bf16 %v2936_v53, %v2934_v45  ;;  %v9145_v63 = vpack.i.bf16 %v2932_v16, %v2930_v15  ;;  %v2630_v36 = vrot.slane %v9127_v35, 2  ;;  %v5687_v45 = vld [vmem:[%s13122_s4 + $0x1c8] sm:$0xff]  ;;  %v5689_v53 = vld [vmem:[%s13122_s4 + $0x1d8] sm:$0xff]  ;;  %v6034_v35 = vld [vmem:[%s13123_s5 + $0x6a0] sm:$0xff] }
 0x252   : > { %6835 = vmatpush1.bf16.msra.mxu1 %v6834_v25  ;;  %1076 = vmatprep.mubr.f32.mxu1 %v8537_v41  ;;  %v5682_v25 = vld [vmem:[%s13122_s4 + $0x1a0] sm:$0xff]  ;;  %v5691_v15 = vld [vmem:[%s13122_s4 + $0x1e8] sm:$0xff]  ;;  %v5693_v16 = vld [vmem:[%s13122_s4 + $0x1f8] sm:$0xff] }
 0x253   : > { %6837 = vmatprep.subr.bf16.mxu1 %v6836_v61  ;;  %v6842_v59 = vpack.c.bf16 %v5684_v56, %v5682_v25  ;;  %v9158_v61 = vsel %vm2624_vm10, %v2626_v23, %v2628_v34  ;;  %v9163_v62 = vsel %vm2624_vm10, %v2628_v34, %v2630_v36  ;;  %v6846_v25 = vpack.c.bf16 %v5688_v8, %v5686_v0  ;;  %v5690_v56 = vld [vmem:[%s13122_s4 + $0x1e0] sm:$0xff]  ;;  %v1896_v0 = vld [vmem:[#allocation2 + $0x8] sm:$0xfe] }
 0x254   : > { %8148 = vrot.lane.b32.xlu1 %v9101_v26, %s8538_s29  ;;  %8143 = vrot.lane.b32.xlu0 %v8142_v2, %s8538_s29  ;;  %v6848_v34 = vpack.c.bf16 %v5693_v16, %v5691_v15  ;;  %v1949_v8 = vrot.slane %v9037_v39, 1  ;;  %v1956_v15 = vrot.slane %v9074_v7, 1  ;;  %v1951_v16 = vrot.slane %v1896_v0, 1  ;;  %v2087_v7 = vld [vmem:[#allocation3] sm:$0xfe] }
 0x255   : > { %v3103_v0 = vrot.slane %v3062_v5, 2 }
 0x256   : > { %6839 = vmatpush1.bf16.msra.mxu1 %v6838_v11  ;;  %v6844_v11 = vpack.c.bf16 %v5689_v53, %v5687_v45  ;;  %v1895_v53 = vld [vmem:[#allocation2] sm:$0xfe] }
 0x257   : > { %6841 = vmatprep.subr.bf16.mxu1 %v6840_v22  ;;  %v5692_v22 = vld [vmem:[%s13122_s4 + $0x1f0] sm:$0xff]  ;;  %v3105_v28 = vsel %vm2624_vm10, %v3103_v0, %v3104_v37  ;;  %v5699_v37 = vld [vmem:[%s13123_s5 + $0x128] sm:$0xff] }
 0x258   : > { %8158 = vrot.lane.b32.xlu1 %v8157_v31, %s8538_s29  ;;  %8153 = vrot.lane.b32.xlu0 %v8152_v17, %s8538_s29 }
 0x25a   : > { %6843 = vmatpush1.bf16.msra.mxu1 %v6842_v59  ;;  %v5695_v59 = vld [vmem:[%s13123_s5 + $0x108] sm:$0xff] }
 0x25b   : > { %6845 = vmatprep.subr.bf16.mxu1 %v6844_v11  ;;  %v1952_v11 = vrot.slane %v9039_v42, 1 }
 0x25c   : > { %8168 = vrot.lane.b32.xlu1 %v9047_v48, %s8539_s17  ;;  %8163 = vrot.lane.b32.xlu0 %v9026_v19, %s8539_s17  ;;  %v5697_v48 = vld [vmem:[%s13123_s5 + $0x118] sm:$0xff]  ;;  %v6850_v19 = vpack.c.bf16 %v5692_v22, %v5690_v56 }
 0x25d   : > { %v6852_v45 = vpack.c.bf16 %v5697_v48, %v5695_v59  ;;  %v1957_v39 = vsel %vm1631_vm9, %v1952_v11, %v1956_v15  ;;  %v2140_v59 = vrot.slane %v2087_v7, 1  ;;  %v2150_v48 = vrot.slane %v8912_v12, 1  ;;  %v5787_v12 = vld [vmem:[%s13123_s5 + $0x2e8] sm:$0xff] }
 0x25e   : > { %6847 = vmatpush1.bf16.msra.mxu1 %v6846_v25 }
 0x25f   : > { %6849 = vmatprep.subr.bf16.mxu1 %v6848_v34  ;;  %v2142_v18 = vsel %vm1631_vm9, %v2140_v59, %v2141_v32 }
 0x260   : > { %8178 = vrot.lane.b32.xlu1 %v9063_v1, %s8539_s17  ;;  %8173 = vrot.lane.b32.xlu0 %v9082_v13, %s8539_s17  ;;  %v1954_v1 = vrot.slane %v9072_v6, 1  ;;  %v1948_v13 = vrot.slane %v1895_v53, 1  ;;  %v1953_v6 = vsel %vm1631_vm9, %v1951_v16, %v1952_v11  ;;  %v2151_v53 = vsel %vm1631_vm9, %v2146_v29, %v2150_v48  ;;  %v3063_v29 = vld [vmem:[#allocation3 + $0x8] sm:$0xfc]  ;;  %v5700_v16 = vld [vmem:[%s13123_s5 + $0x130] sm:$0xff] }
 0x262   : > { %6851 = vmatpush1.bf16.msra.mxu1 %v6850_v19  ;;  %v1955_v25 = vsel %vm1631_vm9, %v1949_v8, %v1954_v1  ;;  %v1950_v42 = vsel %vm1631_vm9, %v1948_v13, %v1949_v8  ;;  %v2152_v19 = vrot.slane %v8950_v43, 1  ;;  %v3106_v8 = vrot.slane %v3063_v29, 2  ;;  %v5698_v13 = vld [vmem:[%s13123_s5 + $0x120] sm:$0xff]  ;;  %v5789_v43 = vld [vmem:[%s13123_s5 + $0x2f8] sm:$0xff] }
 0x263   : > { %6853 = vmatprep.subr.bf16.mxu1 %v6852_v45  ;;  %v8202_v56 = vpack.i.bf16 %v1953_v6, %v1950_v42  ;;  %v5705_v42 = vld [vmem:[%s13123_s5 + $0x158] sm:$0xff] }
 0x264   : > { %8188 = vrot.lane.b32.xlu1 %v9101_v26, %s8539_s17  ;;  %8183 = vrot.lane.b32.xlu0 %v8142_v2, %s8539_s17  ;;  %v1958_v26 = vrot.slane %v9049_v50, 1  ;;  %v1960_v2 = vrot.slane %v9051_v51, 1  ;;  %v2153_v32 = vsel %vm1631_vm9, %v2148_v30, %v2152_v19  ;;  %v3108_v30 = vsel %vm2624_vm10, %v3106_v8, %v3107_v38  ;;  %v5701_v38 = vld [vmem:[%s13123_s5 + $0x138] sm:$0xff]  ;;  %v5706_v8 = vld [vmem:[%s13123_s5 + $0x160] sm:$0xff] }
 0x265   : > { %v8302_v11 = vpack.i.bf16 %v3108_v30, %v3105_v28  ;;  %v5708_v28 = vld [vmem:[%s13123_s5 + $0x170] sm:$0xff]  ;;  %v5779_v51 = vld [vmem:[%s13123_s5 + $0x2a8] sm:$0xff] }
 0x266   : > { %v1959_v22 = vsel %vm1631_vm9, %v1954_v1, %v1958_v26  ;;  %v1961_v34 = vsel %vm1631_vm9, %v1956_v15, %v1960_v2  ;;  %v6854_v1 = vpack.c.bf16 %v5696_v27, %v5694_v40  ;;  %v6856_v15 = vpack.c.bf16 %v5701_v38, %v5699_v37  ;;  %v5713_v40 = vld [vmem:[%s13123_s5 + $0x198] sm:$0xff] }
 0x267   : > { %v6866_v38 = vpack.c.bf16 %v5708_v28, %v5706_v8  ;;  %v5727_v8 = vld [vmem:[%s13122_s4 + $0x208] sm:$0xff]  ;;  %v5729_v28 = vld [vmem:[%s13122_s4 + $0x218] sm:$0xff] }
 0x268   : > { %8198 = vrot.lane.b32.xlu1 %v8157_v31, %s8539_s17  ;;  %8193 = vrot.lane.b32.xlu0 %v8152_v17, %s8539_s17  ;;  %v2088_v31 = vld [vmem:[#allocation3 + $0x8] sm:$0xfe]  ;;  %v9224_v17 = vpack.i.bf16 %v1957_v39, %v1955_v25  ;;  %v5703_v39 = vld [vmem:[%s13123_s5 + $0x148] sm:$0xff] }
 0x269   : > { %v2143_v21 = vrot.slane %v2088_v31, 1  ;;  %v6860_v59 = vpack.c.bf16 %v5705_v42, %v5703_v39 }
 0x26c   : > { %671 = vrot.lane.b32.xlu1 %v661_v24, %s8536_s18  ;;  %626 = vrot.lane.b32.xlu0 %v616_v20, %s8536_s18  ;;  %v8212_v24 = vpack.i.bf16 %v1961_v34, %v1959_v22  ;;  %v2145_v20 = vsel %vm1631_vm9, %v2143_v21, %v2144_v33  ;;  %v8232_v33 = vpack.i.bf16 %v2153_v32, %v2151_v53  ;;  %v5702_v22 = vld [vmem:[%s13123_s5 + $0x140] sm:$0xff]  ;;  %v5704_v34 = vld [vmem:[%s13123_s5 + $0x150] sm:$0xff] }
 0x26d   : > { %v8222_v45 = vpack.i.bf16 %v2145_v20, %v2142_v18  ;;  %v5709_v18 = vld [vmem:[%s13123_s5 + $0x178] sm:$0xff]  ;;  %v6862_v53 = vpack.c.bf16 %v5704_v34, %v5702_v22 }
 0x270   : > { %8208 = vrot.lane.b32.xlu1 %v9224_v17, %s8538_s29  ;;  %8203 = vrot.lane.b32.xlu0 %v8202_v56, %s8538_s29 }
 0x274   : > { %8213 = vrot.lane.b32.xlu0 %v8212_v24, %s8538_s29 }
 0x278   : > { %8223 = vrot.lane.b32.xlu0 %v8222_v45, %s8538_s29 }
 0x27c   : > { %8233 = vrot.lane.b32.xlu0 %v8232_v33, %s8538_s29 }
 0x280   : > { %8243 = vrot.lane.b32.xlu0 %v8202_v56, %s8539_s17  ;;  %v6858_v56 = vpack.c.bf16 %v5700_v16, %v5698_v13  ;;  %v5717_v13 = vld [vmem:[%s13123_s5 + $0x1b8] sm:$0xff] }
 0x284   : > { %8253 = vrot.lane.b32.xlu0 %v8212_v24, %s8539_s17  ;;  %v5707_v24 = vld [vmem:[%s13123_s5 + $0x168] sm:$0xff] }
 0x285   : > { %v6864_v0 = vpack.c.bf16 %v5709_v18, %v5707_v24  ;;  %v5718_v24 = vld [vmem:[%s13123_s5 + $0x1c0] sm:$0xff]  ;;  %v5720_v18 = vld [vmem:[%s13123_s5 + $0x1d0] sm:$0xff] }
 0x288   : > { %8263 = vrot.lane.b32.xlu0 %v8222_v45, %s8539_s17 }
 0x28c   : > { %8273 = vrot.lane.b32.xlu0 %v8232_v33, %s8539_s17 }
 0x290   : > { %8283 = vrot.lane.b32.xlu0 %v9084_v14, %s8538_s29 }
 0x294   : > { %8293 = vrot.lane.b32.xlu0 %v9123_v3, %s8538_s29 }
 0x298   : > { %8303 = vrot.lane.b32.xlu0 %v8302_v11, %s8538_s29 }
 0x29c   : > { %8313 = vrot.lane.b32.xlu0 %v8972_v54, %s8538_s29 }
 0x2a0   : > { %8323 = vrot.lane.b32.xlu0 %v9084_v14, %s8539_s17 }
 0x2a4   : > { %8333 = vrot.lane.b32.xlu0 %v9123_v3, %s8539_s17 }
 0x2a8   : > { %8343 = vrot.lane.b32.xlu0 %v8302_v11, %s8539_s17  ;;  %v5711_v11 = vld [vmem:[%s13123_s5 + $0x188] sm:$0xff] }
 0x2ac   : > { %8353 = vrot.lane.b32.xlu0 %v8972_v54, %s8539_s17 }
 0x2ba   : > { %v8124_v14 = vpop.permute.xlu0 %8123 }
 0x2bb   : > { %v8126_v3 = vunpack.i.h.bf16 %v8124_v14  ;;  %v8125_v54 = vunpack.i.l.bf16 %v8124_v14 }
 0x2bd   : > { %v1004_v25 = vsel %vm1003_vm13, %v8125_v54, %v8126_v3  ;;  %v6868_v3 = vpack.c.bf16 %v5713_v40, %v5711_v11  ;;  %v5710_v54 = vld [vmem:[%s13123_s5 + $0x180] sm:$0xff] }
 0x2be   : > { %v8129_v6 = vpop.permute.xlu1 %8128  ;;  %1077 = vmatmul.mubr.f32.vlgmr.msra.gmra.mrb[4].mxu1 %v1004_v25 }
 0x2bf   : > { %v8131_v7 = vunpack.i.h.bf16 %v8129_v6  ;;  %v8130_v31 = vunpack.i.l.bf16 %v8129_v6  ;;  %6855 = vmatpush1.bf16.msra.mxu1 %v6854_v1  ;;  %1082 = vmatprep.mubr.f32.mxu1 %v8537_v41  ;;  %v5712_v1 = vld [vmem:[%s13123_s5 + $0x190] sm:$0xff]  ;;  %v5714_v6 = vld [vmem:[%s13123_s5 + $0x1a0] sm:$0xff] }
 0x2c0   : > { %6857 = vmatprep.subr.bf16.mxu1 %v6856_v15  ;;  %v5715_v15 = vld [vmem:[%s13123_s5 + $0x1a8] sm:$0xff]  ;;  %v6870_v39 = vpack.c.bf16 %v5712_v1, %v5710_v54 }
 0x2c1   : > { %v1005_v21 = vsel %vm1003_vm13, %v8130_v31, %v8131_v7  ;;  %v6872_v42 = vpack.c.bf16 %v5717_v13, %v5715_v15  ;;  %v5716_v7 = vld [vmem:[%s13123_s5 + $0x1b0] sm:$0xff]  ;;  %v5719_v31 = vld [vmem:[%s13123_s5 + $0x1c8] sm:$0xff]  ;;  %v5733_v13 = vld [vmem:[%s13122_s4 + $0x238] sm:$0xff] }
 0x2c2   : > { %v8139_v20 = vpop.permute.xlu1 %8138  ;;  %v8134_v45 = vpop.permute.xlu0 %8133  ;;  %1083 = vmatmul.mubr.f32.gmra.mrb[6].mxu1 %v1005_v21  ;;  %v5731_v15 = vld [vmem:[%s13122_s4 + $0x228] sm:$0xff] }
 0x2c3   : > { %v8141_v32 = vunpack.i.h.bf16 %v8139_v20  ;;  %v8140_v33 = vunpack.i.l.bf16 %v8139_v20  ;;  %v8136_v5 = vunpack.i.h.bf16 %v8134_v45  ;;  %v8135_v29 = vunpack.i.l.bf16 %v8134_v45  ;;  %6859 = vmatpush1.bf16.msra.mxu1 %v6858_v56  ;;  %1088 = vmatprep.mubr.f32.mxu1 %v8537_v41  ;;  %v5721_v56 = vld [vmem:[%s13123_s5 + $0x1d8] sm:$0xff]  ;;  %v5723_v20 = vld [vmem:[%s13123_s5 + $0x1e8] sm:$0xff] }
 0x2c4   : > { %6861 = vmatprep.subr.bf16.mxu1 %v6860_v59  ;;  %v6874_v59 = vpack.c.bf16 %v5716_v7, %v5714_v6  ;;  %v6876_v21 = vpack.c.bf16 %v5721_v56, %v5719_v31  ;;  %v5725_v45 = vld [vmem:[%s13123_s5 + $0x1f8] sm:$0xff]  ;;  %v6888_v7 = vpack.c.bf16 %v5733_v13, %v5731_v15  ;;  %v5732_v31 = vld [vmem:[%s13122_s4 + $0x230] sm:$0xff] }
 0x2c5   : > { %v1006_v30 = vsel %vm1003_vm13, %v8135_v29, %v8136_v5  ;;  %v1007_v14 = vsel %vm1003_vm13, %v8140_v33, %v8141_v32  ;;  %v6878_v33 = vpack.c.bf16 %v5720_v18, %v5718_v24  ;;  %v6880_v5 = vpack.c.bf16 %v5725_v45, %v5723_v20  ;;  %v5722_v29 = vld [vmem:[%s13123_s5 + $0x1e0] sm:$0xff]  ;;  %v5735_v24 = vld [vmem:[%s13122_s4 + $0x248] sm:$0xff]  ;;  %v5737_v18 = vld [vmem:[%s13122_s4 + $0x258] sm:$0xff] }
 0x2c6   : > { %v9333_v27 = vpop.permute.xlu1 %8148  ;;  %v9335_v37 = vpop.permute.xlu0 %8143  ;;  %1089 = vmatmul.mubr.f32.gmra.mrb[8].mxu1 %v1006_v30 }
 0x2c7   : > { %6863 = vmatpush1.bf16.msra.mxu1 %v6862_v53  ;;  %1094 = vmatprep.mubr.f32.mxu1 %v8537_v41  ;;  %v8146_v54 = vunpack.i.h.bf16 %v9335_v37  ;;  %v8145_v1 = vunpack.i.l.bf16 %v9335_v37  ;;  %v5730_v37 = vld [vmem:[%s13122_s4 + $0x220] sm:$0xff]  ;;  %v8151_v56 = vunpack.i.h.bf16 %v9333_v27 }
 0x2c8   : > { %6865 = vmatprep.subr.bf16.mxu1 %v6864_v0  ;;  %v5724_v0 = vld [vmem:[%s13123_s5 + $0x1f0] sm:$0xff] }
 0x2c9   : > { %v6882_v40 = vpack.c.bf16 %v5724_v0, %v5722_v29  ;;  %v5736_v29 = vld [vmem:[%s13122_s4 + $0x250] sm:$0xff] }
 0x2ca   : > { %v9351_v16 = vpop.permute.xlu1 %8158  ;;  %v9353_v25 = vpop.permute.xlu0 %8153  ;;  %1095 = vmatmul.mubr.f32.gmra.mrb[10].mxu1 %v1007_v14  ;;  %v5726_v14 = vld [vmem:[%s13122_s4 + $0x200] sm:$0xff] }
 0x2cb   : > { %6867 = vmatpush1.bf16.msra.mxu1 %v6866_v38  ;;  %1246 = vmatprep.mubr.f32.mxu1 %v8537_v41  ;;  %v6884_v38 = vpack.c.bf16 %v5729_v28, %v5727_v8  ;;  %v8156_v0 = vunpack.i.h.bf16 %v9353_v25  ;;  %v8155_v8 = vunpack.i.l.bf16 %v9353_v25  ;;  %v5738_v25 = vld [vmem:[%s13122_s4 + $0x260] sm:$0xff]  ;;  %v8160_v15 = vunpack.i.l.bf16 %v9351_v16 }
 0x2cc   : > { %6869 = vmatprep.subr.bf16.mxu1 %v6868_v3  ;;  %v5728_v3 = vld [vmem:[%s13122_s4 + $0x210] sm:$0xff] }
 0x2cd   : > { %v6886_v6 = vpack.c.bf16 %v5728_v3, %v5726_v14  ;;  %v1176_v13 = vsel %vm1003_vm13, %v8155_v8, %v8156_v0  ;;  %v5749_v0 = vld [vmem:[%s13122_s4 + $0x2b8] sm:$0xff] }
 0x2ce   : > { %v9368_v22 = vpop.permute.xlu1 %8168  ;;  %v9370_v34 = vpop.permute.xlu0 %8163 }
 0x2cf   : > { %6871 = vmatpush1.bf16.msra.mxu1 %v6870_v39 }
 0x2d0   : > { %6873 = vmatprep.subr.bf16.mxu1 %v6872_v42 }
 0x2d2   : > { %v9384_v53 = vpop.permute.xlu1 %8178  ;;  %v9386_v32 = vpop.permute.xlu0 %8173 }
 0x2d3   : > { %6875 = vmatpush1.bf16.msra.mxu1 %v6874_v59  ;;  %v8150_v59 = vunpack.i.l.bf16 %v9333_v27  ;;  %v6890_v27 = vpack.c.bf16 %v5732_v31, %v5730_v37 }
 0x2d4   : > { %6877 = vmatprep.subr.bf16.mxu1 %v6876_v21  ;;  %v1174_v21 = vsel %vm1003_vm13, %v8145_v1, %v8146_v54  ;;  %v5740_v54 = vld [vmem:[%s13122_s4 + $0x270] sm:$0xff]  ;;  %v8161_v1 = vunpack.i.h.bf16 %v9351_v16  ;;  %v5742_v16 = vld [vmem:[%s13122_s4 + $0x280] sm:$0xff] }
 0x2d5   : > { %v1175_v28 = vsel %vm1003_vm13, %v8150_v59, %v8151_v56  ;;  %v6898_v56 = vpack.c.bf16 %v5740_v54, %v5738_v25  ;;  %v5753_v25 = vld [vmem:[%s13122_s4 + $0x2d8] sm:$0xff] }
 0x2d6   : > { %v9400_v30 = vpop.permute.xlu1 %8188  ;;  %v9402_v11 = vpop.permute.xlu0 %8183 }
 0x2d7   : > { %6879 = vmatpush1.bf16.msra.mxu1 %v6878_v33  ;;  %v6892_v33 = vpack.c.bf16 %v5737_v18, %v5735_v24  ;;  %v5744_v18 = vld [vmem:[%s13122_s4 + $0x290] sm:$0xff] }
 0x2d8   : > { %6881 = vmatprep.subr.bf16.mxu1 %v6880_v5  ;;  %v5734_v5 = vld [vmem:[%s13122_s4 + $0x240] sm:$0xff] }
 0x2d9   : > { %v6894_v14 = vpack.c.bf16 %v5736_v29, %v5734_v5  ;;  %v5747_v29 = vld [vmem:[%s13122_s4 + $0x2a8] sm:$0xff] }
 0x2da   : > { %v9418_v39 = vpop.permute.xlu1 %8198  ;;  %v9420_v42 = vpop.permute.xlu0 %8193 }
 0x2db   : > { %6883 = vmatpush1.bf16.msra.mxu1 %v6882_v40  ;;  %v5739_v40 = vld [vmem:[%s13122_s4 + $0x268] sm:$0xff] }
 0x2dc   : > { %6885 = vmatprep.subr.bf16.mxu1 %v6884_v38  ;;  %v5741_v38 = vld [vmem:[%s13122_s4 + $0x278] sm:$0xff] }
 0x2dd   : > { %v6896_v3 = vpack.c.bf16 %v5741_v38, %v5739_v40 }
 0x2de   : > { %1247 = vmatmul.mubr.f32.vlgmr.msra.gmra.mrb[4].mxu1 %v1174_v21  ;;  %v672_v20 = vpop.permute.xlu1 %671  ;;  %v627_v45 = vpop.permute.xlu0 %626 }
 0x2df   : > { %686 = vst.msk [vmem:[#allocation3 + $0x40] sm:$0x1] %vm644_vm14, %v672_v20  ;;  %645 = vst.msk [vmem:[#allocation2 + $0x40] sm:$0x1] %vm644_vm14, %v627_v45  ;;  %6887 = vmatpush1.bf16.msra.mxu1 %v6886_v6  ;;  %1252 = vmatprep.mubr.f32.mxu1 %v8537_v41  ;;  %v5743_v6 = vld [vmem:[%s13122_s4 + $0x288] sm:$0xff] }
 0x2e0   : > { %687 = vst.msk [vmem:[#allocation3 + $0x48] sm:$0x1] %vm646_vm15, %v672_v20  ;;  %647 = vst.msk [vmem:[#allocation2 + $0x48] sm:$0x1] %vm646_vm15, %v627_v45  ;;  %6889 = vmatprep.subr.bf16.mxu1 %v6888_v7  ;;  %v5745_v7 = vld [vmem:[%s13122_s4 + $0x298] sm:$0xff] }
 0x2e1   : > { %v6900_v24 = vpack.c.bf16 %v5745_v7, %v5743_v6  ;;  %v5750_v6 = vld [vmem:[%s13122_s4 + $0x2c0] sm:$0xff]  ;;  %v5752_v7 = vld [vmem:[%s13122_s4 + $0x2d0] sm:$0xff] }
 0x2e2   : > { %1253 = vmatmul.mubr.f32.gmra.mrb[6].mxu1 %v1175_v28  ;;  %v6902_v28 = vpack.c.bf16 %v5744_v18, %v5742_v16  ;;  %v5759_v16 = vld [vmem:[%s13123_s5 + $0x208] sm:$0xff] }
 0x2e3   : > { %6891 = vmatpush1.bf16.msra.mxu1 %v6890_v27  ;;  %1258 = vmatprep.mubr.f32.mxu1 %v8537_v41  ;;  %v1177_v27 = vsel %vm1003_vm13, %v8160_v15, %v8161_v1 }
 0x2e4   : > { %6893 = vmatprep.subr.bf16.mxu1 %v6892_v33 }
 0x2e6   : > { %1259 = vmatmul.mubr.f32.gmra.mrb[8].mxu1 %v1176_v13  ;;  %v1903_v37 = vld [vmem:[#allocation2 + $0x40] sm:$0x1]  ;;  %v2095_v20 = vld [vmem:[#allocation3 + $0x40] sm:$0x1] }
 0x2e7   : > { %v1904_v31 = vld [vmem:[#allocation2 + $0x48] sm:$0x1]  ;;  %6895 = vmatpush1.bf16.msra.mxu1 %v6894_v14  ;;  %1264 = vmatprep.mubr.f32.mxu1 %v8537_v41  ;;  %v1962_v59 = vrot.slane %v1903_v37, 1  ;;  %v2096_v45 = vld [vmem:[#allocation3 + $0x48] sm:$0x1]  ;;  %v2154_v40 = vrot.slane %v2095_v20, 1 }
 0x2e8   : > { %v1964_v21 = vrot.slane %v1904_v31, 1  ;;  %6897 = vmatprep.subr.bf16.mxu1 %v6896_v3  ;;  %v2156_v38 = vrot.slane %v2096_v45, 1  ;;  %v5748_v14 = vld [vmem:[%s13122_s4 + $0x2b0] sm:$0xff]  ;;  %v5751_v3 = vld [vmem:[%s13122_s4 + $0x2c8] sm:$0xff]  ;;  %v6910_v31 = vpack.c.bf16 %v5752_v7, %v5750_v6  ;;  %v5758_v45 = vld [vmem:[%s13123_s5 + $0x200] sm:$0xff]  ;;  %v8175_v6 = vunpack.i.l.bf16 %v9386_v32 }
 0x2e9   : > { %v1963_v33 = vsel %vm1631_vm9, %v1958_v26, %v1962_v59  ;;  %v6904_v26 = vpack.c.bf16 %v5749_v0, %v5747_v29  ;;  %v2155_v1 = vsel %vm1631_vm9, %v2150_v48, %v2154_v40  ;;  %v6908_v13 = vpack.c.bf16 %v5753_v25, %v5751_v3  ;;  %v5755_v48 = vld [vmem:[%s13122_s4 + $0x2e8] sm:$0xff]  ;;  %v5754_v59 = vld [vmem:[%s13122_s4 + $0x2e0] sm:$0xff]  ;;  %v3064_v50 = vld [vmem:[#allocation3 + $0x40] sm:$0x3] }
 0x2ea   : > { %v1965_v5 = vsel %vm1631_vm9, %v1960_v2, %v1964_v21  ;;  %1265 = vmatmul.mubr.f32.gmra.mrb[10].mxu1 %v1177_v27  ;;  %v5746_v2 = vld [vmem:[%s13122_s4 + $0x2a0] sm:$0xff]  ;;  %v2157_v15 = vsel %vm1631_vm9, %v2152_v19, %v2156_v38  ;;  %v5757_v19 = vld [vmem:[%s13122_s4 + $0x2f8] sm:$0xff]  ;;  %v5756_v21 = vld [vmem:[%s13122_s4 + $0x2f0] sm:$0xff]  ;;  %v8171_v38 = vunpack.i.h.bf16 %v9368_v22 }
 0x2eb   : > { %v8217_v8 = vpack.i.bf16 %v1965_v5, %v1963_v33  ;;  %6899 = vmatpush1.bf16.msra.mxu1 %v6898_v56  ;;  %1401 = vmatprep.mubr.f32.mxu1 %v8537_v41  ;;  %v6906_v54 = vpack.c.bf16 %v5748_v14, %v5746_v2  ;;  %v8237_v37 = vpack.i.bf16 %v2157_v15, %v2155_v1  ;;  %v5760_v27 = vld [vmem:[%s13123_s5 + $0x210] sm:$0xff]  ;;  %v8166_v33 = vunpack.i.h.bf16 %v9370_v34  ;;  %v5763_v29 = vld [vmem:[%s13123_s5 + $0x228] sm:$0xff]  ;;  %v5762_v40 = vld [vmem:[%s13123_s5 + $0x220] sm:$0xff] }
 0x2ec   : > { %6901 = vmatprep.subr.bf16.mxu1 %v6900_v24  ;;  %v6912_v56 = vpack.c.bf16 %v5757_v19, %v5755_v48  ;;  %v5761_v24 = vld [vmem:[%s13123_s5 + $0x218] sm:$0xff]  ;;  %v6914_v18 = vpack.c.bf16 %v5756_v21, %v5754_v59  ;;  %v8165_v5 = vunpack.i.l.bf16 %v9370_v34  ;;  %v6918_v0 = vpack.c.bf16 %v5760_v27, %v5758_v45  ;;  %v5764_v34 = vld [vmem:[%s13123_s5 + $0x230] sm:$0xff]  ;;  %v5766_v25 = vld [vmem:[%s13123_s5 + $0x240] sm:$0xff] }
 0x2ed   : > { %8218 = vrot.lane.b32.xlu1 %v8217_v8, %s8538_s29  ;;  %v6916_v20 = vpack.c.bf16 %v5761_v24, %v5759_v16  ;;  %v5769_v14 = vld [vmem:[%s13123_s5 + $0x258] sm:$0xff]  ;;  %v6922_v3 = vpack.c.bf16 %v5764_v34, %v5762_v40  ;;  %v2884_v1 = vld [vmem:[#allocation2 + $0x40] sm:$0x3]  ;;  %v2885_v15 = vld [vmem:[#allocation2 + $0x48] sm:$0x3]  ;;  %v8181_v16 = vunpack.i.h.bf16 %v9384_v53  ;;  %v8180_v24 = vunpack.i.l.bf16 %v9384_v53 }
 0x2ee   : > { %v1329_v2 = vsel %vm1328_vm0, %v8165_v5, %v8166_v33  ;;  %v5771_v48 = vld [vmem:[%s13123_s5 + $0x268] sm:$0xff]  ;;  %v5770_v59 = vld [vmem:[%s13123_s5 + $0x260] sm:$0xff]  ;;  %v5772_v21 = vld [vmem:[%s13123_s5 + $0x270] sm:$0xff]  ;;  %v3117_v40 = vrot.slane %v3064_v50, 2 }
 0x2ef   : > { %6903 = vmatpush1.bf16.msra.mxu1 %v6902_v28  ;;  %v6930_v45 = vpack.c.bf16 %v5772_v21, %v5770_v59  ;;  %v5774_v33 = vld [vmem:[%s13123_s5 + $0x280] sm:$0xff]  ;;  %v8186_v59 = vunpack.i.h.bf16 %v9402_v11  ;;  %v8185_v21 = vunpack.i.l.bf16 %v9402_v11  ;;  %v5796_v11 = vld [vmem:[%s13122_s4 + $0x330] sm:$0xff] }
 0x2f0   : > { %6905 = vmatprep.subr.bf16.mxu1 %v6904_v26  ;;  %v8170_v26 = vunpack.i.l.bf16 %v9368_v22  ;;  %v5800_v50 = vld [vmem:[%s13122_s4 + $0x350] sm:$0xff] }
 0x2f1   : > { %8228 = vrot.lane.b32.xlu1 %v8952_v44, %s8538_s29 }
 0x2f2   : > { %v1330_v7 = vsel %vm1328_vm0, %v8170_v26, %v8171_v38  ;;  %v5778_v26 = vld [vmem:[%s13123_s5 + $0x2a0] sm:$0xff] }
 0x2f3   : > { %6907 = vmatpush1.bf16.msra.mxu1 %v6906_v54  ;;  %v5768_v54 = vld [vmem:[%s13123_s5 + $0x250] sm:$0xff] }
 0x2f4   : > { %6909 = vmatprep.subr.bf16.mxu1 %v6908_v13  ;;  %v8176_v13 = vunpack.i.h.bf16 %v9386_v32  ;;  %v6926_v19 = vpack.c.bf16 %v5768_v54, %v5766_v25  ;;  %v3118_v25 = vsel %vm2624_vm10, %v3113_v46, %v3117_v40  ;;  %v5804_v40 = vld [vmem:[%s13122_s4 + $0x370] sm:$0xff] }
 0x2f5   : > { %8238 = vrot.lane.b32.xlu1 %v8237_v37, %s8538_s29 }
 0x2f7   : > { %6911 = vmatpush1.bf16.msra.mxu1 %v6910_v31  ;;  %v2937_v31 = vrot.slane %v2884_v1, 2  ;;  %v5782_v1 = vld [vmem:[%s13123_s5 + $0x2c0] sm:$0xff] }
 0x2f8   : > { %6913 = vmatprep.subr.bf16.mxu1 %v6912_v56  ;;  %v2939_v56 = vrot.slane %v2885_v15, 2  ;;  %v5784_v15 = vld [vmem:[%s13123_s5 + $0x2d0] sm:$0xff] }
 0x2f9   : > { %8248 = vrot.lane.b32.xlu1 %v9224_v17, %s8539_s17  ;;  %v5765_v17 = vld [vmem:[%s13123_s5 + $0x238] sm:$0xff]  ;;  %v2938_v27 = vsel %vm2624_vm10, %v2933_v9, %v2937_v31  ;;  %v1332_v9 = vsel %vm1328_vm0, %v8180_v24, %v8181_v16  ;;  %v5795_v16 = vld [vmem:[%s13122_s4 + $0x328] sm:$0xff] }
 0x2fa   : > { %v6920_v28 = vpack.c.bf16 %v5765_v17, %v5763_v29  ;;  %v2940_v53 = vsel %vm2624_vm10, %v2935_v10, %v2939_v56  ;;  %v5776_v29 = vld [vmem:[%s13123_s5 + $0x290] sm:$0xff]  ;;  %v3065_v17 = vld [vmem:[#allocation3 + $0x48] sm:$0x3]  ;;  %v5790_v56 = vld [vmem:[%s13122_s4 + $0x300] sm:$0xff] }
 0x2fb   : > { %6915 = vmatpush1.bf16.msra.mxu1 %v6914_v18  ;;  %v1331_v18 = vsel %vm1328_vm0, %v8175_v6, %v8176_v13  ;;  %v5781_v10 = vld [vmem:[%s13123_s5 + $0x2b8] sm:$0xff]  ;;  %v3119_v34 = vrot.slane %v3065_v17, 2  ;;  %v6944_v13 = vpack.c.bf16 %v5789_v43, %v5787_v12  ;;  %v5786_v6 = vld [vmem:[%s13123_s5 + $0x2e0] sm:$0xff]  ;;  %v8196_v17 = vunpack.i.h.bf16 %v9420_v42 }
 0x2fc   : > { %6917 = vmatprep.subr.bf16.mxu1 %v6916_v20  ;;  %v5777_v20 = vld [vmem:[%s13123_s5 + $0x298] sm:$0xff]  ;;  %v6936_v38 = vpack.c.bf16 %v5781_v10, %v5779_v51  ;;  %v5810_v43 = vld [vmem:[%s13122_s4 + $0x3a0] sm:$0xff] }
 0x2fd   : > { %8258 = vrot.lane.b32.xlu1 %v8217_v8, %s8539_s17  ;;  %v5767_v8 = vld [vmem:[%s13123_s5 + $0x248] sm:$0xff]  ;;  %v5805_v10 = vld [vmem:[%s13122_s4 + $0x378] sm:$0xff] }
 0x2fe   : > { %1402 = vmatmul.mubr.f32.vlgmr.msra.gmra.mrb[4].mxu1 %v1329_v2  ;;  %v6924_v22 = vpack.c.bf16 %v5769_v14, %v5767_v8  ;;  %v5780_v2 = vld [vmem:[%s13123_s5 + $0x2b0] sm:$0xff]  ;;  %v5783_v8 = vld [vmem:[%s13123_s5 + $0x2c8] sm:$0xff]  ;;  %v5785_v14 = vld [vmem:[%s13123_s5 + $0x2d8] sm:$0xff] }
 0x2ff   : > { %6919 = vmatpush1.bf16.msra.mxu1 %v6918_v0  ;;  %1407 = vmatprep.mubr.f32.mxu1 %v8537_v41  ;;  %v8297_v0 = vpack.i.bf16 %v2940_v53, %v2938_v27  ;;  %v6940_v54 = vpack.c.bf16 %v5785_v14, %v5783_v8  ;;  %v1483_v27 = vsel %vm1328_vm0, %v8185_v21, %v8186_v59  ;;  %v5799_v53 = vld [vmem:[%s13122_s4 + $0x348] sm:$0xff]  ;;  %v5809_v8 = vld [vmem:[%s13122_s4 + $0x398] sm:$0xff]  ;;  %v5818_v59 = vld [vmem:[%s13122_s4 + $0x3e0] sm:$0xff] }
 0x300   : > { %6921 = vmatprep.subr.bf16.mxu1 %v6920_v28  ;;  %v6934_v28 = vpack.c.bf16 %v5776_v29, %v5774_v33  ;;  %v5801_v33 = vld [vmem:[%s13122_s4 + $0x358] sm:$0xff]  ;;  %v5798_v29 = vld [vmem:[%s13122_s4 + $0x340] sm:$0xff]  ;;  %v5820_v21 = vld [vmem:[%s13122_s4 + $0x3f0] sm:$0xff] }
 0x301   : > { %8268 = vrot.lane.b32.xlu1 %v8952_v44, %s8539_s17  ;;  %v5773_v44 = vld [vmem:[%s13123_s5 + $0x278] sm:$0xff] }
 0x302   : > { %1408 = vmatmul.mubr.f32.gmra.mrb[6].mxu1 %v1330_v7  ;;  %v6928_v32 = vpack.c.bf16 %v5773_v44, %v5771_v48  ;;  %v5788_v7 = vld [vmem:[%s13123_s5 + $0x2f0] sm:$0xff]  ;;  %v5791_v48 = vld [vmem:[%s13122_s4 + $0x308] sm:$0xff]  ;;  %v5793_v44 = vld [vmem:[%s13122_s4 + $0x318] sm:$0xff] }
 0x303   : > { %6923 = vmatpush1.bf16.msra.mxu1 %v6922_v3  ;;  %1413 = vmatprep.mubr.f32.mxu1 %v8537_v41  ;;  %v6938_v3 = vpack.c.bf16 %v5780_v2, %v5778_v26  ;;  %v6948_v31 = vpack.c.bf16 %v5793_v44, %v5791_v48  ;;  %v5807_v2 = vld [vmem:[%s13122_s4 + $0x388] sm:$0xff]  ;;  %v5814_v48 = vld [vmem:[%s13122_s4 + $0x3c0] sm:$0xff]  ;;  %v5816_v44 = vld [vmem:[%s13122_s4 + $0x3d0] sm:$0xff] }
 0x304   : > { %6925 = vmatprep.subr.bf16.mxu1 %v6924_v22  ;;  %v3120_v22 = vsel %vm2624_vm10, %v3115_v47, %v3119_v34  ;;  %v6942_v47 = vpack.c.bf16 %v5784_v15, %v5782_v1  ;;  %v8201_v34 = vunpack.i.h.bf16 %v9418_v39  ;;  %v5813_v1 = vld [vmem:[%s13122_s4 + $0x3b8] sm:$0xff] }
 0x305   : > { %8278 = vrot.lane.b32.xlu1 %v8237_v37, %s8539_s17  ;;  %v5775_v37 = vld [vmem:[%s13123_s5 + $0x288] sm:$0xff]  ;;  %v8317_v46 = vpack.i.bf16 %v3120_v22, %v3118_v25  ;;  %v5808_v25 = vld [vmem:[%s13122_s4 + $0x390] sm:$0xff] }
 0x306   : > { %1414 = vmatmul.mubr.f32.gmra.mrb[8].mxu1 %v1331_v18  ;;  %v6932_v5 = vpack.c.bf16 %v5777_v20, %v5775_v37  ;;  %v5794_v37 = vld [vmem:[%s13122_s4 + $0x320] sm:$0xff]  ;;  %v8191_v20 = vunpack.i.h.bf16 %v9400_v30 }
 0x307   : > { %6927 = vmatpush1.bf16.msra.mxu1 %v6926_v19  ;;  %1419 = vmatprep.mubr.f32.mxu1 %v8537_v41  ;;  %v6946_v19 = vpack.c.bf16 %v5788_v7, %v5786_v6 }
 0x308   : > { %6929 = vmatprep.subr.bf16.mxu1 %v6928_v32  ;;  %v5792_v32 = vld [vmem:[%s13122_s4 + $0x310] sm:$0xff] }
 0x309   : > { %8288 = vrot.lane.b32.xlu1 %v9145_v63, %s8538_s29  ;;  %v6950_v24 = vpack.c.bf16 %v5792_v32, %v5790_v56  ;;  %v6974_v56 = vpack.c.bf16 %v5816_v44, %v5814_v48  ;;  %v5843_v48 = vld [vmem:[%s13123_s5 + $0x3a8] sm:$0xff]  ;;  %v5845_v44 = vld [vmem:[%s13123_s5 + $0x3b8] sm:$0xff] }
 0x30a   : > { %1420 = vmatmul.mubr.f32.gmra.mrb[10].mxu1 %v1332_v9  ;;  %v8195_v9 = vunpack.i.l.bf16 %v9420_v42  ;;  %v5802_v42 = vld [vmem:[%s13122_s4 + $0x360] sm:$0xff] }
 0x30b   : > { %6931 = vmatpush1.bf16.msra.mxu1 %v6930_v45  ;;  %1555 = vmatprep.mubr.f32.mxu1 %v8537_v41  ;;  %v8190_v45 = vunpack.i.l.bf16 %v9400_v30  ;;  %v6956_v30 = vpack.c.bf16 %v5801_v33, %v5799_v53  ;;  %v6962_v14 = vpack.c.bf16 %v5804_v40, %v5802_v42  ;;  %v5827_v53 = vld [vmem:[%s13123_s5 + $0x328] sm:$0xff]  ;;  %v5829_v33 = vld [vmem:[%s13123_s5 + $0x338] sm:$0xff]  ;;  %v5830_v40 = vld [vmem:[%s13123_s5 + $0x340] sm:$0xff] }
 0x30c   : > { %6933 = vmatprep.subr.bf16.mxu1 %v6932_v5  ;;  %v6954_v5 = vpack.c.bf16 %v5796_v11, %v5794_v37  ;;  %v1485_v26 = vsel %vm1328_vm0, %v8195_v9, %v8196_v17  ;;  %v5822_v11 = vld [vmem:[%s13123_s5 + $0x300] sm:$0xff]  ;;  %v5828_v17 = vld [vmem:[%s13123_s5 + $0x330] sm:$0xff] }
 0x30d   : > { %8298 = vrot.lane.b32.xlu1 %v8297_v0, %s8538_s29  ;;  %v1484_v51 = vsel %vm1328_vm0, %v8190_v45, %v8191_v20  ;;  %v5824_v20 = vld [vmem:[%s13123_s5 + $0x310] sm:$0xff] }
 0x30e   : > { %v8517_v45 = vld [vmem:[#allocation2 + $0x10] sm:$0xff] }
 0x30f   : > { %6935 = vmatpush1.bf16.msra.mxu1 %v6934_v28 }
 0x310   : > { %6937 = vmatprep.subr.bf16.mxu1 %v6936_v38  ;;  %v8200_v38 = vunpack.i.l.bf16 %v9418_v39  ;;  %v5806_v39 = vld [vmem:[%s13122_s4 + $0x380] sm:$0xff] }
 0x311   : > { %8308 = vrot.lane.b32.xlu1 %v8962_v49, %s8538_s29  ;;  %v6966_v15 = vpack.c.bf16 %v5808_v25, %v5806_v39 }
 0x312   : > { %v1486_v22 = vsel %vm1328_vm0, %v8200_v38, %v8201_v34  ;;  %v5832_v34 = vld [vmem:[%s13123_s5 + $0x350] sm:$0xff] }
 0x313   : > { %6939 = vmatpush1.bf16.msra.mxu1 %v6938_v3  ;;  %v6964_v3 = vpack.c.bf16 %v5809_v8, %v5807_v2  ;;  %v5835_v8 = vld [vmem:[%s13123_s5 + $0x368] sm:$0xff]  ;;  %v6990_v39 = vpack.c.bf16 %v5832_v34, %v5830_v40  ;;  %v5858_v34 = vld [vmem:[%s13122_s4 + $0x420] sm:$0xff] }
 0x314   : > { %6941 = vmatprep.subr.bf16.mxu1 %v6940_v54  ;;  %v5811_v54 = vld [vmem:[%s13122_s4 + $0x3a8] sm:$0xff] }
 0x315   : > { %8318 = vrot.lane.b32.xlu1 %v8317_v46, %s8538_s29  ;;  %v6968_v12 = vpack.c.bf16 %v5813_v1, %v5811_v54  ;;  %v5836_v54 = vld [vmem:[%s13123_s5 + $0x370] sm:$0xff] }
 0x317   : > { %6943 = vmatpush1.bf16.msra.mxu1 %v6942_v47  ;;  %v5815_v47 = vld [vmem:[%s13122_s4 + $0x3c8] sm:$0xff] }
 0x318   : > { %6945 = vmatprep.subr.bf16.mxu1 %v6944_v13  ;;  %v5817_v13 = vld [vmem:[%s13122_s4 + $0x3d8] sm:$0xff] }
 0x319   : > { %8328 = vrot.lane.b32.xlu1 %v9145_v63, %s8539_s17  ;;  %v5797_v63 = vld [vmem:[%s13122_s4 + $0x338] sm:$0xff]  ;;  %v6972_v7 = vpack.c.bf16 %v5817_v13, %v5815_v47  ;;  %v5838_v13 = vld [vmem:[%s13123_s5 + $0x380] sm:$0xff] }
 0x31a   : > { %v6952_v18 = vpack.c.bf16 %v5797_v63, %v5795_v16  ;;  %v5823_v16 = vld [vmem:[%s13123_s5 + $0x308] sm:$0xff]  ;;  %v5825_v63 = vld [vmem:[%s13123_s5 + $0x318] sm:$0xff] }
 0x31b   : > { %6947 = vmatpush1.bf16.msra.mxu1 %v6946_v19  ;;  %v5819_v19 = vld [vmem:[%s13122_s4 + $0x3e8] sm:$0xff]  ;;  %v6980_v37 = vpack.c.bf16 %v5825_v63, %v5823_v16 }
 0x31c   : > { %6949 = vmatprep.subr.bf16.mxu1 %v6948_v31  ;;  %v5821_v31 = vld [vmem:[%s13122_s4 + $0x3f8] sm:$0xff] }
 0x31d   : > { %8338 = vrot.lane.b32.xlu1 %v8297_v0, %s8539_s17  ;;  %v6958_v0 = vpack.c.bf16 %v5800_v50, %v5798_v29  ;;  %v6976_v32 = vpack.c.bf16 %v5821_v31, %v5819_v19  ;;  %v6984_v29 = vpack.c.bf16 %v5829_v33, %v5827_v53  ;;  %v5826_v50 = vld [vmem:[%s13123_s5 + $0x320] sm:$0xff]  ;;  %v7000_v31 = vpack.c.bf16 %v5845_v44, %v5843_v48  ;;  %v5852_v53 = vld [vmem:[%s13123_s5 + $0x3f0] sm:$0xff]  ;;  %v5855_v33 = vld [vmem:[%s13122_s4 + $0x408] sm:$0xff] }
 0x31e   : > { %1556 = vmatmul.mubr.f32.vlgmr.msra.gmra.mrb[4].mxu1 %v1483_v27  ;;  %v1633_v27 = vrot.slane %v8517_v45, 1  ;;  %v5868_v48 = vld [vmem:[%s13122_s4 + $0x470] sm:$0xff] }
 0x31f   : > { %6951 = vmatpush1.bf16.msra.mxu1 %v6950_v24  ;;  %1561 = vmatprep.mubr.f32.mxu1 %v8537_v41  ;;  %v6978_v24 = vpack.c.bf16 %v5820_v21, %v5818_v59  ;;  %v5847_v59 = vld [vmem:[%s13123_s5 + $0x3c8] sm:$0xff]  ;;  %v5849_v21 = vld [vmem:[%s13123_s5 + $0x3d8] sm:$0xff] }
 0x320   : > { %6953 = vmatprep.subr.bf16.mxu1 %v6952_v18  ;;  %v1588_v18 = vld [vmem:[#allocation2] sm:$0xfe]  ;;  %v7004_v63 = vpack.c.bf16 %v5849_v21, %v5847_v59 }
 0x321   : > { %8348 = vrot.lane.b32.xlu1 %v8962_v49, %s8539_s17  ;;  %v5803_v49 = vld [vmem:[%s13122_s4 + $0x368] sm:$0xff]  ;;  %v5870_v21 = vld [vmem:[%s13122_s4 + $0x480] sm:$0xff] }
 0x322   : > { %1562 = vmatmul.mubr.f32.gmra.mrb[6].mxu1 %v1484_v51  ;;  %v6960_v28 = vpack.c.bf16 %v5805_v10, %v5803_v49  ;;  %v8518_v51 = vld [vmem:[#allocation2 + $0x20] sm:$0xff]  ;;  %v5831_v10 = vld [vmem:[%s13123_s5 + $0x348] sm:$0xff] }
 0x323   : > { %6955 = vmatpush1.bf16.msra.mxu1 %v6954_v5  ;;  %1567 = vmatprep.mubr.f32.mxu1 %v8537_v41  ;;  %v1632_v5 = vrot.slane %v1588_v18, 1  ;;  %v1635_v49 = vrot.slane %v8518_v51, 1  ;;  %v5848_v18 = vld [vmem:[%s13123_s5 + $0x3d0] sm:$0xff] }
 0x324   : > { %6957 = vmatprep.subr.bf16.mxu1 %v6956_v30  ;;  %v6982_v30 = vpack.c.bf16 %v5824_v20, %v5822_v11  ;;  %v5853_v11 = vld [vmem:[%s13123_s5 + $0x3f8] sm:$0xff] }
 0x325   : > { %8358 = vrot.lane.b32.xlu1 %v8317_v46, %s8539_s17  ;;  %v5812_v46 = vld [vmem:[%s13122_s4 + $0x3b0] sm:$0xff]  ;;  %v1634_v9 = vsel %vm1631_vm9, %v1632_v5, %v1633_v27  ;;  %v1636_v38 = vsel %vm1631_vm9, %v1633_v27, %v1635_v49  ;;  %v5850_v27 = vld [vmem:[%s13123_s5 + $0x3e0] sm:$0xff]  ;;  %v5857_v5 = vld [vmem:[%s13122_s4 + $0x418] sm:$0xff] }
 0x326   : > { %1568 = vmatmul.mubr.f32.gmra.mrb[8].mxu1 %v1485_v26  ;;  %v6970_v6 = vpack.c.bf16 %v5812_v46, %v5810_v43  ;;  %v8519_v26 = vld [vmem:[#allocation2 + $0x30] sm:$0xff]  ;;  %v5841_v43 = vld [vmem:[%s13123_s5 + $0x398] sm:$0xff] }
 0x327   : > { %6959 = vmatpush1.bf16.msra.mxu1 %v6958_v0  ;;  %1573 = vmatprep.mubr.f32.mxu1 %v8537_v41  ;;  %v5833_v0 = vld [vmem:[%s13123_s5 + $0x358] sm:$0xff]  ;;  %v1637_v2 = vrot.slane %v8519_v26, 1 }
 0x328   : > { %6961 = vmatprep.subr.bf16.mxu1 %v6960_v28  ;;  %v6986_v28 = vpack.c.bf16 %v5828_v17, %v5826_v50  ;;  %v6988_v42 = vpack.c.bf16 %v5833_v0, %v5831_v10  ;;  %v7012_v50 = vpack.c.bf16 %v5857_v5, %v5855_v33  ;;  %v5854_v17 = vld [vmem:[%s13122_s4 + $0x400] sm:$0xff]  ;;  %v5859_v0 = vld [vmem:[%s13122_s4 + $0x428] sm:$0xff] }
 0x329   : > { %v1638_v1 = vsel %vm1631_vm9, %v1635_v49, %v1637_v2  ;;  %v8520_v49 = vld [vmem:[#allocation3 + $0x10] sm:$0xff] }
 0x32a   : > { %1574 = vmatmul.mubr.f32.gmra.mrb[10].mxu1 %v1486_v22  ;;  %v5834_v22 = vld [vmem:[%s13123_s5 + $0x360] sm:$0xff]  ;;  %v1786_v10 = vrot.slane %v8520_v49, 1 }
 0x32b   : > { %6963 = vmatpush1.bf16.msra.mxu1 %v6962_v14  ;;  %1709 = vmatprep.mubr.f32.mxu1 %v8537_v41  ;;  %v5837_v14 = vld [vmem:[%s13123_s5 + $0x378] sm:$0xff]  ;;  %v6994_v46 = vpack.c.bf16 %v5836_v54, %v5834_v22  ;;  %v5862_v22 = vld [vmem:[%s13122_s4 + $0x440] sm:$0xff]  ;;  %v5864_v54 = vld [vmem:[%s13122_s4 + $0x450] sm:$0xff] }
 0x32c   : > { %6965 = vmatprep.subr.bf16.mxu1 %v6964_v3  ;;  %v1592_v3 = vld [vmem:[#allocation2 + $0x40] sm:$0x1]  ;;  %v6992_v25 = vpack.c.bf16 %v5837_v14, %v5835_v8  ;;  %v5863_v14 = vld [vmem:[%s13122_s4 + $0x448] sm:$0xff] }
 0x32d   : > { %v5882_v49 = vld [vmem:[%s13122_s4 + $0x4e0] sm:$0xff] }
 0x32f   : > { %6967 = vmatpush1.bf16.msra.mxu1 %v6966_v15  ;;  %v1639_v15 = vrot.slane %v1592_v3, 1  ;;  %v5865_v3 = vld [vmem:[%s13122_s4 + $0x458] sm:$0xff] }
 0x330   : > { %6969 = vmatprep.subr.bf16.mxu1 %v6968_v12  ;;  %v5839_v12 = vld [vmem:[%s13123_s5 + $0x388] sm:$0xff] }
 0x331   : > { %v6996_v47 = vpack.c.bf16 %v5841_v43, %v5839_v12  ;;  %v5867_v43 = vld [vmem:[%s13122_s4 + $0x468] sm:$0xff] }
 0x333   : > { %6971 = vmatpush1.bf16.msra.mxu1 %v6970_v6  ;;  %v5840_v6 = vld [vmem:[%s13123_s5 + $0x390] sm:$0xff] }
 0x334   : > { %6973 = vmatprep.subr.bf16.mxu1 %v6972_v7  ;;  %v1640_v7 = vsel %vm1631_vm9, %v1637_v2, %v1639_v15  ;;  %v6998_v19 = vpack.c.bf16 %v5840_v6, %v5838_v13  ;;  %v8521_v2 = vld [vmem:[#allocation3 + $0x20] sm:$0xff]  ;;  %v8522_v15 = vld [vmem:[#allocation3 + $0x30] sm:$0xff]  ;;  %v7022_v13 = vpack.c.bf16 %v5864_v54, %v5862_v22 }
 0x335   : > { %v1788_v8 = vrot.slane %v8521_v2, 1  ;;  %v1790_v12 = vrot.slane %v8522_v15, 1  ;;  %v5890_v54 = vld [vmem:[%s13123_s5 + $0x420] sm:$0xff] }
 0x337   : > { %6975 = vmatpush1.bf16.msra.mxu1 %v6974_v56  ;;  %v5842_v56 = vld [vmem:[%s13123_s5 + $0x3a0] sm:$0xff]  ;;  %v1791_v44 = vsel %vm1631_vm9, %v1788_v8, %v1790_v12 }
 0x338   : > { %6977 = vmatprep.subr.bf16.mxu1 %v6976_v32  ;;  %v5844_v32 = vld [vmem:[%s13123_s5 + $0x3b0] sm:$0xff] }
 0x339   : > { %v7002_v16 = vpack.c.bf16 %v5844_v32, %v5842_v56  ;;  %v5873_v56 = vld [vmem:[%s13122_s4 + $0x498] sm:$0xff] }
 0x33b   : > { %6979 = vmatpush1.bf16.msra.mxu1 %v6978_v24  ;;  %v5846_v24 = vld [vmem:[%s13123_s5 + $0x3c0] sm:$0xff] }
 0x33c   : > { %6981 = vmatprep.subr.bf16.mxu1 %v6980_v37  ;;  %v5851_v37 = vld [vmem:[%s13123_s5 + $0x3e8] sm:$0xff]  ;;  %v7006_v20 = vpack.c.bf16 %v5848_v18, %v5846_v24  ;;  %v5877_v18 = vld [vmem:[%s13122_s4 + $0x4b8] sm:$0xff] }
 0x33d   : > { %v7008_v45 = vpack.c.bf16 %v5853_v11, %v5851_v37  ;;  %v5875_v24 = vld [vmem:[%s13122_s4 + $0x4a8] sm:$0xff] }
 0x33e   : > { %1710 = vmatmul.mubr.f32.vlgmr.msra.gmra.mrb[4].mxu1 %v1634_v9  ;;  %v5856_v9 = vld [vmem:[%s13122_s4 + $0x410] sm:$0xff]  ;;  %v7032_v11 = vpack.c.bf16 %v5877_v18, %v5875_v24  ;;  %v5898_v24 = vld [vmem:[%s13123_s5 + $0x460] sm:$0xff] }
 0x33f   : > { %6983 = vmatpush1.bf16.msra.mxu1 %v6982_v30  ;;  %1715 = vmatprep.mubr.f32.mxu1 %v8537_v41  ;;  %v1742_v30 = vld [vmem:[#allocation3] sm:$0xfe] }
 0x340   : > { %6985 = vmatprep.subr.bf16.mxu1 %v6984_v29  ;;  %v7010_v29 = vpack.c.bf16 %v5852_v53, %v5850_v27  ;;  %v1785_v51 = vrot.slane %v1742_v30, 1  ;;  %v5879_v27 = vld [vmem:[%s13122_s4 + $0x4c8] sm:$0xff]  ;;  %v5881_v53 = vld [vmem:[%s13122_s4 + $0x4d8] sm:$0xff]  ;;  %v5878_v30 = vld [vmem:[%s13122_s4 + $0x4c0] sm:$0xff] }
 0x341   : > { %v7036_v5 = vpack.c.bf16 %v5881_v53, %v5879_v27  ;;  %v5900_v18 = vld [vmem:[%s13123_s5 + $0x470] sm:$0xff]  ;;  %v5905_v27 = vld [vmem:[%s13123_s5 + $0x498] sm:$0xff] }
 0x342   : > { %1716 = vmatmul.mubr.f32.gmra.mrb[6].mxu1 %v1636_v38  ;;  %v5860_v38 = vld [vmem:[%s13122_s4 + $0x430] sm:$0xff]  ;;  %v1787_v26 = vsel %vm1631_vm9, %v1785_v51, %v1786_v10  ;;  %v7058_v53 = vpack.c.bf16 %v5900_v18, %v5898_v24 }
 0x343   : > { %6987 = vmatpush1.bf16.msra.mxu1 %v6986_v28  ;;  %1721 = vmatprep.mubr.f32.mxu1 %v8537_v41  ;;  %v5861_v28 = vld [vmem:[%s13122_s4 + $0x438] sm:$0xff] }
 0x344   : > { %6989 = vmatprep.subr.bf16.mxu1 %v6988_v42  ;;  %v7014_v42 = vpack.c.bf16 %v5856_v9, %v5854_v17  ;;  %v7016_v40 = vpack.c.bf16 %v5861_v28, %v5859_v0  ;;  %v5885_v17 = vld [vmem:[%s13122_s4 + $0x4f8] sm:$0xff]  ;;  %v5887_v0 = vld [vmem:[%s13123_s5 + $0x408] sm:$0xff] }
 0x345   : > { %v5889_v28 = vld [vmem:[%s13123_s5 + $0x418] sm:$0xff] }
 0x346   : > { %1722 = vmatmul.mubr.f32.gmra.mrb[8].mxu1 %v1638_v1  ;;  %v1789_v1 = vsel %vm1631_vm9, %v1786_v10, %v1788_v8  ;;  %v5884_v10 = vld [vmem:[%s13122_s4 + $0x4f0] sm:$0xff] }
 0x347   : > { %6991 = vmatpush1.bf16.msra.mxu1 %v6990_v39  ;;  %1727 = vmatprep.mubr.f32.mxu1 %v8537_v41  ;;  %v7018_v39 = vpack.c.bf16 %v5860_v38, %v5858_v34  ;;  %v7044_v34 = vpack.c.bf16 %v5889_v28, %v5887_v0  ;;  %v5886_v38 = vld [vmem:[%s13123_s5 + $0x400] sm:$0xff]  ;;  %v5911_v0 = vld [vmem:[%s13123_s5 + $0x4c8] sm:$0xff]  ;;  %v5913_v28 = vld [vmem:[%s13123_s5 + $0x4d8] sm:$0xff] }
 0x348   : > { %6993 = vmatprep.subr.bf16.mxu1 %v6992_v25  ;;  %v7020_v25 = vpack.c.bf16 %v5865_v3, %v5863_v14  ;;  %v5891_v14 = vld [vmem:[%s13123_s5 + $0x428] sm:$0xff]  ;;  %v5893_v3 = vld [vmem:[%s13123_s5 + $0x438] sm:$0xff] }
 0x349   : > { %v7048_v22 = vpack.c.bf16 %v5893_v3, %v5891_v14  ;;  %v5914_v3 = vld [vmem:[%s13123_s5 + $0x4e0] sm:$0xff] }
 0x34a   : > { %1728 = vmatmul.mubr.f32.gmra.mrb[10].mxu1 %v1640_v7  ;;  %v5866_v7 = vld [vmem:[%s13122_s4 + $0x460] sm:$0xff] }
 0x34b   : > { %6995 = vmatpush1.bf16.msra.mxu1 %v6994_v46  ;;  %1862 = vmatprep.mubr.f32.mxu1 %v8537_v41  ;;  %v5869_v46 = vld [vmem:[%s13122_s4 + $0x478] sm:$0xff]  ;;  %v7026_v32 = vpack.c.bf16 %v5868_v48, %v5866_v7  ;;  %v5894_v48 = vld [vmem:[%s13123_s5 + $0x440] sm:$0xff] }
 0x34c   : > { %6997 = vmatprep.subr.bf16.mxu1 %v6996_v47  ;;  %v1746_v47 = vld [vmem:[#allocation3 + $0x40] sm:$0x1]  ;;  %v7024_v6 = vpack.c.bf16 %v5869_v46, %v5867_v43  ;;  %v5895_v46 = vld [vmem:[%s13123_s5 + $0x448] sm:$0xff] }
 0x34f   : > { %6999 = vmatpush1.bf16.msra.mxu1 %v6998_v19  ;;  %v1792_v19 = vrot.slane %v1746_v47, 1  ;;  %v5897_v47 = vld [vmem:[%s13123_s5 + $0x458] sm:$0xff] }
 0x350   : > { %7001 = vmatprep.subr.bf16.mxu1 %v7000_v31  ;;  %v5871_v31 = vld [vmem:[%s13122_s4 + $0x488] sm:$0xff]  ;;  %v7052_v7 = vpack.c.bf16 %v5897_v47, %v5895_v46 }
 0x351   : > { %v7028_v59 = vpack.c.bf16 %v5873_v56, %v5871_v31 }
 0x353   : > { %7003 = vmatpush1.bf16.msra.mxu1 %v7002_v16  ;;  %v5872_v16 = vld [vmem:[%s13122_s4 + $0x490] sm:$0xff] }
 0x354   : > { %7005 = vmatprep.subr.bf16.mxu1 %v7004_v63  ;;  %v1793_v63 = vsel %vm1631_vm9, %v1790_v12, %v1792_v19  ;;  %v7030_v37 = vpack.c.bf16 %v5872_v16, %v5870_v21 }
 0x357   : > { %7007 = vmatpush1.bf16.msra.mxu1 %v7006_v20  ;;  %v5874_v20 = vld [vmem:[%s13122_s4 + $0x4a0] sm:$0xff] }
 0x358   : > { %7009 = vmatprep.subr.bf16.mxu1 %v7008_v45  ;;  %v5876_v45 = vld [vmem:[%s13122_s4 + $0x4b0] sm:$0xff] }
 0x359   : > { %v7034_v33 = vpack.c.bf16 %v5876_v45, %v5874_v20  ;;  %v5903_v45 = vld [vmem:[%s13123_s5 + $0x488] sm:$0xff] }
 0x35b   : > { %7011 = vmatpush1.bf16.msra.mxu1 %v7010_v29  ;;  %v5880_v29 = vld [vmem:[%s13122_s4 + $0x4d0] sm:$0xff] }
 0x35c   : > { %7013 = vmatprep.subr.bf16.mxu1 %v7012_v50  ;;  %v5883_v50 = vld [vmem:[%s13122_s4 + $0x4e8] sm:$0xff]  ;;  %v7038_v9 = vpack.c.bf16 %v5880_v29, %v5878_v30  ;;  %v5904_v30 = vld [vmem:[%s13123_s5 + $0x490] sm:$0xff] }
 0x35d   : > { %v7040_v51 = vpack.c.bf16 %v5885_v17, %v5883_v50  ;;  %v5907_v50 = vld [vmem:[%s13123_s5 + $0x4a8] sm:$0xff]  ;;  %v5909_v17 = vld [vmem:[%s13123_s5 + $0x4b8] sm:$0xff] }
 0x35e   : > { %1863 = vmatmul.mubr.f32.vlgmr.msra.gmra.mrb[4].mxu1 %v1787_v26  ;;  %v5888_v26 = vld [vmem:[%s13123_s5 + $0x410] sm:$0xff] }
 0x35f   : > { %7015 = vmatpush1.bf16.msra.mxu1 %v7014_v42  ;;  %1868 = vmatprep.mubr.f32.mxu1 %v8537_v41  ;;  %v8204_v42 = vpop.permute.xlu0 %8203 }
 0x360   : > { %7017 = vmatprep.subr.bf16.mxu1 %v7016_v40  ;;  %v7042_v40 = vpack.c.bf16 %v5884_v10, %v5882_v49  ;;  %v8206_v2 = vunpack.i.h.bf16 %v8204_v42  ;;  %v8205_v8 = vunpack.i.l.bf16 %v8204_v42  ;;  %v5906_v49 = vld [vmem:[%s13123_s5 + $0x4a0] sm:$0xff]  ;;  %v5908_v10 = vld [vmem:[%s13123_s5 + $0x4b0] sm:$0xff] }
 0x361   : > { %v7066_v42 = vpack.c.bf16 %v5908_v10, %v5906_v49  ;;  %v5935_v10 = vld [vmem:[%s13122_s4 + $0x588] sm:$0xff] }
 0x362   : > { %1869 = vmatmul.mubr.f32.gmra.mrb[6].mxu1 %v1789_v1  ;;  %v5892_v1 = vld [vmem:[%s13123_s5 + $0x430] sm:$0xff]  ;;  %v1982_v43 = vsel %vm1003_vm13, %v8205_v8, %v8206_v2  ;;  %v5917_v2 = vld [vmem:[%s13123_s5 + $0x4f8] sm:$0xff] }
 0x363   : > { %7019 = vmatpush1.bf16.msra.mxu1 %v7018_v39  ;;  %1874 = vmatprep.mubr.f32.mxu1 %v8537_v41  ;;  %v8209_v39 = vpop.permute.xlu1 %8208 }
 0x364   : > { %7021 = vmatprep.subr.bf16.mxu1 %v7020_v25  ;;  %v7046_v25 = vpack.c.bf16 %v5888_v26, %v5886_v38  ;;  %v8211_v15 = vunpack.i.h.bf16 %v8209_v39  ;;  %v8210_v12 = vunpack.i.l.bf16 %v8209_v39  ;;  %v5912_v38 = vld [vmem:[%s13123_s5 + $0x4d0] sm:$0xff]  ;;  %v5915_v26 = vld [vmem:[%s13123_s5 + $0x4e8] sm:$0xff] }
 0x365   : > { %v7072_v14 = vpack.c.bf16 %v5917_v2, %v5915_v26  ;;  %v5916_v39 = vld [vmem:[%s13123_s5 + $0x4f0] sm:$0xff]  ;;  %v5939_v26 = vld [vmem:[%s13122_s4 + $0x5a8] sm:$0xff]  ;;  %v5941_v2 = vld [vmem:[%s13122_s4 + $0x5b8] sm:$0xff] }
 0x366   : > { %1875 = vmatmul.mubr.f32.gmra.mrb[8].mxu1 %v1791_v44  ;;  %v5896_v44 = vld [vmem:[%s13123_s5 + $0x450] sm:$0xff]  ;;  %v1983_v56 = vsel %vm1003_vm13, %v8210_v12, %v8211_v15  ;;  %v5918_v12 = vld [vmem:[%s13122_s4 + $0x500] sm:$0xff] }
 0x367   : > { %7023 = vmatpush1.bf16.msra.mxu1 %v7022_v13  ;;  %1880 = vmatprep.mubr.f32.mxu1 %v8537_v41  ;;  %v8214_v13 = vpop.permute.xlu0 %8213  ;;  %v8219_v21 = vpop.permute.xlu1 %8218  ;;  %v7054_v16 = vpack.c.bf16 %v5896_v44, %v5894_v48 }
 0x368   : > { %7025 = vmatprep.subr.bf16.mxu1 %v7024_v6  ;;  %v7050_v6 = vpack.c.bf16 %v5892_v1, %v5890_v54  ;;  %v8216_v19 = vunpack.i.h.bf16 %v8214_v13  ;;  %v8215_v31 = vunpack.i.l.bf16 %v8214_v13  ;;  %v7074_v1 = vpack.c.bf16 %v5916_v39, %v5914_v3  ;;  %v5923_v13 = vld [vmem:[%s13122_s4 + $0x528] sm:$0xff]  ;;  %v5938_v3 = vld [vmem:[%s13122_s4 + $0x5a0] sm:$0xff]  ;;  %v5940_v39 = vld [vmem:[%s13122_s4 + $0x5b0] sm:$0xff] }
 0x36a   : > { %1881 = vmatmul.mubr.f32.gmra.mrb[10].mxu1 %v1793_v63  ;;  %v1984_v20 = vsel %vm1003_vm13, %v8215_v31, %v8216_v19  ;;  %v5922_v19 = vld [vmem:[%s13122_s4 + $0x520] sm:$0xff]  ;;  %v5924_v31 = vld [vmem:[%s13122_s4 + $0x530] sm:$0xff] }
 0x36b   : > { %7027 = vmatpush1.bf16.msra.mxu1 %v7026_v32  ;;  %2054 = vmatprep.mubr.f32.mxu1 %v8537_v41  ;;  %v5899_v32 = vld [vmem:[%s13123_s5 + $0x468] sm:$0xff]  ;;  %v8224_v54 = vpop.permute.xlu0 %8223  ;;  %v7082_v24 = vpack.c.bf16 %v5924_v31, %v5922_v19 }
 0x36c   : > { %7029 = vmatprep.subr.bf16.mxu1 %v7028_v59  ;;  %v5901_v59 = vld [vmem:[%s13123_s5 + $0x478] sm:$0xff]  ;;  %v8226_v46 = vunpack.i.h.bf16 %v8224_v54  ;;  %v8225_v47 = vunpack.i.l.bf16 %v8224_v54  ;;  %v7098_v54 = vpack.c.bf16 %v5940_v39, %v5938_v3  ;;  %v5967_v39 = vld [vmem:[%s13123_s5 + $0x588] sm:$0xff] }
 0x36d   : > { %v7056_v63 = vpack.c.bf16 %v5901_v59, %v5899_v32 }
 0x36e   : > { %v2174_v59 = vsel %vm1003_vm13, %v8225_v47, %v8226_v46  ;;  %v5949_v46 = vld [vmem:[%s13122_s4 + $0x5f8] sm:$0xff] }
 0x36f   : > { %7031 = vmatpush1.bf16.msra.mxu1 %v7030_v37  ;;  %v8221_v37 = vunpack.i.h.bf16 %v8219_v21 }
 0x370   : > { %7033 = vmatprep.subr.bf16.mxu1 %v7032_v11  ;;  %v8220_v11 = vunpack.i.l.bf16 %v8219_v21  ;;  %v5927_v21 = vld [vmem:[%s13122_s4 + $0x548] sm:$0xff] }
 0x372   : > { %v1985_v29 = vsel %vm1003_vm13, %v8220_v11, %v8221_v37  ;;  %v5926_v37 = vld [vmem:[%s13122_s4 + $0x540] sm:$0xff]  ;;  %v5928_v11 = vld [vmem:[%s13122_s4 + $0x550] sm:$0xff] }
 0x373   : > { %7035 = vmatpush1.bf16.msra.mxu1 %v7034_v33  ;;  %v7060_v33 = vpack.c.bf16 %v5905_v27, %v5903_v45 }
 0x374   : > { %7037 = vmatprep.subr.bf16.mxu1 %v7036_v5  ;;  %v5902_v5 = vld [vmem:[%s13123_s5 + $0x480] sm:$0xff] }
 0x377   : > { %7039 = vmatpush1.bf16.msra.mxu1 %v7038_v9  ;;  %v7062_v9 = vpack.c.bf16 %v5904_v30, %v5902_v5  ;;  %v7086_v30 = vpack.c.bf16 %v5928_v11, %v5926_v37 }
 0x378   : > { %7041 = vmatprep.subr.bf16.mxu1 %v7040_v51  ;;  %v7064_v51 = vpack.c.bf16 %v5909_v17, %v5907_v50  ;;  %v5930_v50 = vld [vmem:[%s13122_s4 + $0x560] sm:$0xff]  ;;  %v5932_v17 = vld [vmem:[%s13122_s4 + $0x570] sm:$0xff] }
 0x37b   : > { %7043 = vmatpush1.bf16.msra.mxu1 %v7042_v40  ;;  %v7068_v40 = vpack.c.bf16 %v5913_v28, %v5911_v0  ;;  %v5937_v0 = vld [vmem:[%s13122_s4 + $0x598] sm:$0xff]  ;;  %v7090_v28 = vpack.c.bf16 %v5932_v17, %v5930_v50 }
 0x37c   : > { %7045 = vmatprep.subr.bf16.mxu1 %v7044_v34  ;;  %v5910_v34 = vld [vmem:[%s13123_s5 + $0x4c0] sm:$0xff] }
 0x37d   : > { %v7070_v8 = vpack.c.bf16 %v5912_v38, %v5910_v34  ;;  %v5936_v34 = vld [vmem:[%s13122_s4 + $0x590] sm:$0xff] }
 0x37e   : > { %2055 = vmatmul.mubr.f32.vlgmr.msra.gmra.mrb[4].mxu1 %v1982_v43  ;;  %v5920_v43 = vld [vmem:[%s13122_s4 + $0x510] sm:$0xff] }
 0x37f   : > { %7047 = vmatpush1.bf16.msra.mxu1 %v7046_v25  ;;  %2060 = vmatprep.mubr.f32.mxu1 %v8537_v41  ;;  %v5919_v25 = vld [vmem:[%s13122_s4 + $0x508] sm:$0xff]  ;;  %v7078_v48 = vpack.c.bf16 %v5920_v43, %v5918_v12  ;;  %v5944_v12 = vld [vmem:[%s13122_s4 + $0x5d0] sm:$0xff] }
 0x380   : > { %7049 = vmatprep.subr.bf16.mxu1 %v7048_v22  ;;  %v5921_v22 = vld [vmem:[%s13122_s4 + $0x518] sm:$0xff]  ;;  %v5947_v43 = vld [vmem:[%s13122_s4 + $0x5e8] sm:$0xff] }
 0x381   : > { %v7076_v15 = vpack.c.bf16 %v5921_v22, %v5919_v25  ;;  %v5943_v25 = vld [vmem:[%s13122_s4 + $0x5c8] sm:$0xff]  ;;  %v5945_v22 = vld [vmem:[%s13122_s4 + $0x5d8] sm:$0xff] }
 0x382   : > { %2061 = vmatmul.mubr.f32.gmra.mrb[6].mxu1 %v1983_v56 }
 0x383   : > { %7051 = vmatpush1.bf16.msra.mxu1 %v7050_v6  ;;  %2066 = vmatprep.mubr.f32.mxu1 %v8537_v41  ;;  %v5925_v6 = vld [vmem:[%s13122_s4 + $0x538] sm:$0xff] }
 0x384   : > { %7053 = vmatprep.subr.bf16.mxu1 %v7052_v7  ;;  %v8229_v7 = vpop.permute.xlu1 %8228  ;;  %v7080_v44 = vpack.c.bf16 %v5925_v6, %v5923_v13  ;;  %v7104_v13 = vpack.c.bf16 %v5949_v46, %v5947_v43  ;;  %v5946_v6 = vld [vmem:[%s13122_s4 + $0x5e0] sm:$0xff]  ;;  %v5971_v43 = vld [vmem:[%s13123_s5 + $0x5a8] sm:$0xff]  ;;  %v5973_v46 = vld [vmem:[%s13123_s5 + $0x5b8] sm:$0xff] }
 0x385   : > { %v8231_v56 = vunpack.i.h.bf16 %v8229_v7  ;;  %v8230_v32 = vunpack.i.l.bf16 %v8229_v7  ;;  %v5948_v7 = vld [vmem:[%s13122_s4 + $0x5f0] sm:$0xff] }
 0x386   : > { %2067 = vmatmul.mubr.f32.gmra.mrb[8].mxu1 %v1984_v20  ;;  %v7106_v31 = vpack.c.bf16 %v5948_v7, %v5946_v6  ;;  %v5970_v6 = vld [vmem:[%s13123_s5 + $0x5a0] sm:$0xff]  ;;  %v5972_v7 = vld [vmem:[%s13123_s5 + $0x5b0] sm:$0xff] }
 0x387   : > { %7055 = vmatpush1.bf16.msra.mxu1 %v7054_v16  ;;  %2072 = vmatprep.mubr.f32.mxu1 %v8537_v41  ;;  %v5929_v16 = vld [vmem:[%s13122_s4 + $0x558] sm:$0xff]  ;;  %v2175_v27 = vsel %vm1003_vm13, %v8230_v32, %v8231_v56  ;;  %v5950_v32 = vld [vmem:[%s13123_s5 + $0x500] sm:$0xff] }
 0x388   : > { %7057 = vmatprep.subr.bf16.mxu1 %v7056_v63  ;;  %v8234_v63 = vpop.permute.xlu0 %8233  ;;  %v7084_v18 = vpack.c.bf16 %v5929_v16, %v5927_v21  ;;  %v8239_v5 = vpop.permute.xlu1 %8238 }
 0x389   : > { %v8236_v20 = vunpack.i.h.bf16 %v8234_v63  ;;  %v8235_v45 = vunpack.i.l.bf16 %v8234_v63  ;;  %v5955_v63 = vld [vmem:[%s13123_s5 + $0x528] sm:$0xff] }
 0x38a   : > { %2073 = vmatmul.mubr.f32.gmra.mrb[10].mxu1 %v1985_v29 }
 0x38b   : > { %7059 = vmatpush1.bf16.msra.mxu1 %v7058_v53  ;;  %2246 = vmatprep.mubr.f32.mxu1 %v8537_v41  ;;  %v5931_v53 = vld [vmem:[%s13122_s4 + $0x568] sm:$0xff]  ;;  %v2176_v49 = vsel %vm1003_vm13, %v8235_v45, %v8236_v20  ;;  %v5954_v20 = vld [vmem:[%s13123_s5 + $0x520] sm:$0xff]  ;;  %v5956_v45 = vld [vmem:[%s13123_s5 + $0x530] sm:$0xff] }
 0x38c   : > { %7061 = vmatprep.subr.bf16.mxu1 %v7060_v33  ;;  %v5933_v33 = vld [vmem:[%s13122_s4 + $0x578] sm:$0xff]  ;;  %v8244_v19 = vpop.permute.xlu0 %8243  ;;  %v7114_v50 = vpack.c.bf16 %v5956_v45, %v5954_v20 }
 0x38d   : > { %v7088_v29 = vpack.c.bf16 %v5933_v33, %v5931_v53  ;;  %v8246_v21 = vunpack.i.h.bf16 %v8244_v19  ;;  %v8245_v16 = vunpack.i.l.bf16 %v8244_v19  ;;  %v7130_v19 = vpack.c.bf16 %v5972_v7, %v5970_v6  ;;  %v5999_v7 = vld [vmem:[%s13122_s4 + $0x688] sm:$0xff] }
 0x38f   : > { %7063 = vmatpush1.bf16.msra.mxu1 %v7062_v9  ;;  %v8241_v9 = vunpack.i.h.bf16 %v8239_v5  ;;  %v2328_v33 = vsel %vm1328_vm0, %v8245_v16, %v8246_v21  ;;  %v5981_v21 = vld [vmem:[%s13123_s5 + $0x5f8] sm:$0xff] }
 0x390   : > { %7065 = vmatprep.subr.bf16.mxu1 %v7064_v51  ;;  %v8240_v51 = vunpack.i.l.bf16 %v8239_v5  ;;  %v5959_v5 = vld [vmem:[%s13123_s5 + $0x548] sm:$0xff] }
 0x392   : > { %v2177_v38 = vsel %vm1003_vm13, %v8240_v51, %v8241_v9  ;;  %v5958_v9 = vld [vmem:[%s13123_s5 + $0x540] sm:$0xff]  ;;  %v5960_v51 = vld [vmem:[%s13123_s5 + $0x550] sm:$0xff] }
 0x393   : > { %7067 = vmatpush1.bf16.msra.mxu1 %v7066_v42  ;;  %v7092_v42 = vpack.c.bf16 %v5937_v0, %v5935_v10 }
 0x394   : > { %7069 = vmatprep.subr.bf16.mxu1 %v7068_v40  ;;  %v5934_v40 = vld [vmem:[%s13122_s4 + $0x580] sm:$0xff] }
 0x397   : > { %7071 = vmatpush1.bf16.msra.mxu1 %v7070_v8  ;;  %v7094_v8 = vpack.c.bf16 %v5936_v34, %v5934_v40  ;;  %v7118_v34 = vpack.c.bf16 %v5960_v51, %v5958_v9 }
 0x398   : > { %7073 = vmatprep.subr.bf16.mxu1 %v7072_v14  ;;  %v7096_v14 = vpack.c.bf16 %v5941_v2, %v5939_v26  ;;  %v5962_v26 = vld [vmem:[%s13123_s5 + $0x560] sm:$0xff]  ;;  %v5964_v2 = vld [vmem:[%s13123_s5 + $0x570] sm:$0xff] }
 0x39b   : > { %7075 = vmatpush1.bf16.msra.mxu1 %v7074_v1  ;;  %v7100_v1 = vpack.c.bf16 %v5945_v22, %v5943_v25  ;;  %v5969_v25 = vld [vmem:[%s13123_s5 + $0x598] sm:$0xff]  ;;  %v7122_v22 = vpack.c.bf16 %v5964_v2, %v5962_v26 }
 0x39c   : > { %7077 = vmatprep.subr.bf16.mxu1 %v7076_v15  ;;  %v5942_v15 = vld [vmem:[%s13122_s4 + $0x5c0] sm:$0xff] }
 0x39d   : > { %v7102_v47 = vpack.c.bf16 %v5944_v12, %v5942_v15  ;;  %v5968_v15 = vld [vmem:[%s13123_s5 + $0x590] sm:$0xff] }
 0x39e   : > { %2247 = vmatmul.mubr.f32.vlgmr.msra.gmra.mrb[4].mxu1 %v2174_v59  ;;  %v5952_v59 = vld [vmem:[%s13123_s5 + $0x510] sm:$0xff] }
 0x39f   : > { %7079 = vmatpush1.bf16.msra.mxu1 %v7078_v48  ;;  %2252 = vmatprep.mubr.f32.mxu1 %v8537_v41  ;;  %v5951_v48 = vld [vmem:[%s13123_s5 + $0x508] sm:$0xff]  ;;  %v7110_v37 = vpack.c.bf16 %v5952_v59, %v5950_v32  ;;  %v5976_v32 = vld [vmem:[%s13123_s5 + $0x5d0] sm:$0xff] }
 0x3a0   : > { %7081 = vmatprep.subr.bf16.mxu1 %v7080_v44  ;;  %v5953_v44 = vld [vmem:[%s13123_s5 + $0x518] sm:$0xff]  ;;  %v5979_v59 = vld [vmem:[%s13123_s5 + $0x5e8] sm:$0xff] }
 0x3a1   : > { %v7108_v56 = vpack.c.bf16 %v5953_v44, %v5951_v48  ;;  %v5975_v48 = vld [vmem:[%s13123_s5 + $0x5c8] sm:$0xff]  ;;  %v5977_v44 = vld [vmem:[%s13123_s5 + $0x5d8] sm:$0xff] }
 0x3a2   : > { %2253 = vmatmul.mubr.f32.gmra.mrb[6].mxu1 %v2175_v27 }
 0x3a3   : > { %7083 = vmatpush1.bf16.msra.mxu1 %v7082_v24  ;;  %2258 = vmatprep.mubr.f32.mxu1 %v8537_v41  ;;  %v5957_v24 = vld [vmem:[%s13123_s5 + $0x538] sm:$0xff] }
 0x3a4   : > { %7085 = vmatprep.subr.bf16.mxu1 %v7084_v18  ;;  %v8249_v18 = vpop.permute.xlu1 %8248  ;;  %v7112_v11 = vpack.c.bf16 %v5957_v24, %v5955_v63  ;;  %v7136_v63 = vpack.c.bf16 %v5981_v21, %v5979_v59  ;;  %v5978_v24 = vld [vmem:[%s13123_s5 + $0x5e0] sm:$0xff]  ;;  %v6003_v59 = vld [vmem:[%s13122_s4 + $0x6a8] sm:$0xff]  ;;  %v6005_v21 = vld [vmem:[%s13122_s4 + $0x6b8] sm:$0xff] }
 0x3a5   : > { %v8251_v27 = vunpack.i.h.bf16 %v8249_v18  ;;  %v8250_v53 = vunpack.i.l.bf16 %v8249_v18  ;;  %v5980_v18 = vld [vmem:[%s13123_s5 + $0x5f0] sm:$0xff] }
 0x3a6   : > { %2259 = vmatmul.mubr.f32.gmra.mrb[8].mxu1 %v2176_v49  ;;  %v7138_v45 = vpack.c.bf16 %v5980_v18, %v5978_v24  ;;  %v6002_v24 = vld [vmem:[%s13122_s4 + $0x6a0] sm:$0xff]  ;;  %v6004_v18 = vld [vmem:[%s13122_s4 + $0x6b0] sm:$0xff] }
 0x3a7   : > { %7087 = vmatpush1.bf16.msra.mxu1 %v7086_v30  ;;  %2264 = vmatprep.mubr.f32.mxu1 %v8537_v41  ;;  %v5961_v30 = vld [vmem:[%s13123_s5 + $0x558] sm:$0xff]  ;;  %v2329_v0 = vsel %vm1328_vm0, %v8250_v53, %v8251_v27  ;;  %v5982_v53 = vld [vmem:[%s13122_s4 + $0x600] sm:$0xff] }
 0x3a8   : > { %7089 = vmatprep.subr.bf16.mxu1 %v7088_v29  ;;  %v8254_v29 = vpop.permute.xlu0 %8253  ;;  %v7116_v17 = vpack.c.bf16 %v5961_v30, %v5959_v5  ;;  %v8259_v40 = vpop.permute.xlu1 %8258 }
 0x3a9   : > { %v8256_v49 = vunpack.i.h.bf16 %v8254_v29  ;;  %v8255_v10 = vunpack.i.l.bf16 %v8254_v29  ;;  %v5987_v29 = vld [vmem:[%s13122_s4 + $0x628] sm:$0xff] }
 0x3aa   : > { %2265 = vmatmul.mubr.f32.gmra.mrb[10].mxu1 %v2177_v38 }
 0x3ab   : > { %7091 = vmatpush1.bf16.msra.mxu1 %v7090_v28  ;;  %2400 = vmatprep.mubr.f32.mxu1 %v8537_v41  ;;  %v5963_v28 = vld [vmem:[%s13123_s5 + $0x568] sm:$0xff]  ;;  %v2330_v3 = vsel %vm1328_vm0, %v8255_v10, %v8256_v49  ;;  %v5986_v49 = vld [vmem:[%s13122_s4 + $0x620] sm:$0xff]  ;;  %v5988_v10 = vld [vmem:[%s13122_s4 + $0x630] sm:$0xff] }
 0x3ac   : > { %7093 = vmatprep.subr.bf16.mxu1 %v7092_v42  ;;  %v5965_v42 = vld [vmem:[%s13123_s5 + $0x578] sm:$0xff]  ;;  %v8264_v20 = vpop.permute.xlu0 %8263  ;;  %v7146_v26 = vpack.c.bf16 %v5988_v10, %v5986_v49  ;;  %v2587_v10 = vld [vmem:[#allocation2] sm:$0xfc] }
 0x3ad   : > { %v7120_v38 = vpack.c.bf16 %v5965_v42, %v5963_v28  ;;  %v8266_v5 = vunpack.i.h.bf16 %v8264_v20  ;;  %v8265_v30 = vunpack.i.l.bf16 %v8264_v20  ;;  %v7162_v20 = vpack.c.bf16 %v6004_v18, %v6002_v24 }
 0x3af   : > { %7095 = vmatpush1.bf16.msra.mxu1 %v7094_v8  ;;  %v8261_v8 = vunpack.i.h.bf16 %v8259_v40  ;;  %v2482_v42 = vsel %vm1328_vm0, %v8265_v30, %v8266_v5  ;;  %v6013_v5 = vld [vmem:[%s13122_s4 + $0x6f8] sm:$0xff] }
 0x3b0   : > { %7097 = vmatprep.subr.bf16.mxu1 %v7096_v14  ;;  %v8260_v14 = vunpack.i.l.bf16 %v8259_v40  ;;  %v5991_v40 = vld [vmem:[%s13122_s4 + $0x648] sm:$0xff] }
 0x3b2   : > { %v2331_v12 = vsel %vm1328_vm0, %v8260_v14, %v8261_v8  ;;  %v5990_v8 = vld [vmem:[%s13122_s4 + $0x640] sm:$0xff]  ;;  %v5992_v14 = vld [vmem:[%s13122_s4 + $0x650] sm:$0xff] }
 0x3b3   : > { %7099 = vmatpush1.bf16.msra.mxu1 %v7098_v54  ;;  %v7124_v54 = vpack.c.bf16 %v5969_v25, %v5967_v39 }
 0x3b4   : > { %7101 = vmatprep.subr.bf16.mxu1 %v7100_v1  ;;  %v5966_v1 = vld [vmem:[%s13123_s5 + $0x580] sm:$0xff] }
 0x3b7   : > { %7103 = vmatpush1.bf16.msra.mxu1 %v7102_v47  ;;  %v7126_v47 = vpack.c.bf16 %v5968_v15, %v5966_v1  ;;  %v7150_v15 = vpack.c.bf16 %v5992_v14, %v5990_v8  ;;  %v6018_v8 = vld [vmem:[%s13123_s5 + $0x620] sm:$0xff]  ;;  %v6020_v14 = vld [vmem:[%s13123_s5 + $0x630] sm:$0xff] }
 0x3b8   : > { %7105 = vmatprep.subr.bf16.mxu1 %v7104_v13  ;;  %v7128_v13 = vpack.c.bf16 %v5973_v46, %v5971_v43  ;;  %v5994_v43 = vld [vmem:[%s13122_s4 + $0x660] sm:$0xff]  ;;  %v5996_v46 = vld [vmem:[%s13122_s4 + $0x670] sm:$0xff] }
 0x3bb   : > { %7107 = vmatpush1.bf16.msra.mxu1 %v7106_v31  ;;  %v7132_v31 = vpack.c.bf16 %v5977_v44, %v5975_v48  ;;  %v6001_v48 = vld [vmem:[%s13122_s4 + $0x698] sm:$0xff]  ;;  %v7154_v44 = vpack.c.bf16 %v5996_v46, %v5994_v43 }
 0x3bc   : > { %7109 = vmatprep.subr.bf16.mxu1 %v7108_v56  ;;  %v5974_v56 = vld [vmem:[%s13123_s5 + $0x5c0] sm:$0xff] }
 0x3bd   : > { %v7134_v16 = vpack.c.bf16 %v5976_v32, %v5974_v56  ;;  %v6000_v56 = vld [vmem:[%s13122_s4 + $0x690] sm:$0xff] }
 0x3be   : > { %2401 = vmatmul.mubr.f32.vlgmr.msra.gmra.mrb[4].mxu1 %v2328_v33  ;;  %v5984_v33 = vld [vmem:[%s13122_s4 + $0x610] sm:$0xff] }
 0x3bf   : > { %7111 = vmatpush1.bf16.msra.mxu1 %v7110_v37  ;;  %2406 = vmatprep.mubr.f32.mxu1 %v8537_v41  ;;  %v5983_v37 = vld [vmem:[%s13122_s4 + $0x608] sm:$0xff]  ;;  %v7142_v9 = vpack.c.bf16 %v5984_v33, %v5982_v53  ;;  %v6008_v53 = vld [vmem:[%s13122_s4 + $0x6d0] sm:$0xff] }
 0x3c0   : > { %7113 = vmatprep.subr.bf16.mxu1 %v7112_v11  ;;  %v5985_v11 = vld [vmem:[%s13122_s4 + $0x618] sm:$0xff]  ;;  %v6011_v33 = vld [vmem:[%s13122_s4 + $0x6e8] sm:$0xff] }
 0x3c1   : > { %v7140_v27 = vpack.c.bf16 %v5985_v11, %v5983_v37  ;;  %v6007_v37 = vld [vmem:[%s13122_s4 + $0x6c8] sm:$0xff]  ;;  %v6009_v11 = vld [vmem:[%s13122_s4 + $0x6d8] sm:$0xff] }
 0x3c2   : > { %2407 = vmatmul.mubr.f32.gmra.mrb[6].mxu1 %v2329_v0 }
 0x3c3   : > { %7115 = vmatpush1.bf16.msra.mxu1 %v7114_v50  ;;  %2412 = vmatprep.mubr.f32.mxu1 %v8537_v41  ;;  %v5989_v50 = vld [vmem:[%s13122_s4 + $0x638] sm:$0xff] }
 0x3c4   : > { %7117 = vmatprep.subr.bf16.mxu1 %v7116_v17  ;;  %v8269_v17 = vpop.permute.xlu1 %8268  ;;  %v7144_v51 = vpack.c.bf16 %v5989_v50, %v5987_v29  ;;  %v7168_v29 = vpack.c.bf16 %v6013_v5, %v6011_v33  ;;  %v6010_v50 = vld [vmem:[%s13122_s4 + $0x6e0] sm:$0xff]  ;;  %v6044_v5 = vld [vmem:[%s13123_s5 + $0x6f0] sm:$0xff] }
 0x3c5   : > { %v8271_v0 = vunpack.i.h.bf16 %v8269_v17  ;;  %v8270_v28 = vunpack.i.l.bf16 %v8269_v17  ;;  %v6012_v17 = vld [vmem:[%s13122_s4 + $0x6f0] sm:$0xff]  ;;  %v6042_v33 = vld [vmem:[%s13123_s5 + $0x6e0] sm:$0xff] }
 0x3c6   : > { %2413 = vmatmul.mubr.f32.gmra.mrb[8].mxu1 %v2330_v3  ;;  %v7170_v49 = vpack.c.bf16 %v6012_v17, %v6010_v50  ;;  %v2735_v50 = vld [vmem:[#allocation3] sm:$0xfc]  ;;  %v7202_v17 = vpack.c.bf16 %v6044_v5, %v6042_v33 }
 0x3c7   : > { %7119 = vmatpush1.bf16.msra.mxu1 %v7118_v34  ;;  %2418 = vmatprep.mubr.f32.mxu1 %v8537_v41  ;;  %v5993_v34 = vld [vmem:[%s13122_s4 + $0x658] sm:$0xff]  ;;  %v2483_v25 = vsel %vm1328_vm0, %v8270_v28, %v8271_v0  ;;  %v6014_v28 = vld [vmem:[%s13123_s5 + $0x600] sm:$0xff]  ;;  %v6080_v33 = vld [vmem:[%s13123_s5 + $0x710] sm:$0xff] }
 0x3c8   : > { %7121 = vmatprep.subr.bf16.mxu1 %v7120_v38  ;;  %v8274_v38 = vpop.permute.xlu0 %8273  ;;  %v7148_v2 = vpack.c.bf16 %v5993_v34, %v5991_v40  ;;  %v8279_v1 = vpop.permute.xlu1 %8278  ;;  %v6019_v40 = vld [vmem:[%s13123_s5 + $0x628] sm:$0xff]  ;;  %v6021_v34 = vld [vmem:[%s13123_s5 + $0x638] sm:$0xff] }
 0x3c9   : > { %v8276_v3 = vunpack.i.h.bf16 %v8274_v38  ;;  %v8275_v39 = vunpack.i.l.bf16 %v8274_v38  ;;  %v2625_v38 = vrot.slane %v2587_v10, 2  ;;  %v2772_v10 = vrot.slane %v2735_v50, 2  ;;  %v6085_v50 = vld [vmem:[%s13123_s5 + $0x738] sm:$0xff] }
 0x3ca   : > { %2419 = vmatmul.mubr.f32.gmra.mrb[10].mxu1 %v2331_v12 }
 0x3cb   : > { %7123 = vmatpush1.bf16.msra.mxu1 %v7122_v22  ;;  %2554 = vmatprep.mubr.f32.mxu1 %v8537_v41  ;;  %v5995_v22 = vld [vmem:[%s13122_s4 + $0x668] sm:$0xff]  ;;  %v2484_v6 = vsel %vm1328_vm0, %v8275_v39, %v8276_v3  ;;  %v2627_v3 = vsel %vm2624_vm10, %v2625_v38, %v2626_v23  ;;  %v6024_v23 = vld [vmem:[%s13123_s5 + $0x650] sm:$0xff] }
 0x3cc   : > { %7125 = vmatprep.subr.bf16.mxu1 %v7124_v54  ;;  %v5997_v54 = vld [vmem:[%s13122_s4 + $0x678] sm:$0xff]  ;;  %v6023_v39 = vld [vmem:[%s13123_s5 + $0x648] sm:$0xff]  ;;  %v7182_v43 = vpack.c.bf16 %v6024_v23, %v6022_v4  ;;  %v6052_v38 = vld [vmem:[%s13122_s4 + $0x730] sm:$0xff] }
 0x3cd   : > { %v7152_v12 = vpack.c.bf16 %v5997_v54, %v5995_v22  ;;  %v7178_v22 = vpack.c.bf16 %v6020_v14, %v6018_v8  ;;  %v6057_v8 = vld [vmem:[%s13122_s4 + $0x758] sm:$0xff]  ;;  %v6058_v23 = vld [vmem:[%s13122_s4 + $0x760] sm:$0xff] }
 0x3cf   : > { %7127 = vmatpush1.bf16.msra.mxu1 %v7126_v47  ;;  %v8281_v47 = vunpack.i.h.bf16 %v8279_v1 }
 0x3d0   : > { %7129 = vmatprep.subr.bf16.mxu1 %v7128_v13  ;;  %v8280_v13 = vunpack.i.l.bf16 %v8279_v1  ;;  %v6027_v1 = vld [vmem:[%s13123_s5 + $0x668] sm:$0xff] }
 0x3d2   : > { %v2485_v32 = vsel %vm1328_vm0, %v8280_v13, %v8281_v47  ;;  %v6026_v47 = vld [vmem:[%s13123_s5 + $0x660] sm:$0xff]  ;;  %v6028_v13 = vld [vmem:[%s13123_s5 + $0x670] sm:$0xff] }
 0x3d3   : > { %7131 = vmatpush1.bf16.msra.mxu1 %v7130_v19  ;;  %v7156_v19 = vpack.c.bf16 %v6001_v48, %v5999_v7  ;;  %v6033_v7 = vld [vmem:[%s13123_s5 + $0x698] sm:$0xff]  ;;  %v7186_v48 = vpack.c.bf16 %v6028_v13, %v6026_v47  ;;  %v6062_v47 = vld [vmem:[%s13122_s4 + $0x780] sm:$0xff]  ;;  %v6064_v13 = vld [vmem:[%s13122_s4 + $0x790] sm:$0xff] }
 0x3d4   : > { %7133 = vmatprep.subr.bf16.mxu1 %v7132_v31  ;;  %v5998_v31 = vld [vmem:[%s13122_s4 + $0x680] sm:$0xff] }
 0x3d7   : > { %7135 = vmatpush1.bf16.msra.mxu1 %v7134_v16  ;;  %v7158_v16 = vpack.c.bf16 %v6000_v56, %v5998_v31  ;;  %v6032_v31 = vld [vmem:[%s13123_s5 + $0x690] sm:$0xff] }
 0x3d8   : > { %7137 = vmatprep.subr.bf16.mxu1 %v7136_v63  ;;  %v7160_v63 = vpack.c.bf16 %v6005_v21, %v6003_v59 }
 0x3db   : > { %7139 = vmatpush1.bf16.msra.mxu1 %v7138_v45  ;;  %v7164_v45 = vpack.c.bf16 %v6009_v11, %v6007_v37  ;;  %v6038_v37 = vld [vmem:[%s13123_s5 + $0x6c0] sm:$0xff]  ;;  %v6040_v11 = vld [vmem:[%s13123_s5 + $0x6d0] sm:$0xff] }
 0x3dc   : > { %7141 = vmatprep.subr.bf16.mxu1 %v7140_v27  ;;  %v6006_v27 = vld [vmem:[%s13122_s4 + $0x6c0] sm:$0xff] }
 0x3dd   : > { %v7166_v30 = vpack.c.bf16 %v6008_v53, %v6006_v27  ;;  %v7198_v27 = vpack.c.bf16 %v6040_v11, %v6038_v37  ;;  %v6079_v37 = vld [vmem:[%s13123_s5 + $0x708] sm:$0xff]  ;;  %v6081_v11 = vld [vmem:[%s13123_s5 + $0x718] sm:$0xff] }
 0x3de   : > { %2555 = vmatmul.mubr.f32.vlgmr.msra.gmra.mrb[4].mxu1 %v2482_v42  ;;  %v6016_v42 = vld [vmem:[%s13123_s5 + $0x610] sm:$0xff] }
 0x3df   : > { %7143 = vmatpush1.bf16.msra.mxu1 %v7142_v9  ;;  %2560 = vmatprep.mubr.f32.mxu1 %v8537_v41  ;;  %v6015_v9 = vld [vmem:[%s13123_s5 + $0x608] sm:$0xff] }
 0x3e0   : > { %7145 = vmatprep.subr.bf16.mxu1 %v7144_v51  ;;  %v6017_v51 = vld [vmem:[%s13123_s5 + $0x618] sm:$0xff] }
 0x3e1   : > { %v7172_v0 = vpack.c.bf16 %v6017_v51, %v6015_v9  ;;  %v6046_v51 = vld [vmem:[%s13122_s4 + $0x700] sm:$0xff] }
 0x3e2   : > { %2561 = vmatmul.mubr.f32.gmra.mrb[6].mxu1 %v2483_v25  ;;  %v6025_v25 = vld [vmem:[%s13123_s5 + $0x658] sm:$0xff] }
 0x3e3   : > { %7147 = vmatpush1.bf16.msra.mxu1 %v7146_v26  ;;  %2566 = vmatprep.mubr.f32.mxu1 %v8537_v41  ;;  %v7174_v26 = vpack.c.bf16 %v6016_v42, %v6014_v28  ;;  %v7180_v54 = vpack.c.bf16 %v6025_v25, %v6023_v39  ;;  %v6053_v28 = vld [vmem:[%s13122_s4 + $0x738] sm:$0xff]  ;;  %v6059_v39 = vld [vmem:[%s13122_s4 + $0x768] sm:$0xff] }
 0x3e4   : > { %7149 = vmatprep.subr.bf16.mxu1 %v7148_v2  ;;  %v7176_v2 = vpack.c.bf16 %v6021_v34, %v6019_v40  ;;  %v6050_v34 = vld [vmem:[%s13122_s4 + $0x720] sm:$0xff]  ;;  %v6061_v25 = vld [vmem:[%s13122_s4 + $0x778] sm:$0xff] }
 0x3e5   : > { %v7210_v14 = vpack.c.bf16 %v6052_v38, %v6050_v34  ;;  %v7216_v4 = vpack.c.bf16 %v6061_v25, %v6059_v39  ;;  %v6089_v34 = vld [vmem:[%s13123_s5 + $0x758] sm:$0xff]  ;;  %v6091_v39 = vld [vmem:[%s13123_s5 + $0x768] sm:$0xff] }
 0x3e6   : > { %2567 = vmatmul.mubr.f32.gmra.mrb[8].mxu1 %v2484_v6  ;;  %v6093_v25 = vld [vmem:[%s13123_s5 + $0x778] sm:$0xff] }
 0x3e7   : > { %7151 = vmatpush1.bf16.msra.mxu1 %v7150_v15  ;;  %2572 = vmatprep.mubr.f32.mxu1 %v8537_v41  ;;  %v6029_v15 = vld [vmem:[%s13123_s5 + $0x678] sm:$0xff] }
 0x3e8   : > { %7153 = vmatprep.subr.bf16.mxu1 %v7152_v12  ;;  %v2588_v12 = vld [vmem:[#allocation2 + $0x40] sm:$0x3]  ;;  %v7184_v46 = vpack.c.bf16 %v6029_v15, %v6027_v1  ;;  %v6060_v1 = vld [vmem:[%s13122_s4 + $0x770] sm:$0xff] }
 0x3e9   : > { %v2632_v6 = vrot.slane %v2588_v12, 2  ;;  %v6065_v12 = vld [vmem:[%s13122_s4 + $0x798] sm:$0xff] }
 0x3ea   : > { %2573 = vmatmul.mubr.f32.gmra.mrb[10].mxu1 %v2485_v32  ;;  %v6037_v32 = vld [vmem:[%s13123_s5 + $0x6b8] sm:$0xff] }
 0x3eb   : > { %7155 = vmatpush1.bf16.msra.mxu1 %v7154_v44  ;;  %2702 = vmatprep.mubr.f32.mxu1 %v8537_v41  ;;  %v2633_v56 = vsel %vm2624_vm10, %v2630_v36, %v2632_v6  ;;  %v6036_v36 = vld [vmem:[%s13123_s5 + $0x6b0] sm:$0xff]  ;;  %v13131_v6 = vrot.slane %v8975_v57, 2  ;;  %v6066_v57 = vld [vmem:[%s13122_s4 + $0x7a0] sm:$0xff] }
 0x3ec   : > { %7157 = vmatprep.subr.bf16.mxu1 %v7156_v19  ;;  %v6030_v19 = vld [vmem:[%s13123_s5 + $0x680] sm:$0xff]  ;;  %v7194_v24 = vpack.c.bf16 %v6036_v36, %v6034_v35  ;;  %v6075_v35 = vld [vmem:[%s13122_s4 + $0x7e8] sm:$0xff]  ;;  %v6077_v36 = vld [vmem:[%s13122_s4 + $0x7f8] sm:$0xff] }
 0x3ed   : > { %v7190_v59 = vpack.c.bf16 %v6032_v31, %v6030_v19  ;;  %v6068_v19 = vld [vmem:[%s13122_s4 + $0x7b0] sm:$0xff]  ;;  %v6071_v31 = vld [vmem:[%s13122_s4 + $0x7c8] sm:$0xff] }
 0x3ef   : > { %7159 = vmatpush1.bf16.msra.mxu1 %v7158_v16  ;;  %v6039_v16 = vld [vmem:[%s13123_s5 + $0x6c8] sm:$0xff] }
 0x3f0   : > { %7161 = vmatprep.subr.bf16.mxu1 %v7160_v63  ;;  %v6041_v63 = vld [vmem:[%s13123_s5 + $0x6d8] sm:$0xff] }
 0x3f1   : > { %v7196_v18 = vpack.c.bf16 %v6041_v63, %v6039_v16  ;;  %v7232_v63 = vpack.c.bf16 %v6077_v36, %v6075_v35  ;;  %v6104_v35 = vld [vmem:[%s13123_s5 + $0x7d0] sm:$0xff]  ;;  %v6107_v36 = vld [vmem:[%s13123_s5 + $0x7e8] sm:$0xff] }
 0x3f3   : > { %7163 = vmatpush1.bf16.msra.mxu1 %v7162_v20  ;;  %v6043_v20 = vld [vmem:[%s13123_s5 + $0x6e8] sm:$0xff] }
 0x3f4   : > { %7165 = vmatprep.subr.bf16.mxu1 %v7164_v45  ;;  %v6045_v45 = vld [vmem:[%s13123_s5 + $0x6f8] sm:$0xff] }
 0x3f5   : > { %v7200_v53 = vpack.c.bf16 %v6045_v45, %v6043_v20  ;;  %v8284_v20 = vpop.permute.xlu0 %8283 }
 0x3f6   : > { %v8286_v5 = vunpack.i.h.bf16 %v8284_v20 }
 0x3f7   : > { %7167 = vmatpush1.bf16.msra.mxu1 %v7166_v30  ;;  %v6047_v30 = vld [vmem:[%s13122_s4 + $0x708] sm:$0xff] }
 0x3f8   : > { %7169 = vmatprep.subr.bf16.mxu1 %v7168_v29  ;;  %v6049_v29 = vld [vmem:[%s13122_s4 + $0x718] sm:$0xff] }
 0x3f9   : > { %v7204_v9 = vpack.c.bf16 %v6049_v29, %v6047_v30  ;;  %v8285_v30 = vunpack.i.l.bf16 %v8284_v20  ;;  %v6083_v29 = vld [vmem:[%s13123_s5 + $0x728] sm:$0xff]  ;;  %v8294_v38 = vpop.permute.xlu0 %8293  ;;  %v6113_v20 = vld [vmem:[%s13122_s4 + $0x818] sm:$0xff] }
 0x3fb   : > { %7171 = vmatpush1.bf16.msra.mxu1 %v7170_v49  ;;  %v6048_v49 = vld [vmem:[%s13122_s4 + $0x710] sm:$0xff] }
 0x3fc   : > { %7173 = vmatprep.subr.bf16.mxu1 %v7172_v0  ;;  %v6051_v0 = vld [vmem:[%s13122_s4 + $0x728] sm:$0xff]  ;;  %v7206_v42 = vpack.c.bf16 %v6048_v49, %v6046_v51  ;;  %v7240_v51 = vpack.c.bf16 %v6085_v50, %v6083_v29  ;;  %v6082_v49 = vld [vmem:[%s13123_s5 + $0x720] sm:$0xff] }
 0x3fd   : > { %v7208_v40 = vpack.c.bf16 %v6053_v28, %v6051_v0  ;;  %v6115_v50 = vld [vmem:[%s13122_s4 + $0x828] sm:$0xff] }
 0x3fe   : > { %2703 = vmatmul.mubr.f32.vlgmr.msra.gmra.mrb[4].mxu1 %v2627_v3 }
 0x3ff   : > { %7175 = vmatpush1.bf16.msra.mxu1 %v7174_v26  ;;  %2708 = vmatprep.mubr.f32.mxu1 %v8537_v41  ;;  %v2774_v26 = vsel %vm2624_vm10, %v2772_v10, %v2773_v55  ;;  %v6056_v55 = vld [vmem:[%s13122_s4 + $0x750] sm:$0xff] }
 0x400   : > { %7177 = vmatprep.subr.bf16.mxu1 %v7176_v2  ;;  %v6055_v2 = vld [vmem:[%s13122_s4 + $0x748] sm:$0xff]  ;;  %v6084_v10 = vld [vmem:[%s13123_s5 + $0x730] sm:$0xff] }
 0x401   : > { %v7212_v3 = vpack.c.bf16 %v6057_v8, %v6055_v2  ;;  %v6086_v8 = vld [vmem:[%s13123_s5 + $0x740] sm:$0xff] }
 0x402   : > { %2709 = vmatmul.mubr.f32.gmra.mrb[6].mxu1 %v9158_v61  ;;  %v6031_v61 = vld [vmem:[%s13123_s5 + $0x688] sm:$0xff] }
 0x403   : > { %7179 = vmatpush1.bf16.msra.mxu1 %v7178_v22  ;;  %2714 = vmatprep.mubr.f32.mxu1 %v8537_v41  ;;  %v7188_v44 = vpack.c.bf16 %v6033_v7, %v6031_v61  ;;  %v2736_v22 = vld [vmem:[#allocation3 + $0x40] sm:$0x3]  ;;  %v6069_v7 = vld [vmem:[%s13122_s4 + $0x7b8] sm:$0xff] }
 0x404   : > { %7181 = vmatprep.subr.bf16.mxu1 %v7180_v54  ;;  %v7214_v54 = vpack.c.bf16 %v6056_v55, %v6054_v52  ;;  %v2779_v15 = vrot.slane %v2736_v22, 2  ;;  %v8295_v52 = vunpack.i.l.bf16 %v8294_v38 }
 0x406   : > { %2715 = vmatmul.mubr.f32.gmra.mrb[8].mxu1 %v9163_v62  ;;  %v6035_v62 = vld [vmem:[%s13123_s5 + $0x6a8] sm:$0xff]  ;;  %v2780_v61 = vsel %vm2624_vm10, %v13131_v6, %v2779_v15  ;;  %v6094_v6 = vld [vmem:[%s13123_s5 + $0x780] sm:$0xff] }
 0x407   : > { %7183 = vmatpush1.bf16.msra.mxu1 %v7182_v43  ;;  %2720 = vmatprep.mubr.f32.mxu1 %v8537_v41  ;;  %v7192_v21 = vpack.c.bf16 %v6037_v32, %v6035_v62  ;;  %v7218_v43 = vpack.c.bf16 %v6060_v1, %v6058_v23  ;;  %v7226_v62 = vpack.c.bf16 %v6068_v19, %v6066_v57  ;;  %v6090_v23 = vld [vmem:[%s13123_s5 + $0x760] sm:$0xff]  ;;  %v6092_v1 = vld [vmem:[%s13123_s5 + $0x770] sm:$0xff] }
 0x408   : > { %7185 = vmatprep.subr.bf16.mxu1 %v7184_v46  ;;  %v6098_v19 = vld [vmem:[%s13123_s5 + $0x7a0] sm:$0xff] }
 0x40a   : > { %2721 = vmatmul.mubr.f32.gmra.mrb[10].mxu1 %v2633_v56  ;;  %v6073_v56 = vld [vmem:[%s13122_s4 + $0x7d8] sm:$0xff] }
 0x40b   : > { %7187 = vmatpush1.bf16.msra.mxu1 %v7186_v48  ;;  %2849 = vmatprep.mubr.f32.mxu1 %v8537_v41  ;;  %v7222_v48 = vpack.c.bf16 %v6064_v13, %v6062_v47  ;;  %v7228_v32 = vpack.c.bf16 %v6073_v56, %v6071_v31  ;;  %v7250_v47 = vpack.c.bf16 %v6092_v1, %v6090_v23  ;;  %v6100_v31 = vld [vmem:[%s13123_s5 + $0x7b0] sm:$0xff]  ;;  %v6103_v56 = vld [vmem:[%s13123_s5 + $0x7c8] sm:$0xff]  ;;  %v6122_v1 = vld [vmem:[%s13122_s4 + $0x860] sm:$0xff] }
 0x40c   : > { %7189 = vmatprep.subr.bf16.mxu1 %v7188_v44 }
 0x40f   : > { %7191 = vmatpush1.bf16.msra.mxu1 %v7190_v59  ;;  %v6070_v59 = vld [vmem:[%s13122_s4 + $0x7c0] sm:$0xff] }
 0x410   : > { %7193 = vmatprep.subr.bf16.mxu1 %v7192_v21  ;;  %v6072_v21 = vld [vmem:[%s13122_s4 + $0x7d0] sm:$0xff] }
 0x411   : > { %v7230_v16 = vpack.c.bf16 %v6072_v21, %v6070_v59  ;;  %v6102_v21 = vld [vmem:[%s13123_s5 + $0x7c0] sm:$0xff] }
 0x413   : > { %7195 = vmatpush1.bf16.msra.mxu1 %v7194_v24  ;;  %v6074_v24 = vld [vmem:[%s13122_s4 + $0x7e0] sm:$0xff] }
 0x414   : > { %7197 = vmatprep.subr.bf16.mxu1 %v7196_v18  ;;  %v6076_v18 = vld [vmem:[%s13122_s4 + $0x7f0] sm:$0xff] }
 0x415   : > { %v7234_v45 = vpack.c.bf16 %v6076_v18, %v6074_v24  ;;  %v6106_v18 = vld [vmem:[%s13123_s5 + $0x7e0] sm:$0xff] }
 0x417   : > { %7199 = vmatpush1.bf16.msra.mxu1 %v7198_v27  ;;  %v7236_v27 = vpack.c.bf16 %v6081_v11, %v6079_v37  ;;  %v6108_v37 = vld [vmem:[%s13123_s5 + $0x7f0] sm:$0xff]  ;;  %v6111_v11 = vld [vmem:[%s13122_s4 + $0x808] sm:$0xff] }
 0x418   : > { %7201 = vmatprep.subr.bf16.mxu1 %v7200_v53  ;;  %v6078_v53 = vld [vmem:[%s13123_s5 + $0x700] sm:$0xff] }
 0x41b   : > { %7203 = vmatpush1.bf16.msra.mxu1 %v7202_v17  ;;  %v8289_v17 = vpop.permute.xlu1 %8288 }
 0x41c   : > { %7205 = vmatprep.subr.bf16.mxu1 %v7204_v9  ;;  %v7238_v9 = vpack.c.bf16 %v6080_v33, %v6078_v53  ;;  %v8291_v0 = vunpack.i.h.bf16 %v8289_v17  ;;  %v8290_v28 = vunpack.i.l.bf16 %v8289_v17  ;;  %v7268_v53 = vpack.c.bf16 %v6113_v20, %v6111_v11  ;;  %v6110_v33 = vld [vmem:[%s13122_s4 + $0x800] sm:$0xff]  ;;  %v6117_v17 = vld [vmem:[%s13122_s4 + $0x838] sm:$0xff]  ;;  %v6140_v11 = vld [vmem:[%s13122_s4 + $0x8f0] sm:$0xff] }
 0x41d   : > { %v6143_v20 = vld [vmem:[%s13123_s5 + $0x808] sm:$0xff] }
 0x41e   : > { %2850 = vmatmul.mubr.f32.vlgmr.msra.gmra.mrb[4].mxu1 %v2774_v26  ;;  %v7242_v26 = vpack.c.bf16 %v6084_v10, %v6082_v49  ;;  %v2958_v55 = vsel %vm1003_vm13, %v8290_v28, %v8291_v0  ;;  %v7272_v49 = vpack.c.bf16 %v6117_v17, %v6115_v50  ;;  %v6114_v10 = vld [vmem:[%s13122_s4 + $0x820] sm:$0xff]  ;;  %v6116_v0 = vld [vmem:[%s13122_s4 + $0x830] sm:$0xff]  ;;  %v6147_v17 = vld [vmem:[%s13123_s5 + $0x828] sm:$0xff] }
 0x41f   : > { %7207 = vmatpush1.bf16.msra.mxu1 %v7206_v42  ;;  %2855 = vmatprep.mubr.f32.mxu1 %v8537_v41  ;;  %v2957_v42 = vsel %vm1003_vm13, %v8285_v30, %v8286_v5  ;;  %v8299_v22 = vpop.permute.xlu1 %8298  ;;  %v6112_v5 = vld [vmem:[%s13122_s4 + $0x810] sm:$0xff] }
 0x420   : > { %7209 = vmatprep.subr.bf16.mxu1 %v7208_v40  ;;  %v6087_v40 = vld [vmem:[%s13123_s5 + $0x748] sm:$0xff]  ;;  %v8301_v15 = vunpack.i.h.bf16 %v8299_v22 }
 0x421   : > { %v7244_v2 = vpack.c.bf16 %v6089_v34, %v6087_v40  ;;  %v6119_v34 = vld [vmem:[%s13122_s4 + $0x848] sm:$0xff] }
 0x422   : > { %2856 = vmatmul.mubr.f32.gmra.mrb[6].mxu1 %v8980_v58  ;;  %v6063_v58 = vld [vmem:[%s13122_s4 + $0x788] sm:$0xff] }
 0x423   : > { %7211 = vmatpush1.bf16.msra.mxu1 %v7210_v14  ;;  %2861 = vmatprep.mubr.f32.mxu1 %v8537_v41  ;;  %v7220_v46 = vpack.c.bf16 %v6065_v12, %v6063_v58  ;;  %v6088_v14 = vld [vmem:[%s13123_s5 + $0x750] sm:$0xff]  ;;  %v8300_v58 = vunpack.i.l.bf16 %v8299_v22  ;;  %v6125_v22 = vld [vmem:[%s13122_s4 + $0x878] sm:$0xff] }
 0x424   : > { %7213 = vmatprep.subr.bf16.mxu1 %v7212_v3  ;;  %v8296_v3 = vunpack.i.h.bf16 %v8294_v38  ;;  %v6121_v38 = vld [vmem:[%s13122_s4 + $0x858] sm:$0xff] }
 0x426   : > { %2862 = vmatmul.mubr.f32.gmra.mrb[8].mxu1 %v8986_v60  ;;  %v6067_v60 = vld [vmem:[%s13122_s4 + $0x7a8] sm:$0xff]  ;;  %v2959_v12 = vsel %vm1003_vm13, %v8295_v52, %v8296_v3  ;;  %v6120_v3 = vld [vmem:[%s13122_s4 + $0x850] sm:$0xff] }
 0x427   : > { %7215 = vmatpush1.bf16.msra.mxu1 %v7214_v54  ;;  %2867 = vmatprep.mubr.f32.mxu1 %v8537_v41  ;;  %v7224_v44 = vpack.c.bf16 %v6069_v7, %v6067_v60  ;;  %v7246_v54 = vpack.c.bf16 %v6088_v14, %v6086_v8  ;;  %v2960_v60 = vsel %vm1003_vm13, %v8300_v58, %v8301_v15  ;;  %v6099_v7 = vld [vmem:[%s13123_s5 + $0x7a8] sm:$0xff]  ;;  %v6118_v14 = vld [vmem:[%s13122_s4 + $0x840] sm:$0xff]  ;;  %v6124_v15 = vld [vmem:[%s13122_s4 + $0x870] sm:$0xff] }
 0x428   : > { %7217 = vmatprep.subr.bf16.mxu1 %v7216_v4  ;;  %v7248_v4 = vpack.c.bf16 %v6093_v25, %v6091_v39  ;;  %v7276_v8 = vpack.c.bf16 %v6121_v38, %v6119_v34  ;;  %v6123_v25 = vld [vmem:[%s13122_s4 + $0x868] sm:$0xff] }
 0x429   : > { %v7280_v23 = vpack.c.bf16 %v6125_v22, %v6123_v25  ;;  %v6151_v38 = vld [vmem:[%s13123_s5 + $0x848] sm:$0xff] }
 0x42a   : > { %2868 = vmatmul.mubr.f32.gmra.mrb[10].mxu1 %v2780_v61  ;;  %v6096_v61 = vld [vmem:[%s13123_s5 + $0x790] sm:$0xff]  ;;  %v6155_v22 = vld [vmem:[%s13123_s5 + $0x868] sm:$0xff] }
 0x42b   : > { %7219 = vmatpush1.bf16.msra.mxu1 %v7218_v43  ;;  %3029 = vmatprep.mubr.f32.mxu1 %v8537_v41  ;;  %v6095_v43 = vld [vmem:[%s13123_s5 + $0x788] sm:$0xff] }
 0x42c   : > { %7221 = vmatprep.subr.bf16.mxu1 %v7220_v46  ;;  %v6097_v46 = vld [vmem:[%s13123_s5 + $0x798] sm:$0xff] }
 0x42d   : > { %v7252_v13 = vpack.c.bf16 %v6097_v46, %v6095_v43  ;;  %v6127_v46 = vld [vmem:[%s13122_s4 + $0x888] sm:$0xff] }
 0x42f   : > { %7223 = vmatpush1.bf16.msra.mxu1 %v7222_v48  ;;  %v6101_v48 = vld [vmem:[%s13123_s5 + $0x7b8] sm:$0xff] }
 0x430   : > { %7225 = vmatprep.subr.bf16.mxu1 %v7224_v44  ;;  %v7254_v44 = vpack.c.bf16 %v6096_v61, %v6094_v6  ;;  %v7256_v57 = vpack.c.bf16 %v6101_v48, %v6099_v7  ;;  %v6126_v61 = vld [vmem:[%s13122_s4 + $0x880] sm:$0xff]  ;;  %v6131_v48 = vld [vmem:[%s13122_s4 + $0x8a8] sm:$0xff] }
 0x433   : > { %7227 = vmatpush1.bf16.msra.mxu1 %v7226_v62  ;;  %v6105_v62 = vld [vmem:[%s13123_s5 + $0x7d8] sm:$0xff] }
 0x434   : > { %7229 = vmatprep.subr.bf16.mxu1 %v7228_v32  ;;  %v7258_v32 = vpack.c.bf16 %v6100_v31, %v6098_v19  ;;  %v7260_v59 = vpack.c.bf16 %v6105_v62, %v6103_v56  ;;  %v6130_v31 = vld [vmem:[%s13122_s4 + $0x8a0] sm:$0xff]  ;;  %v6132_v56 = vld [vmem:[%s13122_s4 + $0x8b0] sm:$0xff]  ;;  %v6135_v62 = vld [vmem:[%s13122_s4 + $0x8c8] sm:$0xff] }
 0x437   : > { %7231 = vmatpush1.bf16.msra.mxu1 %v7230_v16  ;;  %v6109_v16 = vld [vmem:[%s13123_s5 + $0x7f8] sm:$0xff] }
 0x438   : > { %7233 = vmatprep.subr.bf16.mxu1 %v7232_v63  ;;  %v7262_v63 = vpack.c.bf16 %v6104_v35, %v6102_v21  ;;  %v7264_v24 = vpack.c.bf16 %v6109_v16, %v6107_v36  ;;  %v6134_v35 = vld [vmem:[%s13122_s4 + $0x8c0] sm:$0xff]  ;;  %v6136_v36 = vld [vmem:[%s13122_s4 + $0x8d0] sm:$0xff]  ;;  %v6139_v16 = vld [vmem:[%s13122_s4 + $0x8e8] sm:$0xff] }
 0x43b   : > { %7235 = vmatpush1.bf16.msra.mxu1 %v7234_v45  ;;  %v8304_v45 = vpop.permute.xlu0 %8303 }
 0x43c   : > { %7237 = vmatprep.subr.bf16.mxu1 %v7236_v27  ;;  %v7266_v27 = vpack.c.bf16 %v6108_v37, %v6106_v18  ;;  %v8306_v30 = vunpack.i.h.bf16 %v8304_v45  ;;  %v8305_v29 = vunpack.i.l.bf16 %v8304_v45  ;;  %v6138_v37 = vld [vmem:[%s13122_s4 + $0x8e0] sm:$0xff]  ;;  %v6145_v45 = vld [vmem:[%s13123_s5 + $0x818] sm:$0xff] }
 0x43e   : > { %3030 = vmatmul.mubr.f32.vlgmr.msra.gmra.mrb[4].mxu1 %v2957_v42  ;;  %v3137_v40 = vsel %vm1003_vm13, %v8305_v29, %v8306_v30  ;;  %v6144_v30 = vld [vmem:[%s13123_s5 + $0x810] sm:$0xff] }
 0x43f   : > { %7239 = vmatpush1.bf16.msra.mxu1 %v7238_v9  ;;  %3035 = vmatprep.mubr.f32.mxu1 %v8537_v41  ;;  %v8309_v9 = vpop.permute.xlu1 %8308 }
 0x440   : > { %7241 = vmatprep.subr.bf16.mxu1 %v7240_v51  ;;  %v7270_v51 = vpack.c.bf16 %v6112_v5, %v6110_v33  ;;  %v8311_v28 = vunpack.i.h.bf16 %v8309_v9  ;;  %v8310_v42 = vunpack.i.l.bf16 %v8309_v9  ;;  %v7300_v33 = vpack.c.bf16 %v6145_v45, %v6143_v20  ;;  %v6142_v5 = vld [vmem:[%s13123_s5 + $0x800] sm:$0xff]  ;;  %v6149_v9 = vld [vmem:[%s13123_s5 + $0x838] sm:$0xff]  ;;  %v6172_v20 = vld [vmem:[%s13123_s5 + $0x8f0] sm:$0xff] }
 0x442   : > { %3036 = vmatmul.mubr.f32.gmra.mrb[6].mxu1 %v2958_v55  ;;  %v3138_v39 = vsel %vm1003_vm13, %v8310_v42, %v8311_v28  ;;  %v6148_v28 = vld [vmem:[%s13123_s5 + $0x830] sm:$0xff] }
 0x443   : > { %7243 = vmatpush1.bf16.msra.mxu1 %v7242_v26  ;;  %3041 = vmatprep.mubr.f32.mxu1 %v8537_v41  ;;  %v8314_v26 = vpop.permute.xlu0 %8313 }
 0x444   : > { %7245 = vmatprep.subr.bf16.mxu1 %v7244_v2  ;;  %v7274_v2 = vpack.c.bf16 %v6116_v0, %v6114_v10  ;;  %v8316_v52 = vunpack.i.h.bf16 %v8314_v26  ;;  %v8315_v55 = vunpack.i.l.bf16 %v8314_v26  ;;  %v7304_v10 = vpack.c.bf16 %v6149_v9, %v6147_v17  ;;  %v6146_v0 = vld [vmem:[%s13123_s5 + $0x820] sm:$0xff]  ;;  %v6153_v26 = vld [vmem:[%s13123_s5 + $0x858] sm:$0xff] }
 0x446   : > { %3042 = vmatmul.mubr.f32.gmra.mrb[8].mxu1 %v2959_v12  ;;  %v3139_v43 = vsel %vm1003_vm13, %v8315_v55, %v8316_v52  ;;  %v6152_v52 = vld [vmem:[%s13123_s5 + $0x850] sm:$0xff] }
 0x447   : > { %7247 = vmatpush1.bf16.msra.mxu1 %v7246_v54  ;;  %3047 = vmatprep.mubr.f32.mxu1 %v8537_v41  ;;  %v8319_v54 = vpop.permute.xlu1 %8318 }
 0x448   : > { %7249 = vmatprep.subr.bf16.mxu1 %v7248_v4  ;;  %v7278_v4 = vpack.c.bf16 %v6120_v3, %v6118_v14  ;;  %v8321_v58 = vunpack.i.h.bf16 %v8319_v54  ;;  %v8320_v12 = vunpack.i.l.bf16 %v8319_v54  ;;  %v7308_v14 = vpack.c.bf16 %v6153_v26, %v6151_v38  ;;  %v6150_v3 = vld [vmem:[%s13123_s5 + $0x840] sm:$0xff]  ;;  %v6157_v54 = vld [vmem:[%s13123_s5 + $0x878] sm:$0xff] }
 0x44a   : > { %3048 = vmatmul.mubr.f32.gmra.mrb[10].mxu1 %v2960_v60  ;;  %v6128_v60 = vld [vmem:[%s13122_s4 + $0x890] sm:$0xff]  ;;  %v3140_v7 = vsel %vm1003_vm13, %v8320_v12, %v8321_v58  ;;  %vm3658_vm13 = vcmask 57344  }
 0x44b   : > { %7251 = vmatpush1.bf16.msra.mxu1 %v7250_v47  ;;  %3209 = vmatprep.mubr.f32.mxu1 %v8537_v41  ;;  %v6129_v47 = vld [vmem:[%s13122_s4 + $0x898] sm:$0xff]  ;;  %v6156_v58 = vld [vmem:[%s13123_s5 + $0x870] sm:$0xff] }
 0x44c   : > { %7253 = vmatprep.subr.bf16.mxu1 %v7252_v13  ;;  %v7282_v13 = vpack.c.bf16 %v6124_v15, %v6122_v1  ;;  %v7284_v6 = vpack.c.bf16 %v6129_v47, %v6127_v46  ;;  %v7312_v1 = vpack.c.bf16 %v6157_v54, %v6155_v22  ;;  %v6154_v15 = vld [vmem:[%s13123_s5 + $0x860] sm:$0xff]  ;;  %v6159_v47 = vld [vmem:[%s13123_s5 + $0x888] sm:$0xff] }
 0x44f   : > { %7255 = vmatpush1.bf16.msra.mxu1 %v7254_v44  ;;  %v6133_v44 = vld [vmem:[%s13122_s4 + $0x8b8] sm:$0xff] }
 0x450   : > { %7257 = vmatprep.subr.bf16.mxu1 %v7256_v57  ;;  %v7286_v57 = vpack.c.bf16 %v6128_v60, %v6126_v61  ;;  %v7288_v19 = vpack.c.bf16 %v6133_v44, %v6131_v48  ;;  %v6158_v60 = vld [vmem:[%s13123_s5 + $0x880] sm:$0xff]  ;;  %v6163_v44 = vld [vmem:[%s13123_s5 + $0x8a8] sm:$0xff] }
 0x453   : > { %7259 = vmatpush1.bf16.msra.mxu1 %v7258_v32  ;;  %v6137_v32 = vld [vmem:[%s13122_s4 + $0x8d8] sm:$0xff] }
 0x454   : > { %7261 = vmatprep.subr.bf16.mxu1 %v7260_v59  ;;  %v7290_v59 = vpack.c.bf16 %v6132_v56, %v6130_v31  ;;  %v7292_v21 = vpack.c.bf16 %v6137_v32, %v6135_v62  ;;  %v6162_v56 = vld [vmem:[%s13123_s5 + $0x8a0] sm:$0xff]  ;;  %v6164_v62 = vld [vmem:[%s13123_s5 + $0x8b0] sm:$0xff]  ;;  %v6167_v32 = vld [vmem:[%s13123_s5 + $0x8c8] sm:$0xff] }
 0x457   : > { %7263 = vmatpush1.bf16.msra.mxu1 %v7262_v63  ;;  %v6141_v63 = vld [vmem:[%s13122_s4 + $0x8f8] sm:$0xff] }
 0x458   : > { %7265 = vmatprep.subr.bf16.mxu1 %v7264_v24  ;;  %v7294_v24 = vpack.c.bf16 %v6136_v36, %v6134_v35  ;;  %v7296_v18 = vpack.c.bf16 %v6141_v63, %v6139_v16  ;;  %v6166_v36 = vld [vmem:[%s13123_s5 + $0x8c0] sm:$0xff]  ;;  %v6168_v16 = vld [vmem:[%s13123_s5 + $0x8d0] sm:$0xff]  ;;  %v6171_v63 = vld [vmem:[%s13123_s5 + $0x8e8] sm:$0xff] }
 0x45b   : > { %7267 = vmatpush1.bf16.msra.mxu1 %v7266_v27  ;;  %v8324_v27 = vpop.permute.xlu0 %8323 }
 0x45c   : > { %7269 = vmatprep.subr.bf16.mxu1 %v7268_v53  ;;  %v7298_v53 = vpack.c.bf16 %v6140_v11, %v6138_v37  ;;  %v8326_v29 = vunpack.i.h.bf16 %v8324_v27  ;;  %v8325_v50 = vunpack.i.l.bf16 %v8324_v27  ;;  %v6170_v11 = vld [vmem:[%s13123_s5 + $0x8e0] sm:$0xff] }
 0x45d   : > { %v7330_v27 = vpack.c.bf16 %v6172_v20, %v6170_v11  ;;  %v6175_v20 = vld [vmem:[%s13125_s7 + $0x208] sm:$0xff] }
 0x45e   : > { %3210 = vmatmul.mubr.f32.vlgmr.msra.gmra.mrb[4].mxu1 %v3137_v40  ;;  %v3291_v34 = vsel %vm1328_vm0, %v8325_v50, %v8326_v29 }
 0x45f   : > { %7271 = vmatpush1.bf16.msra.mxu1 %v7270_v51  ;;  %3215 = vmatprep.mubr.f32.mxu1 %v8537_v41  ;;  %v8329_v51 = vpop.permute.xlu1 %8328 }
 0x460   : > { %7273 = vmatprep.subr.bf16.mxu1 %v7272_v49  ;;  %v7302_v49 = vpack.c.bf16 %v6144_v30, %v6142_v5  ;;  %v8331_v42 = vunpack.i.h.bf16 %v8329_v51  ;;  %v8330_v40 = vunpack.i.l.bf16 %v8329_v51 }
 0x462   : > { %3216 = vmatmul.mubr.f32.gmra.mrb[6].mxu1 %v3138_v39  ;;  %v3292_v25 = vsel %vm1328_vm0, %v8330_v40, %v8331_v42 }
 0x463   : > { %7275 = vmatpush1.bf16.msra.mxu1 %v7274_v2  ;;  %3221 = vmatprep.mubr.f32.mxu1 %v8537_v41  ;;  %v8334_v2 = vpop.permute.xlu0 %8333 }
 0x464   : > { %7277 = vmatprep.subr.bf16.mxu1 %v7276_v8  ;;  %v7306_v8 = vpack.c.bf16 %v6148_v28, %v6146_v0  ;;  %v8336_v55 = vunpack.i.h.bf16 %v8334_v2  ;;  %v8335_v39 = vunpack.i.l.bf16 %v8334_v2  ;;  %v3550_v2 = vld [vmem:[%s13124_s6] sm:$0x3] }
 0x466   : > { %3222 = vmatmul.mubr.f32.gmra.mrb[8].mxu1 %v3139_v43  ;;  %v3293_v46 = vsel %vm1328_vm0, %v8335_v39, %v8336_v55 }
 0x467   : > { %7279 = vmatpush1.bf16.msra.mxu1 %v7278_v4  ;;  %3227 = vmatprep.mubr.f32.mxu1 %v8537_v41  ;;  %v8339_v4 = vpop.permute.xlu1 %8338  ;;  %v8344_v45 = vpop.permute.xlu0 %8343 }
 0x468   : > { %7281 = vmatprep.subr.bf16.mxu1 %v7280_v23  ;;  %v7310_v23 = vpack.c.bf16 %v6152_v52, %v6150_v3  ;;  %v8341_v12 = vunpack.i.h.bf16 %v8339_v4  ;;  %v8340_v43 = vunpack.i.l.bf16 %v8339_v4 }
 0x46a   : > { %3228 = vmatmul.mubr.f32.gmra.mrb[10].mxu1 %v3140_v7  ;;  %v6160_v7 = vld [vmem:[%s13123_s5 + $0x890] sm:$0xff]  ;;  %v3294_v48 = vsel %vm1328_vm0, %v8340_v43, %v8341_v12 }
 0x46b   : > { %7283 = vmatpush1.bf16.msra.mxu1 %v7282_v13  ;;  %3363 = vmatprep.mubr.f32.mxu1 %v8537_v41  ;;  %v6161_v13 = vld [vmem:[%s13123_s5 + $0x898] sm:$0xff]  ;;  %v8349_v5 = vpop.permute.xlu1 %8348  ;;  %v8354_v17 = vpop.permute.xlu0 %8353 }
 0x46c   : > { %7285 = vmatprep.subr.bf16.mxu1 %v7284_v6  ;;  %v7314_v6 = vpack.c.bf16 %v6156_v58, %v6154_v15  ;;  %v7316_v61 = vpack.c.bf16 %v6161_v13, %v6159_v47  ;;  %v8351_v30 = vunpack.i.h.bf16 %v8349_v5  ;;  %v8350_v29 = vunpack.i.l.bf16 %v8349_v5  ;;  %v6179_v5 = vld [vmem:[%s13125_s7 + $0x228] sm:$0xff] }
 0x46d   : > { %v8356_v9 = vunpack.i.h.bf16 %v8354_v17  ;;  %v8355_v51 = vunpack.i.l.bf16 %v8354_v17  ;;  %v6178_v17 = vld [vmem:[%s13125_s7 + $0x220] sm:$0xff] }
 0x46f   : > { %7287 = vmatpush1.bf16.msra.mxu1 %v7286_v57  ;;  %v6165_v57 = vld [vmem:[%s13123_s5 + $0x8b8] sm:$0xff]  ;;  %v3447_v42 = vsel %vm1328_vm0, %v8355_v51, %v8356_v9  ;;  %v6180_v9 = vld [vmem:[%s13125_s7 + $0x230] sm:$0xff]  ;;  %v6183_v51 = vld [vmem:[%s13125_s7 + $0x248] sm:$0xff] }
 0x470   : > { %7289 = vmatprep.subr.bf16.mxu1 %v7288_v19  ;;  %v7318_v19 = vpack.c.bf16 %v6160_v7, %v6158_v60  ;;  %v7320_v31 = vpack.c.bf16 %v6165_v57, %v6163_v44 }
 0x473   : > { %7291 = vmatpush1.bf16.msra.mxu1 %v7290_v59  ;;  %v6169_v59 = vld [vmem:[%s13123_s5 + $0x8d8] sm:$0xff] }
 0x474   : > { %7293 = vmatprep.subr.bf16.mxu1 %v7292_v21  ;;  %v7322_v21 = vpack.c.bf16 %v6164_v62, %v6162_v56  ;;  %v7324_v35 = vpack.c.bf16 %v6169_v59, %v6167_v32 }
 0x477   : > { %7295 = vmatpush1.bf16.msra.mxu1 %v7294_v24  ;;  %v6173_v24 = vld [vmem:[%s13123_s5 + $0x8f8] sm:$0xff] }
 0x478   : > { %7297 = vmatprep.subr.bf16.mxu1 %v7296_v18  ;;  %v7326_v18 = vpack.c.bf16 %v6168_v16, %v6166_v36  ;;  %v7328_v37 = vpack.c.bf16 %v6173_v24, %v6171_v63 }
 0x47b   : > { %7299 = vmatpush1.bf16.msra.mxu1 %v7298_v53  ;;  %v8346_v53 = vunpack.i.h.bf16 %v8344_v45 }
 0x47c   : > { %7301 = vmatprep.subr.bf16.mxu1 %v7300_v33  ;;  %v8345_v33 = vunpack.i.l.bf16 %v8344_v45  ;;  %v6177_v45 = vld [vmem:[%s13125_s7 + $0x218] sm:$0xff] }
 0x47e   : > { %3364 = vmatmul.mubr.f32.vlgmr.msra.gmra.mrb[4].mxu1 %v3291_v34  ;;  %v3445_v50 = vsel %vm1328_vm0, %v8345_v33, %v8346_v53  ;;  %v13132_v34 = vlaneseq  ;;  %v7332_v53 = vpack.c.bf16 %v6177_v45, %v6175_v20  ;;  %v6176_v33 = vld [vmem:[%s13125_s7 + $0x210] sm:$0xff]  ;;  %v6215_v45 = vld [vmem:[%s13125_s7 + $0x348] sm:$0xff] }
 0x47f   : > { %7303 = vmatpush1.bf16.msra.mxu1 %v7302_v49  ;;  %3369 = vmatprep.mubr.f32.mxu1 %v8537_v41  ;;  %v3446_v49 = vsel %vm1328_vm0, %v8350_v29, %v8351_v30  ;;  %v6181_v30 = vld [vmem:[%s13125_s7 + $0x238] sm:$0xff]  ;;  %v6212_v20 = vld [vmem:[%s13125_s7 + $0x330] sm:$0xff] }
 0x480   : > { %7305 = vmatprep.subr.bf16.mxu1 %v7304_v10  ;;  %v8359_v10 = vpop.permute.xlu1 %8358  ;;  %vm391_vm1 = vcmp.lt.s32.totalorder %v13132_v34, 272  ;;  %v10955_v38 = vshrl.u32 %v13132_v34, 7  ;;  %7333 = vmatprep.subr.bf16.mxu0 %v7332_v53  ;;  %v6189_v34 = vld [vmem:[%s13125_s7 + $0x278] sm:$0xff] }
 0x481   : > { %v8361_v0 = vunpack.i.h.bf16 %v8359_v10  ;;  %v8360_v28 = vunpack.i.l.bf16 %v8359_v10  ;;  %393 = vst.msk [vmem:[#allocation4] ss:$8 sm:$0x7] %vm391_vm1, %v8537_v41  ;;  %396 = vst.msk [vmem:[#allocation4 + $0x61] ss:$8 sm:$0x7] %vm391_vm1, %v8537_v41  ;;  %v7338_v10 = vpack.c.bf16 %v6180_v9, %v6178_v17 }
 0x482   : > { %3370 = vmatmul.mubr.f32.gmra.mrb[6].mxu1 %v3292_v25  ;;  %399 = vst.msk [vmem:[#allocation4] sm:$0xff] %vm398_vm3, %v8537_v41  ;;  %v3554_v26 = vsub.s32 0, %v10955_v38 }
 0x483   : > { %7307 = vmatpush1.bf16.msra.mxu1 %v7306_v8  ;;  %3375 = vmatprep.mubr.f32.mxu1 %v8537_v41  ;;  %v3448_v40 = vsel %vm1328_vm0, %v8360_v28, %v8361_v0  ;;  %v3558_v8 = vsub.s32 1, %v10955_v38  ;;  %406 = vst.msk [vmem:[#allocation4 + $0x10] sm:$0xff] %vm405_vm4, %v8537_v41  ;;  %v6182_v28 = vld [vmem:[%s13125_s7 + $0x240] sm:$0xff] }
 0x484   : > { %7309 = vmatprep.subr.bf16.mxu1 %v7308_v14  ;;  %v3555_v14 = vrot.slane %v3550_v2, %v3554_v26  ;;  %404 = vst.msk [vmem:[#allocation4 + $0x60] sm:$0x3] %vm403_vm7, %v8537_v41 }
 0x485   : > { %v3559_v3 = vrot.slane %v3550_v2, %v3558_v8  ;;  %411 = vst.msk [vmem:[#allocation4 + $0x70] sm:$0x3] %vm410_vm8, %v8537_v41 }
 0x486   : > { %3376 = vmatmul.mubr.f32.gmra.mrb[8].mxu1 %v3293_v46 }
 0x487   : > { %7311 = vmatpush1.bf16.msra.mxu1 %v7310_v23  ;;  %3381 = vmatprep.mubr.f32.mxu1 %v8537_v41 }
 0x488   : > { %7313 = vmatprep.subr.bf16.mxu1 %v7312_v1 }
 0x48a   : > { %3382 = vmatmul.mubr.f32.gmra.mrb[10].mxu1 %v3294_v48 }
 0x48b   : > { %7315 = vmatpush1.bf16.msra.mxu1 %v7314_v6  ;;  %3517 = vmatprep.mubr.f32.mxu1 %v8537_v41 }
 0x48c   : > { %7317 = vmatprep.subr.bf16.mxu1 %v7316_v61 }
 0x48f   : > { %7319 = vmatpush1.bf16.msra.mxu1 %v7318_v19 }
 0x490   : > { %7321 = vmatprep.subr.bf16.mxu1 %v7320_v31 }
 0x493   : > { %7323 = vmatpush1.bf16.msra.mxu1 %v7322_v21 }
 0x494   : > { %7325 = vmatprep.subr.bf16.mxu1 %v7324_v35 }
 0x497   : > { %7327 = vmatpush1.bf16.msra.mxu1 %v7326_v18 }
 0x498   : > { %7329 = vmatprep.subr.bf16.mxu1 %v7328_v37 }
 0x49b   : > { %7331 = vmatpush1.bf16.msra.mxu1 %v7330_v27  ;;  %v6174_v27 = vld [vmem:[%s13125_s7 + $0x200] sm:$0xff] }
 0x49c   : > { %v7334_v29 = vpack.c.bf16 %v6176_v33, %v6174_v27  ;;  %v6217_v27 = vld [vmem:[%s13125_s7 + $0x358] sm:$0xff] }
 0x49d   : > { %v7372_v33 = vpack.c.bf16 %v6217_v27, %v6215_v45 }
 0x49e   : > { %3518 = vmatmul.mubr.f32.vlgmr.msra.gmra.mrb[4].mxu1 %v3445_v50  ;;  %v7336_v50 = vpack.c.bf16 %v6181_v30, %v6179_v5  ;;  %7335 = vmatpush1.bf16.msra.mxu0 %v7334_v29  ;;  %v6214_v5 = vld [vmem:[%s13125_s7 + $0x340] sm:$0xff]  ;;  %v6216_v30 = vld [vmem:[%s13125_s7 + $0x350] sm:$0xff]  ;;  %v6219_v29 = vld [vmem:[%s13125_s7 + $0x368] sm:$0xff] }
 0x49f   : > { %3523 = vmatprep.mubr.f32.mxu1 %v8537_v41  ;;  %v7374_v17 = vpack.c.bf16 %v6216_v30, %v6214_v5 }
 0x4a0   : > { %7337 = vmatprep.subr.bf16.mxu0 %v7336_v50  ;;  %v6221_v50 = vld [vmem:[%s13125_s7 + $0x378] sm:$0xff] }
 0x4a1   : > { %v7376_v9 = vpack.c.bf16 %v6221_v50, %v6219_v29 }
 0x4a2   : > { %3524 = vmatmul.mubr.f32.gmra.mrb[6].mxu1 %v3446_v49  ;;  %v6185_v49 = vld [vmem:[%s13125_s7 + $0x258] sm:$0xff]  ;;  %7339 = vmatpush1.bf16.msra.mxu0 %v7338_v10  ;;  %v6223_v10 = vld [vmem:[%s13125_s7 + $0x388] sm:$0xff] }
 0x4a3   : > { %3529 = vmatprep.mubr.f32.mxu1 %v8537_v41  ;;  %v7340_v0 = vpack.c.bf16 %v6185_v49, %v6183_v51  ;;  %v6218_v51 = vld [vmem:[%s13125_s7 + $0x360] sm:$0xff]  ;;  %v6220_v49 = vld [vmem:[%s13125_s7 + $0x370] sm:$0xff] }
 0x4a5   : > { %7341 = vmatprep.subr.bf16.mxu0 %v7340_v0  ;;  %v6225_v0 = vld [vmem:[%s13125_s7 + $0x398] sm:$0xff] }
 0x4a6   : > { %3530 = vmatmul.mubr.f32.gmra.mrb[8].mxu1 %v3447_v42  ;;  %v6184_v42 = vld [vmem:[%s13125_s7 + $0x250] sm:$0xff] }
 0x4a7   : > { %3535 = vmatprep.mubr.f32.mxu1 %v8537_v41  ;;  %v7342_v2 = vpack.c.bf16 %v6184_v42, %v6182_v28  ;;  %v7378_v28 = vpack.c.bf16 %v6220_v49, %v6218_v51  ;;  %v7380_v42 = vpack.c.bf16 %v6225_v0, %v6223_v10 }
 0x4a9   : > { %7343 = vmatpush1.bf16.msra.mxu0 %v7342_v2  ;;  %v6227_v2 = vld [vmem:[%s13125_s7 + $0x3a8] sm:$0xff] }
 0x4aa   : > { %3536 = vmatmul.mubr.f32.gmra.mrb[10].mxu1 %v3448_v40  ;;  %v6187_v40 = vld [vmem:[%s13125_s7 + $0x268] sm:$0xff] }
 0x571   : > { %v3519_v52 = vpop.f32.mrb[4].mxu1 }
 0x572   : > { %v3562_v55 = vadd.f32 %v3555_v14, %v3519_v52  ;;  %v3521_v39 = vpop.f32.mrb[5].mxu1  ;;  %v6188_v52 = vld [vmem:[%s13125_s7 + $0x270] sm:$0xff] }
 0x573   : > { %v3563_v25 = vadd.f32 %v3559_v3, %v3521_v39  ;;  %v6193_v39 = vld [vmem:[%s13125_s7 + $0x298] sm:$0xff] }
 0x574   : > { %v3570_v22 = vmax.f32 %v3562_v55, 0.0  ;;  %v6191_v55 = vld [vmem:[%s13125_s7 + $0x288] sm:$0xff] }
 0x575   : > { %v3571_v54 = vmax.f32 %v3563_v25, 0.0  ;;  %v3525_v4 = vpop.f32.mrb[6].mxu1 }
 0x576   : > { %v3586_v23 = vrot.slane %v3570_v22, 7  ;;  %v3564_v1 = vadd.f32 %v3555_v14, %v3525_v4  ;;  %v3527_v15 = vpop.f32.mrb[7].mxu1  ;;  %v7348_v22 = vpack.c.bf16 %v6193_v39, %v6191_v55  ;;  %v6192_v4 = vld [vmem:[%s13125_s7 + $0x290] sm:$0xff]  ;;  %v6226_v55 = vld [vmem:[%s13125_s7 + $0x3a0] sm:$0xff] }
 0x577   : > { %v3587_v58 = vrot.slane %v3571_v54, 7  ;;  %v3565_v12 = vadd.f32 %v3559_v3, %v3527_v15  ;;  %v6190_v54 = vld [vmem:[%s13125_s7 + $0x280] sm:$0xff]  ;;  %v6228_v39 = vld [vmem:[%s13125_s7 + $0x3b0] sm:$0xff] }
 0x578   : > { %v3572_v43 = vmax.f32 %v3564_v1, 0.0  ;;  %3600 = vrot.lane.b32.xlu0 %v3586_v23, %s8540_s24  ;;  %v6197_v1 = vld [vmem:[%s13125_s7 + $0x2b8] sm:$0xff]  ;;  %v7350_v15 = vpack.c.bf16 %v6192_v4, %v6190_v54  ;;  %v7386_v54 = vpack.c.bf16 %v6228_v39, %v6226_v55 }
 0x579   : > { %v3573_v46 = vmax.f32 %v3565_v12, 0.0  ;;  %3602 = vrot.lane.b32.xlu1 %v3587_v58, %s8540_s24  ;;  %v3531_v47 = vpop.f32.mrb[8].mxu1  ;;  %v6194_v12 = vld [vmem:[%s13125_s7 + $0x2a0] sm:$0xff] }
 0x57a   : > { %v3588_v13 = vrot.slane %v3572_v43, 7  ;;  %v3566_v6 = vadd.f32 %v3555_v14, %v3531_v47  ;;  %v3533_v61 = vpop.f32.mrb[9].mxu1  ;;  %v6196_v43 = vld [vmem:[%s13125_s7 + $0x2b0] sm:$0xff]  ;;  %v6201_v47 = vld [vmem:[%s13125_s7 + $0x2d8] sm:$0xff] }
 0x57b   : > { %v3590_v60 = vrot.slane %v3573_v46, 7  ;;  %v3567_v7 = vadd.f32 %v3559_v3, %v3533_v61  ;;  %v6199_v46 = vld [vmem:[%s13125_s7 + $0x2c8] sm:$0xff]  ;;  %v6198_v61 = vld [vmem:[%s13125_s7 + $0x2c0] sm:$0xff] }
 0x57c   : > { %v3574_v48 = vmax.f32 %v3566_v6, 0.0  ;;  %v3589_v44 = vsel %vm610_vm2, %v3586_v23, %v3588_v13  ;;  %v6195_v23 = vld [vmem:[%s13125_s7 + $0x2a8] sm:$0xff]  ;;  %v7356_v6 = vpack.c.bf16 %v6201_v47, %v6199_v46  ;;  %v6234_v47 = vld [vmem:[%s13125_s7 + $0x3e0] sm:$0xff] }
 0x57d   : > { %v3575_v57 = vmax.f32 %v3567_v7, 0.0  ;;  %3604 = vrot.lane.b32.xlu0 %v3589_v44, %s8540_s24  ;;  %v3537_v19 = vpop.f32.mrb[10].mxu1  ;;  %v3591_v31 = vsel %vm610_vm2, %v3587_v58, %v3590_v60  ;;  %v7352_v58 = vpack.c.bf16 %v6197_v1, %v6195_v23  ;;  %v6203_v7 = vld [vmem:[%s13125_s7 + $0x2e8] sm:$0xff]  ;;  %v6230_v23 = vld [vmem:[%s13125_s7 + $0x3c0] sm:$0xff]  ;;  %v6232_v1 = vld [vmem:[%s13125_s7 + $0x3d0] sm:$0xff] }
 0x57e   : > { %v3592_v56 = vrot.slane %v3574_v48, 7  ;;  %v3568_v62 = vadd.f32 %v3555_v14, %v3537_v19  ;;  %3606 = vrot.lane.b32.xlu1 %v3591_v31, %s8540_s24  ;;  %v3539_v32 = vpop.f32.mrb[11].mxu1  ;;  %v7344_v14 = vpack.c.bf16 %v6189_v34, %v6187_v40  ;;  %v6205_v48 = vld [vmem:[%s13125_s7 + $0x2f8] sm:$0xff]  ;;  %v6202_v19 = vld [vmem:[%s13125_s7 + $0x2e0] sm:$0xff]  ;;  %v6204_v31 = vld [vmem:[%s13125_s7 + $0x2f0] sm:$0xff] }
 0x57f   : > { %v3594_v59 = vrot.slane %v3575_v57, 7  ;;  %v3569_v21 = vadd.f32 %v3559_v3, %v3539_v32  ;;  %v6186_v3 = vld [vmem:[%s13125_s7 + $0x260] sm:$0xff]  ;;  %v7360_v57 = vpack.c.bf16 %v6205_v48, %v6203_v7  ;;  %v7362_v32 = vpack.c.bf16 %v6204_v31, %v6202_v19  ;;  %v6224_v34 = vld [vmem:[%s13125_s7 + $0x390] sm:$0xff]  ;;  %v3669_v7 = vld [vmem:[%s13125_s7 + $0x8] sm:$0xff] }
 0x580   : > { %v3576_v35 = vmax.f32 %v3568_v62, 0.0  ;;  %v3593_v36 = vsel %vm610_vm2, %v3588_v13, %v3592_v56  ;;  %v7346_v25 = vpack.c.bf16 %v6188_v52, %v6186_v3  ;;  %7345 = vmatprep.subr.bf16.mxu0 %v7344_v14  ;;  %v7354_v13 = vpack.c.bf16 %v6196_v43, %v6194_v12  ;;  %v6209_v62 = vld [vmem:[%s13125_s7 + $0x318] sm:$0xff]  ;;  %v6222_v40 = vld [vmem:[%s13125_s7 + $0x380] sm:$0xff] }
 0x581   : > { %v3577_v16 = vmax.f32 %v3569_v21, 0.0  ;;  %3608 = vrot.lane.b32.xlu0 %v3593_v36, %s8540_s24  ;;  %v3595_v63 = vsel %vm610_vm2, %v3590_v60, %v3594_v59  ;;  %v6200_v60 = vld [vmem:[%s13125_s7 + $0x2d0] sm:$0xff]  ;;  %v6206_v21 = vld [vmem:[%s13125_s7 + $0x300] sm:$0xff]  ;;  %v6211_v36 = vld [vmem:[%s13125_s7 + $0x328] sm:$0xff]  ;;  %v7382_v3 = vpack.c.bf16 %v6224_v34, %v6222_v40 }
 0x582   : > { %v10979_v24 = vrot.slane %v3576_v35, 7  ;;  %3610 = vrot.lane.b32.xlu1 %v3595_v63, %s8540_s24  ;;  %7347 = vmatpush1.bf16.msra.mxu0 %v7346_v25  ;;  %v7358_v44 = vpack.c.bf16 %v6200_v60, %v6198_v61  ;;  %v6208_v35 = vld [vmem:[%s13125_s7 + $0x310] sm:$0xff]  ;;  %v6229_v14 = vld [vmem:[%s13125_s7 + $0x3b8] sm:$0xff]  ;;  %v6231_v25 = vld [vmem:[%s13125_s7 + $0x3c8] sm:$0xff] }
 0x583   : > { %v10982_v18 = vrot.slane %v3577_v16, 7  ;;  %7349 = vmatprep.subr.bf16.mxu0 %v7348_v22  ;;  %v6213_v16 = vld [vmem:[%s13125_s7 + $0x338] sm:$0xff]  ;;  %v7366_v63 = vpack.c.bf16 %v6208_v35, %v6206_v21  ;;  %v7384_v52 = vpack.c.bf16 %v6229_v14, %v6227_v2 }
 0x584   : > { %v3597_v37 = vsel %vm610_vm2, %v3592_v56, %v10979_v24  ;;  %v6207_v56 = vld [vmem:[%s13125_s7 + $0x308] sm:$0xff]  ;;  %v6233_v22 = vld [vmem:[%s13125_s7 + $0x3d8] sm:$0xff] }
 0x585   : > { %3612 = vrot.lane.b32.xlu0 %v3597_v37, %s8540_s24  ;;  %v3599_v11 = vsel %vm610_vm2, %v3594_v59, %v10982_v18  ;;  %v7364_v59 = vpack.c.bf16 %v6209_v62, %v6207_v56  ;;  %v7368_v37 = vpack.c.bf16 %v6213_v16, %v6211_v36  ;;  %v7388_v4 = vpack.c.bf16 %v6233_v22, %v6231_v25  ;;  %v6237_v12 = vld [vmem:[%s13125_s7 + $0x3f8] sm:$0xff] }
 0x586   : > { %3614 = vrot.lane.b32.xlu1 %v3599_v11, %s8540_s24  ;;  %7351 = vmatpush1.bf16.msra.mxu0 %v7350_v15  ;;  %v6210_v11 = vld [vmem:[%s13125_s7 + $0x320] sm:$0xff]  ;;  %v6235_v15 = vld [vmem:[%s13125_s7 + $0x3e8] sm:$0xff]  ;;  %vm3640_vm2 = vcmask 1047617   ;;  %v3671_v48 = vld [vmem:[%s13125_s7 + $0x18] sm:$0xff] }
 0x587   : > { %7353 = vmatprep.subr.bf16.mxu0 %v7352_v58  ;;  %v7370_v53 = vpack.c.bf16 %v6212_v20, %v6210_v11  ;;  %v7390_v58 = vpack.c.bf16 %v6232_v1, %v6230_v23  ;;  %v7392_v43 = vpack.c.bf16 %v6237_v12, %v6235_v15 }
 0x58a   : > { %7355 = vmatpush1.bf16.msra.mxu0 %v7354_v13  ;;  %v6236_v13 = vld [vmem:[%s13125_s7 + $0x3f0] sm:$0xff] }
 0x58b   : > { %7357 = vmatprep.subr.bf16.mxu0 %v7356_v6  ;;  %v7394_v61 = vpack.c.bf16 %v6236_v13, %v6234_v47 }
 0x58e   : > { %7359 = vmatpush1.bf16.msra.mxu0 %v7358_v44  ;;  %v7396_v44 = vpack.c.bf16 %v3671_v48, %v3669_v7 }
 0x58f   : > { %7361 = vmatprep.subr.bf16.mxu0 %v7360_v57 }
 0x592   : > { %7363 = vmatpush1.bf16.msra.mxu0 %v7362_v32 }
 0x593   : > { %7365 = vmatprep.subr.bf16.mxu0 %v7364_v59 }
 0x596   : > { %7367 = vmatpush1.bf16.msra.mxu0 %v7366_v63 }
 0x597   : > { %7369 = vmatprep.subr.bf16.mxu0 %v7368_v37 }
 0x59a   : > { %7371 = vmatpush1.bf16.msra.mxu0 %v7370_v53 }
 0x59b   : > { %7373 = vmatprep.subr.bf16.mxu0 %v7372_v33 }
 0x59e   : > { %7375 = vmatpush1.bf16.msra.mxu0 %v7374_v17 }
 0x59f   : > { %7377 = vmatprep.subr.bf16.mxu0 %v7376_v9 }
 0x5a2   : > { %7379 = vmatpush1.bf16.msra.mxu0 %v7378_v28 }
 0x5a3   : > { %7381 = vmatprep.subr.bf16.mxu0 %v7380_v42 }
 0x5a6   : > { %7383 = vmatpush1.bf16.msra.mxu0 %v7382_v3 }
 0x5a7   : > { %7385 = vmatprep.subr.bf16.mxu0 %v7384_v52 }
 0x5aa   : > { %7387 = vmatpush1.bf16.msra.mxu0 %v7386_v54 }
 0x5ab   : > { %7389 = vmatprep.subr.bf16.mxu0 %v7388_v4 }
 0x5ae   : > { %7391 = vmatpush1.bf16.msra.mxu0 %v7390_v58 }
 0x5af   : > { %7393 = vmatprep.subr.bf16.mxu0 %v7392_v43 }
 0x5b2   : > { %7395 = vmatpush1.bf16.msra.mxu0 %v7394_v61 }
 0x5b3   : > { %7397 = vmatprep.subr.bf16.mxu0 %v7396_v44 }
 0x5ea   : > { %v3601_v46 = vpop.permute.xlu0 %3600 }
 0x5eb   : > { %3641 = vst.msk [vmem:[#allocation4] sm:$0xfe] %vm3640_vm2, %v3601_v46  ;;  %v3603_v6 = vpop.permute.xlu1 %3602 }
 0x5ec   : > { %v3620_v60 = vsel %vm398_vm3, %v3601_v46, %v3603_v6  ;;  %3644 = vst.msk [vmem:[#allocation4 + $0x10] sm:$0xfe] %vm3643_vm5, %v3603_v6 }
 0x5ed   : > { %3642 = vst [vmem:[#allocation4 + $0x8] sm:$0xfe] %v3620_v60 }
 0x5ef   : > { %v3605_v57 = vpop.permute.xlu0 %3604 }
 0x5f0   : > { %3646 = vst.msk [vmem:[#allocation4 + $0x18] sm:$0xff] %vm3645_vm6, %v3605_v57  ;;  %v3607_v19 = vpop.permute.xlu1 %3606 }
 0x5f1   : > { %v11191_v31 = vsel %vm398_vm3, %v3605_v57, %v3607_v19  ;;  %3648 = vst.msk [vmem:[#allocation4 + $0x28] sm:$0xff] %vm398_vm3, %v3607_v19 }
 0x5f2   : > { %3647 = vst [vmem:[#allocation4 + $0x20] sm:$0xff] %v11191_v31  ;;  %v11195_v56 = vld [vmem:[#allocation4] sm:$0xff]  ;;  %v4541_v43 = vrot.slane %v11191_v31, 1 }
 0x5f3   : > { %v3609_v62 = vpop.permute.xlu0 %3608  ;;  %3813 = vrot.lane.b32.xlu1 %v11195_v56, %s8539_s17  ;;  %v3732_v32 = vld [vmem:[#allocation4 + $0x10] sm:$0xff]  ;;  %v4442_v60 = vld [vmem:[#allocation4] sm:$0xfe] }
 0x5f4   : > { %3649 = vst.msk [vmem:[#allocation4 + $0x30] sm:$0xff] %vm3645_vm6, %v3609_v62  ;;  %v3611_v59 = vpop.permute.xlu1 %3610  ;;  %v11200_v21 = vld [vmem:[#allocation4 + $0x8] sm:$0xff]  ;;  %v4444_v14 = vld [vmem:[#allocation4 + $0x10] sm:$0xfe] }
 0x5f5   : > { %v11203_v35 = vsel %vm398_vm3, %v3609_v62, %v3611_v59  ;;  %3651 = vst.msk [vmem:[#allocation4 + $0x40] sm:$0xff] %vm398_vm3, %v3611_v59  ;;  %v8362_v36 = vpack.i.bf16 %v3732_v32, %v11200_v21  ;;  %v4443_v55 = vld [vmem:[#allocation4 + $0x8] sm:$0xfe]  ;;  %v4543_v58 = vrot.slane %v4444_v14, 1  ;;  %v4537_v62 = vrot.slane %v4442_v60, 1  ;;  %v3675_v14 = vld [vmem:[%s13125_s7 + $0x38] sm:$0xff] }
 0x5f6   : > { %3650 = vst [vmem:[#allocation4 + $0x38] sm:$0xff] %v11203_v35  ;;  %v4540_v15 = vrot.slane %v4443_v55, 1  ;;  %v4548_v6 = vrot.slane %v11203_v35, 1  ;;  %v3677_v60 = vld [vmem:[%s13125_s7 + $0x48] sm:$0xff] }
 0x5f7   : > { %8363 = vrot.lane.b32.xlu0 %v8362_v36, %s8539_s17  ;;  %v3613_v16 = vpop.permute.xlu0 %3612  ;;  %v11209_v63 = vld [vmem:[#allocation4 + $0x18] sm:$0xff] }
 0x5f8   : > { %3652 = vst.msk [vmem:[#allocation4 + $0x48] sm:$0xff] %vm3645_vm6, %v3613_v16  ;;  %v3615_v37 = vpop.permute.xlu1 %3614  ;;  %v11212_v11 = vld [vmem:[#allocation4 + $0x28] sm:$0xff]  ;;  %v8372_v20 = vpack.i.bf16 %v11203_v35, %v11209_v63  ;;  %v11260_v28 = vld [vmem:[#allocation4 + $0x18] sm:$0xff]  ;;  %v4542_v13 = vsel %vm1631_vm9, %v4540_v15, %v4541_v43  ;;  %v4538_v7 = vrot.slane %v11209_v63, 1  ;;  %v4549_v19 = vsel %vm1631_vm9, %v4541_v43, %v4548_v6  ;;  %v3672_v43 = vld [vmem:[%s13125_s7 + $0x20] sm:$0xff] }
 0x5f9   : > { %v11217_v45 = vsel %vm398_vm3, %v3613_v16, %v3615_v37  ;;  %3654 = vst.msk [vmem:[#allocation4 + $0x58] sm:$0xff] %vm398_vm3, %v3615_v37  ;;  %v8367_v27 = vpack.i.bf16 %v11212_v11, %v11191_v31  ;;  %v5183_v29 = vrot.slane %v11212_v11, 2  ;;  %v11258_v0 = vld [vmem:[#allocation4 + $0x20] sm:$0xff]  ;;  %v4977_v39 = vrot.slane %v11260_v28, 2 }
 0x5fa   : > { %3653 = vst [vmem:[#allocation4 + $0x50] sm:$0xff] %v11217_v45  ;;  %8373 = vrot.lane.b32.xlu1 %v8372_v20, %s8539_s17  ;;  %v4980_v3 = vrot.slane %v11258_v0, 2  ;;  %v4544_v4 = vrot.slane %v11212_v11, 1  ;;  %v4554_v32 = vrot.slane %v11217_v45, 1  ;;  %v6566_v28 = vld [vmem:[%s13125_s7 + $0xe40] sm:$0xff] }
 0x5fb   : > { %8368 = vrot.lane.b32.xlu0 %v8367_v27, %s8539_s17  ;;  %v11225_v53 = vld [vmem:[#allocation4 + $0x30] sm:$0xff] }
 0x5fc   : > { %v11227_v33 = vld [vmem:[#allocation4 + $0x40] sm:$0xff]  ;;  %v4238_v40 = vld [vmem:[#allocation4 + $0x30] sm:$0xff]  ;;  %v4545_v46 = vsel %vm1631_vm9, %v4543_v58, %v4544_v4  ;;  %v4546_v44 = vrot.slane %v11225_v53, 1 }
 0x5fd   : > { %v8377_v5 = vpack.i.bf16 %v11225_v53, %v11227_v33  ;;  %v5189_v30 = vrot.slane %v11227_v33, 2  ;;  %v4239_v42 = vld [vmem:[#allocation4 + $0x38] sm:$0xff]  ;;  %v4982_v25 = vrot.slane %v4238_v40, 2  ;;  %v4550_v47 = vrot.slane %v11227_v33, 1  ;;  %v3673_v40 = vld [vmem:[%s13125_s7 + $0x28] sm:$0xff] }
 0x5fe   : > { %v4984_v52 = vrot.slane %v4239_v42, 2  ;;  %v11305_v61 = vpack.i.bf16 %v4545_v46, %v4542_v13  ;;  %v7400_v58 = vpack.c.bf16 %v3675_v14, %v3673_v40  ;;  %v3674_v46 = vld [vmem:[%s13125_s7 + $0x30] sm:$0xff] }
 0x5ff   : > { %8378 = vrot.lane.b32.xlu0 %v8377_v5, %s8539_s17  ;;  %v11242_v51 = vsel %vm2624_vm10, %v5183_v29, %v5189_v30  ;;  %v11244_v49 = vld [vmem:[#allocation4 + $0x48] sm:$0xff]  ;;  %v11284_v41 = vsel %vm2624_vm10, %v4977_v39, %v4982_v25  ;;  %v4551_v48 = vsel %vm1631_vm9, %v4544_v4, %v4550_v47 }
 0x600   : > { %v11234_v50 = vld [vmem:[#allocation4 + $0x58] sm:$0xff]  ;;  %v11264_v2 = vld [vmem:[#allocation4 + $0x48] sm:$0xff]  ;;  %v11277_v23 = vsel %vm2624_vm10, %v4980_v3, %v4984_v52  ;;  %v4552_v57 = vrot.slane %v11244_v49, 1  ;;  %v11318_v59 = vpack.i.bf16 %v4551_v48, %v4549_v19  ;;  %v7402_v19 = vpack.c.bf16 %v3674_v46, %v3672_v43 }
 0x601   : > { %v8382_v17 = vpack.i.bf16 %v11234_v50, %v11217_v45  ;;  %v5195_v9 = vrot.slane %v11234_v50, 2  ;;  %v11262_v34 = vld [vmem:[#allocation4 + $0x50] sm:$0xff]  ;;  %v4986_v54 = vrot.slane %v11264_v2, 2  ;;  %v5191_v11 = vrot.slane %v11244_v49, 2 }
 0x602   : > { %v4988_v22 = vrot.slane %v11262_v34, 2  ;;  %v4553_v16 = vsel %vm1631_vm9, %v4546_v44, %v4552_v57  ;;  %v6579_v34 = vld [vmem:[%s13125_s7 + $0xea8] sm:$0xff] }
 0x603   : > { %3831 = vrot.lane.b32.xlu0 %v11244_v49, %s8539_s17  ;;  %8383 = vrot.lane.b32.xlu1 %v8382_v17, %s8539_s17  ;;  %v11252_v10 = vsel %vm2624_vm10, %v5189_v30, %v5195_v9  ;;  %v11294_v12 = vsel %vm2624_vm10, %v4982_v25, %v4986_v54  ;;  %v3668_v30 = vld [vmem:[%s13125_s7] sm:$0xff] }
 0x604   : > { %v11289_v1 = vsel %vm2624_vm10, %v4984_v52, %v4988_v22 }
 0x607   : > { %4096 = vrot.lane.b32.xlu0 %v11195_v56, %s8541_s20  ;;  %8388 = vrot.lane.b32.xlu1 %v8362_v36, %s8541_s20  ;;  %v11321_v36 = vsel %vm1631_vm9, %v4537_v62, %v4538_v7 }
 0x60b   : > { %8398 = vrot.lane.b32.xlu0 %v8372_v20, %s8541_s20  ;;  %8393 = vrot.lane.b32.xlu1 %v8367_v27, %s8541_s20  ;;  %v4555_v20 = vsel %vm1631_vm9, %v4548_v6, %v4554_v32 }
 0x60f   : > { %8408 = vrot.lane.b32.xlu0 %v8382_v17, %s8541_s20  ;;  %8403 = vrot.lane.b32.xlu1 %v8377_v5, %s8541_s20  ;;  %v3670_v17 = vld [vmem:[%s13125_s7 + $0x10] sm:$0xff] }
 0x610   : > { %v7398_v25 = vpack.c.bf16 %v3670_v17, %v3668_v30  ;;  %v3681_v30 = vld [vmem:[%s13125_s7 + $0x68] sm:$0xff]  ;;  %v3683_v17 = vld [vmem:[%s13125_s7 + $0x78] sm:$0xff] }
 0x613   : > { %3616 = vrot.lane.b32.xlu0 %v10979_v24, %s8540_s24  ;;  %4114 = vrot.lane.b32.xlu1 %v11244_v49, %s8541_s20  ;;  %v4556_v24 = vrot.slane %v11234_v50, 1  ;;  %v6253_v50 = vld [vmem:[%s13125_s7 + $0x478] sm:$0xff] }
 0x615   : > { %v4557_v37 = vsel %vm1631_vm9, %v4550_v47, %v4556_v24 }
 0x616   : > { %v11337_v27 = vpack.i.bf16 %v4553_v16, %v4557_v37  ;;  %v3676_v37 = vld [vmem:[%s13125_s7 + $0x40] sm:$0xff] }
 0x617   : > { %8413 = vrot.lane.b32.xlu0 %v11305_v61, %s8539_s17  ;;  %3618 = vrot.lane.b32.xlu1 %v10982_v18, %s8540_s24  ;;  %v4547_v18 = vsel %vm1631_vm9, %v4538_v7, %v4546_v44  ;;  %v3679_v7 = vld [vmem:[%s13125_s7 + $0x58] sm:$0xff] }
 0x618   : > { %v11339_v33 = vpack.i.bf16 %v4555_v20, %v4547_v18  ;;  %v7404_v16 = vpack.c.bf16 %v3679_v7, %v3677_v60  ;;  %v3678_v18 = vld [vmem:[%s13125_s7 + $0x50] sm:$0xff] }
 0x61b   : > { %8418 = vrot.lane.b32.xlu0 %v11318_v59, %s8539_s17  ;;  %4564 = vrot.lane.b32.xlu1 %v11321_v36, %s8539_s17 }
 0x61f   : > { %8428 = vrot.lane.b32.xlu0 %v11337_v27, %s8539_s17  ;;  %8423 = vrot.lane.b32.xlu1 %v11339_v33, %s8539_s17 }
 0x665   : > { %v3814_v5 = vpop.permute.xlu1 %3813 }
 0x669   : > { %v8364_v42 = vpop.permute.xlu0 %8363 }
 0x66a   : > { %v8366_v52 = vunpack.i.h.bf16 %v8364_v42  ;;  %v8365_v55 = vunpack.i.l.bf16 %v8364_v42 }
 0x66c   : > { %v3838_v4 = vsel %vm1328_vm0, %v8365_v55, %v8366_v52  ;;  %v3837_v15 = vsel %vm1328_vm0, %v3814_v5, %v8365_v55  ;;  %v8374_v47 = vpop.permute.xlu1 %8373  ;;  %v7406_v52 = vpack.c.bf16 %v3678_v18, %v3676_v37 }
 0x66d   : > { %3917 = vmatprep.mubr.f32.mxu0 %v3838_v4  ;;  %v8369_v13 = vpop.permute.xlu0 %8368  ;;  %v8375_v6 = vunpack.i.l.bf16 %v8374_v47  ;;  %v8376_v14 = vunpack.i.h.bf16 %v8374_v47  ;;  %v3680_v4 = vld [vmem:[%s13125_s7 + $0x60] sm:$0xff]  ;;  %v3685_v47 = vld [vmem:[%s13125_s7 + $0x88] sm:$0xff] }
 0x66e   : > { %v8371_v48 = vunpack.i.h.bf16 %v8369_v13  ;;  %v8370_v44 = vunpack.i.l.bf16 %v8369_v13  ;;  %3918 = vmatmul.mubr.f32.vlgmr.msra.gmra.mrb[2].mxu0 %v3837_v15  ;;  %v3682_v15 = vld [vmem:[%s13125_s7 + $0x70] sm:$0xff]  ;;  %v3687_v13 = vld [vmem:[%s13125_s7 + $0x98] sm:$0xff] }
 0x66f   : > { %7399 = vmatpush1.bf16.msra.mxu0 %v7398_v25  ;;  %v7408_v25 = vpack.c.bf16 %v3683_v17, %v3681_v30  ;;  %v7410_v7 = vpack.c.bf16 %v3682_v15, %v3680_v4 }
 0x670   : > { %7401 = vmatprep.subr.bf16.mxu0 %v7400_v58  ;;  %v3840_v62 = vsel %vm1328_vm0, %v8370_v44, %v8371_v48  ;;  %v3839_v20 = vsel %vm1328_vm0, %v8375_v6, %v8370_v44  ;;  %v7412_v44 = vpack.c.bf16 %v3687_v13, %v3685_v47 }
 0x671   : > { %v8379_v5 = vpop.permute.xlu0 %8378  ;;  %3923 = vmatprep.mubr.f32.mxu0 %v3840_v62  ;;  %v3686_v62 = vld [vmem:[%s13125_s7 + $0x90] sm:$0xff] }
 0x672   : > { %v8381_v42 = vunpack.i.h.bf16 %v8379_v5  ;;  %v8380_v40 = vunpack.i.l.bf16 %v8379_v5  ;;  %3924 = vmatmul.mubr.f32.gmra.mrb[4].mxu0 %v3839_v20  ;;  %v3689_v20 = vld [vmem:[%s13125_s7 + $0xa8] sm:$0xff]  ;;  %v3691_v5 = vld [vmem:[%s13125_s7 + $0xb8] sm:$0xff] }
 0x673   : > { %7403 = vmatpush1.bf16.msra.mxu0 %v7402_v19  ;;  %v3684_v19 = vld [vmem:[%s13125_s7 + $0x80] sm:$0xff]  ;;  %v7416_v17 = vpack.c.bf16 %v3691_v5, %v3689_v20 }
 0x674   : > { %7405 = vmatprep.subr.bf16.mxu0 %v7404_v16  ;;  %v3842_v55 = vsel %vm1328_vm0, %v8376_v14, %v8380_v40  ;;  %v3841_v58 = vsel %vm1328_vm0, %v8381_v42, %v8376_v14  ;;  %v7414_v30 = vpack.c.bf16 %v3686_v62, %v3684_v19  ;;  %v3688_v42 = vld [vmem:[%s13125_s7 + $0xa0] sm:$0xff]  ;;  %v3690_v40 = vld [vmem:[%s13125_s7 + $0xb0] sm:$0xff] }
 0x675   : > { %v3832_v43 = vpop.permute.xlu0 %3831  ;;  %v8384_v46 = vpop.permute.xlu1 %8383  ;;  %3929 = vmatprep.mubr.f32.mxu0 %v3842_v55  ;;  %v3693_v55 = vld [vmem:[%s13125_s7 + $0xc8] sm:$0xff]  ;;  %v7418_v15 = vpack.c.bf16 %v3690_v40, %v3688_v42  ;;  %v3696_v5 = vld [vmem:[%s13125_s7 + $0xe0] sm:$0xff] }
 0x676   : > { %v8386_v6 = vunpack.i.h.bf16 %v8384_v46  ;;  %v8385_v60 = vunpack.i.l.bf16 %v8384_v46  ;;  %3930 = vmatmul.mubr.f32.gmra.mrb[6].mxu0 %v3841_v58  ;;  %v3694_v46 = vld [vmem:[%s13125_s7 + $0xd0] sm:$0xff] }
 0x677   : > { %7407 = vmatpush1.bf16.msra.mxu0 %v7406_v52 }
 0x678   : > { %7409 = vmatprep.subr.bf16.mxu0 %v7408_v25  ;;  %v3844_v48 = vsel %vm1328_vm0, %v8385_v60, %v8386_v6  ;;  %v3843_v16 = vsel %vm1328_vm0, %v3832_v43, %v8385_v60  ;;  %v3692_v43 = vld [vmem:[%s13125_s7 + $0xc0] sm:$0xff]  ;;  %v3697_v60 = vld [vmem:[%s13125_s7 + $0xe8] sm:$0xff] }
 0x679   : > { %v11407_v37 = vpop.permute.xlu0 %4096  ;;  %v11409_v18 = vpop.permute.xlu1 %8388  ;;  %3935 = vmatprep.mubr.f32.mxu0 %v3844_v48  ;;  %v7422_v62 = vpack.c.bf16 %v3694_v46, %v3692_v43  ;;  %v3700_v43 = vld [vmem:[%s13125_s7 + $0x100] sm:$0xff]  ;;  %v3702_v46 = vld [vmem:[%s13125_s7 + $0x110] sm:$0xff] }
 0x67a   : > { %3936 = vmatmul.mubr.f32.gmra.mrb[8].mxu0 %v3843_v16 }
 0x67b   : > { %7411 = vmatpush1.bf16.msra.mxu0 %v7410_v7  ;;  %4006 = vmatprep.mubr.f32.mxu0 %v11200_v21  ;;  %v3695_v21 = vld [vmem:[%s13125_s7 + $0xd8] sm:$0xff] }
 0x67c   : > { %7413 = vmatprep.subr.bf16.mxu0 %v7412_v44  ;;  %v7420_v58 = vpack.c.bf16 %v3695_v21, %v3693_v55  ;;  %v3699_v7 = vld [vmem:[%s13125_s7 + $0xf8] sm:$0xff]  ;;  %v3701_v55 = vld [vmem:[%s13125_s7 + $0x108] sm:$0xff] }
 0x67d   : > { %v8399_v14 = vpop.permute.xlu0 %8398  ;;  %v11424_v52 = vpop.permute.xlu1 %8393  ;;  %v7424_v20 = vpack.c.bf16 %v3699_v7, %v3697_v60  ;;  %v3703_v21 = vld [vmem:[%s13125_s7 + $0x118] sm:$0xff]  ;;  %v3705_v60 = vld [vmem:[%s13125_s7 + $0x128] sm:$0xff] }
 0x67e   : > { %v8400_v25 = vunpack.i.l.bf16 %v8399_v14  ;;  %v8395_v4 = vunpack.i.l.bf16 %v11424_v52  ;;  %v8401_v48 = vunpack.i.h.bf16 %v8399_v14  ;;  %v3707_v7 = vld [vmem:[%s13125_s7 + $0x138] sm:$0xff] }
 0x67f   : > { %7415 = vmatpush1.bf16.msra.mxu0 %v7414_v30  ;;  %v3698_v30 = vld [vmem:[%s13125_s7 + $0xf0] sm:$0xff] }
 0x680   : > { %7417 = vmatprep.subr.bf16.mxu0 %v7416_v17  ;;  %v11442_v47 = vsel %vm4120_vm11, %v8400_v25, %v8395_v4 }
 0x681   : > { %v11444_v13 = vpop.permute.xlu0 %8408  ;;  %v8404_v6 = vpop.permute.xlu1 %8403 }
 0x682   : > { %v8406_v44 = vunpack.i.h.bf16 %v8404_v6  ;;  %v8405_v19 = vunpack.i.l.bf16 %v8404_v6  ;;  %v8410_v16 = vunpack.i.l.bf16 %v11444_v13 }
 0x683   : > { %7419 = vmatpush1.bf16.msra.mxu0 %v7418_v15  ;;  %v7426_v15 = vpack.c.bf16 %v3698_v30, %v3696_v5  ;;  %v3709_v30 = vld [vmem:[%s13125_s7 + $0x148] sm:$0xff] }
 0x684   : > { %7421 = vmatprep.subr.bf16.mxu0 %v7420_v58  ;;  %v11460_v17 = vsel %vm4120_vm11, %v8401_v48, %v8405_v19  ;;  %v11463_v42 = vsel %vm4120_vm11, %v8406_v44, %v8401_v48  ;;  %v7428_v58 = vpack.c.bf16 %v3703_v21, %v3701_v55  ;;  %v7430_v44 = vpack.c.bf16 %v3702_v46, %v3700_v43  ;;  %v3710_v43 = vld [vmem:[%s13125_s7 + $0x150] sm:$0xff]  ;;  %v3713_v46 = vld [vmem:[%s13125_s7 + $0x168] sm:$0xff] }
 0x685   : > { %v3617_v40 = vpop.permute.xlu0 %3616  ;;  %v4115_v14 = vpop.permute.xlu1 %4114  ;;  %v7432_v19 = vpack.c.bf16 %v3707_v7, %v3705_v60 }
 0x686   : > { %3656 = vst.msk [vmem:[#allocation4 + $0x60] sm:$0x1] %vm3655_vm12, %v3617_v40  ;;  %v11474_v25 = vsel %vm4120_vm11, %v4115_v14, %v8410_v16 }
 0x687   : > { %7423 = vmatpush1.bf16.msra.mxu0 %v7422_v62  ;;  %v3704_v62 = vld [vmem:[%s13125_s7 + $0x120] sm:$0xff] }
 0x688   : > { %7425 = vmatprep.subr.bf16.mxu0 %v7424_v20  ;;  %v3706_v20 = vld [vmem:[%s13125_s7 + $0x130] sm:$0xff] }
 0x689   : > { %v3619_v6 = vpop.permute.xlu1 %3618  ;;  %v7434_v55 = vpack.c.bf16 %v3706_v20, %v3704_v62  ;;  %v3712_v62 = vld [vmem:[%s13125_s7 + $0x160] sm:$0xff]  ;;  %v3714_v20 = vld [vmem:[%s13125_s7 + $0x170] sm:$0xff] }
 0x68a   : > { %v3624_v48 = vsel %vm398_vm3, %v3617_v40, %v3619_v6  ;;  %3659 = vst.msk [vmem:[#allocation4 + $0x70] sm:$0x1] %vm3658_vm13, %v3619_v6  ;;  %v3711_v40 = vld [vmem:[%s13125_s7 + $0x158] sm:$0xff] }
 0x68b   : > { %7427 = vmatpush1.bf16.msra.mxu0 %v7426_v15  ;;  %3657 = vst [vmem:[#allocation4 + $0x68] sm:$0x1] %v3624_v48  ;;  %v7436_v15 = vpack.c.bf16 %v3711_v40, %v3709_v30  ;;  %v3717_v40 = vld [vmem:[%s13125_s7 + $0x188] sm:$0xff] }
 0x68c   : > { %7429 = vmatprep.subr.bf16.mxu0 %v7428_v58  ;;  %v3708_v58 = vld [vmem:[%s13125_s7 + $0x140] sm:$0xff] }
 0x68d   : > { %v4454_v5 = vld [vmem:[#allocation4 + $0x60] sm:$0x1]  ;;  %v7438_v7 = vpack.c.bf16 %v3710_v43, %v3708_v58  ;;  %v5101_v58 = vld [vmem:[#allocation4 + $0x10] sm:$0xfc] }
 0x68e   : > { %v4558_v14 = vrot.slane %v4454_v5, 1  ;;  %v3718_v43 = vld [vmem:[%s13125_s7 + $0x190] sm:$0xff] }
 0x68f   : > { %7431 = vmatpush1.bf16.msra.mxu0 %v7430_v44 }
 0x690   : > { %7433 = vmatprep.subr.bf16.mxu0 %v7432_v19  ;;  %v11504_v21 = vsel %vm1631_vm9, %v4552_v57, %v4558_v14  ;;  %v3715_v57 = vld [vmem:[%s13125_s7 + $0x178] sm:$0xff] }
 0x691   : > { %4582 = vrot.lane.b32.xlu0 %v11504_v21, %s8539_s17  ;;  %v4456_v6 = vld [vmem:[#allocation4 + $0x70] sm:$0x1]  ;;  %v7440_v19 = vpack.c.bf16 %v3715_v57, %v3713_v46  ;;  %v3719_v14 = vld [vmem:[%s13125_s7 + $0x198] sm:$0xff]  ;;  %v3721_v46 = vld [vmem:[%s13125_s7 + $0x1a8] sm:$0xff] }
 0x692   : > { %v4455_v60 = vld [vmem:[#allocation4 + $0x68] sm:$0x1]  ;;  %v4562_v44 = vrot.slane %v4456_v6, 1  ;;  %v3723_v57 = vld [vmem:[%s13125_s7 + $0x1b8] sm:$0xff] }
 0x693   : > { %7435 = vmatpush1.bf16.msra.mxu0 %v7434_v55  ;;  %v4560_v48 = vrot.slane %v4455_v60, 1  ;;  %v5182_v60 = vrot.slane %v5101_v58, 2  ;;  %v5185_v58 = vrot.slane %v11225_v53, 2 }
 0x694   : > { %7437 = vmatprep.subr.bf16.mxu0 %v7436_v15  ;;  %v4563_v30 = vsel %vm1631_vm9, %v4556_v24, %v4562_v44  ;;  %v7442_v15 = vpack.c.bf16 %v3714_v20, %v3712_v62  ;;  %v3716_v24 = vld [vmem:[%s13125_s7 + $0x180] sm:$0xff]  ;;  %v3722_v44 = vld [vmem:[%s13125_s7 + $0x1b0] sm:$0xff]  ;;  %v3727_v20 = vld [vmem:[%s13125_s7 + $0x1d8] sm:$0xff] }
 0x695   : > { %4766 = vrot.lane.b32.xlu0 %v11321_v36, %s8541_s20  ;;  %v4561_v5 = vsel %vm1631_vm9, %v4554_v32, %v4560_v48  ;;  %v5100_v36 = vld [vmem:[#allocation4 + $0x8] sm:$0xfc]  ;;  %v7444_v32 = vpack.c.bf16 %v3719_v14, %v3717_v40  ;;  %v7448_v48 = vpack.c.bf16 %v3723_v57, %v3721_v46  ;;  %v5184_v62 = vsel %vm2624_vm10, %v5182_v60, %v5183_v29  ;;  %v3728_v57 = vld [vmem:[%s13125_s7 + $0x1e0] sm:$0xff] }
 0x696   : > { %v8432_v55 = vpack.i.bf16 %v4563_v30, %v4561_v5  ;;  %v5179_v6 = vrot.slane %v5100_v36, 2  ;;  %v5187_v5 = vrot.slane %v11203_v35, 2  ;;  %v3729_v36 = vld [vmem:[%s13125_s7 + $0x1e8] sm:$0xff]  ;;  %v11607_v60 = vsel %vm2624_vm10, %v5185_v58, %v5191_v11 }
 0x697   : > { %7439 = vmatpush1.bf16.msra.mxu0 %v7438_v7  ;;  %v7446_v7 = vpack.c.bf16 %v3718_v43, %v3716_v24 }
 0x698   : > { %7441 = vmatprep.subr.bf16.mxu0 %v7440_v19  ;;  %8433 = vrot.lane.b32.xlu1 %v8432_v55, %s8539_s17  ;;  %v5180_v19 = vrot.slane %v11191_v31, 2 }
 0x699   : > { %8448 = vrot.lane.b32.xlu0 %v11339_v33, %s8541_s20  ;;  %v3720_v33 = vld [vmem:[%s13125_s7 + $0x1a0] sm:$0xff] }
 0x69a   : > { %v5181_v30 = vsel %vm2624_vm10, %v5179_v6, %v5180_v19  ;;  %v7450_v40 = vpack.c.bf16 %v3722_v44, %v3720_v33  ;;  %v3730_v6 = vld [vmem:[%s13125_s7 + $0x1f0] sm:$0xff]  ;;  %v5102_v33 = vld [vmem:[#allocation4 + $0x60] sm:$0x3]  ;;  %v5177_v44 = vrot.slane %v11209_v63, 2 }
 0x69b   : > { %7443 = vmatpush1.bf16.msra.mxu0 %v7442_v15  ;;  %v11576_v14 = vpack.i.bf16 %v5184_v62, %v5181_v30  ;;  %v3726_v15 = vld [vmem:[%s13125_s7 + $0x1d0] sm:$0xff]  ;;  %v8477_v62 = vpack.i.bf16 %v11607_v60, %v11252_v10 }
 0x69c   : > { %7445 = vmatprep.subr.bf16.mxu0 %v7444_v32  ;;  %8438 = vrot.lane.b32.xlu1 %v11305_v61, %s8541_s20  ;;  %v3725_v61 = vld [vmem:[%s13125_s7 + $0x1c8] sm:$0xff]  ;;  %v5188_v32 = vsel %vm2624_vm10, %v5180_v19, %v5187_v5  ;;  %v7458_v19 = vpack.c.bf16 %v3730_v6, %v3728_v57  ;;  %v5186_v6 = vsel %vm2624_vm10, %v5177_v44, %v5185_v58 }
 0x69d   : > { %8458 = vrot.lane.b32.xlu0 %v8432_v55, %s8541_s20  ;;  %v7452_v29 = vpack.c.bf16 %v3727_v20, %v3725_v61  ;;  %v3724_v55 = vld [vmem:[%s13125_s7 + $0x1c0] sm:$0xff]  ;;  %v8467_v43 = vpack.i.bf16 %v11242_v51, %v5188_v32  ;;  %v6247_v58 = vld [vmem:[%s13125_s7 + $0x448] sm:$0xff] }
 0x69e   : > { %v7454_v24 = vpack.c.bf16 %v3726_v15, %v3724_v55  ;;  %v6238_v20 = vld [vmem:[%s13125_s7 + $0x400] sm:$0xff]  ;;  %v5103_v55 = vld [vmem:[#allocation4 + $0x68] sm:$0x3]  ;;  %v6240_v15 = vld [vmem:[%s13125_s7 + $0x410] sm:$0xff] }
 0x69f   : > { %7447 = vmatpush1.bf16.msra.mxu0 %v7446_v7  ;;  %v5099_v7 = vld [vmem:[#allocation4] sm:$0xfc]  ;;  %v7462_v57 = vpack.c.bf16 %v6240_v15, %v6238_v20 }
 0x6a0   : > { %7449 = vmatprep.subr.bf16.mxu0 %v7448_v48  ;;  %8443 = vrot.lane.b32.xlu1 %v11318_v59, %s8541_s20  ;;  %v3731_v59 = vld [vmem:[%s13125_s7 + $0x1f8] sm:$0xff]  ;;  %v6239_v48 = vld [vmem:[%s13125_s7 + $0x408] sm:$0xff]  ;;  %v5176_v61 = vrot.slane %v5099_v7, 2  ;;  %v6250_v15 = vld [vmem:[%s13125_s7 + $0x460] sm:$0xff] }
 0x6a1   : > { %8463 = vrot.lane.b32.xlu0 %v11576_v14, %s8539_s17  ;;  %v7456_v46 = vpack.c.bf16 %v3731_v59, %v3729_v36  ;;  %v5193_v36 = vrot.slane %v11217_v45, 2  ;;  %v6243_v59 = vld [vmem:[%s13125_s7 + $0x428] sm:$0xff] }
 0x6a3   : > { %7451 = vmatpush1.bf16.msra.mxu0 %v7450_v40  ;;  %v5104_v40 = vld [vmem:[#allocation4 + $0x70] sm:$0x3] }
 0x6a4   : > { %7453 = vmatprep.subr.bf16.mxu0 %v7452_v29  ;;  %8453 = vrot.lane.b32.xlu1 %v11337_v27, %s8541_s20  ;;  %v6241_v27 = vld [vmem:[%s13125_s7 + $0x418] sm:$0xff]  ;;  %v5197_v29 = vrot.slane %v5102_v33, 2  ;;  %v6244_v33 = vld [vmem:[%s13125_s7 + $0x430] sm:$0xff] }
 0x6a5   : > { %8468 = vrot.lane.b32.xlu0 %v8467_v43, %s8539_s17  ;;  %v7460_v30 = vpack.c.bf16 %v6241_v27, %v6239_v48  ;;  %v5201_v43 = vrot.slane %v5104_v40, 2  ;;  %v6242_v27 = vld [vmem:[%s13125_s7 + $0x420] sm:$0xff] }
 0x6a6   : > { %v5198_v7 = vsel %vm2624_vm10, %v5191_v11, %v5197_v29  ;;  %v6249_v11 = vld [vmem:[%s13125_s7 + $0x458] sm:$0xff] }
 0x6a7   : > { %7455 = vmatpush1.bf16.msra.mxu0 %v7454_v24  ;;  %v5178_v24 = vsel %vm2624_vm10, %v5176_v61, %v5177_v44  ;;  %v5202_v61 = vsel %vm2624_vm10, %v5195_v9, %v5201_v43 }
 0x6a8   : > { %7457 = vmatprep.subr.bf16.mxu0 %v7456_v46  ;;  %4784 = vrot.lane.b32.xlu1 %v11504_v21, %s8541_s20  ;;  %v6245_v21 = vld [vmem:[%s13125_s7 + $0x438] sm:$0xff]  ;;  %v5199_v46 = vrot.slane %v5103_v55, 2  ;;  %v8492_v44 = vpack.i.bf16 %v5188_v32, %v5178_v24  ;;  %v6246_v32 = vld [vmem:[%s13125_s7 + $0x440] sm:$0xff] }
 0x6a9   : > { %8478 = vrot.lane.b32.xlu0 %v8477_v62, %s8539_s17  ;;  %v7464_v48 = vpack.c.bf16 %v6245_v21, %v6243_v59  ;;  %v8390_v59 = vunpack.i.l.bf16 %v11409_v18  ;;  %v8512_v21 = vpack.i.bf16 %v5198_v7, %v5202_v61 }
 0x6aa   : > { %v5200_v20 = vsel %vm2624_vm10, %v5193_v36, %v5199_v46  ;;  %v6254_v46 = vld [vmem:[%s13125_s7 + $0x480] sm:$0xff] }
 0x6ab   : > { %7459 = vmatpush1.bf16.msra.mxu0 %v7458_v19  ;;  %v5194_v19 = vsel %vm2624_vm10, %v5187_v5, %v5193_v36  ;;  %v7466_v5 = vpack.c.bf16 %v6244_v33, %v6242_v27  ;;  %v8482_v9 = vpack.i.bf16 %v5202_v61, %v5200_v20  ;;  %v6252_v36 = vld [vmem:[%s13125_s7 + $0x470] sm:$0xff]  ;;  %v6258_v33 = vld [vmem:[%s13125_s7 + $0x4a0] sm:$0xff]  ;;  %v6267_v61 = vld [vmem:[%s13125_s7 + $0x4e8] sm:$0xff] }
 0x6ac   : > { %7461 = vmatprep.subr.bf16.mxu0 %v7460_v30  ;;  %5203 = vrot.lane.b32.xlu1 %v5178_v24, %s8539_s17  ;;  %v8472_v62 = vpack.i.bf16 %v5194_v19, %v5186_v6  ;;  %v7468_v30 = vpack.c.bf16 %v6249_v11, %v6247_v58  ;;  %v8502_v40 = vpack.i.bf16 %v11252_v10, %v5194_v19  ;;  %v8391_v10 = vunpack.i.h.bf16 %v11409_v18  ;;  %v6263_v19 = vld [vmem:[%s13125_s7 + $0x4c8] sm:$0xff] }
 0x6ad   : > { %5221 = vrot.lane.b32.xlu0 %v5198_v7, %s8539_s17  ;;  %v7474_v24 = vpack.c.bf16 %v6252_v36, %v6250_v15  ;;  %v8497_v7 = vpack.i.bf16 %v5186_v6, %v11242_v51  ;;  %v6265_v51 = vld [vmem:[%s13125_s7 + $0x4d8] sm:$0xff]  ;;  %v8507_v6 = vpack.i.bf16 %v5200_v20, %v11607_v60 }
 0x6ae   : > { %4007 = vmatmul.mubr.f32.vlgmr.msra.gmra.mrb[2].mxu0 %v11195_v56  ;;  %v6248_v56 = vld [vmem:[%s13125_s7 + $0x450] sm:$0xff]  ;;  %v7484_v11 = vpack.c.bf16 %v6265_v51, %v6263_v19  ;;  %v6269_v60 = vld [vmem:[%s13125_s7 + $0x4f8] sm:$0xff] }
 0x6af   : > { %4012 = vmatprep.mubr.f32.mxu0 %v11191_v31  ;;  %7463 = vmatpush1.bf16.msra.mxu0 %v7462_v57  ;;  %v6251_v31 = vld [vmem:[%s13125_s7 + $0x468] sm:$0xff]  ;;  %v7470_v29 = vpack.c.bf16 %v6248_v56, %v6246_v32  ;;  %v6256_v57 = vld [vmem:[%s13125_s7 + $0x490] sm:$0xff]  ;;  %v6277_v15 = vld [vmem:[%s13125_s7 + $0x538] sm:$0xff] }
 0x6b0   : > { %8473 = vrot.lane.b32.xlu1 %v8472_v62, %s8539_s17  ;;  %7465 = vmatprep.subr.bf16.mxu0 %v7464_v48  ;;  %v7472_v55 = vpack.c.bf16 %v6253_v50, %v6251_v31  ;;  %v7478_v48 = vpack.c.bf16 %v6256_v57, %v6254_v46  ;;  %v6264_v62 = vld [vmem:[%s13125_s7 + $0x4d0] sm:$0xff]  ;;  %v6271_v56 = vld [vmem:[%s13125_s7 + $0x508] sm:$0xff]  ;;  %v6273_v31 = vld [vmem:[%s13125_s7 + $0x518] sm:$0xff] }
 0x6b1   : > { %8493 = vrot.lane.b32.xlu0 %v8492_v44, %s8541_s20  ;;  %v6262_v44 = vld [vmem:[%s13125_s7 + $0x4c0] sm:$0xff]  ;;  %v6268_v32 = vld [vmem:[%s13125_s7 + $0x4f0] sm:$0xff]  ;;  %v6289_v19 = vld [vmem:[%s13125_s7 + $0x598] sm:$0xff] }
 0x6b2   : > { %4013 = vmatmul.mubr.f32.gmra.mrb[4].mxu0 %v11209_v63  ;;  %v6257_v63 = vld [vmem:[%s13125_s7 + $0x498] sm:$0xff]  ;;  %v7486_v20 = vpack.c.bf16 %v6264_v62, %v6262_v44  ;;  %v6278_v57 = vld [vmem:[%s13125_s7 + $0x540] sm:$0xff]  ;;  %v6291_v44 = vld [vmem:[%s13125_s7 + $0x5a8] sm:$0xff] }
 0x6b3   : > { %4018 = vmatprep.mubr.f32.mxu0 %v11203_v35  ;;  %7467 = vmatpush1.bf16.msra.mxu0 %v7466_v5  ;;  %v6255_v35 = vld [vmem:[%s13125_s7 + $0x488] sm:$0xff]  ;;  %v7488_v5 = vpack.c.bf16 %v6269_v60, %v6267_v61  ;;  %v6293_v62 = vld [vmem:[%s13125_s7 + $0x5b8] sm:$0xff] }
 0x6b4   : > { %8483 = vrot.lane.b32.xlu1 %v8482_v9, %s8539_s17  ;;  %7469 = vmatprep.subr.bf16.mxu0 %v7468_v30  ;;  %v7476_v43 = vpack.c.bf16 %v6257_v63, %v6255_v35  ;;  %v6266_v30 = vld [vmem:[%s13125_s7 + $0x4e0] sm:$0xff]  ;;  %v7492_v9 = vpack.c.bf16 %v6273_v31, %v6271_v56  ;;  %v7512_v60 = vpack.c.bf16 %v6293_v62, %v6291_v44 }
 0x6b5   : > { %8503 = vrot.lane.b32.xlu0 %v8502_v40, %s8541_s20  ;;  %v7490_v50 = vpack.c.bf16 %v6268_v32, %v6266_v30  ;;  %v6270_v40 = vld [vmem:[%s13125_s7 + $0x500] sm:$0xff]  ;;  %v6295_v30 = vld [vmem:[%s13125_s7 + $0x5c8] sm:$0xff]  ;;  %v6297_v32 = vld [vmem:[%s13125_s7 + $0x5d8] sm:$0xff] }
 0x6b6   : > { %4019 = vmatmul.mubr.f32.gmra.mrb[6].mxu0 %v11225_v53  ;;  %v6261_v53 = vld [vmem:[%s13125_s7 + $0x4b8] sm:$0xff]  ;;  %v6274_v63 = vld [vmem:[%s13125_s7 + $0x520] sm:$0xff]  ;;  %v7516_v31 = vpack.c.bf16 %v6297_v32, %v6295_v30 }
 0x6b7   : > { %4024 = vmatprep.mubr.f32.mxu0 %v11217_v45  ;;  %7471 = vmatpush1.bf16.msra.mxu0 %v7470_v29  ;;  %v6259_v45 = vld [vmem:[%s13125_s7 + $0x4a8] sm:$0xff]  ;;  %v6272_v29 = vld [vmem:[%s13125_s7 + $0x510] sm:$0xff]  ;;  %v6314_v62 = vld [vmem:[%s13125_s7 + $0x660] sm:$0xff] }
 0x6b8   : > { %8488 = vrot.lane.b32.xlu1 %v11576_v14, %s8541_s20  ;;  %7473 = vmatprep.subr.bf16.mxu0 %v7472_v55  ;;  %v4122_v14 = vsel %vm4120_vm11, %v8390_v59, %v8391_v10  ;;  %v7480_v27 = vpack.c.bf16 %v6261_v53, %v6259_v45  ;;  %v6275_v55 = vld [vmem:[%s13125_s7 + $0x528] sm:$0xff]  ;;  %v7494_v36 = vpack.c.bf16 %v6272_v29, %v6270_v40  ;;  %v6276_v10 = vld [vmem:[%s13125_s7 + $0x530] sm:$0xff]  ;;  %v6301_v29 = vld [vmem:[%s13125_s7 + $0x5f8] sm:$0xff] }
 0x6b9   : > { %8513 = vrot.lane.b32.xlu0 %v8512_v21, %s8541_s20  ;;  %v7496_v35 = vpack.c.bf16 %v6277_v15, %v6275_v55  ;;  %v6279_v21 = vld [vmem:[%s13125_s7 + $0x548] sm:$0xff]  ;;  %v6280_v45 = vld [vmem:[%s13125_s7 + $0x550] sm:$0xff] }
 0x6ba   : > { %4025 = vmatmul.mubr.f32.gmra.mrb[8].mxu0 %v11244_v49  ;;  %v6260_v49 = vld [vmem:[%s13125_s7 + $0x4b0] sm:$0xff]  ;;  %v6283_v53 = vld [vmem:[%s13125_s7 + $0x568] sm:$0xff] }
 0x6bb   : > { %7475 = vmatpush1.bf16.msra.mxu0 %v7474_v24  ;;  %4201 = vmatprep.mubr.f32.mxu0 %v4122_v14  ;;  %v7482_v58 = vpack.c.bf16 %v6260_v49, %v6258_v33  ;;  %v6281_v24 = vld [vmem:[%s13125_s7 + $0x558] sm:$0xff]  ;;  %v6284_v33 = vld [vmem:[%s13125_s7 + $0x570] sm:$0xff]  ;;  %v6287_v49 = vld [vmem:[%s13125_s7 + $0x588] sm:$0xff] }
 0x6bc   : > { %8498 = vrot.lane.b32.xlu1 %v8497_v7, %s8541_s20  ;;  %7477 = vmatprep.subr.bf16.mxu0 %v7476_v43  ;;  %v7498_v43 = vpack.c.bf16 %v6276_v10, %v6274_v63  ;;  %v7500_v46 = vpack.c.bf16 %v6281_v24, %v6279_v21  ;;  %v6285_v14 = vld [vmem:[%s13125_s7 + $0x578] sm:$0xff]  ;;  %v7502_v7 = vpack.c.bf16 %v6280_v45, %v6278_v57  ;;  %v6299_v40 = vld [vmem:[%s13125_s7 + $0x5e8] sm:$0xff] }
 0x6bd   : > { %v7520_v15 = vpack.c.bf16 %v6301_v29, %v6299_v40  ;;  %v6303_v63 = vld [vmem:[%s13125_s7 + $0x608] sm:$0xff]  ;;  %v6305_v10 = vld [vmem:[%s13125_s7 + $0x618] sm:$0xff]  ;;  %v6322_v29 = vld [vmem:[%s13125_s7 + $0x6a0] sm:$0xff] }
 0x6be   : > { %v7524_v24 = vpack.c.bf16 %v6305_v10, %v6303_v63  ;;  %v6307_v57 = vld [vmem:[%s13125_s7 + $0x628] sm:$0xff]  ;;  %v6309_v45 = vld [vmem:[%s13125_s7 + $0x638] sm:$0xff]  ;;  %v6326_v63 = vld [vmem:[%s13125_s7 + $0x6c0] sm:$0xff] }
 0x6bf   : > { %7479 = vmatpush1.bf16.msra.mxu0 %v7478_v48  ;;  %v7504_v48 = vpack.c.bf16 %v6285_v14, %v6283_v53  ;;  %v8396_v53 = vunpack.i.h.bf16 %v11424_v52  ;;  %v6317_v52 = vld [vmem:[%s13125_s7 + $0x678] sm:$0xff]  ;;  %v6328_v10 = vld [vmem:[%s13125_s7 + $0x6d0] sm:$0xff] }
 0x6c0   : > { %8508 = vrot.lane.b32.xlu1 %v8507_v6, %s8541_s20  ;;  %7481 = vmatprep.subr.bf16.mxu0 %v7480_v27  ;;  %v6282_v27 = vld [vmem:[%s13125_s7 + $0x560] sm:$0xff]  ;;  %v7508_v6 = vpack.c.bf16 %v6289_v19, %v6287_v49  ;;  %v6311_v49 = vld [vmem:[%s13125_s7 + $0x648] sm:$0xff]  ;;  %v6313_v19 = vld [vmem:[%s13125_s7 + $0x658] sm:$0xff] }
 0x6c1   : > { %v7506_v51 = vpack.c.bf16 %v6284_v33, %v6282_v27  ;;  %v6308_v27 = vld [vmem:[%s13125_s7 + $0x630] sm:$0xff]  ;;  %v4121_v33 = vsel %vm4120_vm11, %v11407_v37, %v8390_v59  ;;  %v7532_v18 = vpack.c.bf16 %v6313_v19, %v6311_v49  ;;  %v6310_v37 = vld [vmem:[%s13125_s7 + $0x640] sm:$0xff]  ;;  %v6339_v49 = vld [vmem:[%s13125_s7 + $0x728] sm:$0xff] }
 0x6c2   : > { %v6312_v59 = vld [vmem:[%s13125_s7 + $0x650] sm:$0xff]  ;;  %v6341_v19 = vld [vmem:[%s13125_s7 + $0x738] sm:$0xff] }
 0x6c3   : > { %7483 = vmatpush1.bf16.msra.mxu0 %v7482_v58  ;;  %v6286_v58 = vld [vmem:[%s13125_s7 + $0x580] sm:$0xff] }
 0x6c4   : > { %7485 = vmatprep.subr.bf16.mxu0 %v7484_v11  ;;  %v6288_v11 = vld [vmem:[%s13125_s7 + $0x590] sm:$0xff] }
 0x6c5   : > { %v7510_v61 = vpack.c.bf16 %v6288_v11, %v6286_v58  ;;  %v6315_v58 = vld [vmem:[%s13125_s7 + $0x668] sm:$0xff]  ;;  %v7534_v11 = vpack.c.bf16 %v6312_v59, %v6310_v37  ;;  %v6340_v37 = vld [vmem:[%s13125_s7 + $0x730] sm:$0xff] }
 0x6c6   : > { %v7536_v44 = vpack.c.bf16 %v6317_v52, %v6315_v58  ;;  %v6343_v59 = vld [vmem:[%s13125_s7 + $0x748] sm:$0xff]  ;;  %v6345_v58 = vld [vmem:[%s13125_s7 + $0x758] sm:$0xff] }
 0x6c7   : > { %7487 = vmatpush1.bf16.msra.mxu0 %v7486_v20  ;;  %v6290_v20 = vld [vmem:[%s13125_s7 + $0x5a0] sm:$0xff] }
 0x6c8   : > { %7489 = vmatprep.subr.bf16.mxu0 %v7488_v5  ;;  %v6292_v5 = vld [vmem:[%s13125_s7 + $0x5b0] sm:$0xff] }
 0x6c9   : > { %v7514_v56 = vpack.c.bf16 %v6292_v5, %v6290_v20  ;;  %v6319_v20 = vld [vmem:[%s13125_s7 + $0x688] sm:$0xff]  ;;  %v4323_v5 = vrot.slane %v11258_v0, 1  ;;  %v6521_v0 = vld [vmem:[%s13125_s7 + $0xcd8] sm:$0xff] }
 0x6cb   : > { %7491 = vmatpush1.bf16.msra.mxu0 %v7490_v50  ;;  %v6294_v50 = vld [vmem:[%s13125_s7 + $0x5c0] sm:$0xff] }
 0x6cc   : > { %7493 = vmatprep.subr.bf16.mxu0 %v7492_v9  ;;  %v6296_v9 = vld [vmem:[%s13125_s7 + $0x5d0] sm:$0xff] }
 0x6cd   : > { %v7518_v55 = vpack.c.bf16 %v6296_v9, %v6294_v50 }
 0x6cf   : > { %7495 = vmatpush1.bf16.msra.mxu0 %v7494_v36  ;;  %v6298_v36 = vld [vmem:[%s13125_s7 + $0x5e0] sm:$0xff] }
 0x6d0   : > { %7497 = vmatprep.subr.bf16.mxu0 %v7496_v35  ;;  %v6300_v35 = vld [vmem:[%s13125_s7 + $0x5f0] sm:$0xff] }
 0x6d1   : > { %v7522_v21 = vpack.c.bf16 %v6300_v35, %v6298_v36 }
 0x6d3   : > { %7499 = vmatpush1.bf16.msra.mxu0 %v7498_v43  ;;  %v6302_v43 = vld [vmem:[%s13125_s7 + $0x600] sm:$0xff] }
 0x6d4   : > { %7501 = vmatprep.subr.bf16.mxu0 %v7500_v46  ;;  %v6304_v46 = vld [vmem:[%s13125_s7 + $0x610] sm:$0xff] }
 0x6d5   : > { %v7526_v14 = vpack.c.bf16 %v6304_v46, %v6302_v43  ;;  %v7550_v43 = vpack.c.bf16 %v6328_v10, %v6326_v63  ;;  %v6358_v63 = vld [vmem:[%s13125_s7 + $0x7c0] sm:$0xff]  ;;  %v6360_v10 = vld [vmem:[%s13125_s7 + $0x7d0] sm:$0xff] }
 0x6d7   : > { %7503 = vmatpush1.bf16.msra.mxu0 %v7502_v7  ;;  %v7528_v7 = vpack.c.bf16 %v6309_v45, %v6307_v57  ;;  %v6330_v57 = vld [vmem:[%s13125_s7 + $0x6e0] sm:$0xff]  ;;  %v6332_v45 = vld [vmem:[%s13125_s7 + $0x6f0] sm:$0xff] }
 0x6d8   : > { %7505 = vmatprep.subr.bf16.mxu0 %v7504_v48  ;;  %v6306_v48 = vld [vmem:[%s13125_s7 + $0x620] sm:$0xff] }
 0x6db   : > { %7507 = vmatpush1.bf16.msra.mxu0 %v7506_v51  ;;  %v4124_v51 = vsel %vm4120_vm11, %v8395_v4, %v8396_v53  ;;  %v8411_v4 = vunpack.i.h.bf16 %v11444_v13  ;;  %v6323_v13 = vld [vmem:[%s13125_s7 + $0x6a8] sm:$0xff] }
 0x6dc   : > { %7509 = vmatprep.subr.bf16.mxu0 %v7508_v6  ;;  %v7530_v6 = vpack.c.bf16 %v6308_v27, %v6306_v48  ;;  %v6335_v53 = vld [vmem:[%s13125_s7 + $0x708] sm:$0xff]  ;;  %v6334_v27 = vld [vmem:[%s13125_s7 + $0x700] sm:$0xff] }
 0x6df   : > { %7511 = vmatpush1.bf16.msra.mxu0 %v7510_v61  ;;  %v6316_v61 = vld [vmem:[%s13125_s7 + $0x670] sm:$0xff] }
 0x6e0   : > { %7513 = vmatprep.subr.bf16.mxu0 %v7512_v60  ;;  %v4235_v60 = vld [vmem:[#allocation4 + $0x8] sm:$0xfe]  ;;  %v7538_v30 = vpack.c.bf16 %v6316_v61, %v6314_v62  ;;  %v6349_v61 = vld [vmem:[%s13125_s7 + $0x778] sm:$0xff] }
 0x6e1   : > { %v4322_v32 = vrot.slane %v4235_v60, 1  ;;  %v6347_v62 = vld [vmem:[%s13125_s7 + $0x768] sm:$0xff] }
 0x6e3   : > { %7515 = vmatpush1.bf16.msra.mxu0 %v7514_v56  ;;  %v4324_v50 = vsel %vm1631_vm9, %v4322_v32, %v4323_v5  ;;  %v6353_v32 = vld [vmem:[%s13125_s7 + $0x798] sm:$0xff] }
 0x6e4   : > { %7517 = vmatprep.subr.bf16.mxu0 %v7516_v31  ;;  %v6318_v31 = vld [vmem:[%s13125_s7 + $0x680] sm:$0xff] }
 0x6e7   : > { %7519 = vmatpush1.bf16.msra.mxu0 %v7518_v55  ;;  %v6324_v55 = vld [vmem:[%s13125_s7 + $0x6b0] sm:$0xff] }
 0x6e8   : > { %7521 = vmatprep.subr.bf16.mxu0 %v7520_v15  ;;  %v6329_v15 = vld [vmem:[%s13125_s7 + $0x6d8] sm:$0xff]  ;;  %v7546_v36 = vpack.c.bf16 %v6324_v55, %v6322_v29  ;;  %v6354_v29 = vld [vmem:[%s13125_s7 + $0x7a0] sm:$0xff]  ;;  %v6356_v55 = vld [vmem:[%s13125_s7 + $0x7b0] sm:$0xff] }
 0x6eb   : > { %7523 = vmatpush1.bf16.msra.mxu0 %v7522_v21  ;;  %v6331_v21 = vld [vmem:[%s13125_s7 + $0x6e8] sm:$0xff] }
 0x6ec   : > { %7525 = vmatprep.subr.bf16.mxu0 %v7524_v24  ;;  %v6333_v24 = vld [vmem:[%s13125_s7 + $0x6f8] sm:$0xff] }
 0x6ed   : > { %v7552_v46 = vpack.c.bf16 %v6333_v24, %v6331_v21  ;;  %v6363_v21 = vld [vmem:[%s13125_s7 + $0x7e8] sm:$0xff]  ;;  %v6365_v24 = vld [vmem:[%s13125_s7 + $0x7f8] sm:$0xff] }
 0x6ee   : > { %4202 = vmatmul.mubr.f32.vlgmr.msra.gmra.mrb[2].mxu0 %v4121_v33  ;;  %v6336_v33 = vld [vmem:[%s13125_s7 + $0x710] sm:$0xff] }
 0x6ef   : > { %4207 = vmatprep.mubr.f32.mxu0 %v4124_v51  ;;  %7527 = vmatpush1.bf16.msra.mxu0 %v7526_v14  ;;  %v6337_v14 = vld [vmem:[%s13125_s7 + $0x718] sm:$0xff]  ;;  %v7558_v51 = vpack.c.bf16 %v6336_v33, %v6334_v27  ;;  %v6366_v33 = vld [vmem:[%s13125_s7 + $0x800] sm:$0xff] }
 0x6f0   : > { %7529 = vmatprep.subr.bf16.mxu0 %v7528_v7  ;;  %v7554_v7 = vpack.c.bf16 %v6332_v45, %v6330_v57  ;;  %v7556_v48 = vpack.c.bf16 %v6337_v14, %v6335_v53  ;;  %v6362_v57 = vld [vmem:[%s13125_s7 + $0x7e0] sm:$0xff]  ;;  %v6364_v45 = vld [vmem:[%s13125_s7 + $0x7f0] sm:$0xff]  ;;  %v6367_v53 = vld [vmem:[%s13125_s7 + $0x808] sm:$0xff] }
 0x6f1   : > { %v6369_v14 = vld [vmem:[%s13125_s7 + $0x818] sm:$0xff] }
 0x6f2   : > { %4208 = vmatmul.mubr.f32.gmra.mrb[4].mxu0 %v11442_v47  ;;  %v6321_v47 = vld [vmem:[%s13125_s7 + $0x698] sm:$0xff]  ;;  %v7588_v27 = vpack.c.bf16 %v6369_v14, %v6367_v53 }
 0x6f3   : > { %4213 = vmatprep.mubr.f32.mxu0 %v11460_v17  ;;  %7531 = vmatpush1.bf16.msra.mxu0 %v7530_v6  ;;  %v4128_v17 = vsel %vm4120_vm11, %v8410_v16, %v8411_v4  ;;  %v7540_v56 = vpack.c.bf16 %v6321_v47, %v6319_v20  ;;  %v6325_v16 = vld [vmem:[%s13125_s7 + $0x6b8] sm:$0xff]  ;;  %v7560_v6 = vpack.c.bf16 %v6341_v19, %v6339_v49  ;;  %v6346_v47 = vld [vmem:[%s13125_s7 + $0x760] sm:$0xff]  ;;  %v6368_v49 = vld [vmem:[%s13125_s7 + $0x810] sm:$0xff] }
 0x6f4   : > { %7533 = vmatprep.subr.bf16.mxu0 %v7532_v18  ;;  %v7544_v40 = vpack.c.bf16 %v6325_v16, %v6323_v13  ;;  %v6338_v18 = vld [vmem:[%s13125_s7 + $0x720] sm:$0xff]  ;;  %v7564_v4 = vpack.c.bf16 %v6345_v58, %v6343_v59  ;;  %v7568_v20 = vpack.c.bf16 %v6349_v61, %v6347_v62  ;;  %v6352_v13 = vld [vmem:[%s13125_s7 + $0x790] sm:$0xff]  ;;  %v6355_v16 = vld [vmem:[%s13125_s7 + $0x7a8] sm:$0xff] }
 0x6f5   : > { %v7562_v52 = vpack.c.bf16 %v6340_v37, %v6338_v18  ;;  %v8523_v19 = vld [vmem:[#allocation4 + $0x18] sm:$0xff]  ;;  %v8525_v61 = vld [vmem:[#allocation4 + $0x30] sm:$0xff] }
 0x6f6   : > { %4214 = vmatmul.mubr.f32.gmra.mrb[6].mxu0 %v11463_v42  ;;  %v6320_v42 = vld [vmem:[%s13125_s7 + $0x690] sm:$0xff]  ;;  %v6373_v18 = vld [vmem:[%s13125_s7 + $0x838] sm:$0xff] }
 0x6f7   : > { %4219 = vmatprep.mubr.f32.mxu0 %v4128_v17  ;;  %7535 = vmatpush1.bf16.msra.mxu0 %v7534_v11  ;;  %v7542_v9 = vpack.c.bf16 %v6320_v42, %v6318_v31  ;;  %v6342_v11 = vld [vmem:[%s13125_s7 + $0x740] sm:$0xff]  ;;  %v6348_v17 = vld [vmem:[%s13125_s7 + $0x770] sm:$0xff]  ;;  %v8524_v37 = vld [vmem:[#allocation4 + $0x38] sm:$0xff] }
 0x6f8   : > { %7537 = vmatprep.subr.bf16.mxu0 %v7536_v44  ;;  %v6344_v44 = vld [vmem:[%s13125_s7 + $0x750] sm:$0xff]  ;;  %v6350_v42 = vld [vmem:[%s13125_s7 + $0x780] sm:$0xff]  ;;  %v4327_v59 = vrot.slane %v8524_v37, 1 }
 0x6f9   : > { %v7566_v60 = vpack.c.bf16 %v6344_v44, %v6342_v11  ;;  %v6370_v11 = vld [vmem:[%s13125_s7 + $0x820] sm:$0xff]  ;;  %v6372_v44 = vld [vmem:[%s13125_s7 + $0x830] sm:$0xff] }
 0x6fa   : > { %4220 = vmatmul.mubr.f32.gmra.mrb[8].mxu0 %v11474_v25  ;;  %v6327_v25 = vld [vmem:[%s13125_s7 + $0x6c8] sm:$0xff] }
 0x6fb   : > { %7539 = vmatpush1.bf16.msra.mxu0 %v7538_v30  ;;  %4409 = vmatprep.mubr.f32.mxu0 %v4324_v50  ;;  %v7548_v35 = vpack.c.bf16 %v6329_v15, %v6327_v25  ;;  %v6351_v30 = vld [vmem:[%s13125_s7 + $0x788] sm:$0xff]  ;;  %v6357_v50 = vld [vmem:[%s13125_s7 + $0x7b8] sm:$0xff] }
 0x6fc   : > { %7541 = vmatprep.subr.bf16.mxu0 %v7540_v56  ;;  %v7570_v56 = vpack.c.bf16 %v6348_v17, %v6346_v47  ;;  %v7572_v31 = vpack.c.bf16 %v6353_v32, %v6351_v30  ;;  %v6359_v25 = vld [vmem:[%s13125_s7 + $0x7c8] sm:$0xff]  ;;  %v6361_v15 = vld [vmem:[%s13125_s7 + $0x7d8] sm:$0xff]  ;;  %v4328_v17 = vsel %vm1631_vm9, %v4323_v5, %v4327_v59  ;;  %v8526_v30 = vld [vmem:[#allocation4 + $0x50] sm:$0xff] }
 0x6fd   : > { %v6377_v47 = vld [vmem:[%s13125_s7 + $0x858] sm:$0xff]  ;;  %v4331_v32 = vrot.slane %v8526_v30, 1  ;;  %v6394_v30 = vld [vmem:[%s13125_s7 + $0x8e0] sm:$0xff] }
 0x6ff   : > { %7543 = vmatpush1.bf16.msra.mxu0 %v7542_v9  ;;  %v7574_v9 = vpack.c.bf16 %v6352_v13, %v6350_v42  ;;  %v6374_v13 = vld [vmem:[%s13125_s7 + $0x840] sm:$0xff] }
 0x700   : > { %7545 = vmatprep.subr.bf16.mxu0 %v7544_v40  ;;  %v7576_v40 = vpack.c.bf16 %v6357_v50, %v6355_v16  ;;  %v6376_v16 = vld [vmem:[%s13125_s7 + $0x850] sm:$0xff] }
 0x703   : > { %7547 = vmatpush1.bf16.msra.mxu0 %v7546_v36  ;;  %v7578_v36 = vpack.c.bf16 %v6356_v55, %v6354_v29  ;;  %v6381_v29 = vld [vmem:[%s13125_s7 + $0x878] sm:$0xff]  ;;  %v4332_v55 = vsel %vm1631_vm9, %v4327_v59, %v4331_v32  ;;  %v6386_v59 = vld [vmem:[%s13125_s7 + $0x8a0] sm:$0xff] }
 0x704   : > { %7549 = vmatprep.subr.bf16.mxu0 %v7548_v35  ;;  %v7580_v35 = vpack.c.bf16 %v6361_v15, %v6359_v25  ;;  %v4242_v15 = vld [vmem:[#allocation4 + $0x60] sm:$0x1] }
 0x707   : > { %7551 = vmatpush1.bf16.msra.mxu0 %v7550_v43  ;;  %v7582_v43 = vpack.c.bf16 %v6360_v10, %v6358_v63  ;;  %v6378_v10 = vld [vmem:[%s13125_s7 + $0x860] sm:$0xff] }
 0x708   : > { %7553 = vmatprep.subr.bf16.mxu0 %v7552_v46  ;;  %v7584_v46 = vpack.c.bf16 %v6365_v24, %v6363_v21  ;;  %v6380_v21 = vld [vmem:[%s13125_s7 + $0x870] sm:$0xff] }
 0x70b   : > { %7555 = vmatpush1.bf16.msra.mxu0 %v7554_v7  ;;  %v7586_v7 = vpack.c.bf16 %v6364_v45, %v6362_v57  ;;  %v6385_v57 = vld [vmem:[%s13125_s7 + $0x898] sm:$0xff] }
 0x70c   : > { %7557 = vmatprep.subr.bf16.mxu0 %v7556_v48  ;;  %v4234_v48 = vld [vmem:[#allocation4] sm:$0xfe] }
 0x70d   : > { %v4319_v58 = vrot.slane %v4234_v48, 1 }
 0x70f   : > { %7559 = vmatpush1.bf16.msra.mxu0 %v7558_v51  ;;  %v4320_v51 = vrot.slane %v8523_v19, 1  ;;  %v6387_v19 = vld [vmem:[%s13125_s7 + $0x8a8] sm:$0xff] }
 0x710   : > { %7561 = vmatprep.subr.bf16.mxu0 %v7560_v6  ;;  %v6371_v6 = vld [vmem:[%s13125_s7 + $0x828] sm:$0xff] }
 0x711   : > { %v4321_v62 = vsel %vm1631_vm9, %v4319_v58, %v4320_v51  ;;  %v6388_v58 = vld [vmem:[%s13125_s7 + $0x8b0] sm:$0xff] }
 0x713   : > { %7563 = vmatpush1.bf16.msra.mxu0 %v7562_v52  ;;  %v7590_v52 = vpack.c.bf16 %v6368_v49, %v6366_v33  ;;  %v6384_v33 = vld [vmem:[%s13125_s7 + $0x890] sm:$0xff] }
 0x714   : > { %7565 = vmatprep.subr.bf16.mxu0 %v7564_v4  ;;  %v7592_v4 = vpack.c.bf16 %v6373_v18, %v6371_v6 }
 0x717   : > { %7567 = vmatpush1.bf16.msra.mxu0 %v7566_v60  ;;  %v4325_v60 = vrot.slane %v8525_v61, 1  ;;  %v6392_v61 = vld [vmem:[%s13125_s7 + $0x8d0] sm:$0xff] }
 0x718   : > { %7569 = vmatprep.subr.bf16.mxu0 %v7568_v20  ;;  %v6375_v20 = vld [vmem:[%s13125_s7 + $0x848] sm:$0xff] }
 0x719   : > { %v7596_v42 = vpack.c.bf16 %v6377_v47, %v6375_v20  ;;  %v4326_v50 = vsel %vm1631_vm9, %v4320_v51, %v4325_v60  ;;  %v6389_v51 = vld [vmem:[%s13125_s7 + $0x8b8] sm:$0xff] }
 0x71a   : > { %v7608_v37 = vpack.c.bf16 %v6389_v51, %v6387_v19  ;;  %v6397_v20 = vld [vmem:[%s13125_s7 + $0x8f8] sm:$0xff]  ;;  %v6414_v19 = vld [vmem:[%s13125_s7 + $0x980] sm:$0xff]  ;;  %v6416_v51 = vld [vmem:[%s13125_s7 + $0x990] sm:$0xff] }
 0x71b   : > { %7571 = vmatpush1.bf16.msra.mxu0 %v7570_v56  ;;  %v7594_v56 = vpack.c.bf16 %v6372_v44, %v6370_v11  ;;  %v7610_v11 = vpack.c.bf16 %v6388_v58, %v6386_v59  ;;  %v6418_v58 = vld [vmem:[%s13125_s7 + $0x9a0] sm:$0xff] }
 0x71c   : > { %7573 = vmatprep.subr.bf16.mxu0 %v7572_v31  ;;  %v4243_v31 = vld [vmem:[#allocation4 + $0x68] sm:$0x1] }
 0x71d   : > { %v4335_v25 = vrot.slane %v4243_v31, 1  ;;  %v6401_v31 = vld [vmem:[%s13125_s7 + $0x918] sm:$0xff] }
 0x71f   : > { %7575 = vmatpush1.bf16.msra.mxu0 %v7574_v9  ;;  %v8527_v9 = vld [vmem:[#allocation4 + $0x48] sm:$0xff]  ;;  %v4336_v14 = vsel %vm1631_vm9, %v4331_v32, %v4335_v25  ;;  %v6396_v32 = vld [vmem:[%s13125_s7 + $0x8f0] sm:$0xff] }
 0x720   : > { %7577 = vmatprep.subr.bf16.mxu0 %v7576_v40  ;;  %v4329_v5 = vrot.slane %v8527_v9, 1  ;;  %v6379_v40 = vld [vmem:[%s13125_s7 + $0x868] sm:$0xff]  ;;  %v6404_v25 = vld [vmem:[%s13125_s7 + $0x930] sm:$0xff] }
 0x721   : > { %v7600_v63 = vpack.c.bf16 %v6381_v29, %v6379_v40  ;;  %v6403_v9 = vld [vmem:[%s13125_s7 + $0x928] sm:$0xff] }
 0x722   : > { %v4330_v24 = vsel %vm1631_vm9, %v4325_v60, %v4329_v5  ;;  %v6395_v60 = vld [vmem:[%s13125_s7 + $0x8e8] sm:$0xff] }
 0x723   : > { %7579 = vmatpush1.bf16.msra.mxu0 %v7578_v36  ;;  %v12103_v36 = vpop.permute.xlu0 %8413 }
 0x724   : > { %7581 = vmatprep.subr.bf16.mxu0 %v7580_v35  ;;  %v7598_v35 = vpack.c.bf16 %v6376_v16, %v6374_v13  ;;  %v8416_v45 = vunpack.i.h.bf16 %v12103_v36  ;;  %v8415_v53 = vunpack.i.l.bf16 %v12103_v36  ;;  %v6398_v16 = vld [vmem:[%s13125_s7 + $0x900] sm:$0xff] }
 0x726   : > { %v4589_v6 = vsel %vm1328_vm0, %v8415_v53, %v8416_v45 }
 0x727   : > { %7583 = vmatpush1.bf16.msra.mxu0 %v7582_v43  ;;  %v4333_v43 = vrot.slane %v4242_v15, 1  ;;  %v6407_v15 = vld [vmem:[%s13125_s7 + $0x948] sm:$0xff] }
 0x728   : > { %7585 = vmatprep.subr.bf16.mxu0 %v7584_v46  ;;  %v6383_v46 = vld [vmem:[%s13125_s7 + $0x888] sm:$0xff] }
 0x729   : > { %v7604_v48 = vpack.c.bf16 %v6385_v57, %v6383_v46  ;;  %v4334_v49 = vsel %vm1631_vm9, %v4329_v5, %v4333_v43  ;;  %v6405_v5 = vld [vmem:[%s13125_s7 + $0x938] sm:$0xff]  ;;  %v6411_v43 = vld [vmem:[%s13125_s7 + $0x968] sm:$0xff] }
 0x72a   : > { %v7624_v29 = vpack.c.bf16 %v6405_v5, %v6403_v9  ;;  %v6413_v46 = vld [vmem:[%s13125_s7 + $0x978] sm:$0xff]  ;;  %v6430_v5 = vld [vmem:[%s13125_s7 + $0xa00] sm:$0xff] }
 0x72b   : > { %7587 = vmatpush1.bf16.msra.mxu0 %v7586_v7  ;;  %v7602_v7 = vpack.c.bf16 %v6380_v21, %v6378_v10  ;;  %v6406_v21 = vld [vmem:[%s13125_s7 + $0x940] sm:$0xff]  ;;  %v7632_v45 = vpack.c.bf16 %v6413_v46, %v6411_v43  ;;  %v6436_v43 = vld [vmem:[%s13125_s7 + $0xa30] sm:$0xff] }
 0x72c   : > { %7589 = vmatprep.subr.bf16.mxu0 %v7588_v27  ;;  %v6382_v27 = vld [vmem:[%s13125_s7 + $0x880] sm:$0xff] }
 0x72d   : > { %v7606_v18 = vpack.c.bf16 %v6384_v33, %v6382_v27  ;;  %v6417_v27 = vld [vmem:[%s13125_s7 + $0x998] sm:$0xff] }
 0x72e   : > { %4410 = vmatmul.mubr.f32.vlgmr.msra.gmra.mrb[2].mxu0 %v4321_v62  ;;  %v6390_v62 = vld [vmem:[%s13125_s7 + $0x8c0] sm:$0xff] }
 0x72f   : > { %4415 = vmatprep.mubr.f32.mxu0 %v4328_v17  ;;  %7591 = vmatpush1.bf16.msra.mxu0 %v7590_v52  ;;  %v6391_v52 = vld [vmem:[%s13125_s7 + $0x8c8] sm:$0xff]  ;;  %v7614_v47 = vpack.c.bf16 %v6392_v61, %v6390_v62  ;;  %v7616_v17 = vpack.c.bf16 %v6397_v20, %v6395_v60  ;;  %v6422_v61 = vld [vmem:[%s13125_s7 + $0x9c0] sm:$0xff]  ;;  %v6424_v60 = vld [vmem:[%s13125_s7 + $0x9d0] sm:$0xff] }
 0x730   : > { %7593 = vmatprep.subr.bf16.mxu0 %v7592_v4  ;;  %v6393_v4 = vld [vmem:[%s13125_s7 + $0x8d8] sm:$0xff]  ;;  %v6427_v20 = vld [vmem:[%s13125_s7 + $0x9e8] sm:$0xff] }
 0x731   : > { %v7612_v44 = vpack.c.bf16 %v6393_v4, %v6391_v52  ;;  %v6420_v52 = vld [vmem:[%s13125_s7 + $0x9b0] sm:$0xff]  ;;  %v6423_v4 = vld [vmem:[%s13125_s7 + $0x9c8] sm:$0xff] }
 0x732   : > { %4416 = vmatmul.mubr.f32.gmra.mrb[4].mxu0 %v4326_v50  ;;  %v6400_v50 = vld [vmem:[%s13125_s7 + $0x910] sm:$0xff] }
 0x733   : > { %4421 = vmatprep.mubr.f32.mxu0 %v4332_v55  ;;  %7595 = vmatpush1.bf16.msra.mxu0 %v7594_v56  ;;  %v6399_v56 = vld [vmem:[%s13125_s7 + $0x908] sm:$0xff]  ;;  %v7622_v40 = vpack.c.bf16 %v6400_v50, %v6398_v16  ;;  %v6402_v55 = vld [vmem:[%s13125_s7 + $0x920] sm:$0xff]  ;;  %v6433_v16 = vld [vmem:[%s13125_s7 + $0xa18] sm:$0xff] }
 0x734   : > { %7597 = vmatprep.subr.bf16.mxu0 %v7596_v42  ;;  %v7618_v42 = vpack.c.bf16 %v6396_v32, %v6394_v30  ;;  %v7620_v13 = vpack.c.bf16 %v6401_v31, %v6399_v56  ;;  %v7646_v30 = vpack.c.bf16 %v6424_v60, %v6422_v61  ;;  %v6426_v56 = vld [vmem:[%s13125_s7 + $0x9e0] sm:$0xff]  ;;  %v6428_v31 = vld [vmem:[%s13125_s7 + $0x9f0] sm:$0xff] }
 0x735   : > { %v7650_v50 = vpack.c.bf16 %v6428_v31, %v6426_v56  ;;  %v6444_v61 = vld [vmem:[%s13125_s7 + $0xa70] sm:$0xff] }
 0x736   : > { %4422 = vmatmul.mubr.f32.gmra.mrb[6].mxu0 %v4330_v24  ;;  %v6408_v24 = vld [vmem:[%s13125_s7 + $0x950] sm:$0xff] }
 0x737   : > { %4427 = vmatprep.mubr.f32.mxu0 %v4336_v14  ;;  %7599 = vmatpush1.bf16.msra.mxu0 %v7598_v35  ;;  %v6409_v35 = vld [vmem:[%s13125_s7 + $0x958] sm:$0xff]  ;;  %v7630_v57 = vpack.c.bf16 %v6408_v24, %v6406_v21  ;;  %v6410_v14 = vld [vmem:[%s13125_s7 + $0x960] sm:$0xff] }
 0x738   : > { %7601 = vmatprep.subr.bf16.mxu0 %v7600_v63  ;;  %v7626_v63 = vpack.c.bf16 %v6404_v25, %v6402_v55  ;;  %v7628_v10 = vpack.c.bf16 %v6409_v35, %v6407_v15  ;;  %v6435_v55 = vld [vmem:[%s13125_s7 + $0xa28] sm:$0xff]  ;;  %v6437_v25 = vld [vmem:[%s13125_s7 + $0xa38] sm:$0xff]  ;;  %v6434_v24 = vld [vmem:[%s13125_s7 + $0xa20] sm:$0xff] }
 0x739   : > { %v7656_v21 = vpack.c.bf16 %v6437_v25, %v6435_v55  ;;  %v7658_v36 = vpack.c.bf16 %v6436_v43, %v6434_v24  ;;  %v6450_v25 = vld [vmem:[%s13125_s7 + $0xaa0] sm:$0xff]  ;;  %v6456_v43 = vld [vmem:[%s13125_s7 + $0xad0] sm:$0xff] }
 0x73a   : > { %4428 = vmatmul.mubr.f32.gmra.mrb[8].mxu0 %v4334_v49  ;;  %v6454_v24 = vld [vmem:[%s13125_s7 + $0xac0] sm:$0xff] }
 0x73b   : > { %7603 = vmatpush1.bf16.msra.mxu0 %v7602_v7  ;;  %4668 = vmatprep.mubr.f32.mxu0 %v4589_v6  ;;  %v6412_v7 = vld [vmem:[%s13125_s7 + $0x970] sm:$0xff]  ;;  %v6419_v6 = vld [vmem:[%s13125_s7 + $0x9a8] sm:$0xff] }
 0x73c   : > { %7605 = vmatprep.subr.bf16.mxu0 %v7604_v48  ;;  %v6415_v48 = vld [vmem:[%s13125_s7 + $0x988] sm:$0xff]  ;;  %v7634_v33 = vpack.c.bf16 %v6412_v7, %v6410_v14  ;;  %v6441_v7 = vld [vmem:[%s13125_s7 + $0xa58] sm:$0xff] }
 0x73d   : > { %v7636_v49 = vpack.c.bf16 %v6417_v27, %v6415_v48  ;;  %v6439_v14 = vld [vmem:[%s13125_s7 + $0xa48] sm:$0xff] }
 0x73f   : > { %7607 = vmatpush1.bf16.msra.mxu0 %v7606_v18  ;;  %v6421_v18 = vld [vmem:[%s13125_s7 + $0x9b8] sm:$0xff] }
 0x740   : > { %7609 = vmatprep.subr.bf16.mxu0 %v7608_v37  ;;  %v7638_v37 = vpack.c.bf16 %v6416_v51, %v6414_v19  ;;  %v7640_v59 = vpack.c.bf16 %v6421_v18, %v6419_v6  ;;  %v6440_v19 = vld [vmem:[%s13125_s7 + $0xa50] sm:$0xff]  ;;  %v6443_v18 = vld [vmem:[%s13125_s7 + $0xa68] sm:$0xff] }
 0x743   : > { %7611 = vmatpush1.bf16.msra.mxu0 %v7610_v11  ;;  %v6425_v11 = vld [vmem:[%s13125_s7 + $0x9d8] sm:$0xff] }
 0x744   : > { %7613 = vmatprep.subr.bf16.mxu0 %v7612_v44  ;;  %v7642_v44 = vpack.c.bf16 %v6420_v52, %v6418_v58  ;;  %v7644_v62 = vpack.c.bf16 %v6425_v11, %v6423_v4 }
 0x747   : > { %7615 = vmatpush1.bf16.msra.mxu0 %v7614_v47  ;;  %v6429_v47 = vld [vmem:[%s13125_s7 + $0x9f8] sm:$0xff] }
 0x748   : > { %7617 = vmatprep.subr.bf16.mxu0 %v7616_v17  ;;  %v4565_v17 = vpop.permute.xlu1 %4564  ;;  %v7648_v32 = vpack.c.bf16 %v6429_v47, %v6427_v20  ;;  %v6447_v20 = vld [vmem:[%s13125_s7 + $0xa88] sm:$0xff]  ;;  %v6449_v47 = vld [vmem:[%s13125_s7 + $0xa98] sm:$0xff] }
 0x749   : > { %v4588_v46 = vsel %vm1328_vm0, %v4565_v17, %v8415_v53  ;;  %v7660_v53 = vpack.c.bf16 %v6441_v7, %v6439_v14  ;;  %v6458_v7 = vld [vmem:[%s13125_s7 + $0xae0] sm:$0xff] }
 0x74b   : > { %7619 = vmatpush1.bf16.msra.mxu0 %v7618_v42  ;;  %v8419_v42 = vpop.permute.xlu0 %8418 }
 0x74c   : > { %7621 = vmatprep.subr.bf16.mxu0 %v7620_v13  ;;  %v6431_v13 = vld [vmem:[%s13125_s7 + $0xa08] sm:$0xff]  ;;  %v8421_v15 = vunpack.i.h.bf16 %v8419_v42  ;;  %v8420_v35 = vunpack.i.l.bf16 %v8419_v42  ;;  %v7668_v42 = vpack.c.bf16 %v6449_v47, %v6447_v20  ;;  %v6477_v47 = vld [vmem:[%s13125_s7 + $0xb78] sm:$0xff] }
 0x74d   : > { %v7652_v9 = vpack.c.bf16 %v6433_v16, %v6431_v13  ;;  %v6446_v13 = vld [vmem:[%s13125_s7 + $0xa80] sm:$0xff]  ;;  %v6448_v16 = vld [vmem:[%s13125_s7 + $0xa90] sm:$0xff]  ;;  %v6475_v20 = vld [vmem:[%s13125_s7 + $0xb68] sm:$0xff] }
 0x74f   : > { %7623 = vmatpush1.bf16.msra.mxu0 %v7622_v40  ;;  %v6432_v40 = vld [vmem:[%s13125_s7 + $0xa10] sm:$0xff] }
 0x750   : > { %7625 = vmatprep.subr.bf16.mxu0 %v7624_v29  ;;  %v8424_v29 = vpop.permute.xlu1 %8423 }
 0x751   : > { %v8426_v27 = vunpack.i.h.bf16 %v8424_v29 }
 0x753   : > { %7627 = vmatpush1.bf16.msra.mxu0 %v7626_v63  ;;  %v8429_v63 = vpop.permute.xlu0 %8428 }
 0x754   : > { %7629 = vmatprep.subr.bf16.mxu0 %v7628_v10  ;;  %v7654_v10 = vpack.c.bf16 %v6432_v40, %v6430_v5  ;;  %v8430_v48 = vunpack.i.l.bf16 %v8429_v63  ;;  %v8431_v51 = vunpack.i.h.bf16 %v8429_v63  ;;  %v6453_v5 = vld [vmem:[%s13125_s7 + $0xab8] sm:$0xff] }
 0x755   : > { %v6457_v63 = vld [vmem:[%s13125_s7 + $0xad8] sm:$0xff] }
 0x756   : > { %v4593_v52 = vsel %vm1328_vm0, %v8426_v27, %v8430_v48  ;;  %v4592_v60 = vsel %vm1328_vm0, %v8431_v51, %v8426_v27  ;;  %v6460_v48 = vld [vmem:[%s13125_s7 + $0xaf0] sm:$0xff]  ;;  %v6463_v27 = vld [vmem:[%s13125_s7 + $0xb08] sm:$0xff] }
 0x757   : > { %7631 = vmatpush1.bf16.msra.mxu0 %v7630_v57  ;;  %v8425_v57 = vunpack.i.l.bf16 %v8424_v29  ;;  %v4583_v31 = vpop.permute.xlu0 %4582  ;;  %v7670_v29 = vpack.c.bf16 %v6448_v16, %v6446_v13  ;;  %v6467_v51 = vld [vmem:[%s13125_s7 + $0xb28] sm:$0xff]  ;;  %v6481_v13 = vld [vmem:[%s13125_s7 + $0xb98] sm:$0xff] }
 0x758   : > { %7633 = vmatprep.subr.bf16.mxu0 %v7632_v45  ;;  %v8434_v45 = vpop.permute.xlu1 %8433 }
 0x759   : > { %v4590_v6 = vsel %vm1328_vm0, %v8425_v57, %v8420_v35  ;;  %v8435_v58 = vunpack.i.l.bf16 %v8434_v45  ;;  %v6461_v57 = vld [vmem:[%s13125_s7 + $0xaf8] sm:$0xff] }
 0x75b   : > { %7635 = vmatpush1.bf16.msra.mxu0 %v7634_v33  ;;  %v4591_v33 = vsel %vm1328_vm0, %v8420_v35, %v8421_v15  ;;  %v6452_v15 = vld [vmem:[%s13125_s7 + $0xab0] sm:$0xff]  ;;  %v6455_v35 = vld [vmem:[%s13125_s7 + $0xac8] sm:$0xff] }
 0x75c   : > { %7637 = vmatprep.subr.bf16.mxu0 %v7636_v49  ;;  %v6438_v49 = vld [vmem:[%s13125_s7 + $0xa40] sm:$0xff]  ;;  %v12311_v4 = vpop.permute.xlu1 %8438 }
 0x75d   : > { %v7662_v11 = vpack.c.bf16 %v6440_v19, %v6438_v49  ;;  %v8441_v17 = vunpack.i.h.bf16 %v12311_v4  ;;  %v6462_v49 = vld [vmem:[%s13125_s7 + $0xb00] sm:$0xff]  ;;  %v6464_v19 = vld [vmem:[%s13125_s7 + $0xb10] sm:$0xff] }
 0x75f   : > { %7639 = vmatpush1.bf16.msra.mxu0 %v7638_v37  ;;  %v6445_v37 = vld [vmem:[%s13125_s7 + $0xa78] sm:$0xff] }
 0x760   : > { %7641 = vmatprep.subr.bf16.mxu0 %v7640_v59  ;;  %v8436_v59 = vunpack.i.h.bf16 %v8434_v45  ;;  %v7678_v45 = vpack.c.bf16 %v6456_v43, %v6454_v24  ;;  %v6486_v43 = vld [vmem:[%s13125_s7 + $0xbc0] sm:$0xff] }
 0x763   : > { %7643 = vmatpush1.bf16.msra.mxu0 %v7642_v44  ;;  %v7664_v44 = vpack.c.bf16 %v6445_v37, %v6443_v18  ;;  %v7686_v18 = vpack.c.bf16 %v6464_v19, %v6462_v49  ;;  %v6497_v49 = vld [vmem:[%s13125_s7 + $0xc18] sm:$0xff] }
 0x764   : > { %7645 = vmatprep.subr.bf16.mxu0 %v7644_v62  ;;  %v6442_v62 = vld [vmem:[%s13125_s7 + $0xa60] sm:$0xff] }
 0x765   : > { %v7666_v56 = vpack.c.bf16 %v6444_v61, %v6442_v62  ;;  %v6470_v61 = vld [vmem:[%s13125_s7 + $0xb40] sm:$0xff] }
 0x767   : > { %7647 = vmatpush1.bf16.msra.mxu0 %v7646_v30  ;;  %v8440_v30 = vunpack.i.l.bf16 %v12311_v4 }
 0x768   : > { %7649 = vmatprep.subr.bf16.mxu0 %v7648_v32  ;;  %v4595_v32 = vsel %vm1328_vm0, %v8435_v58, %v8436_v59  ;;  %v6466_v59 = vld [vmem:[%s13125_s7 + $0xb20] sm:$0xff] }
 0x769   : > { %v4791_v40 = vsel %vm4120_vm11, %v8440_v30, %v8441_v17 }
 0x76b   : > { %7651 = vmatpush1.bf16.msra.mxu0 %v7650_v50  ;;  %v4594_v50 = vsel %vm1328_vm0, %v4583_v31, %v8435_v58  ;;  %v6468_v58 = vld [vmem:[%s13125_s7 + $0xb30] sm:$0xff] }
 0x76c   : > { %7653 = vmatprep.subr.bf16.mxu0 %v7652_v9  ;;  %v6451_v9 = vld [vmem:[%s13125_s7 + $0xaa8] sm:$0xff]  ;;  %v6476_v31 = vld [vmem:[%s13125_s7 + $0xb70] sm:$0xff] }
 0x76d   : > { %v7672_v55 = vpack.c.bf16 %v6453_v5, %v6451_v9  ;;  %v6478_v9 = vld [vmem:[%s13125_s7 + $0xb80] sm:$0xff]  ;;  %v6480_v5 = vld [vmem:[%s13125_s7 + $0xb90] sm:$0xff] }
 0x76e   : > { %4669 = vmatmul.mubr.f32.vlgmr.msra.gmra.mrb[2].mxu0 %v4588_v46  ;;  %v6459_v46 = vld [vmem:[%s13125_s7 + $0xae8] sm:$0xff] }
 0x76f   : > { %4674 = vmatprep.mubr.f32.mxu0 %v4591_v33  ;;  %7655 = vmatpush1.bf16.msra.mxu0 %v7654_v10  ;;  %v7674_v10 = vpack.c.bf16 %v6452_v15, %v6450_v25  ;;  %v7680_v14 = vpack.c.bf16 %v6461_v57, %v6459_v46  ;;  %v6465_v33 = vld [vmem:[%s13125_s7 + $0xb18] sm:$0xff]  ;;  %v6482_v15 = vld [vmem:[%s13125_s7 + $0xba0] sm:$0xff]  ;;  %v6488_v46 = vld [vmem:[%s13125_s7 + $0xbd0] sm:$0xff] }
 0x770   : > { %7657 = vmatprep.subr.bf16.mxu0 %v7656_v21  ;;  %v7676_v21 = vpack.c.bf16 %v6457_v63, %v6455_v35  ;;  %v6484_v35 = vld [vmem:[%s13125_s7 + $0xbb0] sm:$0xff]  ;;  %v6487_v63 = vld [vmem:[%s13125_s7 + $0xbc8] sm:$0xff] }
 0x771   : > { %v6491_v57 = vld [vmem:[%s13125_s7 + $0xbe8] sm:$0xff] }
 0x772   : > { %4675 = vmatmul.mubr.f32.gmra.mrb[4].mxu0 %v4590_v6  ;;  %v6469_v6 = vld [vmem:[%s13125_s7 + $0xb38] sm:$0xff] }
 0x773   : > { %4680 = vmatprep.mubr.f32.mxu0 %v4593_v52  ;;  %7659 = vmatpush1.bf16.msra.mxu0 %v7658_v36  ;;  %v7682_v36 = vpack.c.bf16 %v6460_v48, %v6458_v7  ;;  %v7688_v37 = vpack.c.bf16 %v6469_v6, %v6467_v51  ;;  %v6471_v52 = vld [vmem:[%s13125_s7 + $0xb48] sm:$0xff]  ;;  %v7710_v7 = vpack.c.bf16 %v6488_v46, %v6486_v43  ;;  %v6494_v6 = vld [vmem:[%s13125_s7 + $0xc00] sm:$0xff] }
 0x774   : > { %7661 = vmatprep.subr.bf16.mxu0 %v7660_v53  ;;  %v7684_v53 = vpack.c.bf16 %v6465_v33, %v6463_v27  ;;  %v6490_v27 = vld [vmem:[%s13125_s7 + $0xbe0] sm:$0xff]  ;;  %v6492_v33 = vld [vmem:[%s13125_s7 + $0xbf0] sm:$0xff]  ;;  %v4904_v46 = vld [vmem:[#allocation4 + $0x8] sm:$0xfc] }
 0x775   : > { %v7714_v19 = vpack.c.bf16 %v6492_v33, %v6490_v27  ;;  %v4979_v27 = vrot.slane %v4904_v46, 2 }
 0x776   : > { %4681 = vmatmul.mubr.f32.gmra.mrb[6].mxu0 %v4592_v60  ;;  %v6472_v60 = vld [vmem:[%s13125_s7 + $0xb50] sm:$0xff] }
 0x777   : > { %4686 = vmatprep.mubr.f32.mxu0 %v4595_v32  ;;  %7663 = vmatpush1.bf16.msra.mxu0 %v7662_v11  ;;  %v6473_v11 = vld [vmem:[%s13125_s7 + $0xb58] sm:$0xff]  ;;  %v7694_v17 = vpack.c.bf16 %v6472_v60, %v6470_v61  ;;  %v7696_v32 = vpack.c.bf16 %v6477_v47, %v6475_v20  ;;  %v6498_v60 = vld [vmem:[%s13125_s7 + $0xc20] sm:$0xff]  ;;  %v6500_v20 = vld [vmem:[%s13125_s7 + $0xc30] sm:$0xff] }
 0x778   : > { %7665 = vmatprep.subr.bf16.mxu0 %v7664_v44  ;;  %v7690_v44 = vpack.c.bf16 %v6468_v58, %v6466_v59  ;;  %v7692_v62 = vpack.c.bf16 %v6473_v11, %v6471_v52  ;;  %v6499_v59 = vld [vmem:[%s13125_s7 + $0xc28] sm:$0xff]  ;;  %v6501_v58 = vld [vmem:[%s13125_s7 + $0xc38] sm:$0xff] }
 0x779   : > { %v7720_v61 = vpack.c.bf16 %v6501_v58, %v6499_v59  ;;  %v6514_v59 = vld [vmem:[%s13125_s7 + $0xca0] sm:$0xff]  ;;  %v6516_v58 = vld [vmem:[%s13125_s7 + $0xcb0] sm:$0xff] }
 0x77a   : > { %4687 = vmatmul.mubr.f32.gmra.mrb[8].mxu0 %v4594_v50 }
 0x77b   : > { %7667 = vmatpush1.bf16.msra.mxu0 %v7666_v56  ;;  %4870 = vmatprep.mubr.f32.mxu0 %v4791_v40  ;;  %v6474_v56 = vld [vmem:[%s13125_s7 + $0xb60] sm:$0xff]  ;;  %v6483_v40 = vld [vmem:[%s13125_s7 + $0xba8] sm:$0xff] }
 0x77c   : > { %7669 = vmatprep.subr.bf16.mxu0 %v7668_v42  ;;  %v6479_v42 = vld [vmem:[%s13125_s7 + $0xb88] sm:$0xff]  ;;  %v7698_v16 = vpack.c.bf16 %v6476_v31, %v6474_v56 }
 0x77d   : > { %v7700_v50 = vpack.c.bf16 %v6481_v13, %v6479_v42 }
 0x77f   : > { %7671 = vmatpush1.bf16.msra.mxu0 %v7670_v29  ;;  %v6485_v29 = vld [vmem:[%s13125_s7 + $0xbb8] sm:$0xff] }
 0x780   : > { %7673 = vmatprep.subr.bf16.mxu0 %v7672_v55  ;;  %v7702_v55 = vpack.c.bf16 %v6480_v5, %v6478_v9  ;;  %v7704_v25 = vpack.c.bf16 %v6485_v29, %v6483_v40  ;;  %v6504_v9 = vld [vmem:[%s13125_s7 + $0xc50] sm:$0xff]  ;;  %v6507_v29 = vld [vmem:[%s13125_s7 + $0xc68] sm:$0xff] }
 0x783   : > { %7675 = vmatpush1.bf16.msra.mxu0 %v7674_v10  ;;  %v6489_v10 = vld [vmem:[%s13125_s7 + $0xbd8] sm:$0xff] }
 0x784   : > { %7677 = vmatprep.subr.bf16.mxu0 %v7676_v21  ;;  %v7706_v21 = vpack.c.bf16 %v6484_v35, %v6482_v15  ;;  %v7708_v24 = vpack.c.bf16 %v6489_v10, %v6487_v63 }
 0x787   : > { %7679 = vmatpush1.bf16.msra.mxu0 %v7678_v45  ;;  %v6493_v45 = vld [vmem:[%s13125_s7 + $0xbf8] sm:$0xff] }
 0x788   : > { %7681 = vmatprep.subr.bf16.mxu0 %v7680_v14  ;;  %v4767_v14 = vpop.permute.xlu0 %4766  ;;  %v7712_v48 = vpack.c.bf16 %v6493_v45, %v6491_v57  ;;  %v6511_v57 = vld [vmem:[%s13125_s7 + $0xc88] sm:$0xff]  ;;  %v6513_v45 = vld [vmem:[%s13125_s7 + $0xc98] sm:$0xff] }
 0x789   : > { %v4790_v47 = vsel %vm4120_vm11, %v4767_v14, %v8440_v30  ;;  %v7732_v33 = vpack.c.bf16 %v6513_v45, %v6511_v57  ;;  %v6538_v57 = vld [vmem:[%s13125_s7 + $0xd60] sm:$0xff]  ;;  %v6540_v45 = vld [vmem:[%s13125_s7 + $0xd70] sm:$0xff] }
 0x78b   : > { %7683 = vmatpush1.bf16.msra.mxu0 %v7682_v36  ;;  %v8444_v36 = vpop.permute.xlu1 %8443 }
 0x78c   : > { %7685 = vmatprep.subr.bf16.mxu0 %v7684_v53  ;;  %v6495_v53 = vld [vmem:[%s13125_s7 + $0xc08] sm:$0xff]  ;;  %v8446_v52 = vunpack.i.h.bf16 %v8444_v36  ;;  %v8445_v11 = vunpack.i.l.bf16 %v8444_v36  ;;  %v6510_v36 = vld [vmem:[%s13125_s7 + $0xc80] sm:$0xff] }
 0x78d   : > { %v7716_v51 = vpack.c.bf16 %v6497_v49, %v6495_v53  ;;  %v6512_v53 = vld [vmem:[%s13125_s7 + $0xc90] sm:$0xff] }
 0x78e   : > { %v4793_v31 = vsel %vm4120_vm11, %v8445_v11, %v8446_v52  ;;  %v6519_v52 = vld [vmem:[%s13125_s7 + $0xcc8] sm:$0xff] }
 0x78f   : > { %7687 = vmatpush1.bf16.msra.mxu0 %v7686_v18  ;;  %v6496_v18 = vld [vmem:[%s13125_s7 + $0xc10] sm:$0xff] }
 0x790   : > { %7689 = vmatprep.subr.bf16.mxu0 %v7688_v37  ;;  %v8449_v37 = vpop.permute.xlu0 %8448 }
 0x791   : > { %v8450_v42 = vunpack.i.l.bf16 %v8449_v37  ;;  %v8451_v4 = vunpack.i.h.bf16 %v8449_v37 }
 0x793   : > { %7691 = vmatpush1.bf16.msra.mxu0 %v7690_v44  ;;  %v8454_v44 = vpop.permute.xlu1 %8453  ;;  %v4792_v40 = vsel %vm4120_vm11, %v8450_v42, %v8445_v11  ;;  %v7740_v11 = vpack.c.bf16 %v6521_v0, %v6519_v52  ;;  %v6550_v0 = vld [vmem:[%s13125_s7 + $0xdc0] sm:$0xff] }
 0x794   : > { %7693 = vmatprep.subr.bf16.mxu0 %v7692_v62  ;;  %v7718_v62 = vpack.c.bf16 %v6496_v18, %v6494_v6  ;;  %v8455_v56 = vunpack.i.l.bf16 %v8454_v44  ;;  %v8459_v13 = vpop.permute.xlu0 %8458  ;;  %v8456_v5 = vunpack.i.h.bf16 %v8454_v44  ;;  %v4981_v6 = vsel %vm2624_vm10, %v4979_v27, %v4980_v3  ;;  %v6518_v44 = vld [vmem:[%s13125_s7 + $0xcc0] sm:$0xff] }
 0x795   : > { %v8460_v15 = vunpack.i.l.bf16 %v8459_v13  ;;  %v7734_v18 = vpack.c.bf16 %v6512_v53, %v6510_v36  ;;  %v7738_v3 = vpack.c.bf16 %v6516_v58, %v6514_v59  ;;  %v6544_v36 = vld [vmem:[%s13125_s7 + $0xd90] sm:$0xff]  ;;  %v6547_v53 = vld [vmem:[%s13125_s7 + $0xda8] sm:$0xff]  ;;  %v6553_v59 = vld [vmem:[%s13125_s7 + $0xdd8] sm:$0xff] }
 0x796   : > { %v4795_v35 = vsel %vm4120_vm11, %v8451_v4, %v8455_v56  ;;  %v4794_v43 = vsel %vm4120_vm11, %v8456_v5, %v8451_v4  ;;  %v6527_v56 = vld [vmem:[%s13125_s7 + $0xd08] sm:$0xff]  ;;  %v6528_v4 = vld [vmem:[%s13125_s7 + $0xd10] sm:$0xff] }
 0x797   : > { %7695 = vmatpush1.bf16.msra.mxu0 %v7694_v17  ;;  %v6503_v17 = vld [vmem:[%s13125_s7 + $0xc48] sm:$0xff]  ;;  %v4785_v14 = vpop.permute.xlu1 %4784 }
 0x798   : > { %7697 = vmatprep.subr.bf16.mxu0 %v7696_v32  ;;  %v6505_v32 = vld [vmem:[%s13125_s7 + $0xc58] sm:$0xff]  ;;  %v4796_v49 = vsel %vm4120_vm11, %v4785_v14, %v8460_v15  ;;  %v6543_v14 = vld [vmem:[%s13125_s7 + $0xd88] sm:$0xff] }
 0x799   : > { %v7724_v30 = vpack.c.bf16 %v6505_v32, %v6503_v17  ;;  %v6522_v17 = vld [vmem:[%s13125_s7 + $0xce0] sm:$0xff]  ;;  %v6524_v32 = vld [vmem:[%s13125_s7 + $0xcf0] sm:$0xff] }
 0x79a   : > { %v7746_v42 = vpack.c.bf16 %v6524_v32, %v6522_v17  ;;  %v6561_v17 = vld [vmem:[%s13125_s7 + $0xe18] sm:$0xff] }
 0x79b   : > { %7699 = vmatpush1.bf16.msra.mxu0 %v7698_v16  ;;  %v7722_v16 = vpack.c.bf16 %v6500_v20, %v6498_v60  ;;  %v6525_v60 = vld [vmem:[%s13125_s7 + $0xcf8] sm:$0xff] }
 0x79c   : > { %7701 = vmatprep.subr.bf16.mxu0 %v7700_v50  ;;  %v6502_v50 = vld [vmem:[%s13125_s7 + $0xc40] sm:$0xff] }
 0x79d   : > { %v7726_v63 = vpack.c.bf16 %v6504_v9, %v6502_v50  ;;  %v6533_v50 = vld [vmem:[%s13125_s7 + $0xd38] sm:$0xff] }
 0x79f   : > { %7703 = vmatpush1.bf16.msra.mxu0 %v7702_v55  ;;  %v6509_v55 = vld [vmem:[%s13125_s7 + $0xc78] sm:$0xff] }
 0x7a0   : > { %7705 = vmatprep.subr.bf16.mxu0 %v7704_v25  ;;  %v8461_v25 = vunpack.i.h.bf16 %v8459_v13  ;;  %v7728_v10 = vpack.c.bf16 %v6509_v55, %v6507_v29  ;;  %v6532_v29 = vld [vmem:[%s13125_s7 + $0xd30] sm:$0xff]  ;;  %v6535_v55 = vld [vmem:[%s13125_s7 + $0xd48] sm:$0xff] }
 0x7a3   : > { %7707 = vmatpush1.bf16.msra.mxu0 %v7706_v21  ;;  %v6506_v21 = vld [vmem:[%s13125_s7 + $0xc60] sm:$0xff] }
 0x7a4   : > { %7709 = vmatprep.subr.bf16.mxu0 %v7708_v24  ;;  %v6508_v24 = vld [vmem:[%s13125_s7 + $0xc70] sm:$0xff] }
 0x7a7   : > { %7711 = vmatpush1.bf16.msra.mxu0 %v7710_v7  ;;  %v4797_v7 = vsel %vm4120_vm11, %v8460_v15, %v8461_v25  ;;  %v6537_v25 = vld [vmem:[%s13125_s7 + $0xd58] sm:$0xff] }
 0x7a8   : > { %7713 = vmatprep.subr.bf16.mxu0 %v7712_v48  ;;  %v7730_v48 = vpack.c.bf16 %v6508_v24, %v6506_v21  ;;  %v6539_v21 = vld [vmem:[%s13125_s7 + $0xd68] sm:$0xff]  ;;  %v6541_v24 = vld [vmem:[%s13125_s7 + $0xd78] sm:$0xff] }
 0x7a9   : > { %v7760_v46 = vpack.c.bf16 %v6541_v24, %v6539_v21  ;;  %v4905_v24 = vld [vmem:[#allocation4 + $0x60] sm:$0x3] }
 0x7ab   : > { %7715 = vmatpush1.bf16.msra.mxu0 %v7714_v19  ;;  %v6515_v19 = vld [vmem:[%s13125_s7 + $0xca8] sm:$0xff] }
 0x7ac   : > { %7717 = vmatprep.subr.bf16.mxu0 %v7716_v51  ;;  %v6517_v51 = vld [vmem:[%s13125_s7 + $0xcb8] sm:$0xff] }
 0x7ad   : > { %v7736_v37 = vpack.c.bf16 %v6517_v51, %v6515_v19 }
 0x7ae   : > { %4871 = vmatmul.mubr.f32.vlgmr.msra.gmra.mrb[2].mxu0 %v4790_v47 }
 0x7af   : > { %4876 = vmatprep.mubr.f32.mxu0 %v4793_v31  ;;  %7719 = vmatpush1.bf16.msra.mxu0 %v7718_v62  ;;  %v6520_v62 = vld [vmem:[%s13125_s7 + $0xcd0] sm:$0xff]  ;;  %v6529_v31 = vld [vmem:[%s13125_s7 + $0xd18] sm:$0xff] }
 0x7b0   : > { %7721 = vmatprep.subr.bf16.mxu0 %v7720_v61  ;;  %v6523_v61 = vld [vmem:[%s13125_s7 + $0xce8] sm:$0xff]  ;;  %v7742_v20 = vpack.c.bf16 %v6520_v62, %v6518_v44  ;;  %v7748_v13 = vpack.c.bf16 %v6529_v31, %v6527_v56  ;;  %v6557_v44 = vld [vmem:[%s13125_s7 + $0xdf8] sm:$0xff]  ;;  %v4903_v56 = vld [vmem:[#allocation4] sm:$0xfc] }
 0x7b1   : > { %v7744_v47 = vpack.c.bf16 %v6525_v60, %v6523_v61  ;;  %v6554_v60 = vld [vmem:[%s13125_s7 + $0xde0] sm:$0xff] }
 0x7b2   : > { %4877 = vmatmul.mubr.f32.gmra.mrb[4].mxu0 %v4792_v40  ;;  %v6530_v40 = vld [vmem:[%s13125_s7 + $0xd20] sm:$0xff] }
 0x7b3   : > { %4882 = vmatprep.mubr.f32.mxu0 %v4795_v35  ;;  %7723 = vmatpush1.bf16.msra.mxu0 %v7722_v16  ;;  %v6526_v16 = vld [vmem:[%s13125_s7 + $0xd00] sm:$0xff]  ;;  %v7754_v15 = vpack.c.bf16 %v6532_v29, %v6530_v40  ;;  %v7756_v35 = vpack.c.bf16 %v6537_v25, %v6535_v55  ;;  %v6564_v40 = vld [vmem:[%s13125_s7 + $0xe30] sm:$0xff]  ;;  %v6567_v55 = vld [vmem:[%s13125_s7 + $0xe48] sm:$0xff] }
 0x7b4   : > { %7725 = vmatprep.subr.bf16.mxu0 %v7724_v30  ;;  %v6531_v30 = vld [vmem:[%s13125_s7 + $0xd28] sm:$0xff]  ;;  %v7750_v9 = vpack.c.bf16 %v6528_v4, %v6526_v16  ;;  %v6565_v4 = vld [vmem:[%s13125_s7 + $0xe38] sm:$0xff] }
 0x7b5   : > { %v7752_v5 = vpack.c.bf16 %v6533_v50, %v6531_v30  ;;  %v6563_v16 = vld [vmem:[%s13125_s7 + $0xe28] sm:$0xff]  ;;  %v4976_v30 = vrot.slane %v4903_v56, 2  ;;  %v6569_v25 = vld [vmem:[%s13125_s7 + $0xe58] sm:$0xff] }
 0x7b6   : > { %4883 = vmatmul.mubr.f32.gmra.mrb[6].mxu0 %v4794_v43 }
 0x7b7   : > { %4888 = vmatprep.mubr.f32.mxu0 %v4797_v7  ;;  %7727 = vmatpush1.bf16.msra.mxu0 %v7726_v63  ;;  %v6534_v63 = vld [vmem:[%s13125_s7 + $0xd40] sm:$0xff]  ;;  %v6545_v7 = vld [vmem:[%s13125_s7 + $0xd98] sm:$0xff]  ;;  %v4978_v29 = vsel %vm2624_vm10, %v4976_v30, %v4977_v39  ;;  %v6568_v39 = vld [vmem:[%s13125_s7 + $0xe50] sm:$0xff] }
 0x7b8   : > { %7729 = vmatprep.subr.bf16.mxu0 %v7728_v10  ;;  %v6536_v10 = vld [vmem:[%s13125_s7 + $0xd50] sm:$0xff]  ;;  %v7764_v27 = vpack.c.bf16 %v6545_v7, %v6543_v14  ;;  %v4990_v7 = vrot.slane %v4905_v24, 2  ;;  %v6609_v24 = vld [vmem:[%s13125_s7 + $0xf98] sm:$0xff] }
 0x7b9   : > { %v7758_v43 = vpack.c.bf16 %v6536_v10, %v6534_v63  ;;  %v7788_v63 = vpack.c.bf16 %v6569_v25, %v6567_v55  ;;  %v6571_v10 = vld [vmem:[%s13125_s7 + $0xe68] sm:$0xff]  ;;  %v6572_v14 = vld [vmem:[%s13125_s7 + $0xe70] sm:$0xff]  ;;  %v6598_v25 = vld [vmem:[%s13125_s7 + $0xf40] sm:$0xff] }
 0x7ba   : > { %4889 = vmatmul.mubr.f32.gmra.mrb[8].mxu0 %v4796_v49  ;;  %v6549_v49 = vld [vmem:[%s13125_s7 + $0xdb8] sm:$0xff] }
 0x7bb   : > { %7731 = vmatpush1.bf16.msra.mxu0 %v7730_v48  ;;  %5066 = vmatprep.mubr.f32.mxu0 %v4981_v6  ;;  %v7762_v48 = vpack.c.bf16 %v6540_v45, %v6538_v57  ;;  %v7768_v51 = vpack.c.bf16 %v6549_v49, %v6547_v53  ;;  %v6546_v6 = vld [vmem:[%s13125_s7 + $0xda0] sm:$0xff] }
 0x7bc   : > { %7733 = vmatprep.subr.bf16.mxu0 %v7732_v33  ;;  %v6542_v33 = vld [vmem:[%s13125_s7 + $0xd80] sm:$0xff] }
 0x7bd   : > { %v7766_v19 = vpack.c.bf16 %v6544_v36, %v6542_v33  ;;  %v6570_v45 = vld [vmem:[%s13125_s7 + $0xe60] sm:$0xff] }
 0x7be   : > { %v7794_v36 = vpack.c.bf16 %v6572_v14, %v6570_v45  ;;  %v6574_v49 = vld [vmem:[%s13125_s7 + $0xe80] sm:$0xff]  ;;  %v6608_v14 = vld [vmem:[%s13125_s7 + $0xf90] sm:$0xff] }
 0x7bf   : > { %7735 = vmatpush1.bf16.msra.mxu0 %v7734_v18  ;;  %v6548_v18 = vld [vmem:[%s13125_s7 + $0xdb0] sm:$0xff]  ;;  %v6606_v45 = vld [vmem:[%s13125_s7 + $0xf80] sm:$0xff] }
 0x7c0   : > { %7737 = vmatprep.subr.bf16.mxu0 %v7736_v37  ;;  %v6551_v37 = vld [vmem:[%s13125_s7 + $0xdc8] sm:$0xff]  ;;  %v7770_v58 = vpack.c.bf16 %v6548_v18, %v6546_v6  ;;  %v6580_v18 = vld [vmem:[%s13125_s7 + $0xeb0] sm:$0xff] }
 0x7c1   : > { %v7772_v52 = vpack.c.bf16 %v6553_v59, %v6551_v37  ;;  %v6583_v37 = vld [vmem:[%s13125_s7 + $0xec8] sm:$0xff]  ;;  %v6585_v59 = vld [vmem:[%s13125_s7 + $0xed8] sm:$0xff] }
 0x7c3   : > { %7739 = vmatpush1.bf16.msra.mxu0 %v7738_v3  ;;  %v6552_v3 = vld [vmem:[%s13125_s7 + $0xdd0] sm:$0xff] }
 0x7c4   : > { %7741 = vmatprep.subr.bf16.mxu0 %v7740_v11  ;;  %v6555_v11 = vld [vmem:[%s13125_s7 + $0xde8] sm:$0xff]  ;;  %v7774_v62 = vpack.c.bf16 %v6552_v3, %v6550_v0  ;;  %v6582_v0 = vld [vmem:[%s13125_s7 + $0xec0] sm:$0xff]  ;;  %v6584_v3 = vld [vmem:[%s13125_s7 + $0xed0] sm:$0xff] }
 0x7c5   : > { %v7776_v61 = vpack.c.bf16 %v6557_v44, %v6555_v11  ;;  %v6587_v11 = vld [vmem:[%s13125_s7 + $0xee8] sm:$0xff]  ;;  %v6589_v44 = vld [vmem:[%s13125_s7 + $0xef8] sm:$0xff] }
 0x7c7   : > { %7743 = vmatpush1.bf16.msra.mxu0 %v7742_v20  ;;  %v6556_v20 = vld [vmem:[%s13125_s7 + $0xdf0] sm:$0xff] }
 0x7c8   : > { %7745 = vmatprep.subr.bf16.mxu0 %v7744_v47  ;;  %v6559_v47 = vld [vmem:[%s13125_s7 + $0xe08] sm:$0xff]  ;;  %v7778_v32 = vpack.c.bf16 %v6556_v20, %v6554_v60  ;;  %v6586_v60 = vld [vmem:[%s13125_s7 + $0xee0] sm:$0xff]  ;;  %v6588_v20 = vld [vmem:[%s13125_s7 + $0xef0] sm:$0xff] }
 0x7c9   : > { %v7780_v31 = vpack.c.bf16 %v6561_v17, %v6559_v47  ;;  %v6591_v47 = vld [vmem:[%s13125_s7 + $0xf08] sm:$0xff]  ;;  %v6593_v17 = vld [vmem:[%s13125_s7 + $0xf18] sm:$0xff] }
 0x7ca   : > { %v7812_v56 = vpack.c.bf16 %v6593_v17, %v6591_v47 }
 0x7cb   : > { %7747 = vmatpush1.bf16.msra.mxu0 %v7746_v42  ;;  %v6558_v42 = vld [vmem:[%s13125_s7 + $0xe00] sm:$0xff] }
 0x7cc   : > { %7749 = vmatprep.subr.bf16.mxu0 %v7748_v13  ;;  %v6560_v13 = vld [vmem:[%s13125_s7 + $0xe10] sm:$0xff] }
 0x7cd   : > { %v7782_v50 = vpack.c.bf16 %v6560_v13, %v6558_v42  ;;  %v6592_v42 = vld [vmem:[%s13125_s7 + $0xf10] sm:$0xff]  ;;  %v6595_v13 = vld [vmem:[%s13125_s7 + $0xf28] sm:$0xff] }
 0x7cf   : > { %7751 = vmatpush1.bf16.msra.mxu0 %v7750_v9  ;;  %v7784_v9 = vpack.c.bf16 %v6565_v4, %v6563_v16  ;;  %v6597_v16 = vld [vmem:[%s13125_s7 + $0xf38] sm:$0xff] }
 0x7d0   : > { %7753 = vmatprep.subr.bf16.mxu0 %v7752_v5  ;;  %v6562_v5 = vld [vmem:[%s13125_s7 + $0xe20] sm:$0xff]  ;;  %v7816_v30 = vpack.c.bf16 %v6597_v16, %v6595_v13 }
 0x7d3   : > { %7755 = vmatpush1.bf16.msra.mxu0 %v7754_v15  ;;  %v7786_v15 = vpack.c.bf16 %v6564_v40, %v6562_v5  ;;  %v6599_v5 = vld [vmem:[%s13125_s7 + $0xf48] sm:$0xff]  ;;  %v6601_v40 = vld [vmem:[%s13125_s7 + $0xf58] sm:$0xff] }
 0x7d4   : > { %7757 = vmatprep.subr.bf16.mxu0 %v7756_v35  ;;  %v4906_v35 = vld [vmem:[#allocation4 + $0x68] sm:$0x3]  ;;  %v7820_v55 = vpack.c.bf16 %v6601_v40, %v6599_v5 }
 0x7d5   : > { %v4992_v21 = vrot.slane %v4906_v35, 2  ;;  %v6603_v35 = vld [vmem:[%s13125_s7 + $0xf68] sm:$0xff] }
 0x7d7   : > { %7759 = vmatpush1.bf16.msra.mxu0 %v7758_v43  ;;  %v12722_v43 = vpop.permute.xlu0 %8463  ;;  %v4993_v33 = vsel %vm2624_vm10, %v4988_v22, %v4992_v21  ;;  %v6581_v22 = vld [vmem:[%s13125_s7 + $0xeb8] sm:$0xff]  ;;  %v6607_v21 = vld [vmem:[%s13125_s7 + $0xf88] sm:$0xff] }
 0x7d8   : > { %7761 = vmatprep.subr.bf16.mxu0 %v7760_v46  ;;  %v7790_v46 = vpack.c.bf16 %v6568_v39, %v6566_v28  ;;  %v7800_v2 = vpack.c.bf16 %v6581_v22, %v6579_v34  ;;  %v6614_v34 = vld [vmem:[%s13125_s7 + $0xfc0] sm:$0xff]  ;;  %v6616_v22 = vld [vmem:[%s13125_s7 + $0xfd0] sm:$0xff] }
 0x7db   : > { %7763 = vmatpush1.bf16.msra.mxu0 %v7762_v48  ;;  %v8466_v48 = vunpack.i.h.bf16 %v12722_v43 }
 0x7dc   : > { %7765 = vmatprep.subr.bf16.mxu0 %v7764_v27  ;;  %v8465_v27 = vunpack.i.l.bf16 %v12722_v43 }
 0x7df   : > { %7767 = vmatpush1.bf16.msra.mxu0 %v7766_v19  ;;  %v6576_v19 = vld [vmem:[%s13125_s7 + $0xe90] sm:$0xff] }
 0x7e0   : > { %7769 = vmatprep.subr.bf16.mxu0 %v7768_v51  ;;  %v5228_v51 = vsel %vm1328_vm0, %v8465_v27, %v8466_v48  ;;  %v7798_v6 = vpack.c.bf16 %v6576_v19, %v6574_v49  ;;  %v6617_v49 = vld [vmem:[%s13125_s7 + $0xfd8] sm:$0xff] }
 0x7e3   : > { %7771 = vmatpush1.bf16.msra.mxu0 %v7770_v58 }
 0x7e4   : > { %7773 = vmatprep.subr.bf16.mxu0 %v7772_v52  ;;  %v7804_v52 = vpack.c.bf16 %v6585_v59, %v6583_v37  ;;  %v6618_v37 = vld [vmem:[%s13125_s7 + $0xfe0] sm:$0xff]  ;;  %v6620_v59 = vld [vmem:[%s13125_s7 + $0xff0] sm:$0xff] }
 0x7e7   : > { %7775 = vmatpush1.bf16.msra.mxu0 %v7774_v62  ;;  %v7806_v62 = vpack.c.bf16 %v6584_v3, %v6582_v0  ;;  %v8469_v0 = vpop.permute.xlu0 %8468 }
 0x7e8   : > { %7777 = vmatprep.subr.bf16.mxu0 %v7776_v61  ;;  %v7808_v61 = vpack.c.bf16 %v6589_v44, %v6587_v11  ;;  %v7842_v11 = vpack.c.bf16 %v6620_v59, %v6618_v37  ;;  %v8471_v47 = vunpack.i.h.bf16 %v8469_v0  ;;  %v8470_v17 = vunpack.i.l.bf16 %v8469_v0  ;;  %v6644_v37 = vld [vmem:[%s13125_s7 + $0x10b0] sm:$0xff]  ;;  %v6647_v59 = vld [vmem:[%s13125_s7 + $0x10c8] sm:$0xff] }
 0x7ea   : > { %v5230_v40 = vsel %vm1328_vm0, %v8470_v17, %v8471_v47  ;;  %v6652_v47 = vld [vmem:[%s13125_s7 + $0x10f0] sm:$0xff] }
 0x7eb   : > { %7779 = vmatpush1.bf16.msra.mxu0 %v7778_v32  ;;  %v7810_v32 = vpack.c.bf16 %v6588_v20, %v6586_v60  ;;  %v6627_v60 = vld [vmem:[%s13125_s7 + $0x1028] sm:$0xff]  ;;  %v6629_v20 = vld [vmem:[%s13125_s7 + $0x1038] sm:$0xff]  ;;  %v8479_v13 = vpop.permute.xlu0 %8478 }
 0x7ec   : > { %7781 = vmatprep.subr.bf16.mxu0 %v7780_v31  ;;  %v6590_v31 = vld [vmem:[%s13125_s7 + $0xf00] sm:$0xff]  ;;  %v8480_v43 = vunpack.i.l.bf16 %v8479_v13 }
 0x7ed   : > { %v7814_v4 = vpack.c.bf16 %v6592_v42, %v6590_v31  ;;  %v6626_v31 = vld [vmem:[%s13125_s7 + $0x1020] sm:$0xff]  ;;  %v6628_v42 = vld [vmem:[%s13125_s7 + $0x1030] sm:$0xff] }
 0x7ee   : > { %5067 = vmatmul.mubr.f32.vlgmr.msra.gmra.mrb[2].mxu0 %v4978_v29 }
 0x7ef   : > { %5072 = vmatprep.mubr.f32.mxu0 %v11277_v23  ;;  %7783 = vmatpush1.bf16.msra.mxu0 %v7782_v50  ;;  %v6573_v23 = vld [vmem:[%s13125_s7 + $0xe78] sm:$0xff]  ;;  %v6594_v50 = vld [vmem:[%s13125_s7 + $0xf20] sm:$0xff] }
 0x7f0   : > { %7785 = vmatprep.subr.bf16.mxu0 %v7784_v9  ;;  %v7792_v57 = vpack.c.bf16 %v6573_v23, %v6571_v10  ;;  %v6596_v9 = vld [vmem:[%s13125_s7 + $0xf30] sm:$0xff]  ;;  %v6602_v10 = vld [vmem:[%s13125_s7 + $0xf60] sm:$0xff] }
 0x7f1   : > { %v7818_v29 = vpack.c.bf16 %v6596_v9, %v6594_v50  ;;  %v6604_v23 = vld [vmem:[%s13125_s7 + $0xf70] sm:$0xff]  ;;  %v6631_v50 = vld [vmem:[%s13125_s7 + $0x1048] sm:$0xff]  ;;  %v6633_v9 = vld [vmem:[%s13125_s7 + $0x1058] sm:$0xff] }
 0x7f2   : > { %5073 = vmatmul.mubr.f32.gmra.mrb[4].mxu0 %v11284_v41  ;;  %v6575_v41 = vld [vmem:[%s13125_s7 + $0xe88] sm:$0xff] }
 0x7f3   : > { %5078 = vmatprep.mubr.f32.mxu0 %v11289_v1  ;;  %7787 = vmatpush1.bf16.msra.mxu0 %v7786_v15  ;;  %v6577_v1 = vld [vmem:[%s13125_s7 + $0xe98] sm:$0xff]  ;;  %v6600_v15 = vld [vmem:[%s13125_s7 + $0xf50] sm:$0xff] }
 0x7f4   : > { %7789 = vmatprep.subr.bf16.mxu0 %v7788_v63  ;;  %v7796_v53 = vpack.c.bf16 %v6577_v1, %v6575_v41  ;;  %v6605_v63 = vld [vmem:[%s13125_s7 + $0xf78] sm:$0xff]  ;;  %v7822_v28 = vpack.c.bf16 %v6600_v15, %v6598_v25  ;;  %v7830_v1 = vpack.c.bf16 %v6608_v14, %v6606_v45  ;;  %v6632_v25 = vld [vmem:[%s13125_s7 + $0x1050] sm:$0xff] }
 0x7f5   : > { %v7824_v39 = vpack.c.bf16 %v6605_v63, %v6603_v35  ;;  %v6613_v41 = vld [vmem:[%s13125_s7 + $0xfb8] sm:$0xff]  ;;  %v6635_v35 = vld [vmem:[%s13125_s7 + $0x1068] sm:$0xff]  ;;  %v6636_v45 = vld [vmem:[%s13125_s7 + $0x1070] sm:$0xff] }
 0x7f6   : > { %5079 = vmatmul.mubr.f32.gmra.mrb[6].mxu0 %v11294_v12  ;;  %v4991_v12 = vsel %vm2624_vm10, %v4986_v54, %v4990_v7  ;;  %v6578_v54 = vld [vmem:[%s13125_s7 + $0xea0] sm:$0xff]  ;;  %v6611_v7 = vld [vmem:[%s13125_s7 + $0xfa8] sm:$0xff]  ;;  %v6637_v63 = vld [vmem:[%s13125_s7 + $0x1078] sm:$0xff] }
 0x7f7   : > { %5084 = vmatprep.mubr.f32.mxu0 %v4993_v33  ;;  %7791 = vmatpush1.bf16.msra.mxu0 %v7790_v46  ;;  %v7802_v58 = vpack.c.bf16 %v6580_v18, %v6578_v54  ;;  %v7826_v46 = vpack.c.bf16 %v6604_v23, %v6602_v10  ;;  %v7832_v48 = vpack.c.bf16 %v6613_v41, %v6611_v7  ;;  %v6610_v33 = vld [vmem:[%s13125_s7 + $0xfa0] sm:$0xff]  ;;  %v8481_v23 = vunpack.i.h.bf16 %v8479_v13  ;;  %v6639_v7 = vld [vmem:[%s13125_s7 + $0x1088] sm:$0xff]  ;;  %v6641_v41 = vld [vmem:[%s13125_s7 + $0x1098] sm:$0xff] }
 0x7f8   : > { %7793 = vmatprep.subr.bf16.mxu0 %v7792_v57  ;;  %v7828_v57 = vpack.c.bf16 %v6609_v24, %v6607_v21  ;;  %v7838_v54 = vpack.c.bf16 %v6616_v22, %v6614_v34  ;;  %v6643_v22 = vld [vmem:[%s13125_s7 + $0x10a8] sm:$0xff]  ;;  %v6656_v13 = vld [vmem:[%s13125_s7 + $0x1110] sm:$0xff] }
 0x7fa   : > { %5085 = vmatmul.mubr.f32.gmra.mrb[8].mxu0 %v4991_v12 }
 0x7fb   : > { %7795 = vmatpush1.bf16.msra.mxu0 %v7794_v36  ;;  %5307 = vmatprep.mubr.f32.mxu0 %v5228_v51  ;;  %v6612_v36 = vld [vmem:[%s13125_s7 + $0xfb0] sm:$0xff]  ;;  %v5204_v51 = vpop.permute.xlu1 %5203 }
 0x7fc   : > { %7797 = vmatprep.subr.bf16.mxu0 %v7796_v53  ;;  %v6615_v53 = vld [vmem:[%s13125_s7 + $0xfc8] sm:$0xff]  ;;  %v7834_v19 = vpack.c.bf16 %v6612_v36, %v6610_v33  ;;  %v5227_v16 = vsel %vm1328_vm0, %v5204_v51, %v8465_v27  ;;  %v7852_v27 = vpack.c.bf16 %v6633_v9, %v6631_v50  ;;  %v6645_v51 = vld [vmem:[%s13125_s7 + $0x10b8] sm:$0xff]  ;;  %v6658_v9 = vld [vmem:[%s13125_s7 + $0x1120] sm:$0xff] }
 0x7fd   : > { %v7836_v12 = vpack.c.bf16 %v6617_v49, %v6615_v53  ;;  %v5222_v53 = vpop.permute.xlu0 %5221  ;;  %v7860_v49 = vpack.c.bf16 %v6641_v41, %v6639_v7  ;;  %v6675_v7 = vld [vmem:[%s13125_s7 + $0x11a8] sm:$0xff]  ;;  %v6677_v41 = vld [vmem:[%s13125_s7 + $0x11b8] sm:$0xff] }
 0x7ff   : > { %7799 = vmatpush1.bf16.msra.mxu0 %v7798_v6  ;;  %v6619_v6 = vld [vmem:[%s13125_s7 + $0xfe8] sm:$0xff]  ;;  %v8474_v3 = vpop.permute.xlu1 %8473 }
 0x800   : > { %7801 = vmatprep.subr.bf16.mxu0 %v7800_v2  ;;  %v6621_v2 = vld [vmem:[%s13125_s7 + $0xff8] sm:$0xff]  ;;  %v8476_v5 = vunpack.i.h.bf16 %v8474_v3 }
 0x801   : > { %v7840_v18 = vpack.c.bf16 %v6621_v2, %v6619_v6 }
 0x802   : > { %v5232_v10 = vsel %vm1328_vm0, %v8476_v5, %v8480_v43  ;;  %v5231_v14 = vsel %vm1328_vm0, %v8481_v23, %v8476_v5  ;;  %v6660_v5 = vld [vmem:[%s13125_s7 + $0x1130] sm:$0xff]  ;;  %v6671_v23 = vld [vmem:[%s13125_s7 + $0x1188] sm:$0xff] }
 0x803   : > { %7803 = vmatpush1.bf16.msra.mxu0 %v7802_v58  ;;  %v6623_v58 = vld [vmem:[%s13125_s7 + $0x1008] sm:$0xff]  ;;  %v7882_v43 = vpack.c.bf16 %v6660_v5, %v6658_v9  ;;  %v5542_v9 = vld [vmem:[%s13126_s8] sm:$0x3] }
 0x804   : > { %7805 = vmatprep.subr.bf16.mxu0 %v7804_v52  ;;  %v6625_v52 = vld [vmem:[%s13125_s7 + $0x1018] sm:$0xff]  ;;  %v5547_v5 = vrot.slane %v5542_v9, %v3554_v26 }
 0x805   : > { %v7844_v44 = vpack.c.bf16 %v6625_v52, %v6623_v58  ;;  %v6649_v58 = vld [vmem:[%s13125_s7 + $0x10d8] sm:$0xff] }
 0x806   : > { %v7868_v0 = vpack.c.bf16 %v6649_v58, %v6647_v59  ;;  %v6684_v59 = vld [vmem:[%s13125_s7 + $0x11f0] sm:$0xff]  ;;  %v8494_v58 = vpop.permute.xlu0 %8493 }
 0x807   : > { %7807 = vmatpush1.bf16.msra.mxu0 %v7806_v62  ;;  %v6622_v62 = vld [vmem:[%s13125_s7 + $0x1000] sm:$0xff] }
 0x808   : > { %7809 = vmatprep.subr.bf16.mxu0 %v7808_v61  ;;  %v6624_v61 = vld [vmem:[%s13125_s7 + $0x1010] sm:$0xff] }
 0x80b   : > { %7811 = vmatpush1.bf16.msra.mxu0 %v7810_v32  ;;  %v7846_v32 = vpack.c.bf16 %v6624_v61, %v6622_v62  ;;  %v6653_v62 = vld [vmem:[%s13125_s7 + $0x10f8] sm:$0xff] }
 0x80c   : > { %7813 = vmatprep.subr.bf16.mxu0 %v7812_v56  ;;  %v7848_v56 = vpack.c.bf16 %v6629_v20, %v6627_v60  ;;  %v6650_v20 = vld [vmem:[%s13125_s7 + $0x10e0] sm:$0xff] }
 0x80f   : > { %7815 = vmatpush1.bf16.msra.mxu0 %v7814_v4  ;;  %v8475_v4 = vunpack.i.l.bf16 %v8474_v3  ;;  %v6646_v3 = vld [vmem:[%s13125_s7 + $0x10c0] sm:$0xff] }
 0x810   : > { %7817 = vmatprep.subr.bf16.mxu0 %v7816_v30  ;;  %v8484_v30 = vpop.permute.xlu1 %8483 }
 0x811   : > { %v5229_v15 = vsel %vm1328_vm0, %v8475_v4, %v8470_v17  ;;  %v6655_v17 = vld [vmem:[%s13125_s7 + $0x1108] sm:$0xff]  ;;  %v6661_v4 = vld [vmem:[%s13125_s7 + $0x1138] sm:$0xff] }
 0x813   : > { %7819 = vmatpush1.bf16.msra.mxu0 %v7818_v29  ;;  %v7850_v29 = vpack.c.bf16 %v6628_v42, %v6626_v31  ;;  %v6654_v42 = vld [vmem:[%s13125_s7 + $0x1100] sm:$0xff] }
 0x814   : > { %7821 = vmatprep.subr.bf16.mxu0 %v7820_v55  ;;  %v6630_v55 = vld [vmem:[%s13125_s7 + $0x1040] sm:$0xff]  ;;  %v12935_v21 = vpop.permute.xlu1 %8488 }
 0x815   : > { %v7854_v24 = vpack.c.bf16 %v6632_v25, %v6630_v55  ;;  %v6662_v55 = vld [vmem:[%s13125_s7 + $0x1140] sm:$0xff]  ;;  %v6664_v25 = vld [vmem:[%s13125_s7 + $0x1150] sm:$0xff] }
 0x817   : > { %7823 = vmatpush1.bf16.msra.mxu0 %v7822_v28  ;;  %v8486_v28 = vunpack.i.h.bf16 %v8484_v30 }
 0x818   : > { %7825 = vmatprep.subr.bf16.mxu0 %v7824_v39  ;;  %v8485_v39 = vunpack.i.l.bf16 %v8484_v30  ;;  %v7878_v30 = vpack.c.bf16 %v6656_v13, %v6654_v42 }
 0x81a   : > { %v5234_v33 = vsel %vm1328_vm0, %v8485_v39, %v8486_v28  ;;  %v5233_v34 = vsel %vm1328_vm0, %v5222_v53, %v8485_v39  ;;  %v6666_v39 = vld [vmem:[%s13125_s7 + $0x1160] sm:$0xff]  ;;  %v6676_v53 = vld [vmem:[%s13125_s7 + $0x11b0] sm:$0xff] }
 0x81b   : > { %7827 = vmatpush1.bf16.msra.mxu0 %v7826_v46  ;;  %v7856_v46 = vpack.c.bf16 %v6637_v63, %v6635_v35  ;;  %v6669_v35 = vld [vmem:[%s13125_s7 + $0x1178] sm:$0xff]  ;;  %v7886_v63 = vpack.c.bf16 %v6664_v25, %v6662_v55 }
 0x81c   : > { %7829 = vmatprep.subr.bf16.mxu0 %v7828_v57  ;;  %v6634_v57 = vld [vmem:[%s13125_s7 + $0x1060] sm:$0xff] }
 0x81d   : > { %v7858_v36 = vpack.c.bf16 %v6636_v45, %v6634_v57  ;;  %v6670_v45 = vld [vmem:[%s13125_s7 + $0x1180] sm:$0xff] }
 0x81f   : > { %7831 = vmatpush1.bf16.msra.mxu0 %v7830_v1  ;;  %v8491_v1 = vunpack.i.h.bf16 %v12935_v21 }
 0x820   : > { %7833 = vmatprep.subr.bf16.mxu0 %v7832_v48  ;;  %v8490_v48 = vunpack.i.l.bf16 %v12935_v21 }
 0x822   : > { %v5430_v6 = vsel %vm4120_vm11, %v8490_v48, %v8491_v1 }
 0x823   : > { %7835 = vmatpush1.bf16.msra.mxu0 %v7834_v19  ;;  %v6638_v19 = vld [vmem:[%s13125_s7 + $0x1080] sm:$0xff] }
 0x824   : > { %7837 = vmatprep.subr.bf16.mxu0 %v7836_v12  ;;  %v6640_v12 = vld [vmem:[%s13125_s7 + $0x1090] sm:$0xff] }
 0x825   : > { %v7862_v2 = vpack.c.bf16 %v6640_v12, %v6638_v19  ;;  %v6681_v19 = vld [vmem:[%s13125_s7 + $0x11d8] sm:$0xff] }
 0x827   : > { %7839 = vmatpush1.bf16.msra.mxu0 %v7838_v54  ;;  %v7864_v54 = vpack.c.bf16 %v6645_v51, %v6643_v22  ;;  %v6678_v22 = vld [vmem:[%s13125_s7 + $0x11c0] sm:$0xff]  ;;  %v6680_v51 = vld [vmem:[%s13125_s7 + $0x11d0] sm:$0xff] }
 0x828   : > { %7841 = vmatprep.subr.bf16.mxu0 %v7840_v18  ;;  %v6642_v18 = vld [vmem:[%s13125_s7 + $0x10a0] sm:$0xff] }
 0x829   : > { %v7866_v52 = vpack.c.bf16 %v6644_v37, %v6642_v18  ;;  %v6682_v37 = vld [vmem:[%s13125_s7 + $0x11e0] sm:$0xff] }
 0x82b   : > { %7843 = vmatpush1.bf16.msra.mxu0 %v7842_v11  ;;  %v6648_v11 = vld [vmem:[%s13125_s7 + $0x10d0] sm:$0xff] }
 0x82c   : > { %7845 = vmatprep.subr.bf16.mxu0 %v7844_v44  ;;  %v6651_v44 = vld [vmem:[%s13125_s7 + $0x10e8] sm:$0xff]  ;;  %v7870_v61 = vpack.c.bf16 %v6648_v11, %v6646_v3  ;;  %v8495_v11 = vunpack.i.l.bf16 %v8494_v58 }
 0x82d   : > { %v7872_v60 = vpack.c.bf16 %v6653_v62, %v6651_v44  ;;  %v8504_v44 = vpop.permute.xlu0 %8503  ;;  %v8496_v62 = vunpack.i.h.bf16 %v8494_v58 }
 0x82e   : > { %5308 = vmatmul.mubr.f32.vlgmr.msra.gmra.mrb[2].mxu0 %v5227_v16  ;;  %v6659_v16 = vld [vmem:[%s13125_s7 + $0x1128] sm:$0xff] }
 0x82f   : > { %5313 = vmatprep.mubr.f32.mxu0 %v5230_v40  ;;  %7847 = vmatpush1.bf16.msra.mxu0 %v7846_v32  ;;  %v6657_v32 = vld [vmem:[%s13125_s7 + $0x1118] sm:$0xff]  ;;  %v7880_v50 = vpack.c.bf16 %v6661_v4, %v6659_v16  ;;  %v6663_v40 = vld [vmem:[%s13125_s7 + $0x1148] sm:$0xff] }
 0x830   : > { %7849 = vmatprep.subr.bf16.mxu0 %v7848_v56  ;;  %v7874_v56 = vpack.c.bf16 %v6652_v47, %v6650_v20  ;;  %v7876_v31 = vpack.c.bf16 %v6657_v32, %v6655_v17  ;;  %v8506_v20 = vunpack.i.h.bf16 %v8504_v44  ;;  %v8505_v47 = vunpack.i.l.bf16 %v8504_v44 }
 0x832   : > { %5314 = vmatmul.mubr.f32.gmra.mrb[4].mxu0 %v5229_v15  ;;  %v6667_v15 = vld [vmem:[%s13125_s7 + $0x1168] sm:$0xff]  ;;  %v5434_v16 = vsel %vm4120_vm11, %v8505_v47, %v8506_v20 }
 0x833   : > { %5319 = vmatprep.mubr.f32.mxu0 %v5232_v10  ;;  %7851 = vmatpush1.bf16.msra.mxu0 %v7850_v29  ;;  %v6665_v29 = vld [vmem:[%s13125_s7 + $0x1158] sm:$0xff]  ;;  %v7888_v28 = vpack.c.bf16 %v6669_v35, %v6667_v15  ;;  %v6668_v10 = vld [vmem:[%s13125_s7 + $0x1170] sm:$0xff] }
 0x834   : > { %7853 = vmatprep.subr.bf16.mxu0 %v7852_v27  ;;  %v7884_v27 = vpack.c.bf16 %v6665_v29, %v6663_v40  ;;  %v5551_v40 = vrot.slane %v5542_v9, %v3558_v8 }
 0x836   : > { %5320 = vmatmul.mubr.f32.gmra.mrb[6].mxu0 %v5231_v14  ;;  %v6672_v14 = vld [vmem:[%s13125_s7 + $0x1190] sm:$0xff] }
 0x837   : > { %5325 = vmatprep.mubr.f32.mxu0 %v5234_v33  ;;  %7855 = vmatpush1.bf16.msra.mxu0 %v7854_v24  ;;  %v6673_v24 = vld [vmem:[%s13125_s7 + $0x1198] sm:$0xff]  ;;  %v7894_v1 = vpack.c.bf16 %v6672_v14, %v6670_v45  ;;  %v7896_v33 = vpack.c.bf16 %v6677_v41, %v6675_v7 }
 0x838   : > { %7857 = vmatprep.subr.bf16.mxu0 %v7856_v46  ;;  %v7890_v46 = vpack.c.bf16 %v6668_v10, %v6666_v39  ;;  %v7892_v57 = vpack.c.bf16 %v6673_v24, %v6671_v23 }
 0x83a   : > { %5326 = vmatmul.mubr.f32.gmra.mrb[8].mxu0 %v5233_v34 }
 0x83b   : > { %7859 = vmatpush1.bf16.msra.mxu0 %v7858_v36  ;;  %5509 = vmatprep.mubr.f32.mxu0 %v5430_v6  ;;  %v6674_v36 = vld [vmem:[%s13125_s7 + $0x11a0] sm:$0xff]  ;;  %v6683_v6 = vld [vmem:[%s13125_s7 + $0x11e8] sm:$0xff] }
 0x83c   : > { %7861 = vmatprep.subr.bf16.mxu0 %v7860_v49  ;;  %v6679_v49 = vld [vmem:[%s13125_s7 + $0x11c8] sm:$0xff]  ;;  %v7898_v12 = vpack.c.bf16 %v6676_v53, %v6674_v36 }
 0x83d   : > { %v7900_v34 = vpack.c.bf16 %v6681_v19, %v6679_v49 }
 0x83f   : > { %7863 = vmatpush1.bf16.msra.mxu0 %v7862_v2  ;;  %v6685_v2 = vld [vmem:[%s13125_s7 + $0x11f8] sm:$0xff] }
 0x840   : > { %7865 = vmatprep.subr.bf16.mxu0 %v7864_v54  ;;  %v7902_v54 = vpack.c.bf16 %v6680_v51, %v6678_v22  ;;  %v7904_v18 = vpack.c.bf16 %v6685_v2, %v6683_v6 }
 0x843   : > { %7867 = vmatpush1.bf16.msra.mxu0 %v7866_v52  ;;  %v8499_v52 = vpop.permute.xlu1 %8498 }
 0x844   : > { %7869 = vmatprep.subr.bf16.mxu0 %v7868_v0  ;;  %v7906_v0 = vpack.c.bf16 %v6684_v59, %v6682_v37  ;;  %v8500_v3 = vunpack.i.l.bf16 %v8499_v52 }
 0x846   : > { %v5432_v32 = vsel %vm4120_vm11, %v8496_v62, %v8500_v3 }
 0x847   : > { %7871 = vmatpush1.bf16.msra.mxu0 %v7870_v61  ;;  %v8501_v61 = vunpack.i.h.bf16 %v8499_v52  ;;  %v8509_v17 = vpop.permute.xlu1 %8508 }
 0x848   : > { %7873 = vmatprep.subr.bf16.mxu0 %v7872_v60  ;;  %v5429_v60 = vsel %vm4120_vm11, %v8495_v11, %v8490_v48  ;;  %v8511_v13 = vunpack.i.h.bf16 %v8509_v17 }
 0x849   : > { %v5431_v42 = vsel %vm4120_vm11, %v8501_v61, %v8496_v62 }
 0x84b   : > { %7875 = vmatpush1.bf16.msra.mxu0 %v7874_v56  ;;  %v8514_v56 = vpop.permute.xlu0 %8513 }
 0x84c   : > { %7877 = vmatprep.subr.bf16.mxu0 %v7876_v31  ;;  %v8510_v31 = vunpack.i.l.bf16 %v8509_v17  ;;  %v8515_v21 = vunpack.i.l.bf16 %v8514_v56 }
 0x84e   : > { %v5433_v48 = vsel %vm4120_vm11, %v8510_v31, %v8505_v47  ;;  %v5436_v4 = vsel %vm4120_vm11, %v8511_v13, %v8515_v21 }
 0x84f   : > { %7879 = vmatpush1.bf16.msra.mxu0 %v7878_v30  ;;  %v8516_v30 = vunpack.i.h.bf16 %v8514_v56 }
 0x850   : > { %7881 = vmatprep.subr.bf16.mxu0 %v7880_v50 }
 0x851   : > { %v5435_v50 = vsel %vm4120_vm11, %v8516_v30, %v8511_v13 }
 0x853   : > { %7883 = vmatpush1.bf16.msra.mxu0 %v7882_v43 }
 0x854   : > { %7885 = vmatprep.subr.bf16.mxu0 %v7884_v27 }
 0x857   : > { %7887 = vmatpush1.bf16.msra.mxu0 %v7886_v63 }
 0x858   : > { %7889 = vmatprep.subr.bf16.mxu0 %v7888_v28 }
 0x85b   : > { %7891 = vmatpush1.bf16.msra.mxu0 %v7890_v46 }
 0x85c   : > { %7893 = vmatprep.subr.bf16.mxu0 %v7892_v57 }
 0x85f   : > { %7895 = vmatpush1.bf16.msra.mxu0 %v7894_v1 }
 0x860   : > { %7897 = vmatprep.subr.bf16.mxu0 %v7896_v33 }
 0x863   : > { %7899 = vmatpush1.bf16.msra.mxu0 %v7898_v12 }
 0x864   : > { %7901 = vmatprep.subr.bf16.mxu0 %v7900_v34 }
 0x867   : > { %7903 = vmatpush1.bf16.msra.mxu0 %v7902_v54 }
 0x868   : > { %7905 = vmatprep.subr.bf16.mxu0 %v7904_v18 }
 0x86b   : > { %7907 = vmatpush1.bf16.msra.mxu0 %v7906_v0 }
 0x86e   : > { %5510 = vmatmul.mubr.f32.vlgmr.msra.gmra.mrb[2].mxu0 %v5429_v60 }
 0x86f   : > { %5515 = vmatprep.mubr.f32.mxu0 %v5432_v32 }
 0x872   : > { %5516 = vmatmul.mubr.f32.gmra.mrb[4].mxu0 %v5431_v42 }
 0x873   : > { %5521 = vmatprep.mubr.f32.mxu0 %v5434_v16 }
 0x876   : > { %5522 = vmatmul.mubr.f32.gmra.mrb[6].mxu0 %v5433_v48 }
 0x877   : > { %5527 = vmatprep.mubr.f32.mxu0 %v5436_v4 }
 0x87a   : > { %5528 = vmatmul.mubr.f32.gmra.mrb[8].mxu0 %v5435_v50 }
 0x941   : > { %v5511_v29 = vpop.f32.mrb[2].mxu0 }
 0x942   : > { %v5554_v43 = vadd.f32 %v5547_v5, %v5511_v29  ;;  %v5513_v27 = vpop.f32.mrb[3].mxu0 }
 0x943   : > { %v5555_v55 = vadd.f32 %v5551_v40, %v5513_v27 }
 0x944   : > { %v5562_v25 = vmax.f32 %v5554_v43, 0.0 }
 0x945   : > { %v5563_v15 = vmax.f32 %v5555_v55, 0.0  ;;  %v5517_v35 = vpop.f32.mrb[4].mxu0 }
 0x946   : > { %5570 = vst [vmem:[%s352_s19] sm:$0xff] %v5562_v25  ;;  %v5556_v63 = vadd.f32 %v5547_v5, %v5517_v35  ;;  %v5519_v28 = vpop.f32.mrb[5].mxu0 }
 0x947   : > { %5571 = vst [vmem:[%s352_s19 + $0x8] sm:$0xff] %v5563_v15  ;;  %v5557_v26 = vadd.f32 %v5551_v40, %v5519_v28 }
 0x948   : > { %v5564_v39 = vmax.f32 %v5556_v63, 0.0 }
 0x949   : > { %v5565_v38 = vmax.f32 %v5557_v26, 0.0  ;;  %v5523_v8 = vpop.f32.mrb[6].mxu0 }
 0x94a   : > { %5572 = vst [vmem:[%s352_s19 + $0x10] sm:$0xff] %v5564_v39  ;;  %v5558_v10 = vadd.f32 %v5547_v5, %v5523_v8  ;;  %v5525_v23 = vpop.f32.mrb[7].mxu0 }
 0x94b   : > { %5573 = vst [vmem:[%s352_s19 + $0x18] sm:$0xff] %v5565_v38  ;;  %v5559_v24 = vadd.f32 %v5551_v40, %v5525_v23 }
 0x94c   : > { %v5566_v46 = vmax.f32 %v5558_v10, 0.0 }
 0x94d   : > { %v5567_v57 = vmax.f32 %v5559_v24, 0.0  ;;  %v5529_v45 = vpop.f32.mrb[8].mxu0 }
 0x94e   : > { %5574 = vst [vmem:[%s352_s19 + $0x20] sm:$0xff] %v5566_v46  ;;  %v5560_v14 = vadd.f32 %v5547_v5, %v5529_v45  ;;  %v5531_v7 = vpop.f32.mrb[9].mxu0 }
 0x94f   : > { %5575 = vst [vmem:[%s352_s19 + $0x28] sm:$0xff] %v5567_v57  ;;  %v5561_v41 = vadd.f32 %v5551_v40, %v5531_v7 }
 0x950   : > { %v5568_v1 = vmax.f32 %v5560_v14, 0.0 }
 0x951   : > { %v5569_v33 = vmax.f32 %v5561_v41, 0.0 }
 0x952   : > { %5576 = vst [vmem:[%s352_s19 + $0x30] sm:$0xff] %v5568_v1 }
 0x953   : > { %5577 = vst [vmem:[%s352_s19 + $0x38] sm:$0xff] %v5569_v33 }
 0x954 PF: > { %s19_s30 = sadd.s32 1, %s8534_s30  }
 0x955   : > { %p16_p4 = scmp.ge.s32.totalorder %s19_s30, 4  }
 0x957   :  { %18 = sbr.rel (!%p16_p4) target bundleno = 1 (0x1), region = 116 }

</bundles_post_ra>
